<compile_context>
chip_gen: v6e
topology: v6e:2x2x1
jax: 0.10.0
libtpu: 0.0.40
codegen_flags: <defaults>
</compile_context>

<pallas_src>
import math

import jax
import jax.numpy as jnp
from jax.experimental import pallas as pl
from jax.experimental.pallas import tpu as pltpu

NEG_SLOPE = 0.2


def _lrelu(x):
    # one vmax instead of compare+select
    return jnp.maximum(x, NEG_SLOPE * x)


def _const_map(ndim):
    return lambda i: (0,) * ndim


def _pick_tile(n, bytes_per_row, budget=4 << 20, mult=1):
    """Largest divisor of n (multiple of `mult`, or n itself) whose block fits a
    small VMEM budget, preferring >= 2 grid steps (megacore-friendly)."""
    cap = min(n, 4096)
    cand = [d for d in range(1, cap + 1)
            if n % d == 0 and (d % mult == 0 or d == n)]
    if not cand:
        return n
    fit = [d for d in cand if d * bytes_per_row <= budget] or cand[:1]
    multi = [d for d in fit if n // d >= 2]
    return max(multi) if multi else max(fit)


# --------------------------- row-MLP kernel (angular) ----------------------- #
def _make_row_mlp_kernel(acts):
    n_layers = len(acts)

    def kernel(*refs):
        x_ref, o_ref = refs[0], refs[-1]
        h = x_ref[...]                               # bf16
        for li in range(n_layers):
            h = jnp.dot(h, refs[1 + li][...], preferred_element_type=jnp.float32)
            if acts[li]:
                h = _lrelu(h)
            if li < n_layers - 1:
                h = h.astype(jnp.bfloat16)
        o_ref[...] = h.astype(o_ref.dtype)

    return kernel


def row_mlp(x, weights, acts, out_dtype=jnp.bfloat16):
    """Fused bias-free MLP over rows.  x: (N, D0) bf16; weights[i]: (Di, Di+1)
    bf16.  No padding of contraction or output dims (full-extent blocks)."""
    N, D0 = x.shape
    d_out = weights[-1].shape[1]
    mult = 8 if N % 8 == 0 else N
    tm = _pick_tile(N, 4 * (D0 + d_out), mult=mult)
    in_specs = [pl.BlockSpec((tm, D0), lambda i: (i, 0))]
    in_specs += [pl.BlockSpec(w.shape, _const_map(2)) for w in weights]
    return pl.pallas_call(
        _make_row_mlp_kernel(tuple(acts)),
        out_shape=jax.ShapeDtypeStruct((N, d_out), out_dtype),
        grid=(N // tm,),
        in_specs=in_specs,
        out_specs=pl.BlockSpec((tm, d_out), lambda i: (i, 0)),
        compiler_params=pltpu.CompilerParams(dimension_semantics=("parallel",)),
    )(x, *weights)


# ------------------------------ EPI conv kernel ----------------------------- #
def _make_epi_kernel(K, w_out):
    def kernel(x_ref, w1_ref, w2_ref, o_ref):
        tr, _, vc = x_ref.shape
        e_ch = w1_ref.shape[2]
        d_out = w2_ref.shape[1]
        rows = tr * w_out
        acc = jnp.zeros((rows, e_ch), jnp.float32)
        for kk in range(K):                          # taps folded in-kernel
            xs = x_ref[:, kk:kk + w_out, :]          # (tr, w_out, angRes*C)
            acc = acc + jnp.dot(xs.reshape(rows, vc), w1_ref[kk],
                                preferred_element_type=jnp.float32)
        h = _lrelu(acc).astype(jnp.bfloat16)
        h = jnp.dot(h, w2_ref[...], preferred_element_type=jnp.float32)
        h = _lrelu(h)
        o_ref[...] = h.reshape(tr, w_out, d_out).astype(o_ref.dtype)

    return kernel


def epi_conv(x_rows, w1, w2, w_out):
    """EPI conv stack.  x_rows: (R, w_out + 2*pad, angRes*C) bf16 (zero-padded
    along the tap axis).  w1: (K, angRes*C, E) bf16; w2: (E, angRes*E) bf16."""
    R, Wp, VC = x_rows.shape
    K = w1.shape[0]
    d_out = w2.shape[1]
    tr = _pick_tile(R, 4 * (Wp * VC + w_out * d_out))
    return pl.pallas_call(
        _make_epi_kernel(K, w_out),
        out_shape=jax.ShapeDtypeStruct((R, w_out, d_out), jnp.bfloat16),
        grid=(R // tr,),
        in_specs=[pl.BlockSpec((tr, Wp, VC), lambda i: (i, 0, 0)),
                  pl.BlockSpec(w1.shape, _const_map(3)),
                  pl.BlockSpec(w2.shape, _const_map(2))],
        out_specs=pl.BlockSpec((tr, w_out, d_out), lambda i: (i, 0, 0)),
        compiler_params=pltpu.CompilerParams(dimension_semantics=("parallel",)),
    )(x_rows, w1, w2)


# ---------------- fused 2-layer image kernel (3x3 in-kernel taps) ----------- #
def _make_image_kernel(h, w, first_kind, act1, act2, n_parts):
    def kernel(*refs):
        x_refs = refs[:n_parts]
        k = n_parts
        n_w1 = n_parts if first_kind == "1x1" else 1
        w1_refs = refs[k:k + n_w1]
        k += n_w1
        b1_ref, w2_ref, b2_ref, o_ref, mid_ref = refs[k:k + 5]

        rows = h * w
        c_mid = mid_ref.shape[-1]
        cout = o_ref.shape[-1]

        # ---- layer 1: 1x1 channel matmul (concat-free parts) or 3x3 taps ----
        acc = jnp.zeros((rows, c_mid), jnp.float32) + b1_ref[...]
        if first_kind == "1x1":
            for p in range(n_parts):
                xp = x_refs[p][...]                  # (h, w, Cp)
                acc = acc + jnp.dot(xp.reshape(rows, xp.shape[-1]),
                                    w1_refs[p][...],
                                    preferred_element_type=jnp.float32)
        else:                                        # 3x3: 9 shifted dots
            cin = x_refs[0].shape[-1]
            for kh in range(3):
                for kw in range(3):
                    xs = x_refs[0][kh:kh + h, kw:kw + w, :]
                    acc = acc + jnp.dot(xs.reshape(rows, cin),
                                        w1_refs[0][kh * 3 + kw],
                                        preferred_element_type=jnp.float32)
        if act1:
            acc = _lrelu(acc)

        # Stage into a zero-bordered VMEM scratch so layer 2's 3x3 sees the same
        # zero padding as the PyTorch conv (no HBM round trip for the mid).
        mid_ref[...] = jnp.zeros_like(mid_ref)
        mid_ref[1:1 + h, 1:1 + w, :] = acc.reshape(h, w, c_mid).astype(mid_ref.dtype)

        # ---- layer 2: 3x3 from the scratch (9 shifted dots) ----
        acc2 = jnp.zeros((rows, cout), jnp.float32) + b2_ref[...]
        for kh in range(3):
            for kw in range(3):
                ms = mid_ref[kh:kh + h, kw:kw + w, :]
                acc2 = acc2 + jnp.dot(ms.reshape(rows, c_mid),
                                      w2_ref[kh * 3 + kw],
                                      preferred_element_type=jnp.float32)
        if act2:
            acc2 = _lrelu(acc2)
        o_ref[...] = acc2.reshape(h, w, cout).astype(o_ref.dtype)

    return kernel


def image_conv2(x_parts, first_kind, w1_list, b1, w2, b2, acts, h, w, out_dtype):
    """Two-layer conv stack over a batch of channels-last images.

    first_kind == "3x3": one spatially pre-padded part (B, h+2, w+2, C).
    first_kind == "1x1": parts (B, h, w, C_p); first-layer weight split per part
    (concat-free fusion).  Layer 2 is always a (1,3,3) conv.  One image per
    grid step ("parallel")."""
    B = x_parts[0].shape[0]
    c_mid, cout = w2.shape[1], w2.shape[2]
    in_specs, args = [], []
    for p in x_parts:
        hp, wp, cp = p.shape[1], p.shape[2], p.shape[3]
        in_specs.append(pl.BlockSpec((None, hp, wp, cp), lambda i: (i, 0, 0, 0)))
        args.append(p)
    for wgt in w1_list:
        in_specs.append(pl.BlockSpec(wgt.shape, _const_map(wgt.ndim)))
        args.append(wgt)
    for arr in (b1, w2, b2):
        in_specs.append(pl.BlockSpec(arr.shape, _const_map(arr.ndim)))
        args.append(arr)
    return pl.pallas_call(
        _make_image_kernel(h, w, first_kind, acts[0], acts[1], len(x_parts)),
        out_shape=jax.ShapeDtypeStruct((B, h, w, cout), out_dtype),
        grid=(B,),
        in_specs=in_specs,
        out_specs=pl.BlockSpec((None, h, w, cout), lambda i: (i, 0, 0, 0)),
        scratch_shapes=[pltpu.VMEM((h + 2, w + 2, c_mid), jnp.bfloat16)],
        compiler_params=pltpu.CompilerParams(dimension_semantics=("parallel",)),
    )(*args)


# ---------------------------------- forward --------------------------------- #
def sa_conv_forward(x, params, angRes):
    """x: (b, ch, n, h, w) f32 with n == angRes**2 -> same shape."""
    b, c, n, h, w = x.shape
    an = angRes
    assert n == an * an
    xb = x.astype(jnp.bfloat16)

    # ----- Spatial branch: two fused (1,3,3) convs per (b, n) image ----------
    x_img = jnp.transpose(xb, (0, 2, 3, 4, 1)).reshape(b * n, h, w, c)
    x_img_pad = jnp.pad(x_img, ((0, 0), (1, 1), (1, 1), (0, 0)))
    s_out = image_conv2([x_img_pad], "3x3",
                        [params["spa_w1"]], params["spa_b1"],
                        params["spa_w2"], params["spa_b2"],
                        acts=(True, True), h=h, w=w, out_dtype=jnp.bfloat16)

    # ----- Angular branch: fused 2-layer 1x1x1-conv MLP over c*n channels ----
    a_rows = jnp.transpose(xb, (0, 3, 4, 1, 2)).reshape(b * h * w, c * n)
    a = row_mlp(a_rows, [params["ang_w1"], params["ang_w2"]], [True, True])
    a_ch = params["ang_w1"].shape[1]
    a_out = a.reshape(b, h, w, a_ch, n)              # col = a*n + nn
    a_out = jnp.transpose(a_out, (0, 4, 1, 2, 3)).reshape(b * n, h, w, a_ch)

    # ----- EPI branch: taps folded in-kernel, both directions share one call --
    e_ch = params["epi_w2"].shape[0]
    pad = an // 2
    x6 = xb.reshape(b, c, an, an, h, w)
    # horizontal EPIs: rows (b,u,h), taps along w, contract (v, c)
    eh = jnp.transpose(x6, (0, 2, 4, 5, 3, 1)).reshape(b * an * h, w, an * c)
    eh = jnp.pad(eh, ((0, 0), (pad, pad), (0, 0)))
    # vertical EPIs: rows (b,v,w), taps along h, contract (u, c)
    ev = jnp.transpose(x6, (0, 3, 5, 4, 2, 1)).reshape(b * an * w, h, an * c)
    ev = jnp.pad(ev, ((0, 0), (pad, pad), (0, 0)))

    if h == w:
        e_out = epi_conv(jnp.concatenate([eh, ev], axis=0),
                         params["epi_w1"], params["epi_w2"], w)
        eh_out, ev_out = e_out[:b * an * h], e_out[b * an * h:]
    else:
        eh_out = epi_conv(eh, params["epi_w1"], params["epi_w2"], w)
        ev_out = epi_conv(ev, params["epi_w1"], params["epi_w2"], h)

    # eh_out: (b*an*h, w, e_ch*an) -> dims (b,u,h,w,e,v) -> per-image layout
    epih = eh_out.reshape(b, an, h, w, e_ch, an)
    epih = jnp.transpose(epih, (0, 1, 5, 2, 3, 4)).reshape(b * n, h, w, e_ch)
    # ev_out: (b*an*w, h, e_ch*an) -> dims (b,v,w,h,e,u) -> per-image layout
    epiv = ev_out.reshape(b, an, w, h, e_ch, an)
    epiv = jnp.transpose(epiv, (0, 5, 1, 3, 2, 4)).reshape(b * n, h, w, e_ch)

    # ----- Fusion heads (concat-free: split first-layer weights) -------------
    sa = image_conv2([s_out, a_out], "1x1",
                     [params["saf_w1s"], params["saf_w1a"]], params["saf_b1"],
                     params["saf_w2"], params["saf_b2"],
                     acts=(True, False), h=h, w=w, out_dtype=jnp.float32)
    ep = image_conv2([epih, epiv], "1x1",
                     [params["epf_w1h"], params["epf_w1v"]], params["epf_b1"],
                     params["epf_w2"], params["epf_b2"],
                     acts=(True, False), h=h, w=w, out_dtype=jnp.float32)

    half = sa.shape[-1]
    sa = jnp.transpose(sa.reshape(b, n, h, w, half), (0, 4, 1, 2, 3))
    ep = jnp.transpose(ep.reshape(b, n, h, w, half), (0, 4, 1, 2, 3))
    return jnp.concatenate([sa, ep], axis=1) + x


# ------------------------------ parameter setup ----------------------------- #
def _uniform(key, shape, fan_in, dtype=jnp.float32):
    bound = 1.0 / math.sqrt(fan_in)
    return jax.random.uniform(key, shape, jnp.float32, -bound, bound).astype(dtype)


def init_params(key, ch, angRes):
    """Weights pre-cast to bf16 in the kernel-friendly layouts, biases f32.
    3x3 weights: (9, Cin, Cout) tap-major; EPI w1: (K, angRes*C, E)."""
    a_ch, e_ch = ch // 4, ch // 2
    an = angRes
    n = an * an
    K = an // 2 * 2 + 1
    ki = iter(jax.random.split(key, 32))
    bf = jnp.bfloat16
    p = {}
    # Spatial: two (1,3,3) convs ch->ch with bias
    p["spa_w1"] = _uniform(next(ki), (9, ch, ch), ch * 9, bf)
    p["spa_b1"] = _uniform(next(ki), (1, ch), ch * 9)
    p["spa_w2"] = _uniform(next(ki), (9, ch, ch), ch * 9, bf)
    p["spa_b2"] = _uniform(next(ki), (1, ch), ch * 9)
    # Angular: 1x1 (ch*n -> a_ch), 1x1 (a_ch -> a_ch*n), no bias
    p["ang_w1"] = _uniform(next(ki), (ch * n, a_ch), ch * n, bf)
    p["ang_w2"] = _uniform(next(ki), (a_ch, a_ch * n), a_ch, bf)
    # EPI: (1, an, K) conv ch->e_ch then 1x1 e_ch -> an*e_ch, no bias
    p["epi_w1"] = _uniform(next(ki), (K, an * ch, e_ch), ch * an * K, bf)
    p["epi_w2"] = _uniform(next(ki), (e_ch, an * e_ch), e_ch, bf)
    # SA fuse: 1x1 (ch + a_ch -> ch) + bias, then 3x3 (ch -> ch//2) + bias
    p["saf_w1s"] = _uniform(next(ki), (ch, ch), ch + a_ch, bf)
    p["saf_w1a"] = _uniform(next(ki), (a_ch, ch), ch + a_ch, bf)
    p["saf_b1"] = _uniform(next(ki), (1, ch), ch + a_ch)
    p["saf_w2"] = _uniform(next(ki), (9, ch, ch // 2), ch * 9, bf)
    p["saf_b2"] = _uniform(next(ki), (1, ch // 2), ch * 9)
    # EPI fuse: 1x1 (2*e_ch -> ch) + bias, then 3x3 (ch -> ch//2) + bias
    p["epf_w1h"] = _uniform(next(ki), (e_ch, ch), 2 * e_ch, bf)
    p["epf_w1v"] = _uniform(next(ki), (e_ch, ch), 2 * e_ch, bf)
    p["epf_b1"] = _uniform(next(ki), (1, ch), 2 * e_ch)
    p["epf_w2"] = _uniform(next(ki), (9, ch, ch // 2), ch * 9, bf)
    p["epf_b2"] = _uniform(next(ki), (1, ch // 2), ch * 9)
    return p


# ----------------------------------- main ----------------------------------- #
if __name__ == "__main__":
    key = jax.random.PRNGKey(0)
    k_x, k_p = jax.random.split(key)

    ch, angRes = 8, 2
    n = angRes * angRes
    b, h, w = 2, 8, 8

    x = jax.random.normal(k_x, (b, ch, n, h, w), dtype=jnp.float32)
    params = init_params(k_p, ch, angRes)

    fwd = jax.jit(sa_conv_forward, static_argnums=(2,))
    out = jax.block_until_ready(fwd(x, params, angRes))

    assert out.shape == x.shape, (out.shape, x.shape)
    assert bool(jnp.all(jnp.isfinite(out)))
    print("KERNEL_OK")
</pallas_src>

<mosaic_0001>
module attributes {stable_mosaic.version = 11 : i64} {
  func.func @kernel(%arg0: i32, %arg1: memref<32x10x16xbf16, #tpu.memory_space<vmem>>, %arg2: memref<3x16x4xbf16, #tpu.memory_space<vmem>>, %arg3: memref<4x8xbf16, #tpu.memory_space<vmem>>, %arg4: memref<32x8x8xbf16, #tpu.memory_space<vmem>>) attributes {dimension_semantics = [#tpu.dimension_semantics<parallel>], iteration_bounds = array<i64: 2>, scalar_prefetch = 0 : i64, scratch_operands = 0 : i64, tpu.core_type = #tpu.core_type<tc>, window_params = [{transform_indices = @transform_0, window_bounds = array<i64: 32, 10, 16>}, {pipeline_mode = #tpu.pipeline_mode<synchronous>, transform_indices = @transform_1, window_bounds = array<i64: 3, 16, 4>}, {pipeline_mode = #tpu.pipeline_mode<synchronous>, transform_indices = @transform_2, window_bounds = array<i64: 4, 8>}, {transform_indices = @transform_3, window_bounds = array<i64: 32, 8, 8>}]} {
    %cst = arith.constant 0.000000e+00 : f32
    %0 = vector.broadcast %cst : f32 to vector<256x4xf32>
    %c0 = arith.constant 0 : index
    %c0_0 = arith.constant 0 : index
    %c0_1 = arith.constant 0 : index
    %1 = vector.load %arg1[%c0, %c0_0, %c0_1] : memref<32x10x16xbf16, #tpu.memory_space<vmem>>, vector<32x8x16xbf16>
    %2 = vector.shape_cast %1 : vector<32x8x16xbf16> to vector<256x16xbf16>
    %c0_2 = arith.constant 0 : index
    %c0_3 = arith.constant 0 : index
    %c0_4 = arith.constant 0 : index
    %3 = vector.load %arg2[%c0_2, %c0_3, %c0_4] : memref<3x16x4xbf16, #tpu.memory_space<vmem>>, vector<1x16x4xbf16>
    %4 = vector.shape_cast %3 : vector<1x16x4xbf16> to vector<16x4xbf16>
    %cst_5 = arith.constant dense<0.000000e+00> : vector<256x4xf32>
    %5 = tpu.matmul %2, %4, %cst_5 {dimension_numbers = #tpu.dot_dimension_numbers<[1], [0], [0], [1], [0, 0, 1, 1], [], []>} : vector<256x16xbf16>, vector<16x4xbf16>, vector<256x4xf32> -> vector<256x4xf32>
    %6 = arith.addf %0, %5 : vector<256x4xf32>
    %c0_6 = arith.constant 0 : index
    %c1 = arith.constant 1 : index
    %c0_7 = arith.constant 0 : index
    %7 = vector.load %arg1[%c0_6, %c1, %c0_7] : memref<32x10x16xbf16, #tpu.memory_space<vmem>>, vector<32x8x16xbf16>
    %8 = vector.shape_cast %7 : vector<32x8x16xbf16> to vector<256x16xbf16>
    %c1_8 = arith.constant 1 : index
    %c0_9 = arith.constant 0 : index
    %c0_10 = arith.constant 0 : index
    %9 = vector.load %arg2[%c1_8, %c0_9, %c0_10] : memref<3x16x4xbf16, #tpu.memory_space<vmem>>, vector<1x16x4xbf16>
    %10 = vector.shape_cast %9 : vector<1x16x4xbf16> to vector<16x4xbf16>
    %cst_11 = arith.constant dense<0.000000e+00> : vector<256x4xf32>
    %11 = tpu.matmul %8, %10, %cst_11 {dimension_numbers = #tpu.dot_dimension_numbers<[1], [0], [0], [1], [0, 0, 1, 1], [], []>} : vector<256x16xbf16>, vector<16x4xbf16>, vector<256x4xf32> -> vector<256x4xf32>
    %12 = arith.addf %6, %11 : vector<256x4xf32>
    %c0_12 = arith.constant 0 : index
    %c2 = arith.constant 2 : index
    %c0_13 = arith.constant 0 : index
    %13 = vector.load %arg1[%c0_12, %c2, %c0_13] : memref<32x10x16xbf16, #tpu.memory_space<vmem>>, vector<32x8x16xbf16>
    %14 = vector.shape_cast %13 : vector<32x8x16xbf16> to vector<256x16xbf16>
    %c2_14 = arith.constant 2 : index
    %c0_15 = arith.constant 0 : index
    %c0_16 = arith.constant 0 : index
    %15 = vector.load %arg2[%c2_14, %c0_15, %c0_16] : memref<3x16x4xbf16, #tpu.memory_space<vmem>>, vector<1x16x4xbf16>
    %16 = vector.shape_cast %15 : vector<1x16x4xbf16> to vector<16x4xbf16>
    %cst_17 = arith.constant dense<0.000000e+00> : vector<256x4xf32>
    %17 = tpu.matmul %14, %16, %cst_17 {dimension_numbers = #tpu.dot_dimension_numbers<[1], [0], [0], [1], [0, 0, 1, 1], [], []>} : vector<256x16xbf16>, vector<16x4xbf16>, vector<256x4xf32> -> vector<256x4xf32>
    %18 = arith.addf %12, %17 : vector<256x4xf32>
    %cst_18 = arith.constant 2.000000e-01 : f32
    %19 = vector.broadcast %cst_18 : f32 to vector<256x4xf32>
    %20 = arith.mulf %19, %18 : vector<256x4xf32>
    %21 = arith.maximumf %18, %20 : vector<256x4xf32>
    %22 = arith.truncf %21 : vector<256x4xf32> to vector<256x4xbf16>
    %c0_19 = arith.constant 0 : index
    %c0_20 = arith.constant 0 : index
    %23 = vector.load %arg3[%c0_19, %c0_20] : memref<4x8xbf16, #tpu.memory_space<vmem>>, vector<4x8xbf16>
    %cst_21 = arith.constant dense<0.000000e+00> : vector<256x8xf32>
    %24 = tpu.matmul %22, %23, %cst_21 {dimension_numbers = #tpu.dot_dimension_numbers<[1], [0], [0], [1], [0, 0, 1, 1], [], []>} : vector<256x4xbf16>, vector<4x8xbf16>, vector<256x8xf32> -> vector<256x8xf32>
    %cst_22 = arith.constant 2.000000e-01 : f32
    %25 = vector.broadcast %cst_22 : f32 to vector<256x8xf32>
    %26 = arith.mulf %25, %24 : vector<256x8xf32>
    %27 = arith.maximumf %24, %26 : vector<256x8xf32>
    %28 = vector.shape_cast %27 : vector<256x8xf32> to vector<32x8x8xf32>
    %29 = arith.truncf %28 : vector<32x8x8xf32> to vector<32x8x8xbf16>
    %c0_23 = arith.constant 0 : index
    %c0_24 = arith.constant 0 : index
    %c0_25 = arith.constant 0 : index
    %30 = vector.load %arg4[%c0_23, %c0_24, %c0_25] : memref<32x8x8xbf16, #tpu.memory_space<vmem>>, vector<32x8x8xbf16>
    tpu.vector_store %arg4[%c0_23, %c0_24, %c0_25], %29 {strides = array<i32>} : memref<32x8x8xbf16, #tpu.memory_space<vmem>>, vector<32x8x8xbf16>,
    return
  }
  func.func @transform_0(%arg0: i32) -> (i32, i32, i32) {
    %c0_i32 = arith.constant 0 : i32
    %c0_i32_0 = arith.constant 0 : i32
    %c0_i32_1 = arith.constant 0 : i32
    return %arg0, %c0_i32, %c0_i32_0 : i32, i32, i32
  }
  func.func @transform_1(%arg0: i32) -> (i32, i32, i32) {
    %c0_i32 = arith.constant 0 : i32
    %c0_i32_0 = arith.constant 0 : i32
    %c0_i32_1 = arith.constant 0 : i32
    %c0_i32_2 = arith.constant 0 : i32
    return %c0_i32, %c0_i32_0, %c0_i32_1 : i32, i32, i32
  }
  func.func @transform_2(%arg0: i32) -> (i32, i32) {
    %c0_i32 = arith.constant 0 : i32
    %c0_i32_0 = arith.constant 0 : i32
    %c0_i32_1 = arith.constant 0 : i32
    return %c0_i32, %c0_i32_0 : i32, i32
  }
  func.func @transform_3(%arg0: i32) -> (i32, i32, i32) {
    %c0_i32 = arith.constant 0 : i32
    %c0_i32_0 = arith.constant 0 : i32
    %c0_i32_1 = arith.constant 0 : i32
    return %arg0, %c0_i32, %c0_i32_0 : i32, i32, i32
  }
}

module attributes {stable_mosaic.version = 11 : i64} {
  func.func @kernel(%arg0: i32, %arg1: memref<1x8x8x4xbf16, #tpu.memory_space<vmem>>, %arg2: memref<1x8x8x4xbf16, #tpu.memory_space<vmem>>, %arg3: memref<4x8xbf16, #tpu.memory_space<vmem>>, %arg4: memref<4x8xbf16, #tpu.memory_space<vmem>>, %arg5: memref<1x8xf32, #tpu.memory_space<vmem>>, %arg6: memref<9x8x4xbf16, #tpu.memory_space<vmem>>, %arg7: memref<1x4xf32, #tpu.memory_space<vmem>>, %arg8: memref<1x8x8x4xf32, #tpu.memory_space<vmem>>, %arg9: memref<10x10x8xbf16, #tpu.memory_space<vmem>>) attributes {dimension_semantics = [#tpu.dimension_semantics<parallel>], iteration_bounds = array<i64: 8>, scalar_prefetch = 0 : i64, scratch_operands = 1 : i64, tpu.core_type = #tpu.core_type<tc>, window_params = [{transform_indices = @transform_0, window_bounds = array<i64: 1, 8, 8, 4>}, {transform_indices = @transform_1, window_bounds = array<i64: 1, 8, 8, 4>}, {pipeline_mode = #tpu.pipeline_mode<synchronous>, transform_indices = @transform_2, window_bounds = array<i64: 4, 8>}, {pipeline_mode = #tpu.pipeline_mode<synchronous>, transform_indices = @transform_3, window_bounds = array<i64: 4, 8>}, {pipeline_mode = #tpu.pipeline_mode<synchronous>, transform_indices = @transform_4, window_bounds = array<i64: 1, 8>}, {pipeline_mode = #tpu.pipeline_mode<synchronous>, transform_indices = @transform_5, window_bounds = array<i64: 9, 8, 4>}, {pipeline_mode = #tpu.pipeline_mode<synchronous>, transform_indices = @transform_6, window_bounds = array<i64: 1, 4>}, {transform_indices = @transform_7, window_bounds = array<i64: 1, 8, 8, 4>}]} {
    %cst = arith.constant 0.000000e+00 : f32
    %0 = vector.broadcast %cst : f32 to vector<64x8xf32>
    %c0 = arith.constant 0 : index
    %c0_0 = arith.constant 0 : index
    %1 = vector.load %arg5[%c0, %c0_0] : memref<1x8xf32, #tpu.memory_space<vmem>>, vector<1x8xf32>
    %2 = vector.broadcast %1 : vector<1x8xf32> to vector<64x8xf32>
    %3 = arith.addf %0, %2 : vector<64x8xf32>
    %c0_1 = arith.constant 0 : index
    %c0_2 = arith.constant 0 : index
    %c0_3 = arith.constant 0 : index
    %c0_4 = arith.constant 0 : index
    %4 = vector.load %arg1[%c0_1, %c0_2, %c0_3, %c0_4] : memref<1x8x8x4xbf16, #tpu.memory_space<vmem>>, vector<1x8x8x4xbf16>
    %5 = vector.shape_cast %4 : vector<1x8x8x4xbf16> to vector<8x8x4xbf16>
    %6 = vector.shape_cast %5 : vector<8x8x4xbf16> to vector<64x4xbf16>
    %c0_5 = arith.constant 0 : index
    %c0_6 = arith.constant 0 : index
    %7 = vector.load %arg3[%c0_5, %c0_6] : memref<4x8xbf16, #tpu.memory_space<vmem>>, vector<4x8xbf16>
    %cst_7 = arith.constant dense<0.000000e+00> : vector<64x8xf32>
    %8 = tpu.matmul %6, %7, %cst_7 {dimension_numbers = #tpu.dot_dimension_numbers<[1], [0], [0], [1], [0, 0, 1, 1], [], []>} : vector<64x4xbf16>, vector<4x8xbf16>, vector<64x8xf32> -> vector<64x8xf32>
    %9 = arith.addf %3, %8 : vector<64x8xf32>
    %c0_8 = arith.constant 0 : index
    %c0_9 = arith.constant 0 : index
    %c0_10 = arith.constant 0 : index
    %c0_11 = arith.constant 0 : index
    %10 = vector.load %arg2[%c0_8, %c0_9, %c0_10, %c0_11] : memref<1x8x8x4xbf16, #tpu.memory_space<vmem>>, vector<1x8x8x4xbf16>
    %11 = vector.shape_cast %10 : vector<1x8x8x4xbf16> to vector<8x8x4xbf16>
    %12 = vector.shape_cast %11 : vector<8x8x4xbf16> to vector<64x4xbf16>
    %c0_12 = arith.constant 0 : index
    %c0_13 = arith.constant 0 : index
    %13 = vector.load %arg4[%c0_12, %c0_13] : memref<4x8xbf16, #tpu.memory_space<vmem>>, vector<4x8xbf16>
    %cst_14 = arith.constant dense<0.000000e+00> : vector<64x8xf32>
    %14 = tpu.matmul %12, %13, %cst_14 {dimension_numbers = #tpu.dot_dimension_numbers<[1], [0], [0], [1], [0, 0, 1, 1], [], []>} : vector<64x4xbf16>, vector<4x8xbf16>, vector<64x8xf32> -> vector<64x8xf32>
    %15 = arith.addf %9, %14 : vector<64x8xf32>
    %cst_15 = arith.constant 2.000000e-01 : f32
    %16 = vector.broadcast %cst_15 : f32 to vector<64x8xf32>
    %17 = arith.mulf %16, %15 : vector<64x8xf32>
    %18 = arith.maximumf %15, %17 : vector<64x8xf32>
    %cst_16 = arith.constant 0.000000e+00 : bf16
    %19 = vector.broadcast %cst_16 : bf16 to vector<10x10x8xbf16>
    %c0_17 = arith.constant 0 : index
    %c0_18 = arith.constant 0 : index
    %c0_19 = arith.constant 0 : index
    %20 = vector.load %arg9[%c0_17, %c0_18, %c0_19] : memref<10x10x8xbf16, #tpu.memory_space<vmem>>, vector<10x10x8xbf16>
    tpu.vector_store %arg9[%c0_17, %c0_18, %c0_19], %19 {strides = array<i32>} : memref<10x10x8xbf16, #tpu.memory_space<vmem>>, vector<10x10x8xbf16>,
    %21 = vector.shape_cast %18 : vector<64x8xf32> to vector<8x8x8xf32>
    %22 = arith.truncf %21 : vector<8x8x8xf32> to vector<8x8x8xbf16>
    %c1 = arith.constant 1 : index
    %c1_20 = arith.constant 1 : index
    %c0_21 = arith.constant 0 : index
    %23 = vector.load %arg9[%c1, %c1_20, %c0_21] : memref<10x10x8xbf16, #tpu.memory_space<vmem>>, vector<8x8x8xbf16>
    tpu.vector_store %arg9[%c1, %c1_20, %c0_21], %22 {strides = array<i32>} : memref<10x10x8xbf16, #tpu.memory_space<vmem>>, vector<8x8x8xbf16>,
    %cst_22 = arith.constant 0.000000e+00 : f32
    %24 = vector.broadcast %cst_22 : f32 to vector<64x4xf32>
    %c0_23 = arith.constant 0 : index
    %c0_24 = arith.constant 0 : index
    %25 = vector.load %arg7[%c0_23, %c0_24] : memref<1x4xf32, #tpu.memory_space<vmem>>, vector<1x4xf32>
    %26 = vector.broadcast %25 : vector<1x4xf32> to vector<64x4xf32>
    %27 = arith.addf %24, %26 : vector<64x4xf32>
    %c0_25 = arith.constant 0 : index
    %c0_26 = arith.constant 0 : index
    %c0_27 = arith.constant 0 : index
    %28 = vector.load %arg9[%c0_25, %c0_26, %c0_27] : memref<10x10x8xbf16, #tpu.memory_space<vmem>>, vector<8x8x8xbf16>
    %29 = vector.shape_cast %28 : vector<8x8x8xbf16> to vector<64x8xbf16>
    %c0_28 = arith.constant 0 : index
    %c0_29 = arith.constant 0 : index
    %c0_30 = arith.constant 0 : index
    %30 = vector.load %arg6[%c0_28, %c0_29, %c0_30] : memref<9x8x4xbf16, #tpu.memory_space<vmem>>, vector<1x8x4xbf16>
    %31 = vector.shape_cast %30 : vector<1x8x4xbf16> to vector<8x4xbf16>
    %cst_31 = arith.constant dense<0.000000e+00> : vector<64x4xf32>
    %32 = tpu.matmul %29, %31, %cst_31 {dimension_numbers = #tpu.dot_dimension_numbers<[1], [0], [0], [1], [0, 0, 1, 1], [], []>} : vector<64x8xbf16>, vector<8x4xbf16>, vector<64x4xf32> -> vector<64x4xf32>
    %33 = arith.addf %27, %32 : vector<64x4xf32>
    %c0_32 = arith.constant 0 : index
    %c1_33 = arith.constant 1 : index
    %c0_34 = arith.constant 0 : index
    %34 = vector.load %arg9[%c0_32, %c1_33, %c0_34] : memref<10x10x8xbf16, #tpu.memory_space<vmem>>, vector<8x8x8xbf16>
    %35 = vector.shape_cast %34 : vector<8x8x8xbf16> to vector<64x8xbf16>
    %c1_35 = arith.constant 1 : index
    %c0_36 = arith.constant 0 : index
    %c0_37 = arith.constant 0 : index
    %36 = vector.load %arg6[%c1_35, %c0_36, %c0_37] : memref<9x8x4xbf16, #tpu.memory_space<vmem>>, vector<1x8x4xbf16>
    %37 = vector.shape_cast %36 : vector<1x8x4xbf16> to vector<8x4xbf16>
    %cst_38 = arith.constant dense<0.000000e+00> : vector<64x4xf32>
    %38 = tpu.matmul %35, %37, %cst_38 {dimension_numbers = #tpu.dot_dimension_numbers<[1], [0], [0], [1], [0, 0, 1, 1], [], []>} : vector<64x8xbf16>, vector<8x4xbf16>, vector<64x4xf32> -> vector<64x4xf32>
    %39 = arith.addf %33, %38 : vector<64x4xf32>
    %c0_39 = arith.constant 0 : index
    %c2 = arith.constant 2 : index
    %c0_40 = arith.constant 0 : index
    %40 = vector.load %arg9[%c0_39, %c2, %c0_40] : memref<10x10x8xbf16, #tpu.memory_space<vmem>>, vector<8x8x8xbf16>
    %41 = vector.shape_cast %40 : vector<8x8x8xbf16> to vector<64x8xbf16>
    %c2_41 = arith.constant 2 : index
    %c0_42 = arith.constant 0 : index
    %c0_43 = arith.constant 0 : index
    %42 = vector.load %arg6[%c2_41, %c0_42, %c0_43] : memref<9x8x4xbf16, #tpu.memory_space<vmem>>, vector<1x8x4xbf16>
    %43 = vector.shape_cast %42 : vector<1x8x4xbf16> to vector<8x4xbf16>
    %cst_44 = arith.constant dense<0.000000e+00> : vector<64x4xf32>
    %44 = tpu.matmul %41, %43, %cst_44 {dimension_numbers = #tpu.dot_dimension_numbers<[1], [0], [0], [1], [0, 0, 1, 1], [], []>} : vector<64x8xbf16>, vector<8x4xbf16>, vector<64x4xf32> -> vector<64x4xf32>
    %45 = arith.addf %39, %44 : vector<64x4xf32>
    %c1_45 = arith.constant 1 : index
    %c0_46 = arith.constant 0 : index
    %c0_47 = arith.constant 0 : index
    %46 = vector.load %arg9[%c1_45, %c0_46, %c0_47] : memref<10x10x8xbf16, #tpu.memory_space<vmem>>, vector<8x8x8xbf16>
    %47 = vector.shape_cast %46 : vector<8x8x8xbf16> to vector<64x8xbf16>
    %c3 = arith.constant 3 : index
    %c0_48 = arith.constant 0 : index
    %c0_49 = arith.constant 0 : index
    %48 = vector.load %arg6[%c3, %c0_48, %c0_49] : memref<9x8x4xbf16, #tpu.memory_space<vmem>>, vector<1x8x4xbf16>
    %49 = vector.shape_cast %48 : vector<1x8x4xbf16> to vector<8x4xbf16>
    %cst_50 = arith.constant dense<0.000000e+00> : vector<64x4xf32>
    %50 = tpu.matmul %47, %49, %cst_50 {dimension_numbers = #tpu.dot_dimension_numbers<[1], [0], [0], [1], [0, 0, 1, 1], [], []>} : vector<64x8xbf16>, vector<8x4xbf16>, vector<64x4xf32> -> vector<64x4xf32>
    %51 = arith.addf %45, %50 : vector<64x4xf32>
    %c1_51 = arith.constant 1 : index
    %c1_52 = arith.constant 1 : index
    %c0_53 = arith.constant 0 : index
    %52 = vector.load %arg9[%c1_51, %c1_52, %c0_53] : memref<10x10x8xbf16, #tpu.memory_space<vmem>>, vector<8x8x8xbf16>
    %53 = vector.shape_cast %52 : vector<8x8x8xbf16> to vector<64x8xbf16>
    %c4 = arith.constant 4 : index
    %c0_54 = arith.constant 0 : index
    %c0_55 = arith.constant 0 : index
    %54 = vector.load %arg6[%c4, %c0_54, %c0_55] : memref<9x8x4xbf16, #tpu.memory_space<vmem>>, vector<1x8x4xbf16>
    %55 = vector.shape_cast %54 : vector<1x8x4xbf16> to vector<8x4xbf16>
    %cst_56 = arith.constant dense<0.000000e+00> : vector<64x4xf32>
    %56 = tpu.matmul %53, %55, %cst_56 {dimension_numbers = #tpu.dot_dimension_numbers<[1], [0], [0], [1], [0, 0, 1, 1], [], []>} : vector<64x8xbf16>, vector<8x4xbf16>, vector<64x4xf32> -> vector<64x4xf32>
    %57 = arith.addf %51, %56 : vector<64x4xf32>
    %c1_57 = arith.constant 1 : index
    %c2_58 = arith.constant 2 : index
    %c0_59 = arith.constant 0 : index
    %58 = vector.load %arg9[%c1_57, %c2_58, %c0_59] : memref<10x10x8xbf16, #tpu.memory_space<vmem>>, vector<8x8x8xbf16>
    %59 = vector.shape_cast %58 : vector<8x8x8xbf16> to vector<64x8xbf16>
    %c5 = arith.constant 5 : index
    %c0_60 = arith.constant 0 : index
    %c0_61 = arith.constant 0 : index
    %60 = vector.load %arg6[%c5, %c0_60, %c0_61] : memref<9x8x4xbf16, #tpu.memory_space<vmem>>, vector<1x8x4xbf16>
    %61 = vector.shape_cast %60 : vector<1x8x4xbf16> to vector<8x4xbf16>
    %cst_62 = arith.constant dense<0.000000e+00> : vector<64x4xf32>
    %62 = tpu.matmul %59, %61, %cst_62 {dimension_numbers = #tpu.dot_dimension_numbers<[1], [0], [0], [1], [0, 0, 1, 1], [], []>} : vector<64x8xbf16>, vector<8x4xbf16>, vector<64x4xf32> -> vector<64x4xf32>
    %63 = arith.addf %57, %62 : vector<64x4xf32>
    %c2_63 = arith.constant 2 : index
    %c0_64 = arith.constant 0 : index
    %c0_65 = arith.constant 0 : index
    %64 = vector.load %arg9[%c2_63, %c0_64, %c0_65] : memref<10x10x8xbf16, #tpu.memory_space<vmem>>, vector<8x8x8xbf16>
    %65 = vector.shape_cast %64 : vector<8x8x8xbf16> to vector<64x8xbf16>
    %c6 = arith.constant 6 : index
    %c0_66 = arith.constant 0 : index
    %c0_67 = arith.constant 0 : index
    %66 = vector.load %arg6[%c6, %c0_66, %c0_67] : memref<9x8x4xbf16, #tpu.memory_space<vmem>>, vector<1x8x4xbf16>
    %67 = vector.shape_cast %66 : vector<1x8x4xbf16> to vector<8x4xbf16>
    %cst_68 = arith.constant dense<0.000000e+00> : vector<64x4xf32>
    %68 = tpu.matmul %65, %67, %cst_68 {dimension_numbers = #tpu.dot_dimension_numbers<[1], [0], [0], [1], [0, 0, 1, 1], [], []>} : vector<64x8xbf16>, vector<8x4xbf16>, vector<64x4xf32> -> vector<64x4xf32>
    %69 = arith.addf %63, %68 : vector<64x4xf32>
    %c2_69 = arith.constant 2 : index
    %c1_70 = arith.constant 1 : index
    %c0_71 = arith.constant 0 : index
    %70 = vector.load %arg9[%c2_69, %c1_70, %c0_71] : memref<10x10x8xbf16, #tpu.memory_space<vmem>>, vector<8x8x8xbf16>
    %71 = vector.shape_cast %70 : vector<8x8x8xbf16> to vector<64x8xbf16>
    %c7 = arith.constant 7 : index
    %c0_72 = arith.constant 0 : index
    %c0_73 = arith.constant 0 : index
    %72 = vector.load %arg6[%c7, %c0_72, %c0_73] : memref<9x8x4xbf16, #tpu.memory_space<vmem>>, vector<1x8x4xbf16>
    %73 = vector.shape_cast %72 : vector<1x8x4xbf16> to vector<8x4xbf16>
    %cst_74 = arith.constant dense<0.000000e+00> : vector<64x4xf32>
    %74 = tpu.matmul %71, %73, %cst_74 {dimension_numbers = #tpu.dot_dimension_numbers<[1], [0], [0], [1], [0, 0, 1, 1], [], []>} : vector<64x8xbf16>, vector<8x4xbf16>, vector<64x4xf32> -> vector<64x4xf32>
    %75 = arith.addf %69, %74 : vector<64x4xf32>
    %c2_75 = arith.constant 2 : index
    %c2_76 = arith.constant 2 : index
    %c0_77 = arith.constant 0 : index
    %76 = vector.load %arg9[%c2_75, %c2_76, %c0_77] : memref<10x10x8xbf16, #tpu.memory_space<vmem>>, vector<8x8x8xbf16>
    %77 = vector.shape_cast %76 : vector<8x8x8xbf16> to vector<64x8xbf16>
    %c8 = arith.constant 8 : index
    %c0_78 = arith.constant 0 : index
    %c0_79 = arith.constant 0 : index
    %78 = vector.load %arg6[%c8, %c0_78, %c0_79] : memref<9x8x4xbf16, #tpu.memory_space<vmem>>, vector<1x8x4xbf16>
    %79 = vector.shape_cast %78 : vector<1x8x4xbf16> to vector<8x4xbf16>
    %cst_80 = arith.constant dense<0.000000e+00> : vector<64x4xf32>
    %80 = tpu.matmul %77, %79, %cst_80 {dimension_numbers = #tpu.dot_dimension_numbers<[1], [0], [0], [1], [0, 0, 1, 1], [], []>} : vector<64x8xbf16>, vector<8x4xbf16>, vector<64x4xf32> -> vector<64x4xf32>
    %81 = arith.addf %75, %80 : vector<64x4xf32>
    %82 = vector.shape_cast %81 : vector<64x4xf32> to vector<8x8x4xf32>
    %c0_81 = arith.constant 0 : index
    %c0_82 = arith.constant 0 : index
    %c0_83 = arith.constant 0 : index
    %c0_84 = arith.constant 0 : index
    %83 = vector.load %arg8[%c0_81, %c0_82, %c0_83, %c0_84] : memref<1x8x8x4xf32, #tpu.memory_space<vmem>>, vector<1x8x8x4xf32>
    %84 = vector.shape_cast %83 : vector<1x8x8x4xf32> to vector<8x8x4xf32>
    %85 = vector.shape_cast %82 : vector<8x8x4xf32> to vector<1x8x8x4xf32>
    tpu.vector_store %arg8[%c0_81, %c0_82, %c0_83, %c0_84], %85 {strides = array<i32>} : memref<1x8x8x4xf32, #tpu.memory_space<vmem>>, vector<1x8x8x4xf32>,
    return
  }
  func.func @transform_0(%arg0: i32) -> (i32, i32, i32, i32) {
    %c0_i32 = arith.constant 0 : i32
    %c0_i32_0 = arith.constant 0 : i32
    %c0_i32_1 = arith.constant 0 : i32
    %c0_i32_2 = arith.constant 0 : i32
    return %arg0, %c0_i32, %c0_i32_0, %c0_i32_1 : i32, i32, i32, i32
  }
  func.func @transform_1(%arg0: i32) -> (i32, i32, i32, i32) {
    %c0_i32 = arith.constant 0 : i32
    %c0_i32_0 = arith.constant 0 : i32
    %c0_i32_1 = arith.constant 0 : i32
    %c0_i32_2 = arith.constant 0 : i32
    return %arg0, %c0_i32, %c0_i32_0, %c0_i32_1 : i32, i32, i32, i32
  }
  func.func @transform_2(%arg0: i32) -> (i32, i32) {
    %c0_i32 = arith.constant 0 : i32
    %c0_i32_0 = arith.constant 0 : i32
    %c0_i32_1 = arith.constant 0 : i32
    return %c0_i32, %c0_i32_0 : i32, i32
  }
  func.func @transform_3(%arg0: i32) -> (i32, i32) {
    %c0_i32 = arith.constant 0 : i32
    %c0_i32_0 = arith.constant 0 : i32
    %c0_i32_1 = arith.constant 0 : i32
    return %c0_i32, %c0_i32_0 : i32, i32
  }
  func.func @transform_4(%arg0: i32) -> (i32, i32) {
    %c0_i32 = arith.constant 0 : i32
    %c0_i32_0 = arith.constant 0 : i32
    %c0_i32_1 = arith.constant 0 : i32
    return %c0_i32, %c0_i32_0 : i32, i32
  }
  func.func @transform_5(%arg0: i32) -> (i32, i32, i32) {
    %c0_i32 = arith.constant 0 : i32
    %c0_i32_0 = arith.constant 0 : i32
    %c0_i32_1 = arith.constant 0 : i32
    %c0_i32_2 = arith.constant 0 : i32
    return %c0_i32, %c0_i32_0, %c0_i32_1 : i32, i32, i32
  }
  func.func @transform_6(%arg0: i32) -> (i32, i32) {
    %c0_i32 = arith.constant 0 : i32
    %c0_i32_0 = arith.constant 0 : i32
    %c0_i32_1 = arith.constant 0 : i32
    return %c0_i32, %c0_i32_0 : i32, i32
  }
  func.func @transform_7(%arg0: i32) -> (i32, i32, i32, i32) {
    %c0_i32 = arith.constant 0 : i32
    %c0_i32_0 = arith.constant 0 : i32
    %c0_i32_1 = arith.constant 0 : i32
    %c0_i32_2 = arith.constant 0 : i32
    return %arg0, %c0_i32, %c0_i32_0, %c0_i32_1 : i32, i32, i32, i32
  }
}

module attributes {stable_mosaic.version = 11 : i64} {
  func.func @kernel(%arg0: i32, %arg1: memref<1x10x10x8xbf16, #tpu.memory_space<vmem>>, %arg2: memref<9x8x8xbf16, #tpu.memory_space<vmem>>, %arg3: memref<1x8xf32, #tpu.memory_space<vmem>>, %arg4: memref<9x8x8xbf16, #tpu.memory_space<vmem>>, %arg5: memref<1x8xf32, #tpu.memory_space<vmem>>, %arg6: memref<1x8x8x8xbf16, #tpu.memory_space<vmem>>, %arg7: memref<10x10x8xbf16, #tpu.memory_space<vmem>>) attributes {dimension_semantics = [#tpu.dimension_semantics<parallel>], iteration_bounds = array<i64: 8>, scalar_prefetch = 0 : i64, scratch_operands = 1 : i64, tpu.core_type = #tpu.core_type<tc>, window_params = [{transform_indices = @transform_0, window_bounds = array<i64: 1, 10, 10, 8>}, {pipeline_mode = #tpu.pipeline_mode<synchronous>, transform_indices = @transform_1, window_bounds = array<i64: 9, 8, 8>}, {pipeline_mode = #tpu.pipeline_mode<synchronous>, transform_indices = @transform_2, window_bounds = array<i64: 1, 8>}, {pipeline_mode = #tpu.pipeline_mode<synchronous>, transform_indices = @transform_3, window_bounds = array<i64: 9, 8, 8>}, {pipeline_mode = #tpu.pipeline_mode<synchronous>, transform_indices = @transform_4, window_bounds = array<i64: 1, 8>}, {transform_indices = @transform_5, window_bounds = array<i64: 1, 8, 8, 8>}]} {
    %cst = arith.constant 0.000000e+00 : f32
    %0 = vector.broadcast %cst : f32 to vector<64x8xf32>
    %c0 = arith.constant 0 : index
    %c0_0 = arith.constant 0 : index
    %1 = vector.load %arg3[%c0, %c0_0] : memref<1x8xf32, #tpu.memory_space<vmem>>, vector<1x8xf32>
    %2 = vector.broadcast %1 : vector<1x8xf32> to vector<64x8xf32>
    %3 = arith.addf %0, %2 : vector<64x8xf32>
    %c0_1 = arith.constant 0 : index
    %c0_2 = arith.constant 0 : index
    %c0_3 = arith.constant 0 : index
    %c0_4 = arith.constant 0 : index
    %4 = vector.load %arg1[%c0_1, %c0_2, %c0_3, %c0_4] : memref<1x10x10x8xbf16, #tpu.memory_space<vmem>>, vector<1x8x8x8xbf16>
    %5 = vector.shape_cast %4 : vector<1x8x8x8xbf16> to vector<8x8x8xbf16>
    %6 = vector.shape_cast %5 : vector<8x8x8xbf16> to vector<64x8xbf16>
    %c0_5 = arith.constant 0 : index
    %c0_6 = arith.constant 0 : index
    %c0_7 = arith.constant 0 : index
    %7 = vector.load %arg2[%c0_5, %c0_6, %c0_7] : memref<9x8x8xbf16, #tpu.memory_space<vmem>>, vector<1x8x8xbf16>
    %8 = vector.shape_cast %7 : vector<1x8x8xbf16> to vector<8x8xbf16>
    %cst_8 = arith.constant dense<0.000000e+00> : vector<64x8xf32>
    %9 = tpu.matmul %6, %8, %cst_8 {dimension_numbers = #tpu.dot_dimension_numbers<[1], [0], [0], [1], [0, 0, 1, 1], [], []>} : vector<64x8xbf16>, vector<8x8xbf16>, vector<64x8xf32> -> vector<64x8xf32>
    %10 = arith.addf %3, %9 : vector<64x8xf32>
    %c0_9 = arith.constant 0 : index
    %c0_10 = arith.constant 0 : index
    %c1 = arith.constant 1 : index
    %c0_11 = arith.constant 0 : index
    %11 = vector.load %arg1[%c0_9, %c0_10, %c1, %c0_11] : memref<1x10x10x8xbf16, #tpu.memory_space<vmem>>, vector<1x8x8x8xbf16>
    %12 = vector.shape_cast %11 : vector<1x8x8x8xbf16> to vector<8x8x8xbf16>
    %13 = vector.shape_cast %12 : vector<8x8x8xbf16> to vector<64x8xbf16>
    %c1_12 = arith.constant 1 : index
    %c0_13 = arith.constant 0 : index
    %c0_14 = arith.constant 0 : index
    %14 = vector.load %arg2[%c1_12, %c0_13, %c0_14] : memref<9x8x8xbf16, #tpu.memory_space<vmem>>, vector<1x8x8xbf16>
    %15 = vector.shape_cast %14 : vector<1x8x8xbf16> to vector<8x8xbf16>
    %cst_15 = arith.constant dense<0.000000e+00> : vector<64x8xf32>
    %16 = tpu.matmul %13, %15, %cst_15 {dimension_numbers = #tpu.dot_dimension_numbers<[1], [0], [0], [1], [0, 0, 1, 1], [], []>} : vector<64x8xbf16>, vector<8x8xbf16>, vector<64x8xf32> -> vector<64x8xf32>
    %17 = arith.addf %10, %16 : vector<64x8xf32>
    %c0_16 = arith.constant 0 : index
    %c0_17 = arith.constant 0 : index
    %c2 = arith.constant 2 : index
    %c0_18 = arith.constant 0 : index
    %18 = vector.load %arg1[%c0_16, %c0_17, %c2, %c0_18] : memref<1x10x10x8xbf16, #tpu.memory_space<vmem>>, vector<1x8x8x8xbf16>
    %19 = vector.shape_cast %18 : vector<1x8x8x8xbf16> to vector<8x8x8xbf16>
    %20 = vector.shape_cast %19 : vector<8x8x8xbf16> to vector<64x8xbf16>
    %c2_19 = arith.constant 2 : index
    %c0_20 = arith.constant 0 : index
    %c0_21 = arith.constant 0 : index
    %21 = vector.load %arg2[%c2_19, %c0_20, %c0_21] : memref<9x8x8xbf16, #tpu.memory_space<vmem>>, vector<1x8x8xbf16>
    %22 = vector.shape_cast %21 : vector<1x8x8xbf16> to vector<8x8xbf16>
    %cst_22 = arith.constant dense<0.000000e+00> : vector<64x8xf32>
    %23 = tpu.matmul %20, %22, %cst_22 {dimension_numbers = #tpu.dot_dimension_numbers<[1], [0], [0], [1], [0, 0, 1, 1], [], []>} : vector<64x8xbf16>, vector<8x8xbf16>, vector<64x8xf32> -> vector<64x8xf32>
    %24 = arith.addf %17, %23 : vector<64x8xf32>
    %c0_23 = arith.constant 0 : index
    %c1_24 = arith.constant 1 : index
    %c0_25 = arith.constant 0 : index
    %c0_26 = arith.constant 0 : index
    %25 = vector.load %arg1[%c0_23, %c1_24, %c0_25, %c0_26] : memref<1x10x10x8xbf16, #tpu.memory_space<vmem>>, vector<1x8x8x8xbf16>
    %26 = vector.shape_cast %25 : vector<1x8x8x8xbf16> to vector<8x8x8xbf16>
    %27 = vector.shape_cast %26 : vector<8x8x8xbf16> to vector<64x8xbf16>
    %c3 = arith.constant 3 : index
    %c0_27 = arith.constant 0 : index
    %c0_28 = arith.constant 0 : index
    %28 = vector.load %arg2[%c3, %c0_27, %c0_28] : memref<9x8x8xbf16, #tpu.memory_space<vmem>>, vector<1x8x8xbf16>
    %29 = vector.shape_cast %28 : vector<1x8x8xbf16> to vector<8x8xbf16>
    %cst_29 = arith.constant dense<0.000000e+00> : vector<64x8xf32>
    %30 = tpu.matmul %27, %29, %cst_29 {dimension_numbers = #tpu.dot_dimension_numbers<[1], [0], [0], [1], [0, 0, 1, 1], [], []>} : vector<64x8xbf16>, vector<8x8xbf16>, vector<64x8xf32> -> vector<64x8xf32>
    %31 = arith.addf %24, %30 : vector<64x8xf32>
    %c0_30 = arith.constant 0 : index
    %c1_31 = arith.constant 1 : index
    %c1_32 = arith.constant 1 : index
    %c0_33 = arith.constant 0 : index
    %32 = vector.load %arg1[%c0_30, %c1_31, %c1_32, %c0_33] : memref<1x10x10x8xbf16, #tpu.memory_space<vmem>>, vector<1x8x8x8xbf16>
    %33 = vector.shape_cast %32 : vector<1x8x8x8xbf16> to vector<8x8x8xbf16>
    %34 = vector.shape_cast %33 : vector<8x8x8xbf16> to vector<64x8xbf16>
    %c4 = arith.constant 4 : index
    %c0_34 = arith.constant 0 : index
    %c0_35 = arith.constant 0 : index
    %35 = vector.load %arg2[%c4, %c0_34, %c0_35] : memref<9x8x8xbf16, #tpu.memory_space<vmem>>, vector<1x8x8xbf16>
    %36 = vector.shape_cast %35 : vector<1x8x8xbf16> to vector<8x8xbf16>
    %cst_36 = arith.constant dense<0.000000e+00> : vector<64x8xf32>
    %37 = tpu.matmul %34, %36, %cst_36 {dimension_numbers = #tpu.dot_dimension_numbers<[1], [0], [0], [1], [0, 0, 1, 1], [], []>} : vector<64x8xbf16>, vector<8x8xbf16>, vector<64x8xf32> -> vector<64x8xf32>
    %38 = arith.addf %31, %37 : vector<64x8xf32>
    %c0_37 = arith.constant 0 : index
    %c1_38 = arith.constant 1 : index
    %c2_39 = arith.constant 2 : index
    %c0_40 = arith.constant 0 : index
    %39 = vector.load %arg1[%c0_37, %c1_38, %c2_39, %c0_40] : memref<1x10x10x8xbf16, #tpu.memory_space<vmem>>, vector<1x8x8x8xbf16>
    %40 = vector.shape_cast %39 : vector<1x8x8x8xbf16> to vector<8x8x8xbf16>
    %41 = vector.shape_cast %40 : vector<8x8x8xbf16> to vector<64x8xbf16>
    %c5 = arith.constant 5 : index
    %c0_41 = arith.constant 0 : index
    %c0_42 = arith.constant 0 : index
    %42 = vector.load %arg2[%c5, %c0_41, %c0_42] : memref<9x8x8xbf16, #tpu.memory_space<vmem>>, vector<1x8x8xbf16>
    %43 = vector.shape_cast %42 : vector<1x8x8xbf16> to vector<8x8xbf16>
    %cst_43 = arith.constant dense<0.000000e+00> : vector<64x8xf32>
    %44 = tpu.matmul %41, %43, %cst_43 {dimension_numbers = #tpu.dot_dimension_numbers<[1], [0], [0], [1], [0, 0, 1, 1], [], []>} : vector<64x8xbf16>, vector<8x8xbf16>, vector<64x8xf32> -> vector<64x8xf32>
    %45 = arith.addf %38, %44 : vector<64x8xf32>
    %c0_44 = arith.constant 0 : index
    %c2_45 = arith.constant 2 : index
    %c0_46 = arith.constant 0 : index
    %c0_47 = arith.constant 0 : index
    %46 = vector.load %arg1[%c0_44, %c2_45, %c0_46, %c0_47] : memref<1x10x10x8xbf16, #tpu.memory_space<vmem>>, vector<1x8x8x8xbf16>
    %47 = vector.shape_cast %46 : vector<1x8x8x8xbf16> to vector<8x8x8xbf16>
    %48 = vector.shape_cast %47 : vector<8x8x8xbf16> to vector<64x8xbf16>
    %c6 = arith.constant 6 : index
    %c0_48 = arith.constant 0 : index
    %c0_49 = arith.constant 0 : index
    %49 = vector.load %arg2[%c6, %c0_48, %c0_49] : memref<9x8x8xbf16, #tpu.memory_space<vmem>>, vector<1x8x8xbf16>
    %50 = vector.shape_cast %49 : vector<1x8x8xbf16> to vector<8x8xbf16>
    %cst_50 = arith.constant dense<0.000000e+00> : vector<64x8xf32>
    %51 = tpu.matmul %48, %50, %cst_50 {dimension_numbers = #tpu.dot_dimension_numbers<[1], [0], [0], [1], [0, 0, 1, 1], [], []>} : vector<64x8xbf16>, vector<8x8xbf16>, vector<64x8xf32> -> vector<64x8xf32>
    %52 = arith.addf %45, %51 : vector<64x8xf32>
    %c0_51 = arith.constant 0 : index
    %c2_52 = arith.constant 2 : index
    %c1_53 = arith.constant 1 : index
    %c0_54 = arith.constant 0 : index
    %53 = vector.load %arg1[%c0_51, %c2_52, %c1_53, %c0_54] : memref<1x10x10x8xbf16, #tpu.memory_space<vmem>>, vector<1x8x8x8xbf16>
    %54 = vector.shape_cast %53 : vector<1x8x8x8xbf16> to vector<8x8x8xbf16>
    %55 = vector.shape_cast %54 : vector<8x8x8xbf16> to vector<64x8xbf16>
    %c7 = arith.constant 7 : index
    %c0_55 = arith.constant 0 : index
    %c0_56 = arith.constant 0 : index
    %56 = vector.load %arg2[%c7, %c0_55, %c0_56] : memref<9x8x8xbf16, #tpu.memory_space<vmem>>, vector<1x8x8xbf16>
    %57 = vector.shape_cast %56 : vector<1x8x8xbf16> to vector<8x8xbf16>
    %cst_57 = arith.constant dense<0.000000e+00> : vector<64x8xf32>
    %58 = tpu.matmul %55, %57, %cst_57 {dimension_numbers = #tpu.dot_dimension_numbers<[1], [0], [0], [1], [0, 0, 1, 1], [], []>} : vector<64x8xbf16>, vector<8x8xbf16>, vector<64x8xf32> -> vector<64x8xf32>
    %59 = arith.addf %52, %58 : vector<64x8xf32>
    %c0_58 = arith.constant 0 : index
    %c2_59 = arith.constant 2 : index
    %c2_60 = arith.constant 2 : index
    %c0_61 = arith.constant 0 : index
    %60 = vector.load %arg1[%c0_58, %c2_59, %c2_60, %c0_61] : memref<1x10x10x8xbf16, #tpu.memory_space<vmem>>, vector<1x8x8x8xbf16>
    %61 = vector.shape_cast %60 : vector<1x8x8x8xbf16> to vector<8x8x8xbf16>
    %62 = vector.shape_cast %61 : vector<8x8x8xbf16> to vector<64x8xbf16>
    %c8 = arith.constant 8 : index
    %c0_62 = arith.constant 0 : index
    %c0_63 = arith.constant 0 : index
    %63 = vector.load %arg2[%c8, %c0_62, %c0_63] : memref<9x8x8xbf16, #tpu.memory_space<vmem>>, vector<1x8x8xbf16>
    %64 = vector.shape_cast %63 : vector<1x8x8xbf16> to vector<8x8xbf16>
    %cst_64 = arith.constant dense<0.000000e+00> : vector<64x8xf32>
    %65 = tpu.matmul %62, %64, %cst_64 {dimension_numbers = #tpu.dot_dimension_numbers<[1], [0], [0], [1], [0, 0, 1, 1], [], []>} : vector<64x8xbf16>, vector<8x8xbf16>, vector<64x8xf32> -> vector<64x8xf32>
    %66 = arith.addf %59, %65 : vector<64x8xf32>
    %cst_65 = arith.constant 2.000000e-01 : f32
    %67 = vector.broadcast %cst_65 : f32 to vector<64x8xf32>
    %68 = arith.mulf %67, %66 : vector<64x8xf32>
    %69 = arith.maximumf %66, %68 : vector<64x8xf32>
    %cst_66 = arith.constant 0.000000e+00 : bf16
    %70 = vector.broadcast %cst_66 : bf16 to vector<10x10x8xbf16>
    %c0_67 = arith.constant 0 : index
    %c0_68 = arith.constant 0 : index
    %c0_69 = arith.constant 0 : index
    %71 = vector.load %arg7[%c0_67, %c0_68, %c0_69] : memref<10x10x8xbf16, #tpu.memory_space<vmem>>, vector<10x10x8xbf16>
    tpu.vector_store %arg7[%c0_67, %c0_68, %c0_69], %70 {strides = array<i32>} : memref<10x10x8xbf16, #tpu.memory_space<vmem>>, vector<10x10x8xbf16>,
    %72 = vector.shape_cast %69 : vector<64x8xf32> to vector<8x8x8xf32>
    %73 = arith.truncf %72 : vector<8x8x8xf32> to vector<8x8x8xbf16>
    %c1_70 = arith.constant 1 : index
    %c1_71 = arith.constant 1 : index
    %c0_72 = arith.constant 0 : index
    %74 = vector.load %arg7[%c1_70, %c1_71, %c0_72] : memref<10x10x8xbf16, #tpu.memory_space<vmem>>, vector<8x8x8xbf16>
    tpu.vector_store %arg7[%c1_70, %c1_71, %c0_72], %73 {strides = array<i32>} : memref<10x10x8xbf16, #tpu.memory_space<vmem>>, vector<8x8x8xbf16>,
    %cst_73 = arith.constant 0.000000e+00 : f32
    %75 = vector.broadcast %cst_73 : f32 to vector<64x8xf32>
    %c0_74 = arith.constant 0 : index
    %c0_75 = arith.constant 0 : index
    %76 = vector.load %arg5[%c0_74, %c0_75] : memref<1x8xf32, #tpu.memory_space<vmem>>, vector<1x8xf32>
    %77 = vector.broadcast %76 : vector<1x8xf32> to vector<64x8xf32>
    %78 = arith.addf %75, %77 : vector<64x8xf32>
    %c0_76 = arith.constant 0 : index
    %c0_77 = arith.constant 0 : index
    %c0_78 = arith.constant 0 : index
    %79 = vector.load %arg7[%c0_76, %c0_77, %c0_78] : memref<10x10x8xbf16, #tpu.memory_space<vmem>>, vector<8x8x8xbf16>
    %80 = vector.shape_cast %79 : vector<8x8x8xbf16> to vector<64x8xbf16>
    %c0_79 = arith.constant 0 : index
    %c0_80 = arith.constant 0 : index
    %c0_81 = arith.constant 0 : index
    %81 = vector.load %arg4[%c0_79, %c0_80, %c0_81] : memref<9x8x8xbf16, #tpu.memory_space<vmem>>, vector<1x8x8xbf16>
    %82 = vector.shape_cast %81 : vector<1x8x8xbf16> to vector<8x8xbf16>
    %cst_82 = arith.constant dense<0.000000e+00> : vector<64x8xf32>
    %83 = tpu.matmul %80, %82, %cst_82 {dimension_numbers = #tpu.dot_dimension_numbers<[1], [0], [0], [1], [0, 0, 1, 1], [], []>} : vector<64x8xbf16>, vector<8x8xbf16>, vector<64x8xf32> -> vector<64x8xf32>
    %84 = arith.addf %78, %83 : vector<64x8xf32>
    %c0_83 = arith.constant 0 : index
    %c1_84 = arith.constant 1 : index
    %c0_85 = arith.constant 0 : index
    %85 = vector.load %arg7[%c0_83, %c1_84, %c0_85] : memref<10x10x8xbf16, #tpu.memory_space<vmem>>, vector<8x8x8xbf16>
    %86 = vector.shape_cast %85 : vector<8x8x8xbf16> to vector<64x8xbf16>
    %c1_86 = arith.constant 1 : index
    %c0_87 = arith.constant 0 : index
    %c0_88 = arith.constant 0 : index
    %87 = vector.load %arg4[%c1_86, %c0_87, %c0_88] : memref<9x8x8xbf16, #tpu.memory_space<vmem>>, vector<1x8x8xbf16>
    %88 = vector.shape_cast %87 : vector<1x8x8xbf16> to vector<8x8xbf16>
    %cst_89 = arith.constant dense<0.000000e+00> : vector<64x8xf32>
    %89 = tpu.matmul %86, %88, %cst_89 {dimension_numbers = #tpu.dot_dimension_numbers<[1], [0], [0], [1], [0, 0, 1, 1], [], []>} : vector<64x8xbf16>, vector<8x8xbf16>, vector<64x8xf32> -> vector<64x8xf32>
    %90 = arith.addf %84, %89 : vector<64x8xf32>
    %c0_90 = arith.constant 0 : index
    %c2_91 = arith.constant 2 : index
    %c0_92 = arith.constant 0 : index
    %91 = vector.load %arg7[%c0_90, %c2_91, %c0_92] : memref<10x10x8xbf16, #tpu.memory_space<vmem>>, vector<8x8x8xbf16>
    %92 = vector.shape_cast %91 : vector<8x8x8xbf16> to vector<64x8xbf16>
    %c2_93 = arith.constant 2 : index
    %c0_94 = arith.constant 0 : index
    %c0_95 = arith.constant 0 : index
    %93 = vector.load %arg4[%c2_93, %c0_94, %c0_95] : memref<9x8x8xbf16, #tpu.memory_space<vmem>>, vector<1x8x8xbf16>
    %94 = vector.shape_cast %93 : vector<1x8x8xbf16> to vector<8x8xbf16>
    %cst_96 = arith.constant dense<0.000000e+00> : vector<64x8xf32>
    %95 = tpu.matmul %92, %94, %cst_96 {dimension_numbers = #tpu.dot_dimension_numbers<[1], [0], [0], [1], [0, 0, 1, 1], [], []>} : vector<64x8xbf16>, vector<8x8xbf16>, vector<64x8xf32> -> vector<64x8xf32>
    %96 = arith.addf %90, %95 : vector<64x8xf32>
    %c1_97 = arith.constant 1 : index
    %c0_98 = arith.constant 0 : index
    %c0_99 = arith.constant 0 : index
    %97 = vector.load %arg7[%c1_97, %c0_98, %c0_99] : memref<10x10x8xbf16, #tpu.memory_space<vmem>>, vector<8x8x8xbf16>
    %98 = vector.shape_cast %97 : vector<8x8x8xbf16> to vector<64x8xbf16>
    %c3_100 = arith.constant 3 : index
    %c0_101 = arith.constant 0 : index
    %c0_102 = arith.constant 0 : index
    %99 = vector.load %arg4[%c3_100, %c0_101, %c0_102] : memref<9x8x8xbf16, #tpu.memory_space<vmem>>, vector<1x8x8xbf16>
    %100 = vector.shape_cast %99 : vector<1x8x8xbf16> to vector<8x8xbf16>
    %cst_103 = arith.constant dense<0.000000e+00> : vector<64x8xf32>
    %101 = tpu.matmul %98, %100, %cst_103 {dimension_numbers = #tpu.dot_dimension_numbers<[1], [0], [0], [1], [0, 0, 1, 1], [], []>} : vector<64x8xbf16>, vector<8x8xbf16>, vector<64x8xf32> -> vector<64x8xf32>
    %102 = arith.addf %96, %101 : vector<64x8xf32>
    %c1_104 = arith.constant 1 : index
    %c1_105 = arith.constant 1 : index
    %c0_106 = arith.constant 0 : index
    %103 = vector.load %arg7[%c1_104, %c1_105, %c0_106] : memref<10x10x8xbf16, #tpu.memory_space<vmem>>, vector<8x8x8xbf16>
    %104 = vector.shape_cast %103 : vector<8x8x8xbf16> to vector<64x8xbf16>
    %c4_107 = arith.constant 4 : index
    %c0_108 = arith.constant 0 : index
    %c0_109 = arith.constant 0 : index
    %105 = vector.load %arg4[%c4_107, %c0_108, %c0_109] : memref<9x8x8xbf16, #tpu.memory_space<vmem>>, vector<1x8x8xbf16>
    %106 = vector.shape_cast %105 : vector<1x8x8xbf16> to vector<8x8xbf16>
    %cst_110 = arith.constant dense<0.000000e+00> : vector<64x8xf32>
    %107 = tpu.matmul %104, %106, %cst_110 {dimension_numbers = #tpu.dot_dimension_numbers<[1], [0], [0], [1], [0, 0, 1, 1], [], []>} : vector<64x8xbf16>, vector<8x8xbf16>, vector<64x8xf32> -> vector<64x8xf32>
    %108 = arith.addf %102, %107 : vector<64x8xf32>
    %c1_111 = arith.constant 1 : index
    %c2_112 = arith.constant 2 : index
    %c0_113 = arith.constant 0 : index
    %109 = vector.load %arg7[%c1_111, %c2_112, %c0_113] : memref<10x10x8xbf16, #tpu.memory_space<vmem>>, vector<8x8x8xbf16>
    %110 = vector.shape_cast %109 : vector<8x8x8xbf16> to vector<64x8xbf16>
    %c5_114 = arith.constant 5 : index
    %c0_115 = arith.constant 0 : index
    %c0_116 = arith.constant 0 : index
    %111 = vector.load %arg4[%c5_114, %c0_115, %c0_116] : memref<9x8x8xbf16, #tpu.memory_space<vmem>>, vector<1x8x8xbf16>
    %112 = vector.shape_cast %111 : vector<1x8x8xbf16> to vector<8x8xbf16>
    %cst_117 = arith.constant dense<0.000000e+00> : vector<64x8xf32>
    %113 = tpu.matmul %110, %112, %cst_117 {dimension_numbers = #tpu.dot_dimension_numbers<[1], [0], [0], [1], [0, 0, 1, 1], [], []>} : vector<64x8xbf16>, vector<8x8xbf16>, vector<64x8xf32> -> vector<64x8xf32>
    %114 = arith.addf %108, %113 : vector<64x8xf32>
    %c2_118 = arith.constant 2 : index
    %c0_119 = arith.constant 0 : index
    %c0_120 = arith.constant 0 : index
    %115 = vector.load %arg7[%c2_118, %c0_119, %c0_120] : memref<10x10x8xbf16, #tpu.memory_space<vmem>>, vector<8x8x8xbf16>
    %116 = vector.shape_cast %115 : vector<8x8x8xbf16> to vector<64x8xbf16>
    %c6_121 = arith.constant 6 : index
    %c0_122 = arith.constant 0 : index
    %c0_123 = arith.constant 0 : index
    %117 = vector.load %arg4[%c6_121, %c0_122, %c0_123] : memref<9x8x8xbf16, #tpu.memory_space<vmem>>, vector<1x8x8xbf16>
    %118 = vector.shape_cast %117 : vector<1x8x8xbf16> to vector<8x8xbf16>
    %cst_124 = arith.constant dense<0.000000e+00> : vector<64x8xf32>
    %119 = tpu.matmul %116, %118, %cst_124 {dimension_numbers = #tpu.dot_dimension_numbers<[1], [0], [0], [1], [0, 0, 1, 1], [], []>} : vector<64x8xbf16>, vector<8x8xbf16>, vector<64x8xf32> -> vector<64x8xf32>
    %120 = arith.addf %114, %119 : vector<64x8xf32>
    %c2_125 = arith.constant 2 : index
    %c1_126 = arith.constant 1 : index
    %c0_127 = arith.constant 0 : index
    %121 = vector.load %arg7[%c2_125, %c1_126, %c0_127] : memref<10x10x8xbf16, #tpu.memory_space<vmem>>, vector<8x8x8xbf16>
    %122 = vector.shape_cast %121 : vector<8x8x8xbf16> to vector<64x8xbf16>
    %c7_128 = arith.constant 7 : index
    %c0_129 = arith.constant 0 : index
    %c0_130 = arith.constant 0 : index
    %123 = vector.load %arg4[%c7_128, %c0_129, %c0_130] : memref<9x8x8xbf16, #tpu.memory_space<vmem>>, vector<1x8x8xbf16>
    %124 = vector.shape_cast %123 : vector<1x8x8xbf16> to vector<8x8xbf16>
    %cst_131 = arith.constant dense<0.000000e+00> : vector<64x8xf32>
    %125 = tpu.matmul %122, %124, %cst_131 {dimension_numbers = #tpu.dot_dimension_numbers<[1], [0], [0], [1], [0, 0, 1, 1], [], []>} : vector<64x8xbf16>, vector<8x8xbf16>, vector<64x8xf32> -> vector<64x8xf32>
    %126 = arith.addf %120, %125 : vector<64x8xf32>
    %c2_132 = arith.constant 2 : index
    %c2_133 = arith.constant 2 : index
    %c0_134 = arith.constant 0 : index
    %127 = vector.load %arg7[%c2_132, %c2_133, %c0_134] : memref<10x10x8xbf16, #tpu.memory_space<vmem>>, vector<8x8x8xbf16>
    %128 = vector.shape_cast %127 : vector<8x8x8xbf16> to vector<64x8xbf16>
    %c8_135 = arith.constant 8 : index
    %c0_136 = arith.constant 0 : index
    %c0_137 = arith.constant 0 : index
    %129 = vector.load %arg4[%c8_135, %c0_136, %c0_137] : memref<9x8x8xbf16, #tpu.memory_space<vmem>>, vector<1x8x8xbf16>
    %130 = vector.shape_cast %129 : vector<1x8x8xbf16> to vector<8x8xbf16>
    %cst_138 = arith.constant dense<0.000000e+00> : vector<64x8xf32>
    %131 = tpu.matmul %128, %130, %cst_138 {dimension_numbers = #tpu.dot_dimension_numbers<[1], [0], [0], [1], [0, 0, 1, 1], [], []>} : vector<64x8xbf16>, vector<8x8xbf16>, vector<64x8xf32> -> vector<64x8xf32>
    %132 = arith.addf %126, %131 : vector<64x8xf32>
    %cst_139 = arith.constant 2.000000e-01 : f32
    %133 = vector.broadcast %cst_139 : f32 to vector<64x8xf32>
    %134 = arith.mulf %133, %132 : vector<64x8xf32>
    %135 = arith.maximumf %132, %134 : vector<64x8xf32>
    %136 = vector.shape_cast %135 : vector<64x8xf32> to vector<8x8x8xf32>
    %137 = arith.truncf %136 : vector<8x8x8xf32> to vector<8x8x8xbf16>
    %c0_140 = arith.constant 0 : index
    %c0_141 = arith.constant 0 : index
    %c0_142 = arith.constant 0 : index
    %c0_143 = arith.constant 0 : index
    %138 = vector.load %arg6[%c0_140, %c0_141, %c0_142, %c0_143] : memref<1x8x8x8xbf16, #tpu.memory_space<vmem>>, vector<1x8x8x8xbf16>
    %139 = vector.shape_cast %138 : vector<1x8x8x8xbf16> to vector<8x8x8xbf16>
    %140 = vector.shape_cast %137 : vector<8x8x8xbf16> to vector<1x8x8x8xbf16>
    tpu.vector_store %arg6[%c0_140, %c0_141, %c0_142, %c0_143], %140 {strides = array<i32>} : memref<1x8x8x8xbf16, #tpu.memory_space<vmem>>, vector<1x8x8x8xbf16>,
    return
  }
  func.func @transform_0(%arg0: i32) -> (i32, i32, i32, i32) {
    %c0_i32 = arith.constant 0 : i32
    %c0_i32_0 = arith.constant 0 : i32
    %c0_i32_1 = arith.constant 0 : i32
    %c0_i32_2 = arith.constant 0 : i32
    return %arg0, %c0_i32, %c0_i32_0, %c0_i32_1 : i32, i32, i32, i32
  }
  func.func @transform_1(%arg0: i32) -> (i32, i32, i32) {
    %c0_i32 = arith.constant 0 : i32
    %c0_i32_0 = arith.constant 0 : i32
    %c0_i32_1 = arith.constant 0 : i32
    %c0_i32_2 = arith.constant 0 : i32
    return %c0_i32, %c0_i32_0, %c0_i32_1 : i32, i32, i32
  }
  func.func @transform_2(%arg0: i32) -> (i32, i32) {
    %c0_i32 = arith.constant 0 : i32
    %c0_i32_0 = arith.constant 0 : i32
    %c0_i32_1 = arith.constant 0 : i32
    return %c0_i32, %c0_i32_0 : i32, i32
  }
  func.func @transform_3(%arg0: i32) -> (i32, i32, i32) {
    %c0_i32 = arith.constant 0 : i32
    %c0_i32_0 = arith.constant 0 : i32
    %c0_i32_1 = arith.constant 0 : i32
    %c0_i32_2 = arith.constant 0 : i32
    return %c0_i32, %c0_i32_0, %c0_i32_1 : i32, i32, i32
  }
  func.func @transform_4(%arg0: i32) -> (i32, i32) {
    %c0_i32 = arith.constant 0 : i32
    %c0_i32_0 = arith.constant 0 : i32
    %c0_i32_1 = arith.constant 0 : i32
    return %c0_i32, %c0_i32_0 : i32, i32
  }
  func.func @transform_5(%arg0: i32) -> (i32, i32, i32, i32) {
    %c0_i32 = arith.constant 0 : i32
    %c0_i32_0 = arith.constant 0 : i32
    %c0_i32_1 = arith.constant 0 : i32
    %c0_i32_2 = arith.constant 0 : i32
    return %arg0, %c0_i32, %c0_i32_0, %c0_i32_1 : i32, i32, i32, i32
  }
}

module attributes {stable_mosaic.version = 11 : i64} {
  func.func @kernel(%arg0: i32, %arg1: memref<64x32xbf16, #tpu.memory_space<vmem>>, %arg2: memref<32x2xbf16, #tpu.memory_space<vmem>>, %arg3: memref<2x8xbf16, #tpu.memory_space<vmem>>, %arg4: memref<64x8xbf16, #tpu.memory_space<vmem>>) attributes {dimension_semantics = [#tpu.dimension_semantics<parallel>], iteration_bounds = array<i64: 2>, scalar_prefetch = 0 : i64, scratch_operands = 0 : i64, tpu.core_type = #tpu.core_type<tc>, window_params = [{transform_indices = @transform_0, window_bounds = array<i64: 64, 32>}, {pipeline_mode = #tpu.pipeline_mode<synchronous>, transform_indices = @transform_1, window_bounds = array<i64: 32, 2>}, {pipeline_mode = #tpu.pipeline_mode<synchronous>, transform_indices = @transform_2, window_bounds = array<i64: 2, 8>}, {transform_indices = @transform_3, window_bounds = array<i64: 64, 8>}]} {
    %c0 = arith.constant 0 : index
    %c0_0 = arith.constant 0 : index
    %0 = vector.load %arg1[%c0, %c0_0] : memref<64x32xbf16, #tpu.memory_space<vmem>>, vector<64x32xbf16>
    %c0_1 = arith.constant 0 : index
    %c0_2 = arith.constant 0 : index
    %1 = vector.load %arg2[%c0_1, %c0_2] : memref<32x2xbf16, #tpu.memory_space<vmem>>, vector<32x2xbf16>
    %cst = arith.constant dense<0.000000e+00> : vector<64x2xf32>
    %2 = tpu.matmul %0, %1, %cst {dimension_numbers = #tpu.dot_dimension_numbers<[1], [0], [0], [1], [0, 0, 1, 1], [], []>} : vector<64x32xbf16>, vector<32x2xbf16>, vector<64x2xf32> -> vector<64x2xf32>
    %cst_3 = arith.constant 2.000000e-01 : f32
    %3 = vector.broadcast %cst_3 : f32 to vector<64x2xf32>
    %4 = arith.mulf %3, %2 : vector<64x2xf32>
    %5 = arith.maximumf %2, %4 : vector<64x2xf32>
    %6 = arith.truncf %5 : vector<64x2xf32> to vector<64x2xbf16>
    %c0_4 = arith.constant 0 : index
    %c0_5 = arith.constant 0 : index
    %7 = vector.load %arg3[%c0_4, %c0_5] : memref<2x8xbf16, #tpu.memory_space<vmem>>, vector<2x8xbf16>
    %cst_6 = arith.constant dense<0.000000e+00> : vector<64x8xf32>
    %8 = tpu.matmul %6, %7, %cst_6 {dimension_numbers = #tpu.dot_dimension_numbers<[1], [0], [0], [1], [0, 0, 1, 1], [], []>} : vector<64x2xbf16>, vector<2x8xbf16>, vector<64x8xf32> -> vector<64x8xf32>
    %cst_7 = arith.constant 2.000000e-01 : f32
    %9 = vector.broadcast %cst_7 : f32 to vector<64x8xf32>
    %10 = arith.mulf %9, %8 : vector<64x8xf32>
    %11 = arith.maximumf %8, %10 : vector<64x8xf32>
    %12 = arith.truncf %11 : vector<64x8xf32> to vector<64x8xbf16>
    %c0_8 = arith.constant 0 : index
    %c0_9 = arith.constant 0 : index
    %13 = vector.load %arg4[%c0_8, %c0_9] : memref<64x8xbf16, #tpu.memory_space<vmem>>, vector<64x8xbf16>
    tpu.vector_store %arg4[%c0_8, %c0_9], %12 {strides = array<i32>} : memref<64x8xbf16, #tpu.memory_space<vmem>>, vector<64x8xbf16>,
    return
  }
  func.func @transform_0(%arg0: i32) -> (i32, i32) {
    %c0_i32 = arith.constant 0 : i32
    %c0_i32_0 = arith.constant 0 : i32
    return %arg0, %c0_i32 : i32, i32
  }
  func.func @transform_1(%arg0: i32) -> (i32, i32) {
    %c0_i32 = arith.constant 0 : i32
    %c0_i32_0 = arith.constant 0 : i32
    %c0_i32_1 = arith.constant 0 : i32
    return %c0_i32, %c0_i32_0 : i32, i32
  }
  func.func @transform_2(%arg0: i32) -> (i32, i32) {
    %c0_i32 = arith.constant 0 : i32
    %c0_i32_0 = arith.constant 0 : i32
    %c0_i32_1 = arith.constant 0 : i32
    return %c0_i32, %c0_i32_0 : i32, i32
  }
  func.func @transform_3(%arg0: i32) -> (i32, i32) {
    %c0_i32 = arith.constant 0 : i32
    %c0_i32_0 = arith.constant 0 : i32
    return %arg0, %c0_i32 : i32, i32
  }
}

module attributes {stable_mosaic.version = 11 : i64} {
  func.func @kernel(%arg0: i32, %arg1: memref<1x8x8x8xbf16, #tpu.memory_space<vmem>>, %arg2: memref<1x8x8x2xbf16, #tpu.memory_space<vmem>>, %arg3: memref<8x8xbf16, #tpu.memory_space<vmem>>, %arg4: memref<2x8xbf16, #tpu.memory_space<vmem>>, %arg5: memref<1x8xf32, #tpu.memory_space<vmem>>, %arg6: memref<9x8x4xbf16, #tpu.memory_space<vmem>>, %arg7: memref<1x4xf32, #tpu.memory_space<vmem>>, %arg8: memref<1x8x8x4xf32, #tpu.memory_space<vmem>>, %arg9: memref<10x10x8xbf16, #tpu.memory_space<vmem>>) attributes {dimension_semantics = [#tpu.dimension_semantics<parallel>], iteration_bounds = array<i64: 8>, scalar_prefetch = 0 : i64, scratch_operands = 1 : i64, tpu.core_type = #tpu.core_type<tc>, window_params = [{transform_indices = @transform_0, window_bounds = array<i64: 1, 8, 8, 8>}, {transform_indices = @transform_1, window_bounds = array<i64: 1, 8, 8, 2>}, {pipeline_mode = #tpu.pipeline_mode<synchronous>, transform_indices = @transform_2, window_bounds = array<i64: 8, 8>}, {pipeline_mode = #tpu.pipeline_mode<synchronous>, transform_indices = @transform_3, window_bounds = array<i64: 2, 8>}, {pipeline_mode = #tpu.pipeline_mode<synchronous>, transform_indices = @transform_4, window_bounds = array<i64: 1, 8>}, {pipeline_mode = #tpu.pipeline_mode<synchronous>, transform_indices = @transform_5, window_bounds = array<i64: 9, 8, 4>}, {pipeline_mode = #tpu.pipeline_mode<synchronous>, transform_indices = @transform_6, window_bounds = array<i64: 1, 4>}, {transform_indices = @transform_7, window_bounds = array<i64: 1, 8, 8, 4>}]} {
    %cst = arith.constant 0.000000e+00 : f32
    %0 = vector.broadcast %cst : f32 to vector<64x8xf32>
    %c0 = arith.constant 0 : index
    %c0_0 = arith.constant 0 : index
    %1 = vector.load %arg5[%c0, %c0_0] : memref<1x8xf32, #tpu.memory_space<vmem>>, vector<1x8xf32>
    %2 = vector.broadcast %1 : vector<1x8xf32> to vector<64x8xf32>
    %3 = arith.addf %0, %2 : vector<64x8xf32>
    %c0_1 = arith.constant 0 : index
    %c0_2 = arith.constant 0 : index
    %c0_3 = arith.constant 0 : index
    %c0_4 = arith.constant 0 : index
    %4 = vector.load %arg1[%c0_1, %c0_2, %c0_3, %c0_4] : memref<1x8x8x8xbf16, #tpu.memory_space<vmem>>, vector<1x8x8x8xbf16>
    %5 = vector.shape_cast %4 : vector<1x8x8x8xbf16> to vector<8x8x8xbf16>
    %6 = vector.shape_cast %5 : vector<8x8x8xbf16> to vector<64x8xbf16>
    %c0_5 = arith.constant 0 : index
    %c0_6 = arith.constant 0 : index
    %7 = vector.load %arg3[%c0_5, %c0_6] : memref<8x8xbf16, #tpu.memory_space<vmem>>, vector<8x8xbf16>
    %cst_7 = arith.constant dense<0.000000e+00> : vector<64x8xf32>
    %8 = tpu.matmul %6, %7, %cst_7 {dimension_numbers = #tpu.dot_dimension_numbers<[1], [0], [0], [1], [0, 0, 1, 1], [], []>} : vector<64x8xbf16>, vector<8x8xbf16>, vector<64x8xf32> -> vector<64x8xf32>
    %9 = arith.addf %3, %8 : vector<64x8xf32>
    %c0_8 = arith.constant 0 : index
    %c0_9 = arith.constant 0 : index
    %c0_10 = arith.constant 0 : index
    %c0_11 = arith.constant 0 : index
    %10 = vector.load %arg2[%c0_8, %c0_9, %c0_10, %c0_11] : memref<1x8x8x2xbf16, #tpu.memory_space<vmem>>, vector<1x8x8x2xbf16>
    %11 = vector.shape_cast %10 : vector<1x8x8x2xbf16> to vector<8x8x2xbf16>
    %12 = vector.shape_cast %11 : vector<8x8x2xbf16> to vector<64x2xbf16>
    %c0_12 = arith.constant 0 : index
    %c0_13 = arith.constant 0 : index
    %13 = vector.load %arg4[%c0_12, %c0_13] : memref<2x8xbf16, #tpu.memory_space<vmem>>, vector<2x8xbf16>
    %cst_14 = arith.constant dense<0.000000e+00> : vector<64x8xf32>
    %14 = tpu.matmul %12, %13, %cst_14 {dimension_numbers = #tpu.dot_dimension_numbers<[1], [0], [0], [1], [0, 0, 1, 1], [], []>} : vector<64x2xbf16>, vector<2x8xbf16>, vector<64x8xf32> -> vector<64x8xf32>
    %15 = arith.addf %9, %14 : vector<64x8xf32>
    %cst_15 = arith.constant 2.000000e-01 : f32
    %16 = vector.broadcast %cst_15 : f32 to vector<64x8xf32>
    %17 = arith.mulf %16, %15 : vector<64x8xf32>
    %18 = arith.maximumf %15, %17 : vector<64x8xf32>
    %cst_16 = arith.constant 0.000000e+00 : bf16
    %19 = vector.broadcast %cst_16 : bf16 to vector<10x10x8xbf16>
    %c0_17 = arith.constant 0 : index
    %c0_18 = arith.constant 0 : index
    %c0_19 = arith.constant 0 : index
    %20 = vector.load %arg9[%c0_17, %c0_18, %c0_19] : memref<10x10x8xbf16, #tpu.memory_space<vmem>>, vector<10x10x8xbf16>
    tpu.vector_store %arg9[%c0_17, %c0_18, %c0_19], %19 {strides = array<i32>} : memref<10x10x8xbf16, #tpu.memory_space<vmem>>, vector<10x10x8xbf16>,
    %21 = vector.shape_cast %18 : vector<64x8xf32> to vector<8x8x8xf32>
    %22 = arith.truncf %21 : vector<8x8x8xf32> to vector<8x8x8xbf16>
    %c1 = arith.constant 1 : index
    %c1_20 = arith.constant 1 : index
    %c0_21 = arith.constant 0 : index
    %23 = vector.load %arg9[%c1, %c1_20, %c0_21] : memref<10x10x8xbf16, #tpu.memory_space<vmem>>, vector<8x8x8xbf16>
    tpu.vector_store %arg9[%c1, %c1_20, %c0_21], %22 {strides = array<i32>} : memref<10x10x8xbf16, #tpu.memory_space<vmem>>, vector<8x8x8xbf16>,
    %cst_22 = arith.constant 0.000000e+00 : f32
    %24 = vector.broadcast %cst_22 : f32 to vector<64x4xf32>
    %c0_23 = arith.constant 0 : index
    %c0_24 = arith.constant 0 : index
    %25 = vector.load %arg7[%c0_23, %c0_24] : memref<1x4xf32, #tpu.memory_space<vmem>>, vector<1x4xf32>
    %26 = vector.broadcast %25 : vector<1x4xf32> to vector<64x4xf32>
    %27 = arith.addf %24, %26 : vector<64x4xf32>
    %c0_25 = arith.constant 0 : index
    %c0_26 = arith.constant 0 : index
    %c0_27 = arith.constant 0 : index
    %28 = vector.load %arg9[%c0_25, %c0_26, %c0_27] : memref<10x10x8xbf16, #tpu.memory_space<vmem>>, vector<8x8x8xbf16>
    %29 = vector.shape_cast %28 : vector<8x8x8xbf16> to vector<64x8xbf16>
    %c0_28 = arith.constant 0 : index
    %c0_29 = arith.constant 0 : index
    %c0_30 = arith.constant 0 : index
    %30 = vector.load %arg6[%c0_28, %c0_29, %c0_30] : memref<9x8x4xbf16, #tpu.memory_space<vmem>>, vector<1x8x4xbf16>
    %31 = vector.shape_cast %30 : vector<1x8x4xbf16> to vector<8x4xbf16>
    %cst_31 = arith.constant dense<0.000000e+00> : vector<64x4xf32>
    %32 = tpu.matmul %29, %31, %cst_31 {dimension_numbers = #tpu.dot_dimension_numbers<[1], [0], [0], [1], [0, 0, 1, 1], [], []>} : vector<64x8xbf16>, vector<8x4xbf16>, vector<64x4xf32> -> vector<64x4xf32>
    %33 = arith.addf %27, %32 : vector<64x4xf32>
    %c0_32 = arith.constant 0 : index
    %c1_33 = arith.constant 1 : index
    %c0_34 = arith.constant 0 : index
    %34 = vector.load %arg9[%c0_32, %c1_33, %c0_34] : memref<10x10x8xbf16, #tpu.memory_space<vmem>>, vector<8x8x8xbf16>
    %35 = vector.shape_cast %34 : vector<8x8x8xbf16> to vector<64x8xbf16>
    %c1_35 = arith.constant 1 : index
    %c0_36 = arith.constant 0 : index
    %c0_37 = arith.constant 0 : index
    %36 = vector.load %arg6[%c1_35, %c0_36, %c0_37] : memref<9x8x4xbf16, #tpu.memory_space<vmem>>, vector<1x8x4xbf16>
    %37 = vector.shape_cast %36 : vector<1x8x4xbf16> to vector<8x4xbf16>
    %cst_38 = arith.constant dense<0.000000e+00> : vector<64x4xf32>
    %38 = tpu.matmul %35, %37, %cst_38 {dimension_numbers = #tpu.dot_dimension_numbers<[1], [0], [0], [1], [0, 0, 1, 1], [], []>} : vector<64x8xbf16>, vector<8x4xbf16>, vector<64x4xf32> -> vector<64x4xf32>
    %39 = arith.addf %33, %38 : vector<64x4xf32>
    %c0_39 = arith.constant 0 : index
    %c2 = arith.constant 2 : index
    %c0_40 = arith.constant 0 : index
    %40 = vector.load %arg9[%c0_39, %c2, %c0_40] : memref<10x10x8xbf16, #tpu.memory_space<vmem>>, vector<8x8x8xbf16>
    %41 = vector.shape_cast %40 : vector<8x8x8xbf16> to vector<64x8xbf16>
    %c2_41 = arith.constant 2 : index
    %c0_42 = arith.constant 0 : index
    %c0_43 = arith.constant 0 : index
    %42 = vector.load %arg6[%c2_41, %c0_42, %c0_43] : memref<9x8x4xbf16, #tpu.memory_space<vmem>>, vector<1x8x4xbf16>
    %43 = vector.shape_cast %42 : vector<1x8x4xbf16> to vector<8x4xbf16>
    %cst_44 = arith.constant dense<0.000000e+00> : vector<64x4xf32>
    %44 = tpu.matmul %41, %43, %cst_44 {dimension_numbers = #tpu.dot_dimension_numbers<[1], [0], [0], [1], [0, 0, 1, 1], [], []>} : vector<64x8xbf16>, vector<8x4xbf16>, vector<64x4xf32> -> vector<64x4xf32>
    %45 = arith.addf %39, %44 : vector<64x4xf32>
    %c1_45 = arith.constant 1 : index
    %c0_46 = arith.constant 0 : index
    %c0_47 = arith.constant 0 : index
    %46 = vector.load %arg9[%c1_45, %c0_46, %c0_47] : memref<10x10x8xbf16, #tpu.memory_space<vmem>>, vector<8x8x8xbf16>
    %47 = vector.shape_cast %46 : vector<8x8x8xbf16> to vector<64x8xbf16>
    %c3 = arith.constant 3 : index
    %c0_48 = arith.constant 0 : index
    %c0_49 = arith.constant 0 : index
    %48 = vector.load %arg6[%c3, %c0_48, %c0_49] : memref<9x8x4xbf16, #tpu.memory_space<vmem>>, vector<1x8x4xbf16>
    %49 = vector.shape_cast %48 : vector<1x8x4xbf16> to vector<8x4xbf16>
    %cst_50 = arith.constant dense<0.000000e+00> : vector<64x4xf32>
    %50 = tpu.matmul %47, %49, %cst_50 {dimension_numbers = #tpu.dot_dimension_numbers<[1], [0], [0], [1], [0, 0, 1, 1], [], []>} : vector<64x8xbf16>, vector<8x4xbf16>, vector<64x4xf32> -> vector<64x4xf32>
    %51 = arith.addf %45, %50 : vector<64x4xf32>
    %c1_51 = arith.constant 1 : index
    %c1_52 = arith.constant 1 : index
    %c0_53 = arith.constant 0 : index
    %52 = vector.load %arg9[%c1_51, %c1_52, %c0_53] : memref<10x10x8xbf16, #tpu.memory_space<vmem>>, vector<8x8x8xbf16>
    %53 = vector.shape_cast %52 : vector<8x8x8xbf16> to vector<64x8xbf16>
    %c4 = arith.constant 4 : index
    %c0_54 = arith.constant 0 : index
    %c0_55 = arith.constant 0 : index
    %54 = vector.load %arg6[%c4, %c0_54, %c0_55] : memref<9x8x4xbf16, #tpu.memory_space<vmem>>, vector<1x8x4xbf16>
    %55 = vector.shape_cast %54 : vector<1x8x4xbf16> to vector<8x4xbf16>
    %cst_56 = arith.constant dense<0.000000e+00> : vector<64x4xf32>
    %56 = tpu.matmul %53, %55, %cst_56 {dimension_numbers = #tpu.dot_dimension_numbers<[1], [0], [0], [1], [0, 0, 1, 1], [], []>} : vector<64x8xbf16>, vector<8x4xbf16>, vector<64x4xf32> -> vector<64x4xf32>
    %57 = arith.addf %51, %56 : vector<64x4xf32>
    %c1_57 = arith.constant 1 : index
    %c2_58 = arith.constant 2 : index
    %c0_59 = arith.constant 0 : index
    %58 = vector.load %arg9[%c1_57, %c2_58, %c0_59] : memref<10x10x8xbf16, #tpu.memory_space<vmem>>, vector<8x8x8xbf16>
    %59 = vector.shape_cast %58 : vector<8x8x8xbf16> to vector<64x8xbf16>
    %c5 = arith.constant 5 : index
    %c0_60 = arith.constant 0 : index
    %c0_61 = arith.constant 0 : index
    %60 = vector.load %arg6[%c5, %c0_60, %c0_61] : memref<9x8x4xbf16, #tpu.memory_space<vmem>>, vector<1x8x4xbf16>
    %61 = vector.shape_cast %60 : vector<1x8x4xbf16> to vector<8x4xbf16>
    %cst_62 = arith.constant dense<0.000000e+00> : vector<64x4xf32>
    %62 = tpu.matmul %59, %61, %cst_62 {dimension_numbers = #tpu.dot_dimension_numbers<[1], [0], [0], [1], [0, 0, 1, 1], [], []>} : vector<64x8xbf16>, vector<8x4xbf16>, vector<64x4xf32> -> vector<64x4xf32>
    %63 = arith.addf %57, %62 : vector<64x4xf32>
    %c2_63 = arith.constant 2 : index
    %c0_64 = arith.constant 0 : index
    %c0_65 = arith.constant 0 : index
    %64 = vector.load %arg9[%c2_63, %c0_64, %c0_65] : memref<10x10x8xbf16, #tpu.memory_space<vmem>>, vector<8x8x8xbf16>
    %65 = vector.shape_cast %64 : vector<8x8x8xbf16> to vector<64x8xbf16>
    %c6 = arith.constant 6 : index
    %c0_66 = arith.constant 0 : index
    %c0_67 = arith.constant 0 : index
    %66 = vector.load %arg6[%c6, %c0_66, %c0_67] : memref<9x8x4xbf16, #tpu.memory_space<vmem>>, vector<1x8x4xbf16>
    %67 = vector.shape_cast %66 : vector<1x8x4xbf16> to vector<8x4xbf16>
    %cst_68 = arith.constant dense<0.000000e+00> : vector<64x4xf32>
    %68 = tpu.matmul %65, %67, %cst_68 {dimension_numbers = #tpu.dot_dimension_numbers<[1], [0], [0], [1], [0, 0, 1, 1], [], []>} : vector<64x8xbf16>, vector<8x4xbf16>, vector<64x4xf32> -> vector<64x4xf32>
    %69 = arith.addf %63, %68 : vector<64x4xf32>
    %c2_69 = arith.constant 2 : index
    %c1_70 = arith.constant 1 : index
    %c0_71 = arith.constant 0 : index
    %70 = vector.load %arg9[%c2_69, %c1_70, %c0_71] : memref<10x10x8xbf16, #tpu.memory_space<vmem>>, vector<8x8x8xbf16>
    %71 = vector.shape_cast %70 : vector<8x8x8xbf16> to vector<64x8xbf16>
    %c7 = arith.constant 7 : index
    %c0_72 = arith.constant 0 : index
    %c0_73 = arith.constant 0 : index
    %72 = vector.load %arg6[%c7, %c0_72, %c0_73] : memref<9x8x4xbf16, #tpu.memory_space<vmem>>, vector<1x8x4xbf16>
    %73 = vector.shape_cast %72 : vector<1x8x4xbf16> to vector<8x4xbf16>
    %cst_74 = arith.constant dense<0.000000e+00> : vector<64x4xf32>
    %74 = tpu.matmul %71, %73, %cst_74 {dimension_numbers = #tpu.dot_dimension_numbers<[1], [0], [0], [1], [0, 0, 1, 1], [], []>} : vector<64x8xbf16>, vector<8x4xbf16>, vector<64x4xf32> -> vector<64x4xf32>
    %75 = arith.addf %69, %74 : vector<64x4xf32>
    %c2_75 = arith.constant 2 : index
    %c2_76 = arith.constant 2 : index
    %c0_77 = arith.constant 0 : index
    %76 = vector.load %arg9[%c2_75, %c2_76, %c0_77] : memref<10x10x8xbf16, #tpu.memory_space<vmem>>, vector<8x8x8xbf16>
    %77 = vector.shape_cast %76 : vector<8x8x8xbf16> to vector<64x8xbf16>
    %c8 = arith.constant 8 : index
    %c0_78 = arith.constant 0 : index
    %c0_79 = arith.constant 0 : index
    %78 = vector.load %arg6[%c8, %c0_78, %c0_79] : memref<9x8x4xbf16, #tpu.memory_space<vmem>>, vector<1x8x4xbf16>
    %79 = vector.shape_cast %78 : vector<1x8x4xbf16> to vector<8x4xbf16>
    %cst_80 = arith.constant dense<0.000000e+00> : vector<64x4xf32>
    %80 = tpu.matmul %77, %79, %cst_80 {dimension_numbers = #tpu.dot_dimension_numbers<[1], [0], [0], [1], [0, 0, 1, 1], [], []>} : vector<64x8xbf16>, vector<8x4xbf16>, vector<64x4xf32> -> vector<64x4xf32>
    %81 = arith.addf %75, %80 : vector<64x4xf32>
    %82 = vector.shape_cast %81 : vector<64x4xf32> to vector<8x8x4xf32>
    %c0_81 = arith.constant 0 : index
    %c0_82 = arith.constant 0 : index
    %c0_83 = arith.constant 0 : index
    %c0_84 = arith.constant 0 : index
    %83 = vector.load %arg8[%c0_81, %c0_82, %c0_83, %c0_84] : memref<1x8x8x4xf32, #tpu.memory_space<vmem>>, vector<1x8x8x4xf32>
    %84 = vector.shape_cast %83 : vector<1x8x8x4xf32> to vector<8x8x4xf32>
    %85 = vector.shape_cast %82 : vector<8x8x4xf32> to vector<1x8x8x4xf32>
    tpu.vector_store %arg8[%c0_81, %c0_82, %c0_83, %c0_84], %85 {strides = array<i32>} : memref<1x8x8x4xf32, #tpu.memory_space<vmem>>, vector<1x8x8x4xf32>,
    return
  }
  func.func @transform_0(%arg0: i32) -> (i32, i32, i32, i32) {
    %c0_i32 = arith.constant 0 : i32
    %c0_i32_0 = arith.constant 0 : i32
    %c0_i32_1 = arith.constant 0 : i32
    %c0_i32_2 = arith.constant 0 : i32
    return %arg0, %c0_i32, %c0_i32_0, %c0_i32_1 : i32, i32, i32, i32
  }
  func.func @transform_1(%arg0: i32) -> (i32, i32, i32, i32) {
    %c0_i32 = arith.constant 0 : i32
    %c0_i32_0 = arith.constant 0 : i32
    %c0_i32_1 = arith.constant 0 : i32
    %c0_i32_2 = arith.constant 0 : i32
    return %arg0, %c0_i32, %c0_i32_0, %c0_i32_1 : i32, i32, i32, i32
  }
  func.func @transform_2(%arg0: i32) -> (i32, i32) {
    %c0_i32 = arith.constant 0 : i32
    %c0_i32_0 = arith.constant 0 : i32
    %c0_i32_1 = arith.constant 0 : i32
    return %c0_i32, %c0_i32_0 : i32, i32
  }
  func.func @transform_3(%arg0: i32) -> (i32, i32) {
    %c0_i32 = arith.constant 0 : i32
    %c0_i32_0 = arith.constant 0 : i32
    %c0_i32_1 = arith.constant 0 : i32
    return %c0_i32, %c0_i32_0 : i32, i32
  }
  func.func @transform_4(%arg0: i32) -> (i32, i32) {
    %c0_i32 = arith.constant 0 : i32
    %c0_i32_0 = arith.constant 0 : i32
    %c0_i32_1 = arith.constant 0 : i32
    return %c0_i32, %c0_i32_0 : i32, i32
  }
  func.func @transform_5(%arg0: i32) -> (i32, i32, i32) {
    %c0_i32 = arith.constant 0 : i32
    %c0_i32_0 = arith.constant 0 : i32
    %c0_i32_1 = arith.constant 0 : i32
    %c0_i32_2 = arith.constant 0 : i32
    return %c0_i32, %c0_i32_0, %c0_i32_1 : i32, i32, i32
  }
  func.func @transform_6(%arg0: i32) -> (i32, i32) {
    %c0_i32 = arith.constant 0 : i32
    %c0_i32_0 = arith.constant 0 : i32
    %c0_i32_1 = arith.constant 0 : i32
    return %c0_i32, %c0_i32_0 : i32, i32
  }
  func.func @transform_7(%arg0: i32) -> (i32, i32, i32, i32) {
    %c0_i32 = arith.constant 0 : i32
    %c0_i32_0 = arith.constant 0 : i32
    %c0_i32_1 = arith.constant 0 : i32
    %c0_i32_2 = arith.constant 0 : i32
    return %arg0, %c0_i32, %c0_i32_0, %c0_i32_1 : i32, i32, i32, i32
  }
}

</mosaic_0001>

<bundles_post_ra>
// kernel: sa_conv_forward.7
= control target key start
LH: loop header
LB: loop body
LE: loop exit
PB: predicated region body
PF: predicated region fallthrough
CT: control target
= control target key end

     0   :  { %s2686_s12 = smov 0   ;;  %s3410_s0 = inlined_call_operand.vmem [shape: bf16[64,10,16], index: 0, kind: input, shape index: {}]   ;;  %s3411_s1 = inlined_call_operand.vmem [shape: bf16[3,16,4], index: 1, kind: input, shape index: {}]   ;;  %s3412_s2 = inlined_call_operand.vmem [shape: bf16[4,8], index: 2, kind: input, shape index: {}]   ;;  %s3413_s3 = inlined_call_operand.vmem [shape: bf16[64,8,8], index: 3, kind: output, shape index: {}]  }
   0x1 LB: > { %s2262_s13 = sadd.s32 4294967295, %s2664_s12   ;;  %p2266_p0 = scmp.ge.s32.totalorder %s2664_s12, 1  ;;  %s2664_s12 = sphi %s2686_s12, %s13_s12  }
   0x2   : > { %p139_p1 = scmp.lt.s32.totalorder %s2664_s12, 3 }
   0x4   : > { %p140_p2 = pnand %p2266_p0, %p139_p1 }
   0x6   : > { %143 = sbr.rel (%p140_p2) target bundleno = 583 (0x247), region = 32 }
   0xb   : > { %v2639_v0 = vld [vmem:[%s3411_s1 + $0x8] sm:$0xff]   ;;  %s2267_s16 = sshll.u32 %s2262_s13, 5  ;;  %v2640_v1 = vld [vmem:[%s3411_s1] sm:$0xff]   ;;  %v2703_v2 = vld [vmem:[%s3411_s1 + $0x10] sm:$0xff]   ;;  %vm244_vm0 = vsmask.f32 3328 }
   0xc   : > { %p165_p3 = scmp.lt.s32.totalorder %s2267_s16, 63  ;;  %2494 = vmatprep.subr.bf16.mxu0 %v2639_v0  ;;  %2528 = vmatprep.subr.bf16.mxu1 %v2640_v1  ;;  %vm245_vm1 = vsmask.f32 7440  ;;  %vm752_vm2 = vcmask 130048   ;;  %vm1353_vm4 = vcmask 1042432   ;;  %vm1354_vm5 = vcmask 1046532  }
   0xd   : > { %2495 = vmatpush3.bf16.msra.mxu0 %v2639_v0  ;;  %2529 = vmatpush3.bf16.msra.mxu1 %v2640_v1  ;;  %vm2737_vm3 = vmor %vm244_vm0, %vm245_vm1  ;;  %vm1912_vm7 = vcmask 1041408   ;;  %vm1863_vm8 = vcmask 31744   ;;  %vm2173_vm9 = vcmask 60416  }
   0xe   : > { %s3425_s16 = smov (!%p165_p3, %s2267_s16), 63  ;;  %2562 = vmatprep.subr.bf16.mxu0 %v2703_v2  ;;  %vm2977_vm6 = vmor %vm1353_vm4, %vm1354_vm5 }
   0xf   : > { %s2425_s21 = sshll.u32 %s3425_s16, 3  ;;  %s2271_s27 = sshll.u32 %s3425_s16, 2 }
  0x10   : > { %s2712_s24 = scalar_lea.vmem %s3410_s0, %s2425_s21  ;;  %s3341_s30 = scalar_lea.vmem %s3413_s3, %s2271_s27 }
  0x11   : > { %v178_v3 = vld [vmem:[%s2712_s24] sm:$0xf]  ;;  %v179_v4 = vld [vmem:[%s2712_s24 + $0x8] sm:$0xf]  ;;  %v2717_v5 = vld [vmem:[%s2712_s24 + $0x4] sm:$0x1] }
  0x12   : > { %v2720_v6 = vld [vmem:[%s2712_s24 + $0xc] sm:$0x1]  ;;  %v248_v7 = vshrl.u32 %v178_v3, 16  ;;  %v251_v8 = vshll.u32 %v178_v3, 16  ;;  %v257_v9 = vshll.u32 %v2717_v5, 16  ;;  %v262_v10 = vshrl.u32 %v179_v4, 16 }
  0x13   : > { %v265_v11 = vshll.u32 %v179_v4, 16  ;;  %v271_v12 = vshll.u32 %v2720_v6, 16  ;;  %v1358_v13 = vrot.slane %v2717_v5, 5  ;;  %v1362_v14 = vrot.slane %v2720_v6, 5  ;;  %v180_v15 = vld [vmem:[%s2712_s24 + $0x10] sm:$0xf] }
  0x14   : > { %v250_v16 = vrot.slane %v248_v7, 4  ;;  %v253_v17 = vrot.slane %v251_v8, 5  ;;  %v259_v18 = vrot.slane %v257_v9, 5  ;;  %v264_v19 = vrot.slane %v262_v10, 4  ;;  %v181_v20 = vld [vmem:[%s2712_s24 + $0x18] sm:$0xf] }
  0x15   : > { %v267_v21 = vrot.slane %v265_v11, 5  ;;  %v273_v22 = vrot.slane %v271_v12, 5  ;;  %v2307_v23 = vcombine.low %v178_v3, %v179_v4  ;;  %v2729_v24 = vld [vmem:[%s2712_s24 + $0x14] sm:$0x1]  ;;  %v2732_v25 = vld [vmem:[%s2712_s24 + $0x1c] sm:$0x1]  ;;  %v2308_v26 = vcombine.low %v180_v15, %v181_v20 }
  0x16   : > { %v254_v27 = vor.u32 %v253_v17, %v250_v16  ;;  %v276_v28 = vshrl.u32 %v180_v15, 16  ;;  %v279_v29 = vshll.u32 %v180_v15, 16  ;;  %v285_v30 = vshll.u32 %v2729_v24, 16  ;;  %v182_v36 = vld [vmem:[%s2712_s24 + $0x20] sm:$0xf] }
  0x17   : > { %v268_v32 = vor.u32 %v267_v21, %v264_v19  ;;  %2530 = vmatprep.mubr.msk.bf16.mxu1 %vm752_vm2, %v2307_v23  ;;  %v290_v33 = vshrl.u32 %v181_v20, 16  ;;  %v293_v34 = vshll.u32 %v181_v20, 16  ;;  %v299_v35 = vshll.u32 %v2732_v25, 16  ;;  %v183_v41 = vld [vmem:[%s2712_s24 + $0x28] sm:$0xf] }
  0x18   : > { %v255_v37 = vrot.slane %v254_v27, 4  ;;  %v278_v38 = vrot.slane %v276_v28, 4  ;;  %v281_v39 = vrot.slane %v279_v29, 5  ;;  %v287_v40 = vrot.slane %v285_v30, 5  ;;  %2531 = vmatmul.mubr.msk.bf16.vlgmr.msra.gmra.mxu1 %vm752_vm2, %v2308_v26  ;;  %v2747_v46 = vld [vmem:[%s2712_s24 + $0x24] sm:$0x1] }
  0x19   : > { %v269_v42 = vrot.slane %v268_v32, 4  ;;  %v292_v43 = vrot.slane %v290_v33, 4  ;;  %v295_v44 = vrot.slane %v293_v34, 5  ;;  %v301_v45 = vrot.slane %v299_v35, 5  ;;  %v2756_v53 = vld [vmem:[%s2712_s24 + $0x2c] sm:$0x1] }
  0x1a   : > { %v260_v47 = vsel %vm2737_vm3, %v255_v37, %v259_v18  ;;  %v282_v48 = vor.u32 %v281_v39, %v278_v38  ;;  %v1366_v49 = vrot.slane %v2729_v24, 5  ;;  %v1370_v50 = vrot.slane %v2732_v25, 5  ;;  %v184_v60 = vld [vmem:[%s2712_s24 + $0x30] sm:$0xf]  ;;  %v185_v1 = vld [vmem:[%s2712_s24 + $0x38] sm:$0xf] }
  0x1b   : > { %v274_v51 = vsel %vm2737_vm3, %v269_v42, %v273_v22  ;;  %v296_v52 = vor.u32 %v295_v44, %v292_v43  ;;  %v304_v54 = vshrl.u32 %v182_v36, 16  ;;  %v307_v55 = vshll.u32 %v182_v36, 16  ;;  %v2766_v9 = vld [vmem:[%s2712_s24 + $0x34] sm:$0x1]  ;;  %v2771_v16 = vld [vmem:[%s2712_s24 + $0x3c] sm:$0x1] }
  0x1c   : > { %v2274_v56 = vcombine.low %v260_v47, %v274_v51  ;;  %v283_v57 = vrot.slane %v282_v48, 4  ;;  %v313_v58 = vshll.u32 %v2747_v46, 16  ;;  %v318_v59 = vshrl.u32 %v183_v41, 16  ;;  %v186_v27 = vld [vmem:[%s2712_s24 + $0x40] sm:$0xf] }
  0x1d   : > { %v297_v61 = vrot.slane %v296_v52, 4  ;;  %v306_v62 = vrot.slane %v304_v54, 4  ;;  %v309_v63 = vrot.slane %v307_v55, 5  ;;  %v321_v0 = vshll.u32 %v183_v41, 16  ;;  %v2779_v33 = vld [vmem:[%s2712_s24 + $0x44] sm:$0x1] }
  0x1e   : > { %2496 = vmatprep.mubr.msk.bf16.mxu0 %vm752_vm2, %v2274_v56  ;;  %v288_v3 = vsel %vm2737_vm3, %v283_v57, %v287_v40  ;;  %v315_v4 = vrot.slane %v313_v58, 5  ;;  %v320_v7 = vrot.slane %v318_v59, 4  ;;  %v327_v8 = vshll.u32 %v2756_v53, 16  ;;  %v187_v38 = vld [vmem:[%s2712_s24 + $0x48] sm:$0xf] }
  0x1f   : > { %v302_v10 = vsel %vm2737_vm3, %v297_v61, %v301_v45  ;;  %v310_v11 = vor.u32 %v309_v63, %v306_v62  ;;  %v323_v12 = vrot.slane %v321_v0, 5  ;;  %v2309_v15 = vcombine.low %v182_v36, %v183_v41  ;;  %v2788_v44 = vld [vmem:[%s2712_s24 + $0x4c] sm:$0x1]  ;;  %v188_v55 = vld [vmem:[%s2712_s24 + $0x50] sm:$0xf] }
  0x20   : > { %v2275_v17 = vcombine.low %v288_v3, %v302_v10  ;;  %v329_v18 = vrot.slane %v327_v8, 5  ;;  %v332_v19 = vshrl.u32 %v184_v60, 16  ;;  %v335_v20 = vshll.u32 %v184_v60, 16 }
  0x21   : > { %v311_v21 = vrot.slane %v310_v11, 4  ;;  %v324_v22 = vor.u32 %v323_v12, %v320_v7  ;;  %2534 = vmatprep.mubr.msk.bf16.mxu1 %vm752_vm2, %v2309_v15  ;;  %v341_v23 = vshll.u32 %v2766_v9, 16  ;;  %v346_v26 = vshrl.u32 %v185_v1, 16  ;;  %v189_v7 = vld [vmem:[%s2712_s24 + $0x58] sm:$0xf] }
  0x22   : > { %2497 = vmatmul.mubr.msk.bf16.vlgmr.msra.gmra.mxu0 %vm752_vm2, %v2275_v17  ;;  %v334_v28 = vrot.slane %v332_v19, 4  ;;  %v337_v29 = vrot.slane %v335_v20, 5  ;;  %v349_v30 = vshll.u32 %v185_v1, 16  ;;  %v355_v32 = vshll.u32 %v2771_v16, 16  ;;  %v2804_v12 = vld [vmem:[%s2712_s24 + $0x5c] sm:$0x1] }
  0x23   : > { %2563 = vmatpush3.bf16.msra.mxu0 %v2703_v2  ;;  %v316_v34 = vsel %vm2737_vm3, %v311_v21, %v315_v4  ;;  %v325_v35 = vrot.slane %v324_v22, 4  ;;  %v343_v36 = vrot.slane %v341_v23, 5  ;;  %v348_v37 = vrot.slane %v346_v26, 4  ;;  %v190_v22 = vld [vmem:[%s2712_s24 + $0x60] sm:$0xf] }
  0x24   : > { %v338_v39 = vor.u32 %v337_v29, %v334_v28  ;;  %v351_v40 = vrot.slane %v349_v30, 5  ;;  %v357_v41 = vrot.slane %v355_v32, 5  ;;  %v2310_v42 = vcombine.low %v184_v60, %v185_v1  ;;  %v2794_v60 = vld [vmem:[%s2712_s24 + $0x54] sm:$0x1]  ;;  %v2810_v29 = vld [vmem:[%s2712_s24 + $0x64] sm:$0x1] }
  0x25   : > { %v330_v43 = vsel %vm2737_vm3, %v325_v35, %v329_v18  ;;  %v360_v45 = vshrl.u32 %v186_v27, 16  ;;  %v363_v2 = vshll.u32 %v186_v27, 16  ;;  %v369_v47 = vshll.u32 %v2779_v33, 16 }
  0x26   : > { %v2276_v48 = vcombine.low %v316_v34, %v330_v43  ;;  %v339_v51 = vrot.slane %v338_v39, 4  ;;  %v352_v52 = vor.u32 %v351_v40, %v348_v37  ;;  %2535 = vmatmul.mubr.msk.bf16.gmra.mxu1 %vm752_vm2, %v2310_v42  ;;  %v374_v54 = vshrl.u32 %v187_v38, 16  ;;  %v191_v39 = vld [vmem:[%s2712_s24 + $0x68] sm:$0xf]  ;;  %v2821_v43 = vld [vmem:[%s2712_s24 + $0x6c] sm:$0x1] }
  0x27   : > { %v362_v56 = vrot.slane %v360_v45, 4  ;;  %v365_v57 = vrot.slane %v363_v2, 5  ;;  %v371_v58 = vrot.slane %v369_v47, 5  ;;  %v377_v59 = vshll.u32 %v187_v38, 16 }
  0x28   : > { %2500 = vmatprep.mubr.msk.bf16.mxu0 %vm752_vm2, %v2276_v48  ;;  %v344_v61 = vsel %vm2737_vm3, %v339_v51, %v343_v36  ;;  %v353_v62 = vrot.slane %v352_v52, 4  ;;  %v376_v63 = vrot.slane %v374_v54, 4  ;;  %v383_v0 = vshll.u32 %v2788_v44, 16  ;;  %v192_v54 = vld [vmem:[%s2712_s24 + $0x70] sm:$0xf] }
  0x29   : > { %v366_v1 = vor.u32 %v365_v57, %v362_v56  ;;  %v379_v3 = vrot.slane %v377_v59, 5  ;;  %v2311_v4 = vcombine.low %v186_v27, %v187_v38  ;;  %v388_v8 = vshrl.u32 %v188_v55, 16  ;;  %v2826_v59 = vld [vmem:[%s2712_s24 + $0x74] sm:$0x1] }
  0x2a   : > { %v358_v10 = vsel %vm2737_vm3, %v353_v62, %v357_v41  ;;  %v385_v11 = vrot.slane %v383_v0, 5  ;;  %v391_v15 = vshll.u32 %v188_v55, 16  ;;  %v397_v17 = vshll.u32 %v2794_v60, 16 }
  0x2b   : > { %v2277_v18 = vcombine.low %v344_v61, %v358_v10  ;;  %v367_v19 = vrot.slane %v366_v1, 4  ;;  %v380_v20 = vor.u32 %v379_v3, %v376_v63  ;;  %2538 = vmatprep.mubr.msk.bf16.mxu1 %vm752_vm2, %v2311_v4  ;;  %v390_v21 = vrot.slane %v388_v8, 4 }
  0x2c   : > { %v393_v23 = vrot.slane %v391_v15, 5  ;;  %v399_v26 = vrot.slane %v397_v17, 5  ;;  %v402_v27 = vshrl.u32 %v189_v7, 16  ;;  %v405_v28 = vshll.u32 %v189_v7, 16  ;;  %v2837_v15 = vld [vmem:[%s2712_s24 + $0x7c] sm:$0x1] }
  0x2d   : > { %2501 = vmatmul.mubr.msk.bf16.gmra.mxu0 %vm752_vm2, %v2277_v18  ;;  %v372_v30 = vsel %vm2737_vm3, %v367_v19, %v371_v58  ;;  %v381_v32 = vrot.slane %v380_v20, 4  ;;  %v411_v34 = vshll.u32 %v2804_v12, 16  ;;  %v2312_v35 = vcombine.low %v188_v55, %v189_v7  ;;  %v193_v7 = vld [vmem:[%s2712_s24 + $0x78] sm:$0xf] }
  0x2e   : > { %v394_v36 = vor.u32 %v393_v23, %v390_v21  ;;  %v404_v37 = vrot.slane %v402_v27, 4  ;;  %v407_v38 = vrot.slane %v405_v28, 5  ;;  %v416_v40 = vshrl.u32 %v190_v22, 16  ;;  %v194_v23 = vld [vmem:[%s2712_s24 + $0x80] sm:$0xf] }
  0x2f   : > { %v386_v41 = vsel %vm2737_vm3, %v381_v32, %v385_v11  ;;  %v413_v42 = vrot.slane %v411_v34, 5  ;;  %2539 = vmatmul.mubr.msk.bf16.gmra.mxu1 %vm752_vm2, %v2312_v35  ;;  %v419_v45 = vshll.u32 %v190_v22, 16  ;;  %v425_v2 = vshll.u32 %v2810_v29, 16  ;;  %v2842_v32 = vld [vmem:[%s2712_s24 + $0x84] sm:$0x1] }
  0x30   : > { %v2278_v47 = vcombine.low %v372_v30, %v386_v41  ;;  %v395_v48 = vrot.slane %v394_v36, 4  ;;  %v408_v51 = vor.u32 %v407_v38, %v404_v37  ;;  %v418_v52 = vrot.slane %v416_v40, 4  ;;  %v195_v41 = vld [vmem:[%s2712_s24 + $0x88] sm:$0xf] }
  0x31   : > { %v421_v55 = vrot.slane %v419_v45, 5  ;;  %v427_v56 = vrot.slane %v425_v2, 5  ;;  %v430_v57 = vshrl.u32 %v191_v39, 16  ;;  %v433_v58 = vshll.u32 %v191_v39, 16 }
  0x32   : > { %2504 = vmatprep.mubr.msk.bf16.mxu0 %vm752_vm2, %v2278_v47  ;;  %v400_v61 = vsel %vm2737_vm3, %v395_v48, %v399_v26  ;;  %v409_v62 = vrot.slane %v408_v51, 4  ;;  %v439_v63 = vshll.u32 %v2821_v43, 16  ;;  %v2313_v0 = vcombine.low %v190_v22, %v191_v39  ;;  %v2853_v47 = vld [vmem:[%s2712_s24 + $0x8c] sm:$0x1] }
  0x33   : > { %v422_v1 = vor.u32 %v421_v55, %v418_v52  ;;  %v432_v3 = vrot.slane %v430_v57, 4  ;;  %v435_v4 = vrot.slane %v433_v58, 5  ;;  %v444_v8 = vshrl.u32 %v192_v54, 16  ;;  %v196_v57 = vld [vmem:[%s2712_s24 + $0x90] sm:$0xf] }
  0x34   : > { %v414_v10 = vsel %vm2737_vm3, %v409_v62, %v413_v42  ;;  %v441_v11 = vrot.slane %v439_v63, 5  ;;  %2542 = vmatprep.mubr.msk.bf16.mxu1 %vm752_vm2, %v2313_v0  ;;  %v447_v17 = vshll.u32 %v192_v54, 16  ;;  %v453_v18 = vshll.u32 %v2826_v59, 16  ;;  %v2858_v0 = vld [vmem:[%s2712_s24 + $0x94] sm:$0x1] }
  0x35   : > { %v2279_v19 = vcombine.low %v400_v61, %v414_v10  ;;  %v423_v20 = vrot.slane %v422_v1, 4  ;;  %v436_v21 = vor.u32 %v435_v4, %v432_v3  ;;  %v446_v22 = vrot.slane %v444_v8, 4 }
  0x36   : > { %v449_v26 = vrot.slane %v447_v17, 5  ;;  %v455_v27 = vrot.slane %v453_v18, 5  ;;  %v458_v28 = vshrl.u32 %v193_v7, 16  ;;  %v461_v30 = vshll.u32 %v193_v7, 16  ;;  %v197_v17 = vld [vmem:[%s2712_s24 + $0x98] sm:$0xf] }
  0x37   : > { %2505 = vmatmul.mubr.msk.bf16.gmra.mxu0 %vm752_vm2, %v2279_v19  ;;  %v428_v34 = vsel %vm2737_vm3, %v423_v20, %v427_v56  ;;  %v437_v35 = vrot.slane %v436_v21, 4  ;;  %v467_v36 = vshll.u32 %v2837_v15, 16  ;;  %v2314_v37 = vcombine.low %v192_v54, %v193_v7  ;;  %v2869_v21 = vld [vmem:[%s2712_s24 + $0x9c] sm:$0x1] }
  0x38   : > { %v450_v38 = vor.u32 %v449_v26, %v446_v22  ;;  %v460_v39 = vrot.slane %v458_v28, 4  ;;  %v463_v40 = vrot.slane %v461_v30, 5  ;;  %v472_v42 = vshrl.u32 %v194_v23, 16 }
  0x39   : > { %v442_v45 = vsel %vm2737_vm3, %v437_v35, %v441_v11  ;;  %v469_v2 = vrot.slane %v467_v36, 5  ;;  %2543 = vmatmul.mubr.msk.bf16.gmra.mxu1 %vm752_vm2, %v2314_v37  ;;  %v475_v48 = vshll.u32 %v194_v23, 16  ;;  %v481_v51 = vshll.u32 %v2842_v32, 16 }
  0x3a   : > { %v2280_v52 = vcombine.low %v428_v34, %v442_v45  ;;  %v451_v54 = vrot.slane %v450_v38, 4  ;;  %v464_v55 = vor.u32 %v463_v40, %v460_v39  ;;  %v474_v56 = vrot.slane %v472_v42, 4  ;;  %v198_v34 = vld [vmem:[%s2712_s24 + $0xa0] sm:$0xf]  ;;  %v2874_v39 = vld [vmem:[%s2712_s24 + $0xa4] sm:$0x1] }
  0x3b   : > { %v477_v58 = vrot.slane %v475_v48, 5  ;;  %v483_v61 = vrot.slane %v481_v51, 5  ;;  %v486_v62 = vshrl.u32 %v195_v41, 16  ;;  %v489_v63 = vshll.u32 %v195_v41, 16 }
  0x3c   : > { %2508 = vmatprep.mubr.msk.bf16.mxu0 %vm752_vm2, %v2280_v52  ;;  %v456_v1 = vsel %vm2737_vm3, %v451_v54, %v455_v27  ;;  %v465_v3 = vrot.slane %v464_v55, 4  ;;  %v495_v4 = vshll.u32 %v2853_v47, 16  ;;  %v2315_v7 = vcombine.low %v194_v23, %v195_v41  ;;  %v199_v52 = vld [vmem:[%s2712_s24 + $0xa8] sm:$0xf] }
  0x3d   : > { %v478_v8 = vor.u32 %v477_v58, %v474_v56  ;;  %v488_v10 = vrot.slane %v486_v62, 4  ;;  %v491_v11 = vrot.slane %v489_v63, 5  ;;  %v500_v18 = vshrl.u32 %v196_v57, 16  ;;  %v2885_v58 = vld [vmem:[%s2712_s24 + $0xac] sm:$0x1] }
  0x3e   : > { %v470_v19 = vsel %vm2737_vm3, %v465_v3, %v469_v2  ;;  %v497_v20 = vrot.slane %v495_v4, 5  ;;  %2546 = vmatprep.mubr.msk.bf16.mxu1 %vm752_vm2, %v2315_v7  ;;  %v503_v22 = vshll.u32 %v196_v57, 16  ;;  %v509_v26 = vshll.u32 %v2858_v0, 16  ;;  %v200_v4 = vld [vmem:[%s2712_s24 + $0xb0] sm:$0xf] }
  0x3f   : > { %v2281_v27 = vcombine.low %v456_v1, %v470_v19  ;;  %v479_v23 = vrot.slane %v478_v8, 4  ;;  %v492_v28 = vor.u32 %v491_v11, %v488_v10  ;;  %v502_v30 = vrot.slane %v500_v18, 4 }
  0x40   : > { %v505_v35 = vrot.slane %v503_v22, 5  ;;  %v511_v36 = vrot.slane %v509_v26, 5  ;;  %v514_v37 = vshrl.u32 %v197_v17, 16  ;;  %v517_v38 = vshll.u32 %v197_v17, 16 }
  0x41   : > { %2509 = vmatmul.mubr.msk.bf16.gmra.mxu0 %vm752_vm2, %v2281_v27  ;;  %v484_v40 = vsel %vm2737_vm3, %v479_v23, %v483_v61  ;;  %v493_v41 = vrot.slane %v492_v28, 4  ;;  %v523_v42 = vshll.u32 %v2869_v21, 16  ;;  %v2316_v45 = vcombine.low %v196_v57, %v197_v17  ;;  %v2890_v17 = vld [vmem:[%s2712_s24 + $0xb4] sm:$0x1]  ;;  %v201_v28 = vld [vmem:[%s2712_s24 + $0xb8] sm:$0xf] }
  0x42   : > { %v506_v2 = vor.u32 %v505_v35, %v502_v30  ;;  %v516_v48 = vrot.slane %v514_v37, 4  ;;  %v519_v51 = vrot.slane %v517_v38, 5  ;;  %v528_v54 = vshrl.u32 %v198_v34, 16  ;;  %v2901_v38 = vld [vmem:[%s2712_s24 + $0xbc] sm:$0x1] }
  0x43   : > { %v498_v55 = vsel %vm2737_vm3, %v493_v41, %v497_v20  ;;  %v525_v56 = vrot.slane %v523_v42, 5  ;;  %2547 = vmatmul.mubr.msk.bf16.gmra.mxu1 %vm752_vm2, %v2316_v45  ;;  %v531_v61 = vshll.u32 %v198_v34, 16  ;;  %v537_v62 = vshll.u32 %v2874_v39, 16 }
  0x44   : > { %v2282_v63 = vcombine.low %v484_v40, %v498_v55  ;;  %v507_v57 = vrot.slane %v506_v2, 4  ;;  %v520_v1 = vor.u32 %v519_v51, %v516_v48  ;;  %v530_v3 = vrot.slane %v528_v54, 4  ;;  %v202_v2 = vld [vmem:[%s2712_s24 + $0xc0] sm:$0xf]  ;;  %v2906_v55 = vld [vmem:[%s2712_s24 + $0xc4] sm:$0x1] }
  0x45   : > { %v533_v7 = vrot.slane %v531_v61, 5  ;;  %v539_v8 = vrot.slane %v537_v62, 5  ;;  %v542_v10 = vshrl.u32 %v199_v52, 16  ;;  %v545_v11 = vshll.u32 %v199_v52, 16 }
  0x46   : > { %2512 = vmatprep.mubr.msk.bf16.mxu0 %vm752_vm2, %v2282_v63  ;;  %v512_v18 = vsel %vm2737_vm3, %v507_v57, %v511_v36  ;;  %v521_v19 = vrot.slane %v520_v1, 4  ;;  %v551_v20 = vshll.u32 %v2885_v58, 16  ;;  %v2317_v22 = vcombine.low %v198_v34, %v199_v52 }
  0x47   : > { %v534_v26 = vor.u32 %v533_v7, %v530_v3  ;;  %v544_v27 = vrot.slane %v542_v10, 4  ;;  %v547_v23 = vrot.slane %v545_v11, 5  ;;  %v556_v30 = vshrl.u32 %v200_v4, 16  ;;  %v203_v7 = vld [vmem:[%s2712_s24 + $0xc8] sm:$0xf] }
  0x48   : > { %v526_v35 = vsel %vm2737_vm3, %v521_v19, %v525_v56  ;;  %v553_v37 = vrot.slane %v551_v20, 5  ;;  %2550 = vmatprep.mubr.msk.bf16.mxu1 %vm752_vm2, %v2317_v22  ;;  %v559_v36 = vshll.u32 %v200_v4, 16  ;;  %v565_v40 = vshll.u32 %v2890_v17, 16  ;;  %v2917_v19 = vld [vmem:[%s2712_s24 + $0xcc] sm:$0x1] }
  0x49   : > { %v2283_v41 = vcombine.low %v512_v18, %v526_v35  ;;  %v535_v34 = vrot.slane %v534_v26, 4  ;;  %v548_v42 = vor.u32 %v547_v23, %v544_v27  ;;  %v558_v45 = vrot.slane %v556_v30, 4  ;;  %v204_v23 = vld [vmem:[%s2712_s24 + $0xd0] sm:$0xf] }
  0x4a   : > { %v561_v48 = vrot.slane %v559_v36, 5  ;;  %v567_v51 = vrot.slane %v565_v40, 5  ;;  %v570_v52 = vshrl.u32 %v201_v28, 16  ;;  %v573_v54 = vshll.u32 %v201_v28, 16 }
  0x4b   : > { %2513 = vmatmul.mubr.msk.bf16.gmra.mxu0 %vm752_vm2, %v2283_v41  ;;  %v540_v56 = vsel %vm2737_vm3, %v535_v34, %v539_v8  ;;  %v549_v61 = vrot.slane %v548_v42, 4  ;;  %v579_v62 = vshll.u32 %v2901_v38, 16  ;;  %v2318_v63 = vcombine.low %v200_v4, %v201_v28 }
  0x4c   : > { %v562_v57 = vor.u32 %v561_v48, %v558_v45  ;;  %v572_v1 = vrot.slane %v570_v52, 4  ;;  %v575_v3 = vrot.slane %v573_v54, 5  ;;  %v584_v10 = vshrl.u32 %v202_v2, 16  ;;  %v205_v54 = vld [vmem:[%s2712_s24 + $0xd8] sm:$0xf] }
  0x4d   : > { %v554_v11 = vsel %vm2737_vm3, %v549_v61, %v553_v37  ;;  %v581_v18 = vrot.slane %v579_v62, 5  ;;  %2551 = vmatmul.mubr.msk.bf16.gmra.mxu1 %vm752_vm2, %v2318_v63  ;;  %v587_v8 = vshll.u32 %v202_v2, 16  ;;  %v593_v20 = vshll.u32 %v2906_v55, 16  ;;  %v2922_v37 = vld [vmem:[%s2712_s24 + $0xd4] sm:$0x1] }
  0x4e   : > { %v2284_v22 = vcombine.low %v540_v56, %v554_v11  ;;  %v563_v4 = vrot.slane %v562_v57, 4  ;;  %v576_v26 = vor.u32 %v575_v3, %v572_v1  ;;  %v586_v27 = vrot.slane %v584_v10, 4  ;;  %v2933_v63 = vld [vmem:[%s2712_s24 + $0xdc] sm:$0x1]  ;;  %v206_v10 = vld [vmem:[%s2712_s24 + $0xe0] sm:$0xf] }
  0x4f   : > { %v589_v28 = vrot.slane %v587_v8, 5  ;;  %v595_v30 = vrot.slane %v593_v20, 5  ;;  %v598_v35 = vshrl.u32 %v203_v7, 16  ;;  %v601_v36 = vshll.u32 %v203_v7, 16 }
  0x50   : > { %2516 = vmatprep.mubr.msk.bf16.mxu0 %vm752_vm2, %v2284_v22  ;;  %v568_v40 = vsel %vm2737_vm3, %v563_v4, %v567_v51  ;;  %v577_v41 = vrot.slane %v576_v26, 4  ;;  %v607_v34 = vshll.u32 %v2917_v19, 16  ;;  %v2319_v42 = vcombine.low %v202_v2, %v203_v7  ;;  %v2938_v4 = vld [vmem:[%s2712_s24 + $0xe4] sm:$0x1] }
  0x51   : > { %v590_v45 = vor.u32 %v589_v28, %v586_v27  ;;  %v600_v48 = vrot.slane %v598_v35, 4  ;;  %v603_v52 = vrot.slane %v601_v36, 5  ;;  %v612_v56 = vshrl.u32 %v204_v23, 16 }
  0x52   : > { %v582_v61 = vsel %vm2737_vm3, %v577_v41, %v581_v18  ;;  %v609_v62 = vrot.slane %v607_v34, 5  ;;  %2554 = vmatprep.mubr.msk.bf16.mxu1 %vm752_vm2, %v2319_v42  ;;  %v615_v51 = vshll.u32 %v204_v23, 16  ;;  %v621_v57 = vshll.u32 %v2922_v37, 16  ;;  %v207_v41 = vld [vmem:[%s2712_s24 + $0xe8] sm:$0xf] }
  0x53   : > { %v2285_v1 = vcombine.low %v568_v40, %v582_v61  ;;  %v591_v2 = vrot.slane %v590_v45, 4  ;;  %v604_v3 = vor.u32 %v603_v52, %v600_v48  ;;  %v614_v7 = vrot.slane %v612_v56, 4  ;;  %v2949_v48 = vld [vmem:[%s2712_s24 + $0xec] sm:$0x1] }
  0x54   : > { %v617_v11 = vrot.slane %v615_v51, 5  ;;  %v623_v8 = vrot.slane %v621_v57, 5  ;;  %v626_v20 = vshrl.u32 %v205_v54, 16  ;;  %v629_v22 = vshll.u32 %v205_v54, 16  ;;  %v208_v51 = vld [vmem:[%s2712_s24 + $0xf0] sm:$0xf] }
  0x55   : > { %2517 = vmatmul.mubr.msk.bf16.gmra.mxu0 %vm752_vm2, %v2285_v1  ;;  %v596_v18 = vsel %vm2737_vm3, %v591_v2, %v595_v30  ;;  %v605_v26 = vrot.slane %v604_v3, 4  ;;  %v635_v27 = vshll.u32 %v2933_v63, 16  ;;  %v2320_v28 = vcombine.low %v204_v23, %v205_v54 }
  0x56   : > { %v618_v35 = vor.u32 %v617_v11, %v614_v7  ;;  %v628_v36 = vrot.slane %v626_v20, 4  ;;  %v631_v40 = vrot.slane %v629_v22, 5  ;;  %v640_v34 = vshrl.u32 %v206_v10, 16 }
  0x57   : > { %v610_v42 = vsel %vm2737_vm3, %v605_v26, %v609_v62  ;;  %v637_v45 = vrot.slane %v635_v27, 5  ;;  %2555 = vmatmul.mubr.msk.bf16.gmra.mxu1 %vm752_vm2, %v2320_v28  ;;  %v643_v30 = vshll.u32 %v206_v10, 16  ;;  %v649_v52 = vshll.u32 %v2938_v4, 16  ;;  %v2954_v62 = vld [vmem:[%s2712_s24 + $0xf4] sm:$0x1] }
  0x58   : > { %v2286_v56 = vcombine.low %v596_v18, %v610_v42  ;;  %v619_v23 = vrot.slane %v618_v35, 4  ;;  %v632_v54 = vor.u32 %v631_v40, %v628_v36  ;;  %v642_v61 = vrot.slane %v640_v34, 4  ;;  %v209_v28 = vld [vmem:[%s2712_s24 + $0xf8] sm:$0xf]  ;;  %v2965_v34 = vld [vmem:[%s2712_s24 + $0xfc] sm:$0x1] }
  0x59   : > { %v645_v57 = vrot.slane %v643_v30, 5  ;;  %v651_v1 = vrot.slane %v649_v52, 5  ;;  %v654_v2 = vshrl.u32 %v207_v41, 16  ;;  %v657_v3 = vshll.u32 %v207_v41, 16 }
  0x5a   : > { %2520 = vmatprep.mubr.msk.bf16.mxu0 %vm752_vm2, %v2286_v56  ;;  %v624_v7 = vsel %vm2737_vm3, %v619_v23, %v623_v8  ;;  %v633_v11 = vrot.slane %v632_v54, 4  ;;  %v663_v20 = vshll.u32 %v2949_v48, 16  ;;  %v2321_v22 = vcombine.low %v206_v10, %v207_v41  ;;  %v1257_v56 = vld [vmem:[%s2712_s24] sm:$0xe]  ;;  %v1258_v23 = vld [vmem:[%s2712_s24 + $0x8] sm:$0xe] }
  0x5b   : > { %v646_v18 = vor.u32 %v645_v57, %v642_v61  ;;  %v656_v26 = vrot.slane %v654_v2, 4  ;;  %v659_v27 = vrot.slane %v657_v3, 5  ;;  %v668_v35 = vshrl.u32 %v208_v51, 16  ;;  %v1259_v2 = vld [vmem:[%s2712_s24 + $0x10] sm:$0xe] }
  0x5c   : > { %v638_v36 = vsel %vm2737_vm3, %v633_v11, %v637_v45  ;;  %v665_v40 = vrot.slane %v663_v20, 5  ;;  %2558 = vmatprep.mubr.msk.bf16.mxu1 %vm752_vm2, %v2321_v22  ;;  %v671_v8 = vshll.u32 %v208_v51, 16  ;;  %v677_v42 = vshll.u32 %v2954_v62, 16 }
  0x5d   : > { %v2287_v10 = vcombine.low %v624_v7, %v638_v36  ;;  %v647_v41 = vrot.slane %v646_v18, 4  ;;  %v660_v30 = vor.u32 %v659_v27, %v656_v26  ;;  %v670_v52 = vrot.slane %v668_v35, 4  ;;  %v1260_v18 = vld [vmem:[%s2712_s24 + $0x18] sm:$0xe] }
  0x5e   : > { %v673_v54 = vrot.slane %v671_v8, 5  ;;  %v679_v61 = vrot.slane %v677_v42, 5  ;;  %v682_v45 = vshrl.u32 %v209_v28, 16  ;;  %v685_v57 = vshll.u32 %v209_v28, 16  ;;  %v1261_v8 = vld [vmem:[%s2712_s24 + $0x20] sm:$0xe] }
  0x5f   : > { %2521 = vmatmul.mubr.msk.bf16.gmra.mxu0 %vm752_vm2, %v2287_v10  ;;  %v652_v3 = vsel %vm2737_vm3, %v647_v41, %v651_v1  ;;  %v661_v11 = vrot.slane %v660_v30, 4  ;;  %v691_v7 = vshll.u32 %v2965_v34, 16  ;;  %v2322_v20 = vcombine.low %v208_v51, %v209_v28 }
  0x60   : > { %v674_v26 = vor.u32 %v673_v54, %v670_v52  ;;  %v684_v27 = vrot.slane %v682_v45, 4  ;;  %v687_v35 = vrot.slane %v685_v57, 5  ;;  %v2340_v36 = vrot.slane %v1257_v56, 9  ;;  %v1262_v54 = vld [vmem:[%s2712_s24 + $0x28] sm:$0xe] }
  0x61   : > { %v666_v1 = vsel %vm2737_vm3, %v661_v11, %v665_v40  ;;  %v693_v42 = vrot.slane %v691_v7, 5  ;;  %2559 = vmatmul.mubr.msk.bf16.gmra.mxu1 %vm752_vm2, %v2322_v20  ;;  %v2341_v51 = vrot.slane %v1258_v23, 9  ;;  %v2342_v28 = vrot.slane %v1259_v2, 9  ;;  %v1263_v56 = vld [vmem:[%s2712_s24 + $0x30] sm:$0xe] }
  0x62   : > { %v2288_v10 = vcombine.low %v652_v3, %v666_v1  ;;  %v675_v41 = vrot.slane %v674_v26, 4  ;;  %v688_v30 = vor.u32 %v687_v35, %v684_v27  ;;  %v1359_v52 = vsel %vm2977_vm6, %v2340_v36, %v1358_v13  ;;  %v1265_v7 = vld [vmem:[%s2712_s24 + $0x40] sm:$0xe]  ;;  %v1268_v35 = vld [vmem:[%s2712_s24 + $0x58] sm:$0xe] }
  0x63   : > { %v1363_v40 = vsel %vm2977_vm6, %v2341_v51, %v1362_v14  ;;  %v3000_v23 = vsel %vm2977_vm6, %v2342_v28, %v1366_v49  ;;  %v2343_v45 = vrot.slane %v1260_v18, 9  ;;  %v2344_v57 = vrot.slane %v1261_v8, 9  ;;  %v1264_v14 = vld [vmem:[%s2712_s24 + $0x38] sm:$0xe]  ;;  %v1267_v18 = vld [vmem:[%s2712_s24 + $0x50] sm:$0xe] }
  0x64   : > { %2524 = vmatprep.mubr.msk.bf16.mxu0 %vm752_vm2, %v2288_v10  ;;  %v680_v5 = vsel %vm2737_vm3, %v675_v41, %v679_v61  ;;  %v689_v13 = vrot.slane %v688_v30, 4  ;;  %v2374_v6 = vcombine.low %v1359_v52, %v1363_v40  ;;  %v1374_v2 = vrot.slane %v2747_v46, 5  ;;  %v1270_v41 = vld [vmem:[%s2712_s24 + $0x68] sm:$0xe] }
  0x65   : > { %v3011_v24 = vsel %vm2977_vm6, %v2343_v45, %v1370_v50  ;;  %v2345_v49 = vrot.slane %v1262_v54, 9  ;;  %v1378_v3 = vrot.slane %v2756_v53, 5  ;;  %v2346_v11 = vrot.slane %v1263_v56, 9  ;;  %v1266_v50 = vld [vmem:[%s2712_s24 + $0x48] sm:$0xe] }
  0x66   : > { %v694_v61 = vsel %vm2737_vm3, %v689_v13, %v693_v42  ;;  %v2375_v46 = vcombine.low %v3000_v23, %v3011_v24  ;;  %v3021_v25 = vsel %vm2977_vm6, %v2344_v57, %v1374_v2  ;;  %v1382_v20 = vrot.slane %v2766_v9, 5  ;;  %v1269_v42 = vld [vmem:[%s2712_s24 + $0x60] sm:$0xe]  ;;  %v1271_v56 = vld [vmem:[%s2712_s24 + $0x70] sm:$0xe] }
  0x67   : > { %v2289_v26 = vcombine.low %v680_v5, %v694_v61  ;;  %v1379_v53 = vsel %vm2977_vm6, %v2345_v49, %v1378_v3  ;;  %v2347_v27 = vrot.slane %v1264_v14, 9  ;;  %v1386_v31 = vrot.slane %v2771_v16, 5  ;;  %v1272_v57 = vld [vmem:[%s2712_s24 + $0x78] sm:$0xe]  ;;  %v1273_v2 = vld [vmem:[%s2712_s24 + $0x80] sm:$0xe] }
  0x68   : > { %v2376_v36 = vcombine.low %v3021_v25, %v1379_v53  ;;  %v3033_v8 = vsel %vm2977_vm6, %v2346_v11, %v1382_v20  ;;  %v2348_v1 = vrot.slane %v1265_v7, 9  ;;  %v1390_v9 = vrot.slane %v2779_v33, 5  ;;  %v1274_v49 = vld [vmem:[%s2712_s24 + $0x88] sm:$0xe]  ;;  %v1275_v3 = vld [vmem:[%s2712_s24 + $0x90] sm:$0xe] }
  0x69   : > { %2525 = vmatmul.mubr.msk.bf16.gmra.mxu0 %vm752_vm2, %v2289_v26  ;;  %v3040_v51 = vsel %vm2977_vm6, %v2347_v27, %v1386_v31  ;;  %v2349_v16 = vrot.slane %v1266_v50, 9  ;;  %v1394_v28 = vrot.slane %v2788_v44, 5  ;;  %v2350_v10 = vrot.slane %v1267_v18, 9  ;;  %v1276_v25 = vld [vmem:[%s2712_s24 + $0x98] sm:$0xe] }
  0x6a   : > { %2564 = vmatprep.mubr.msk.bf16.mxu0 %vm752_vm2, %v2374_v6  ;;  %v2377_v30 = vcombine.low %v3033_v8, %v3040_v51  ;;  %v3049_v33 = vsel %vm2977_vm6, %v2348_v1, %v1390_v9  ;;  %v1398_v52 = vrot.slane %v2794_v60, 5  ;;  %v2351_v54 = vrot.slane %v1268_v35, 9  ;;  %v1277_v26 = vld [vmem:[%s2712_s24 + $0xa0] sm:$0xe]  ;;  %v1278_v35 = vld [vmem:[%s2712_s24 + $0xa8] sm:$0xe] }
  0x6b   : > { %v3055_v44 = vsel %vm2977_vm6, %v2349_v16, %v1394_v28  ;;  %v1402_v40 = vrot.slane %v2804_v12, 5  ;;  %v2352_v23 = vrot.slane %v1269_v42, 9  ;;  %v1406_v45 = vrot.slane %v2810_v29, 5  ;;  %v1279_v16 = vld [vmem:[%s2712_s24 + $0xb0] sm:$0xe] }
  0x6c   : > { %v2378_v5 = vcombine.low %v3049_v33, %v3055_v44  ;;  %v3064_v60 = vsel %vm2977_vm6, %v2350_v10, %v1398_v52  ;;  %v2353_v13 = vrot.slane %v1270_v41, 9  ;;  %v1410_v6 = vrot.slane %v2821_v43, 5  ;;  %v1280_v41 = vld [vmem:[%s2712_s24 + $0xb8] sm:$0xe]  ;;  %v1862_v33 = vld [vmem:[%s3412_s2] sm:$0x3] }
  0x6d   : > { %v3070_v12 = vsel %vm2977_vm6, %v2351_v54, %v1402_v40  ;;  %v3074_v29 = vsel %vm2977_vm6, %v2352_v23, %v1406_v45  ;;  %v2354_v14 = vrot.slane %v1271_v56, 9  ;;  %v1414_v24 = vrot.slane %v2826_v59, 5  ;;  %v1281_v56 = vld [vmem:[%s2712_s24 + $0xc0] sm:$0xe]  ;;  %v1282_v45 = vld [vmem:[%s2712_s24 + $0xc8] sm:$0xe]  ;;  %2630 = vmatprep.subr.msk.bf16.mxu1 %vm1912_vm7, %v1862_v33 }
  0x6e   : > { %v2379_v11 = vcombine.low %v3064_v60, %v3070_v12  ;;  %v3083_v43 = vsel %vm2977_vm6, %v2353_v13, %v1410_v6  ;;  %v2355_v7 = vrot.slane %v1272_v57, 9  ;;  %v1418_v61 = vrot.slane %v2837_v15, 5  ;;  %v1283_v57 = vld [vmem:[%s2712_s24 + $0xd0] sm:$0xe] }
  0x6f   : > { %v2380_v20 = vcombine.low %v3074_v29, %v3083_v43  ;;  %v3091_v59 = vsel %vm2977_vm6, %v2354_v14, %v1414_v24  ;;  %v2356_v50 = vrot.slane %v1273_v2, 9  ;;  %v1422_v18 = vrot.slane %v2842_v32, 5  ;;  %v1284_v14 = vld [vmem:[%s2712_s24 + $0xd8] sm:$0xe] }
  0x70   : > { %v3097_v53 = vsel %vm2977_vm6, %v2355_v7, %v1418_v61  ;;  %v2357_v27 = vrot.slane %v1274_v49, 9  ;;  %v1426_v15 = vrot.slane %v2853_v47, 5  ;;  %v2358_v31 = vrot.slane %v1275_v3, 9  ;;  %v1285_v7 = vld [vmem:[%s2712_s24 + $0xe0] sm:$0xe] }
  0x71   : > { %2565 = vmatmul.mubr.msk.bf16.vlgmr.msra.gmra.mxu0 %vm752_vm2, %v2375_v46  ;;  %v2381_v1 = vcombine.low %v3091_v59, %v3097_v53  ;;  %v3106_v32 = vsel %vm2977_vm6, %v2356_v50, %v1422_v18  ;;  %v1430_v9 = vrot.slane %v2858_v0, 5  ;;  %v2359_v42 = vrot.slane %v1276_v25, 9 }
  0x72   : > { %2568 = vmatprep.mubr.msk.bf16.mxu0 %vm752_vm2, %v2376_v36  ;;  %v3113_v47 = vsel %vm2977_vm6, %v2357_v27, %v1426_v15  ;;  %v1434_v46 = vrot.slane %v2869_v21, 5  ;;  %v2360_v28 = vrot.slane %v1277_v26, 9  ;;  %v1438_v10 = vrot.slane %v2874_v39, 5  ;;  %v1286_v26 = vld [vmem:[%s2712_s24 + $0xe8] sm:$0xe] }
  0x73   : > { %v2382_v0 = vcombine.low %v3106_v32, %v3113_v47  ;;  %v3122_v52 = vsel %vm2977_vm6, %v2358_v31, %v1430_v9  ;;  %v2361_v36 = vrot.slane %v1278_v35, 9  ;;  %v1442_v54 = vrot.slane %v2885_v58, 5  ;;  %v1287_v35 = vld [vmem:[%s2712_s24 + $0xf0] sm:$0xe] }
  0x74   : > { %v1435_v21 = vsel %vm2977_vm6, %v2359_v42, %v1434_v46  ;;  %v1439_v39 = vsel %vm2977_vm6, %v2360_v28, %v1438_v10  ;;  %v2362_v40 = vrot.slane %v1279_v16, 9  ;;  %v1446_v23 = vrot.slane %v2890_v17, 5  ;;  %v1288_v42 = vld [vmem:[%s2712_s24 + $0xf8] sm:$0xe] }
  0x75   : > { %v2383_v13 = vcombine.low %v3122_v52, %v1435_v21  ;;  %v1443_v6 = vsel %vm2977_vm6, %v2361_v36, %v1442_v54  ;;  %v2363_v58 = vrot.slane %v1280_v41, 9  ;;  %v1450_v2 = vrot.slane %v2901_v38, 5 }
  0x76   : > { %v2384_v24 = vcombine.low %v1439_v39, %v1443_v6  ;;  %v1447_v49 = vsel %vm2977_vm6, %v2362_v40, %v1446_v23  ;;  %v2364_v3 = vrot.slane %v1281_v56, 9  ;;  %v1454_v17 = vrot.slane %v2906_v55, 5 }
  0x77   : > { %v1451_v61 = vsel %vm2977_vm6, %v2363_v58, %v1450_v2  ;;  %v2365_v25 = vrot.slane %v1282_v45, 9  ;;  %v1458_v50 = vrot.slane %v2917_v19, 5  ;;  %v2366_v18 = vrot.slane %v1283_v57, 9 }
  0x78   : > { %v2385_v38 = vcombine.low %v1447_v49, %v1451_v61  ;;  %v1455_v27 = vsel %vm2977_vm6, %v2364_v3, %v1454_v17  ;;  %v1462_v15 = vrot.slane %v2922_v37, 5  ;;  %v2367_v31 = vrot.slane %v1284_v14, 9 }
  0x79   : > { %2569 = vmatmul.mubr.msk.bf16.gmra.mxu0 %vm752_vm2, %v2377_v30  ;;  %v1459_v55 = vsel %vm2977_vm6, %v2365_v25, %v1458_v50  ;;  %v1466_v19 = vrot.slane %v2933_v63, 5  ;;  %v2368_v32 = vrot.slane %v1285_v7, 9  ;;  %v1470_v9 = vrot.slane %v2938_v4, 5 }
  0x7a   : > { %2572 = vmatprep.mubr.msk.bf16.mxu0 %vm752_vm2, %v2378_v5  ;;  %v2386_v37 = vcombine.low %v1455_v27, %v1459_v55  ;;  %v1463_v8 = vsel %vm2977_vm6, %v2366_v18, %v1462_v15  ;;  %v2369_v51 = vrot.slane %v1286_v26, 9  ;;  %v1474_v30 = vrot.slane %v2949_v48, 5 }
  0x7b   : > { %v1467_v16 = vsel %vm2977_vm6, %v2367_v31, %v1466_v19  ;;  %v1471_v63 = vsel %vm2977_vm6, %v2368_v32, %v1470_v9  ;;  %v2370_v4 = vrot.slane %v1287_v35, 9  ;;  %v1478_v47 = vrot.slane %v2954_v62, 5 }
  0x7c   : > { %v2387_v44 = vcombine.low %v1463_v8, %v1467_v16  ;;  %v1475_v5 = vsel %vm2977_vm6, %v2369_v51, %v1474_v30  ;;  %v2371_v46 = vrot.slane %v1288_v42, 9  ;;  %v1482_v48 = vrot.slane %v2965_v34, 5 }
  0x7d   : > { %v2388_v28 = vcombine.low %v1471_v63, %v1475_v5  ;;  %v1479_v10 = vsel %vm2977_vm6, %v2370_v4, %v1478_v47  ;;  %v1914_v62 = vsel %vm1912_vm7, %v1862_v33, 0 }
  0x7e   : > { %v1483_v41 = vsel %vm2977_vm6, %v2371_v46, %v1482_v48  ;;  %2597 = vmatpush3.bf16.msra.mxu1 %v1914_v62 }
  0x7f   : > { %v2389_v52 = vcombine.low %v1479_v10, %v1483_v41 }
  0x81   : > { %2573 = vmatmul.mubr.msk.bf16.gmra.mxu0 %vm752_vm2, %v2379_v11 }
  0x82   : > { %2576 = vmatprep.mubr.msk.bf16.mxu0 %vm752_vm2, %v2380_v20 }
  0x89   : > { %2577 = vmatmul.mubr.msk.bf16.gmra.mxu0 %vm752_vm2, %v2381_v1 }
  0x8a   : > { %2580 = vmatprep.mubr.msk.bf16.mxu0 %vm752_vm2, %v2382_v0 }
  0x91   : > { %2581 = vmatmul.mubr.msk.bf16.gmra.mxu0 %vm752_vm2, %v2383_v13 }
  0x92   : > { %2584 = vmatprep.mubr.msk.bf16.mxu0 %vm752_vm2, %v2384_v24 }
  0x99   : > { %2585 = vmatmul.mubr.msk.bf16.gmra.mxu0 %vm752_vm2, %v2385_v38 }
  0x9a   : > { %2588 = vmatprep.mubr.msk.bf16.mxu0 %vm752_vm2, %v2386_v37 }
  0xa1   : > { %2589 = vmatmul.mubr.msk.bf16.gmra.mxu0 %vm752_vm2, %v2387_v44 }
  0xa2   : > { %2592 = vmatprep.mubr.msk.bf16.mxu0 %vm752_vm2, %v2388_v28 }
  0xa9   : > { %2593 = vmatmul.mubr.msk.bf16.gmra.mxu0 %vm752_vm2, %v2389_v52 }
  0xd8   : > { %v2532_v11 = vpop.f32.mrf.mxu1 }
  0xda   : > { %v1130_v59 = vpop.f32.mrf.mxu1 }
  0xdc   : > { %v2533_v1 = vpop.f32.mrf.mxu1 }
  0xde   : > { %v1133_v54 = vpop.f32.mrf.mxu1 }
  0xe2   : > { %v2498_v34 = vpop.f32.mrf.mxu0 }
  0xe3   : > { %v1139_v30 = vadd.f32 %v2532_v11, %v2498_v34 }
  0xe4   : > { %v835_v22 = vpop.f32.mrf.mxu0 }
  0xe5   : > { %v1131_v63 = vadd.f32 %v1130_v59, %v835_v22 }
  0xe6   : > { %v2499_v60 = vpop.f32.mrf.mxu0  ;;  %v2536_v39 = vpop.f32.mrf.mxu1 }
  0xe7   : > { %v1142_v44 = vadd.f32 %v2533_v1, %v2499_v60 }
  0xe8   : > { %v838_v12 = vpop.f32.mrf.mxu0  ;;  %v1146_v23 = vpop.f32.mrf.mxu1 }
  0xe9   : > { %v1134_v48 = vadd.f32 %v1133_v54, %v838_v12 }
  0xea   : > { %v2537_v13 = vpop.f32.mrf.mxu1 }
  0xec   : > { %v1149_v58 = vpop.f32.mrf.mxu1 }
  0xed   : > { %v2502_v29 = vpop.f32.mrf.mxu0 }
  0xee   : > { %v1155_v52 = vadd.f32 %v2536_v39, %v2502_v29 }
  0xef   : > { %v851_v43 = vpop.f32.mrf.mxu0  ;;  %v2540_v24 = vpop.f32.mrf.mxu1 }
  0xf0   : > { %v1147_v34 = vadd.f32 %v1146_v23, %v851_v43 }
  0xf1   : > { %v3201_v20 = vpop.f32.mrf.mxu0  ;;  %v3229_v17 = vpop.f32.mrf.mxu1 }
  0xf2   : > { %v1158_v60 = vadd.f32 %v2537_v13, %v3201_v20 }
  0xf3   : > { %v3203_v53 = vpop.f32.mrf.mxu0  ;;  %v3233_v61 = vpop.f32.mrf.mxu1 }
  0xf4   : > { %v1150_v29 = vadd.f32 %v1149_v58, %v3203_v53 }
  0xf5   : > { %v3239_v18 = vpop.f32.mrf.mxu1 }
  0xf7   : > { %v3205_v0 = vpop.f32.mrf.mxu0 }
  0xf9   : > { %v3207_v36 = vpop.f32.mrf.mxu0  ;;  %v3243_v38 = vpop.f32.mrf.mxu1 }
  0xfb   : > { %v3209_v56 = vpop.f32.mrf.mxu0  ;;  %v3249_v31 = vpop.f32.mrf.mxu1 }
  0xfd   : > { %v3211_v21 = vpop.f32.mrf.mxu0  ;;  %v3255_v19 = vpop.f32.mrf.mxu1 }
  0xff   : > { %v3259_v9 = vpop.f32.mrf.mxu1 }
 0x101   : > { %v3213_v40 = vpop.f32.mrf.mxu0 }
 0x103   : > { %v3215_v45 = vpop.f32.mrf.mxu0  ;;  %v3265_v8 = vpop.f32.mrf.mxu1 }
 0x105   : > { %v3217_v57 = vpop.f32.mrf.mxu0  ;;  %v3269_v47 = vpop.f32.mrf.mxu1 }
 0x107   : > { %v3219_v6 = vpop.f32.mrf.mxu0  ;;  %v3271_v41 = vpop.f32.mrf.mxu1 }
 0x109   : > { %v3274_v1 = vpop.f32.mrf.mxu1 }
 0x10b   : > { %v3221_v2 = vpop.f32.mrf.mxu0 }
 0x10d   : > { %v3223_v14 = vpop.f32.mrf.mxu0 }
 0x10f   : > { %v3225_v49 = vpop.f32.mrf.mxu0 }
 0x111   : > { %v3227_v3 = vpop.f32.mrf.mxu0 }
 0x115   : > { %v3231_v7 = vpop.f32.mrf.mxu0 }
 0x117   : > { %v3235_v25 = vpop.f32.mrf.mxu0 }
 0x119   : > { %v3237_v50 = vpop.f32.mrf.mxu0 }
 0x11b   : > { %v3241_v26 = vpop.f32.mrf.mxu0 }
 0x11f   : > { %v3245_v27 = vpop.f32.mrf.mxu0 }
 0x121   : > { %v3247_v15 = vpop.f32.mrf.mxu0 }
 0x123   : > { %v3251_v35 = vpop.f32.mrf.mxu0 }
 0x125   : > { %v3253_v55 = vpop.f32.mrf.mxu0 }
 0x129   : > { %v3257_v32 = vpop.f32.mrf.mxu0 }
 0x12b   : > { %v3261_v42 = vpop.f32.mrf.mxu0 }
 0x12c   : > { %3418 = vst [vmem:[#allocation2_spill] sm:$0xff] %v3261_v42 }
 0x12d   : > { %v3263_v37 = vpop.f32.mrf.mxu0 }
 0x12e   : > { %3419 = vst [vmem:[#allocation3_spill] sm:$0xff] %v3263_v37 }
 0x12f   : > { %v3267_v51 = vpop.f32.mrf.mxu0 }
 0x130   : > { %3420 = vst [vmem:[#allocation4_spill] sm:$0xff] %v3267_v51 }
 0x131   : > { %v2566_v16 = vpop.f32.mrf.mxu0 }
 0x132   : > { %v1752_v4 = vadd.f32 %v2566_v16, %v1139_v30 }
 0x133   : > { %v1623_v33 = vpop.f32.mrf.mxu0 }
 0x134   : > { %v1750_v5 = vadd.f32 %v1623_v33, %v1131_v63  ;;  %v1784_v28 = vmul.f32 0.2, %v1752_v4 }
 0x135   : > { %v2567_v46 = vpop.f32.mrf.mxu0 }
 0x136   : > { %v1753_v10 = vadd.f32 %v2567_v46, %v1142_v44  ;;  %v1782_v37 = vmul.f32 0.2, %v1750_v5  ;;  %v1816_v22 = vmax.f32 %v1752_v4, %v1784_v28  ;;  %v3277_v4 = vpop.f32.mrf.mxu1 }
 0x137   : > { %v1626_v62 = vpop.f32.mrf.mxu0 }
 0x138   : > { %v1785_v42 = vmul.f32 0.2, %v1753_v10  ;;  %v1751_v51 = vadd.f32 %v1626_v62, %v1134_v48  ;;  %v1814_v54 = vmax.f32 %v1750_v5, %v1782_v37  ;;  %v1171_v48 = vadd.f32 %v2540_v24, %v3205_v0 }
 0x139   : > { %v2570_v11 = vpop.f32.mrf.mxu0  ;;  %v1163_v37 = vadd.f32 %v3229_v17, %v3207_v36  ;;  %v1174_v62 = vadd.f32 %v3233_v61, %v3209_v56  ;;  %v1166_v36 = vadd.f32 %v3239_v18, %v3211_v21  ;;  %v1187_v56 = vadd.f32 %v3243_v38, %v3213_v40 }
 0x13a   : > { %v1817_v59 = vmax.f32 %v1753_v10, %v1785_v42  ;;  %v1783_v30 = vmul.f32 0.2, %v1751_v51  ;;  %v1756_v16 = vadd.f32 %v2570_v11, %v1155_v52  ;;  %v3286_v52 = vpop.f32.mrf.mxu1 }
 0x13b   : > { %v1639_v12 = vpop.f32.mrf.mxu0 }
 0x13c   : > { %v1847_v63 = vpack.c.bf16 %v1817_v59, %v1816_v22  ;;  %v1815_v33 = vmax.f32 %v1751_v51, %v1783_v30  ;;  %v1754_v44 = vadd.f32 %v1639_v12, %v1147_v34  ;;  %v1788_v43 = vmul.f32 0.2, %v1756_v16 }
 0x13d   : > { %v2571_v46 = vpop.f32.mrf.mxu0 }
 0x13e   : > { %v1846_v39 = vpack.c.bf16 %v1815_v33, %v1814_v54  ;;  %v1757_v23 = vadd.f32 %v2571_v46, %v1158_v60  ;;  %v1786_v20 = vmul.f32 0.2, %v1754_v44  ;;  %v1820_v53 = vmax.f32 %v1756_v16, %v1788_v43  ;;  %v3290_v60 = vpop.f32.mrf.mxu1 }
 0x13f   : > { %v1642_v42 = vpop.f32.mrf.mxu0  ;;  %v1179_v33 = vadd.f32 %v3249_v31, %v3215_v45  ;;  %v1182_v45 = vadd.f32 %v3259_v9, %v3219_v6 }
 0x140   : > { %v1789_v13 = vmul.f32 0.2, %v1757_v23  ;;  %v1755_v28 = vadd.f32 %v1642_v42, %v1150_v29  ;;  %2598 = vmatprep.mubr.msk.bf16.mxu1 %vm1863_vm8, %v1846_v39  ;;  %v1818_v24 = vmax.f32 %v1754_v44, %v1786_v20  ;;  %v1190_v39 = vadd.f32 %v3255_v19, %v3217_v57  ;;  %v1213_v43 = vpop.f32.mrf.mxu1 }
 0x141   : > { %v2574_v51 = vpop.f32.mrf.mxu0  ;;  %2599 = vmatmul.mubr.msk.bf16.vlgmr.msra.gmra.mxu1 %vm1863_vm8, %v1847_v63 }
 0x142   : > { %v1821_v58 = vmax.f32 %v1757_v23, %v1789_v13  ;;  %v1787_v5 = vmul.f32 0.2, %v1755_v28  ;;  %v1760_v10 = vadd.f32 %v2574_v51, %v1171_v48 }
 0x143   : > { %v1655_v0 = vpop.f32.mrf.mxu0 }
 0x144   : > { %v1849_v34 = vpack.c.bf16 %v1821_v58, %v1820_v53  ;;  %v1819_v11 = vmax.f32 %v1755_v28, %v1787_v5  ;;  %v1758_v22 = vadd.f32 %v1655_v0, %v1163_v37  ;;  %v1792_v30 = vmul.f32 0.2, %v1760_v10  ;;  %v2556_v37 = vpop.f32.mrf.mxu1 }
 0x145   : > { %v2575_v59 = vpop.f32.mrf.mxu0  ;;  %v1203_v53 = vadd.f32 %v3265_v8, %v3221_v2  ;;  %v1195_v5 = vadd.f32 %v3269_v47, %v3223_v14  ;;  %v1198_v14 = vadd.f32 %v3274_v1, %v3227_v3 }
 0x146   : > { %v1848_v17 = vpack.c.bf16 %v1819_v11, %v1818_v24  ;;  %v1761_v16 = vadd.f32 %v2575_v59, %v1174_v62  ;;  %v1790_v61 = vmul.f32 0.2, %v1758_v22  ;;  %v1824_v21 = vmax.f32 %v1760_v10, %v1792_v30 }
 0x147   : > { %v1658_v12 = vpop.f32.mrf.mxu0  ;;  %v1206_v24 = vadd.f32 %v3271_v41, %v3225_v49 }
 0x148   : > { %v1793_v54 = vmul.f32 0.2, %v1761_v16  ;;  %v1759_v63 = vadd.f32 %v1658_v12, %v1166_v36  ;;  %2602 = vmatprep.mubr.msk.bf16.mxu1 %vm1863_vm8, %v1848_v17  ;;  %v1822_v38 = vmax.f32 %v1758_v22, %v1790_v61 }
 0x149   : > { %v2578_v44 = vpop.f32.mrf.mxu0  ;;  %2603 = vmatmul.mubr.msk.bf16.gmra.mxu1 %vm1863_vm8, %v1849_v34  ;;  %v1226_v34 = vpop.f32.mrf.mxu1 }
 0x14a   : > { %v1825_v18 = vmax.f32 %v1761_v16, %v1793_v54  ;;  %v1791_v46 = vmul.f32 0.2, %v1759_v63  ;;  %v1764_v29 = vadd.f32 %v2578_v44, %v1187_v56  ;;  %v1219_v56 = vadd.f32 %v3277_v4, %v3231_v7 }
 0x14b   : > { %v1671_v40 = vpop.f32.mrf.mxu0  ;;  %v2557_v16 = vpop.f32.mrf.mxu1  ;;  %v1211_v54 = vadd.f32 %v3286_v52, %v3235_v25 }
 0x14c   : > { %v1851_v23 = vpack.c.bf16 %v1825_v18, %v1824_v21  ;;  %v1823_v42 = vmax.f32 %v1759_v63, %v1791_v46  ;;  %v1762_v48 = vadd.f32 %v1671_v40, %v1179_v33  ;;  %v1796_v13 = vmul.f32 0.2, %v1764_v29 }
 0x14d   : > { %v2579_v20 = vpop.f32.mrf.mxu0  ;;  %v1222_v21 = vadd.f32 %v3290_v60, %v3237_v50  ;;  %v1229_v18 = vpop.f32.mrf.mxu1  ;;  %v1227_v50 = vadd.f32 %v1226_v34, %v3247_v15 }
 0x14e   : > { %v1850_v31 = vpack.c.bf16 %v1823_v42, %v1822_v38  ;;  %v1765_v28 = vadd.f32 %v2579_v20, %v1190_v39  ;;  %v1794_v58 = vmul.f32 0.2, %v1762_v48  ;;  %v1828_v6 = vmax.f32 %v1764_v29, %v1796_v13 }
 0x14f   : > { %v1674_v51 = vpop.f32.mrf.mxu0  ;;  %v1214_v38 = vadd.f32 %v1213_v43, %v3241_v26  ;;  %v2560_v42 = vpop.f32.mrf.mxu1  ;;  %v1235_v20 = vadd.f32 %v2556_v37, %v3245_v27 }
 0x150   : > { %v1797_v57 = vmul.f32 0.2, %v1765_v28  ;;  %v1763_v19 = vadd.f32 %v1674_v51, %v1182_v45  ;;  %2606 = vmatprep.mubr.msk.bf16.mxu1 %vm1863_vm8, %v1850_v31  ;;  %v1826_v8 = vmax.f32 %v1762_v48, %v1794_v58  ;;  %v1251_v34 = vadd.f32 %v2560_v42, %v3257_v32 }
 0x151   : > { %v2582_v10 = vpop.f32.mrf.mxu0  ;;  %2607 = vmatmul.mubr.msk.bf16.gmra.mxu1 %vm1863_vm8, %v1851_v23  ;;  %v1242_v58 = vpop.f32.mrf.mxu1 }
 0x152   : > { %v1829_v9 = vmax.f32 %v1765_v28, %v1797_v57  ;;  %v1795_v62 = vmul.f32 0.2, %v1763_v19  ;;  %v1768_v0 = vadd.f32 %v2582_v10, %v1203_v53  ;;  %v1238_v53 = vadd.f32 %v2557_v16, %v3251_v35  ;;  %v3421_v35 = vld [vmem:[#allocation2_spill] sm:$0xff] }
 0x153   : > { %v1687_v2 = vpop.f32.mrf.mxu0 }
 0x154   : > { %v1853_v11 = vpack.c.bf16 %v1829_v9, %v1828_v6  ;;  %v1827_v22 = vmax.f32 %v1763_v19, %v1795_v62  ;;  %v1766_v59 = vadd.f32 %v1687_v2, %v1195_v5  ;;  %v1800_v17 = vmul.f32 0.2, %v1768_v0 }
 0x155   : > { %v2583_v36 = vpop.f32.mrf.mxu0  ;;  %v1230_v6 = vadd.f32 %v1229_v18, %v3253_v55 }
 0x156   : > { %v1852_v47 = vpack.c.bf16 %v1827_v22, %v1826_v8  ;;  %v1769_v30 = vadd.f32 %v2583_v36, %v1206_v24  ;;  %v1798_v61 = vmul.f32 0.2, %v1766_v59  ;;  %v1832_v3 = vmax.f32 %v1768_v0, %v1800_v17  ;;  %v2561_v0 = vpop.f32.mrf.mxu1  ;;  %v3422_v17 = vld [vmem:[#allocation3_spill] sm:$0xff] }
 0x157   : > { %v1690_v12 = vpop.f32.mrf.mxu0  ;;  %v1243_v22 = vadd.f32 %v1242_v58, %v3421_v35 }
 0x158   : > { %v1801_v49 = vmul.f32 0.2, %v1769_v30  ;;  %v1767_v41 = vadd.f32 %v1690_v12, %v1198_v14  ;;  %2610 = vmatprep.mubr.msk.bf16.mxu1 %vm1863_vm8, %v1852_v47  ;;  %v1830_v4 = vmax.f32 %v1766_v59, %v1798_v61  ;;  %v1245_v16 = vpop.f32.mrf.mxu1 }
 0x159   : > { %v2586_v63 = vpop.f32.mrf.mxu0  ;;  %2611 = vmatmul.mubr.msk.bf16.gmra.mxu1 %vm1863_vm8, %v1853_v11 }
 0x15a   : > { %v1833_v1 = vmax.f32 %v1769_v30, %v1801_v49  ;;  %v1799_v33 = vmul.f32 0.2, %v1767_v41  ;;  %v1772_v44 = vadd.f32 %v2586_v63, %v1219_v56  ;;  %v1254_v30 = vadd.f32 %v2561_v0, %v3422_v17 }
 0x15b   : > { %v1703_v7 = vpop.f32.mrf.mxu0 }
 0x15c   : > { %v1855_v46 = vpack.c.bf16 %v1833_v1, %v1832_v3  ;;  %v1831_v29 = vmax.f32 %v1767_v41, %v1799_v33  ;;  %v1770_v39 = vadd.f32 %v1703_v7, %v1211_v54  ;;  %v1804_v52 = vmul.f32 0.2, %v1772_v44  ;;  %v3423_v54 = vld [vmem:[#allocation4_spill] sm:$0xff] }
 0x15d   : > { %v2587_v40 = vpop.f32.mrf.mxu0  ;;  %v1246_v63 = vadd.f32 %v1245_v16, %v3423_v54 }
 0x15e   : > { %v1854_v25 = vpack.c.bf16 %v1831_v29, %v1830_v4  ;;  %v1773_v23 = vadd.f32 %v2587_v40, %v1222_v21  ;;  %v1802_v45 = vmul.f32 0.2, %v1770_v39  ;;  %v1836_v28 = vmax.f32 %v1772_v44, %v1804_v52 }
 0x15f   : > { %v1706_v48 = vpop.f32.mrf.mxu0 }
 0x160   : > { %v1805_v31 = vmul.f32 0.2, %v1773_v23  ;;  %v1771_v13 = vadd.f32 %v1706_v48, %v1214_v38  ;;  %2614 = vmatprep.mubr.msk.bf16.mxu1 %vm1863_vm8, %v1854_v25  ;;  %v1834_v19 = vmax.f32 %v1770_v39, %v1802_v45 }
 0x161   : > { %v2590_v60 = vpop.f32.mrf.mxu0  ;;  %2615 = vmatmul.mubr.msk.bf16.gmra.mxu1 %vm1863_vm8, %v1855_v46 }
 0x162   : > { %v1837_v51 = vmax.f32 %v1773_v23, %v1805_v31  ;;  %v1803_v26 = vmul.f32 0.2, %v1771_v13  ;;  %v1776_v43 = vadd.f32 %v2590_v60, %v1235_v20 }
 0x163   : > { %v1719_v57 = vpop.f32.mrf.mxu0 }
 0x164   : > { %v1857_v27 = vpack.c.bf16 %v1837_v51, %v1836_v28  ;;  %v1835_v37 = vmax.f32 %v1771_v13, %v1803_v26  ;;  %v1774_v5 = vadd.f32 %v1719_v57, %v1227_v50  ;;  %v1808_v15 = vmul.f32 0.2, %v1776_v43 }
 0x165   : > { %v2591_v10 = vpop.f32.mrf.mxu0 }
 0x166   : > { %v1856_v9 = vpack.c.bf16 %v1835_v37, %v1834_v19  ;;  %v1777_v62 = vadd.f32 %v2591_v10, %v1238_v53  ;;  %v1806_v2 = vmul.f32 0.2, %v1774_v5  ;;  %v1840_v36 = vmax.f32 %v1776_v43, %v1808_v15 }
 0x167   : > { %v1722_v24 = vpop.f32.mrf.mxu0 }
 0x168   : > { %v1809_v8 = vmul.f32 0.2, %v1777_v62  ;;  %v1775_v11 = vadd.f32 %v1722_v24, %v1230_v6  ;;  %2618 = vmatprep.mubr.msk.bf16.mxu1 %vm1863_vm8, %v1856_v9  ;;  %v1838_v56 = vmax.f32 %v1774_v5, %v1806_v2 }
 0x169   : > { %v2594_v59 = vpop.f32.mrf.mxu0  ;;  %2619 = vmatmul.mubr.msk.bf16.gmra.mxu1 %vm1863_vm8, %v1857_v27 }
 0x16a   : > { %v1841_v14 = vmax.f32 %v1777_v62, %v1809_v8  ;;  %v1807_v55 = vmul.f32 0.2, %v1775_v11  ;;  %v1780_v47 = vadd.f32 %v2594_v59, %v1251_v34 }
 0x16b   : > { %v1735_v12 = vpop.f32.mrf.mxu0 }
 0x16c   : > { %v1859_v32 = vpack.c.bf16 %v1841_v14, %v1840_v36  ;;  %v1839_v61 = vmax.f32 %v1775_v11, %v1807_v55  ;;  %v1778_v49 = vadd.f32 %v1735_v12, %v1243_v22  ;;  %v1812_v1 = vmul.f32 0.2, %v1780_v47 }
 0x16d   : > { %v2595_v41 = vpop.f32.mrf.mxu0 }
 0x16e   : > { %v1858_v3 = vpack.c.bf16 %v1839_v61, %v1838_v56  ;;  %v1781_v33 = vadd.f32 %v2595_v41, %v1254_v30  ;;  %v1810_v21 = vmul.f32 0.2, %v1778_v49  ;;  %v1844_v4 = vmax.f32 %v1780_v47, %v1812_v1 }
 0x16f   : > { %v1738_v44 = vpop.f32.mrf.mxu0 }
 0x170   : > { %v1813_v18 = vmul.f32 0.2, %v1781_v33  ;;  %v1779_v7 = vadd.f32 %v1738_v44, %v1246_v63  ;;  %2622 = vmatprep.mubr.msk.bf16.mxu1 %vm1863_vm8, %v1858_v3  ;;  %v1842_v39 = vmax.f32 %v1778_v49, %v1810_v21 }
 0x171   : > { %2623 = vmatmul.mubr.msk.bf16.gmra.mxu1 %vm1863_vm8, %v1859_v32 }
 0x172   : > { %v1845_v46 = vmax.f32 %v1781_v33, %v1813_v18  ;;  %v1811_v29 = vmul.f32 0.2, %v1779_v7 }
 0x174   : > { %v1861_v40 = vpack.c.bf16 %v1845_v46, %v1844_v4  ;;  %v1843_v38 = vmax.f32 %v1779_v7, %v1811_v29 }
 0x176   : > { %v1860_v25 = vpack.c.bf16 %v1843_v38, %v1842_v39 }
 0x178   : > { %2626 = vmatprep.mubr.msk.bf16.mxu1 %vm1863_vm8, %v1860_v25 }
 0x179   : > { %2627 = vmatmul.mubr.msk.bf16.gmra.mxu1 %vm1863_vm8, %v1861_v40 }
 0x201   : > { %v2600_v52 = vpop.f32.mrf.mxu1 }
 0x202   : > { %v2079_v23 = vmul.f32 0.2, %v2600_v52 }
 0x203   : > { %v1950_v42 = vpop.f32.mrf.mxu1 }
 0x204   : > { %v2111_v48 = vmax.f32 %v2600_v52, %v2079_v23  ;;  %v2077_v20 = vmul.f32 0.2, %v1950_v42 }
 0x205   : > { %v2601_v45 = vpop.f32.mrf.mxu1 }
 0x206   : > { %v2143_v31 = vpack.c.bf16 %v2111_v48, %v2111_v48  ;;  %v2109_v13 = vmax.f32 %v1950_v42, %v2077_v20  ;;  %v2080_v50 = vmul.f32 0.2, %v2601_v45 }
 0x207   : > { %v1953_v60 = vpop.f32.mrf.mxu1 }
 0x208   : > { %2176 = vst.msk [vmem:[%s3341_s30 + $0x8] sm:$0xf] %vm2173_vm9, %v2143_v31  ;;  %v2141_v28 = vpack.c.bf16 %v2109_v13, %v2109_v13  ;;  %v2112_v51 = vmax.f32 %v2601_v45, %v2080_v50  ;;  %v2078_v26 = vmul.f32 0.2, %v1953_v60 }
 0x209   : > { %v2604_v43 = vpop.f32.mrf.mxu1 }
 0x20a   : > { %2174 = vst.msk [vmem:[%s3341_s30] sm:$0xf] %vm2173_vm9, %v2141_v28  ;;  %v2144_v53 = vpack.c.bf16 %v2112_v51, %v2112_v51  ;;  %v2110_v58 = vmax.f32 %v1953_v60, %v2078_v26  ;;  %v2083_v57 = vmul.f32 0.2, %v2604_v43 }
 0x20b   : > { %v1966_v19 = vpop.f32.mrf.mxu1 }
 0x20c   : > { %2177 = vst.msk [vmem:[%s3341_s30 + $0xc] sm:$0xf] %vm2173_vm9, %v2144_v53  ;;  %v2142_v27 = vpack.c.bf16 %v2110_v58, %v2110_v58  ;;  %v2115_v37 = vmax.f32 %v2604_v43, %v2083_v57  ;;  %v2081_v5 = vmul.f32 0.2, %v1966_v19 }
 0x20d   : > { %v2605_v10 = vpop.f32.mrf.mxu1 }
 0x20e   : > { %2175 = vst.msk [vmem:[%s3341_s30 + $0x4] sm:$0xf] %vm2173_vm9, %v2142_v27  ;;  %v2147_v6 = vpack.c.bf16 %v2115_v37, %v2115_v37  ;;  %v2113_v9 = vmax.f32 %v1966_v19, %v2081_v5  ;;  %v2084_v15 = vmul.f32 0.2, %v2605_v10 }
 0x20f   : > { %v1969_v62 = vpop.f32.mrf.mxu1 }
 0x210   : > { %2180 = vst.msk [vmem:[%s3341_s30 + $0x18] sm:$0xf] %vm2173_vm9, %v2147_v6  ;;  %v2145_v0 = vpack.c.bf16 %v2113_v9, %v2113_v9  ;;  %v2116_v24 = vmax.f32 %v2605_v10, %v2084_v15  ;;  %v2082_v34 = vmul.f32 0.2, %v1969_v62 }
 0x211   : > { %v2608_v2 = vpop.f32.mrf.mxu1 }
 0x212   : > { %2178 = vst.msk [vmem:[%s3341_s30 + $0x10] sm:$0xf] %vm2173_vm9, %v2145_v0  ;;  %v2148_v8 = vpack.c.bf16 %v2116_v24, %v2116_v24  ;;  %v2114_v11 = vmax.f32 %v1969_v62, %v2082_v34  ;;  %v2087_v35 = vmul.f32 0.2, %v2608_v2 }
 0x213   : > { %v1982_v22 = vpop.f32.mrf.mxu1 }
 0x214   : > { %2181 = vst.msk [vmem:[%s3341_s30 + $0x1c] sm:$0xf] %vm2173_vm9, %v2148_v8  ;;  %v2146_v59 = vpack.c.bf16 %v2114_v11, %v2114_v11  ;;  %v2119_v36 = vmax.f32 %v2608_v2, %v2087_v35  ;;  %v2085_v14 = vmul.f32 0.2, %v1982_v22 }
 0x215   : > { %v2609_v55 = vpop.f32.mrf.mxu1 }
 0x216   : > { %2179 = vst.msk [vmem:[%s3341_s30 + $0x14] sm:$0xf] %vm2173_vm9, %v2146_v59  ;;  %v2151_v47 = vpack.c.bf16 %v2119_v36, %v2119_v36  ;;  %v2117_v17 = vmax.f32 %v1982_v22, %v2085_v14  ;;  %v2088_v30 = vmul.f32 0.2, %v2609_v55 }
 0x217   : > { %v1985_v16 = vpop.f32.mrf.mxu1 }
 0x218   : > { %2184 = vst.msk [vmem:[%s3341_s30 + $0x28] sm:$0xf] %vm2173_vm9, %v2151_v47  ;;  %v2149_v12 = vpack.c.bf16 %v2117_v17, %v2117_v17  ;;  %v2120_v56 = vmax.f32 %v2609_v55, %v2088_v30  ;;  %v2086_v32 = vmul.f32 0.2, %v1985_v16 }
 0x219   : > { %v2612_v61 = vpop.f32.mrf.mxu1 }
 0x21a   : > { %2182 = vst.msk [vmem:[%s3341_s30 + $0x20] sm:$0xf] %vm2173_vm9, %v2149_v12  ;;  %v2152_v49 = vpack.c.bf16 %v2120_v56, %v2120_v56  ;;  %v2118_v41 = vmax.f32 %v1985_v16, %v2086_v32  ;;  %v2091_v54 = vmul.f32 0.2, %v2612_v61 }
 0x21b   : > { %v1998_v63 = vpop.f32.mrf.mxu1 }
 0x21c   : > { %2185 = vst.msk [vmem:[%s3341_s30 + $0x2c] sm:$0xf] %vm2173_vm9, %v2152_v49  ;;  %v2150_v3 = vpack.c.bf16 %v2118_v41, %v2118_v41  ;;  %v2123_v1 = vmax.f32 %v2612_v61, %v2091_v54  ;;  %v2089_v33 = vmul.f32 0.2, %v1998_v63 }
 0x21d   : > { %v2613_v44 = vpop.f32.mrf.mxu1 }
 0x21e   : > { %2183 = vst.msk [vmem:[%s3341_s30 + $0x24] sm:$0xf] %vm2173_vm9, %v2150_v3  ;;  %v2155_v21 = vpack.c.bf16 %v2123_v1, %v2123_v1  ;;  %v2121_v18 = vmax.f32 %v1998_v63, %v2089_v33  ;;  %v2092_v7 = vmul.f32 0.2, %v2613_v44 }
 0x21f   : > { %v2001_v4 = vpop.f32.mrf.mxu1 }
 0x220   : > { %2188 = vst.msk [vmem:[%s3341_s30 + $0x38] sm:$0xf] %vm2173_vm9, %v2155_v21  ;;  %v2153_v46 = vpack.c.bf16 %v2121_v18, %v2121_v18  ;;  %v2124_v29 = vmax.f32 %v2613_v44, %v2092_v7  ;;  %v2090_v39 = vmul.f32 0.2, %v2001_v4 }
 0x221   : > { %v2616_v40 = vpop.f32.mrf.mxu1 }
 0x222   : > { %2186 = vst.msk [vmem:[%s3341_s30 + $0x30] sm:$0xf] %vm2173_vm9, %v2153_v46  ;;  %v2156_v38 = vpack.c.bf16 %v2124_v29, %v2124_v29  ;;  %v2122_v25 = vmax.f32 %v2001_v4, %v2090_v39  ;;  %v2095_v52 = vmul.f32 0.2, %v2616_v40 }
 0x223   : > { %v2014_v23 = vpop.f32.mrf.mxu1 }
 0x224   : > { %2189 = vst.msk [vmem:[%s3341_s30 + $0x3c] sm:$0xf] %vm2173_vm9, %v2156_v38  ;;  %v2154_v42 = vpack.c.bf16 %v2122_v25, %v2122_v25  ;;  %v2127_v48 = vmax.f32 %v2616_v40, %v2095_v52  ;;  %v2093_v20 = vmul.f32 0.2, %v2014_v23 }
 0x225   : > { %v2617_v45 = vpop.f32.mrf.mxu1 }
 0x226   : > { %2187 = vst.msk [vmem:[%s3341_s30 + $0x34] sm:$0xf] %vm2173_vm9, %v2154_v42  ;;  %v2159_v31 = vpack.c.bf16 %v2127_v48, %v2127_v48  ;;  %v2125_v13 = vmax.f32 %v2014_v23, %v2093_v20  ;;  %v2096_v50 = vmul.f32 0.2, %v2617_v45 }
 0x227   : > { %v2017_v60 = vpop.f32.mrf.mxu1 }
 0x228   : > { %2192 = vst.msk [vmem:[%s3341_s30 + $0x48] sm:$0xf] %vm2173_vm9, %v2159_v31  ;;  %v2157_v28 = vpack.c.bf16 %v2125_v13, %v2125_v13  ;;  %v2128_v51 = vmax.f32 %v2617_v45, %v2096_v50  ;;  %v2094_v26 = vmul.f32 0.2, %v2017_v60 }
 0x229   : > { %v2620_v43 = vpop.f32.mrf.mxu1 }
 0x22a   : > { %2190 = vst.msk [vmem:[%s3341_s30 + $0x40] sm:$0xf] %vm2173_vm9, %v2157_v28  ;;  %v2160_v53 = vpack.c.bf16 %v2128_v51, %v2128_v51  ;;  %v2126_v58 = vmax.f32 %v2017_v60, %v2094_v26  ;;  %v2099_v57 = vmul.f32 0.2, %v2620_v43 }
 0x22b   : > { %v2030_v19 = vpop.f32.mrf.mxu1 }
 0x22c   : > { %2193 = vst.msk [vmem:[%s3341_s30 + $0x4c] sm:$0xf] %vm2173_vm9, %v2160_v53  ;;  %v2158_v27 = vpack.c.bf16 %v2126_v58, %v2126_v58  ;;  %v2131_v37 = vmax.f32 %v2620_v43, %v2099_v57  ;;  %v2097_v5 = vmul.f32 0.2, %v2030_v19 }
 0x22d   : > { %v2621_v10 = vpop.f32.mrf.mxu1 }
 0x22e   : > { %2191 = vst.msk [vmem:[%s3341_s30 + $0x44] sm:$0xf] %vm2173_vm9, %v2158_v27  ;;  %v2163_v6 = vpack.c.bf16 %v2131_v37, %v2131_v37  ;;  %v2129_v9 = vmax.f32 %v2030_v19, %v2097_v5  ;;  %v2100_v15 = vmul.f32 0.2, %v2621_v10 }
 0x22f   : > { %v2033_v62 = vpop.f32.mrf.mxu1 }
 0x230   : > { %2196 = vst.msk [vmem:[%s3341_s30 + $0x58] sm:$0xf] %vm2173_vm9, %v2163_v6  ;;  %v2161_v0 = vpack.c.bf16 %v2129_v9, %v2129_v9  ;;  %v2132_v24 = vmax.f32 %v2621_v10, %v2100_v15  ;;  %v2098_v34 = vmul.f32 0.2, %v2033_v62 }
 0x231   : > { %v2624_v2 = vpop.f32.mrf.mxu1 }
 0x232   : > { %2194 = vst.msk [vmem:[%s3341_s30 + $0x50] sm:$0xf] %vm2173_vm9, %v2161_v0  ;;  %v2164_v8 = vpack.c.bf16 %v2132_v24, %v2132_v24  ;;  %v2130_v11 = vmax.f32 %v2033_v62, %v2098_v34  ;;  %v2103_v35 = vmul.f32 0.2, %v2624_v2 }
 0x233   : > { %v2046_v22 = vpop.f32.mrf.mxu1 }
 0x234   : > { %2197 = vst.msk [vmem:[%s3341_s30 + $0x5c] sm:$0xf] %vm2173_vm9, %v2164_v8  ;;  %v2162_v59 = vpack.c.bf16 %v2130_v11, %v2130_v11  ;;  %v2135_v36 = vmax.f32 %v2624_v2, %v2103_v35  ;;  %v2101_v14 = vmul.f32 0.2, %v2046_v22 }
 0x235   : > { %v2625_v55 = vpop.f32.mrf.mxu1 }
 0x236   : > { %2195 = vst.msk [vmem:[%s3341_s30 + $0x54] sm:$0xf] %vm2173_vm9, %v2162_v59  ;;  %v2167_v47 = vpack.c.bf16 %v2135_v36, %v2135_v36  ;;  %v2133_v17 = vmax.f32 %v2046_v22, %v2101_v14  ;;  %v2104_v30 = vmul.f32 0.2, %v2625_v55 }
 0x237   : > { %v2049_v16 = vpop.f32.mrf.mxu1 }
 0x238   : > { %2200 = vst.msk [vmem:[%s3341_s30 + $0x68] sm:$0xf] %vm2173_vm9, %v2167_v47  ;;  %v2165_v12 = vpack.c.bf16 %v2133_v17, %v2133_v17  ;;  %v2136_v56 = vmax.f32 %v2625_v55, %v2104_v30  ;;  %v2102_v32 = vmul.f32 0.2, %v2049_v16 }
 0x239   : > { %v2628_v61 = vpop.f32.mrf.mxu1 }
 0x23a   : > { %2198 = vst.msk [vmem:[%s3341_s30 + $0x60] sm:$0xf] %vm2173_vm9, %v2165_v12  ;;  %v2168_v49 = vpack.c.bf16 %v2136_v56, %v2136_v56  ;;  %v2134_v41 = vmax.f32 %v2049_v16, %v2102_v32  ;;  %v2107_v54 = vmul.f32 0.2, %v2628_v61 }
 0x23b   : > { %v2062_v63 = vpop.f32.mrf.mxu1 }
 0x23c   : > { %2201 = vst.msk [vmem:[%s3341_s30 + $0x6c] sm:$0xf] %vm2173_vm9, %v2168_v49  ;;  %v2166_v3 = vpack.c.bf16 %v2134_v41, %v2134_v41  ;;  %v2139_v1 = vmax.f32 %v2628_v61, %v2107_v54  ;;  %v2105_v33 = vmul.f32 0.2, %v2062_v63 }
 0x23d   : > { %v2629_v44 = vpop.f32.mrf.mxu1 }
 0x23e   : > { %2199 = vst.msk [vmem:[%s3341_s30 + $0x64] sm:$0xf] %vm2173_vm9, %v2166_v3  ;;  %v2171_v21 = vpack.c.bf16 %v2139_v1, %v2139_v1  ;;  %v2137_v18 = vmax.f32 %v2062_v63, %v2105_v33  ;;  %v2108_v7 = vmul.f32 0.2, %v2629_v44 }
 0x23f   : > { %v2065_v4 = vpop.f32.mrf.mxu1 }
 0x240   : > { %2204 = vst.msk [vmem:[%s3341_s30 + $0x78] sm:$0xf] %vm2173_vm9, %v2171_v21  ;;  %v2169_v46 = vpack.c.bf16 %v2137_v18, %v2137_v18  ;;  %v2140_v29 = vmax.f32 %v2629_v44, %v2108_v7  ;;  %v2106_v39 = vmul.f32 0.2, %v2065_v4 }
 0x242   : > { %2202 = vst.msk [vmem:[%s3341_s30 + $0x70] sm:$0xf] %vm2173_vm9, %v2169_v46  ;;  %v2172_v40 = vpack.c.bf16 %v2140_v29, %v2140_v29  ;;  %v2138_v38 = vmax.f32 %v2065_v4, %v2106_v39 }
 0x244   : > { %2205 = vst.msk [vmem:[%s3341_s30 + $0x7c] sm:$0xf] %vm2173_vm9, %v2172_v40  ;;  %v2170_v25 = vpack.c.bf16 %v2138_v38, %v2138_v38 }
 0x246   : > { %2203 = vst.msk [vmem:[%s3341_s30 + $0x74] sm:$0xf] %vm2173_vm9, %v2170_v25 }
 0x247 PF: > { %s13_s12 = sadd.s32 1, %s2664_s12  }
 0x248   : > { %p10_p4 = scmp.ge.s32.totalorder %s13_s12, 4  }
 0x24a   :  { %12 = sbr.rel (!%p10_p4) target bundleno = 1 (0x1), region = 64 }

// kernel: sa_conv_forward.9
= control target key start
LH: loop header
LB: loop body
LE: loop exit
PB: predicated region body
PF: predicated region fallthrough
CT: control target
= control target key end

     0   :  { %s2769_s24 = smov 0   ;;  %s3306_s0 = inlined_call_operand.vmem [shape: bf16[8,8,8,4], index: 0, kind: input, shape index: {}]   ;;  %s3307_s1 = inlined_call_operand.vmem [shape: bf16[8,8,8,4], index: 1, kind: input, shape index: {}]   ;;  %s3308_s2 = inlined_call_operand.vmem [shape: bf16[4,8], index: 2, kind: input, shape index: {}]   ;;  %s3309_s3 = inlined_call_operand.vmem [shape: bf16[4,8], index: 3, kind: input, shape index: {}]   ;;  %s3310_s4 = inlined_call_operand.vmem [shape: f32[1,8], index: 4, kind: input, shape index: {}]   ;;  %s3311_s5 = inlined_call_operand.vmem [shape: bf16[9,8,4], index: 5, kind: input, shape index: {}]   ;;  %s3312_s6 = inlined_call_operand.vmem [shape: f32[1,4], index: 6, kind: input, shape index: {}]   ;;  %s3313_s7 = inlined_call_operand.vmem [shape: f32[8,8,8,4], index: 7, kind: output, shape index: {}]  }
   0x1 LB: > { %s2358_s25 = sadd.s32 4294967295, %s2726_s24   ;;  %p2362_p0 = scmp.ge.s32.totalorder %s2726_s24, 1  ;;  %s2726_s24 = sphi %s2769_s24, %s17_s24  }
   0x2   : > { %p247_p1 = scmp.lt.s32.totalorder %s2726_s24, 9 }
   0x4   : > { %p248_p2 = pnand %p2362_p0, %p247_p1 }
   0x6   : > { %251 = sbr.rel (%p248_p2) target bundleno = 535 (0x217), region = 48 }
   0xb   : > { %v316_v0 = vld [vmem:[%s3308_s2] sm:$0x3]  ;;  %vm350_vm0 = vcmask 1041408   ;;  %p284_p3 = scmp.lt.s32.totalorder %s2358_s25, 7  ;;  %vm337_vm1 = vcmask 31744   ;;  %vm560_vm2 = vcmask 60416  }
   0xc   : > { %2680 = vmatprep.subr.msk.bf16.mxu1 %vm350_vm0, %v316_v0  ;;  %2679 = vmatprep.subr.msk.bf16.mxu0 %vm350_vm0, %v316_v0  ;;  %v352_v1 = vsel %vm350_vm0, %v316_v0, 0  ;;  %v435_v2 = vld [vmem:[%s3309_s3] sm:$0x3]  ;;  %vm562_vm3 = vcmask 57344   ;;  %v2728_v12 = vmov 0   ;;  %vm799_vm4 = vcmask 1043456  }
   0xd   : > { %2678 = vmatpush3.bf16.msra.mxu1 %v352_v1  ;;  %2568 = vmatpush3.bf16.msra.mxu0 %v352_v1  ;;  %s3331_s25 = smov (!%p284_p3, %s2358_s25), 7  ;;  %v469_v7 = vsel %vm350_vm0, %v435_v2, 0  ;;  %568 = vst.msk [vmem:[#allocation2 + $0x18] sm:$0xf] %vm560_vm2, %v2728_v12  ;;  %561 = vst.msk [vmem:[#allocation2] sm:$0xf] %vm560_vm2, %v2728_v12 }
   0xe   : > { %2681 = vmatprep.subr.msk.bf16.mxu1 %vm350_vm0, %v435_v2  ;;  %s2501_s30 = sshll.u32 %s3331_s25, 5  ;;  %569 = vst.msk [vmem:[#allocation2 + $0x1c] sm:$0x1] %vm562_vm3, %v2728_v12  ;;  %563 = vst.msk [vmem:[#allocation2 + $0x4] sm:$0x1] %vm562_vm3, %v2728_v12  ;;  %vm786_vm9 = vcmask 64512  }
   0xf   : > { %s288_s10 = scalar_lea.vmem %s3306_s0, %s2501_s30  ;;  %s293_s13 = scalar_lea.vmem %s3307_s1, %s2501_s30  ;;  %564 = vst.msk [vmem:[#allocation2 + $0x8] sm:$0xf] %vm560_vm2, %v2728_v12  ;;  %566 = vst.msk [vmem:[#allocation2 + $0x10] sm:$0xf] %vm560_vm2, %v2728_v12  ;;  %v765_v13 = vld [vmem:[%s3311_s5] sm:$0xf] }
  0x10   : > { %v2700_v3 = vld [vmem:[%s288_s10] sm:$0xff]   ;;  %v2701_v4 = vld [vmem:[%s288_s10 + $0x10] sm:$0xff]   ;;  %v2702_v5 = vld [vmem:[%s288_s10 + $0x8] sm:$0xff]   ;;  %565 = vst.msk [vmem:[#allocation2 + $0xc] sm:$0x1] %vm562_vm3, %v2728_v12  ;;  %2682 = vmatprep.subr.msk.bf16.mxu0 %vm799_vm4, %v765_v13  ;;  %v801_v14 = vsel %vm799_vm4, %v765_v13, 0 }
  0x11   : > { %2569 = vmatprep.mubr.msk.bf16.mxu0 %vm337_vm1, %v2700_v3  ;;  %2573 = vmatprep.mubr.msk.bf16.mxu1 %vm337_vm1, %v2701_v4  ;;  %v2703_v6 = vld [vmem:[%s288_s10 + $0x18] sm:$0xff]   ;;  %v2704_v8 = vld [vmem:[%s293_s13] sm:$0xff]   ;;  %v2705_v9 = vld [vmem:[%s293_s13 + $0x8] sm:$0xff]   ;;  %567 = vst.msk [vmem:[#allocation2 + $0x14] sm:$0x1] %vm562_vm3, %v2728_v12  ;;  %vm1133_vm12 = vcmask 1042432  }
  0x12   : > { %2570 = vmatmul.mubr.msk.bf16.vlgmr.msra.gmra.mxu0 %vm337_vm1, %v2702_v5  ;;  %2574 = vmatmul.mubr.msk.bf16.vlgmr.msra.gmra.mxu1 %vm337_vm1, %v2703_v6  ;;  %v2706_v10 = vld [vmem:[%s293_s13 + $0x10] sm:$0xff]   ;;  %v2707_v11 = vld [vmem:[%s293_s13 + $0x18] sm:$0xff]   ;;  %570 = vst.msk [vmem:[#allocation2 + $0x20] sm:$0xf] %vm560_vm2, %v2728_v12  ;;  %572 = vst.msk [vmem:[#allocation2 + $0x28] sm:$0xf] %vm560_vm2, %v2728_v12 }
  0x13   : > { %2578 = vmatpush3.bf16.msra.mxu1 %v469_v7  ;;  %2579 = vmatprep.mubr.msk.bf16.mxu1 %vm337_vm1, %v2704_v8  ;;  %571 = vst.msk [vmem:[#allocation2 + $0x24] sm:$0x1] %vm562_vm3, %v2728_v12  ;;  %573 = vst.msk [vmem:[#allocation2 + $0x2c] sm:$0x1] %vm562_vm3, %v2728_v12  ;;  %v2403_v15 = vld [vmem:[%s3311_s5 + $0x4] sm:$0xf] }
  0x14   : > { %574 = vst.msk [vmem:[#allocation2 + $0x30] sm:$0xf] %vm560_vm2, %v2728_v12  ;;  %576 = vst.msk [vmem:[#allocation2 + $0x38] sm:$0xf] %vm560_vm2, %v2728_v12  ;;  %2588 = vmatpush3.bf16.msra.mxu0 %v801_v14  ;;  %v2420_v16 = vld [vmem:[%s3311_s5 + $0x8] sm:$0xf]  ;;  %2683 = vmatprep.subr.msk.bf16.mxu1 %vm799_vm4, %v2403_v15 }
  0x15   : > { %575 = vst.msk [vmem:[#allocation2 + $0x34] sm:$0x1] %vm562_vm3, %v2728_v12  ;;  %577 = vst.msk [vmem:[#allocation2 + $0x3c] sm:$0x1] %vm562_vm3, %v2728_v12  ;;  %v1034_v17 = vsel %vm799_vm4, %v2403_v15, 0  ;;  %2684 = vmatprep.subr.msk.bf16.mxu0 %vm799_vm4, %v2420_v16  ;;  %v2868_v50 = vsel %vm799_vm4, %v2420_v16, 0 }
  0x16   : > { %578 = vst.msk [vmem:[#allocation2 + $0x40] sm:$0xf] %vm560_vm2, %v2728_v12  ;;  %580 = vst.msk [vmem:[#allocation2 + $0x48] sm:$0xf] %vm560_vm2, %v2728_v12  ;;  %v2429_v18 = vld [vmem:[%s3311_s5 + $0xc] sm:$0xf] }
  0x17   : > { %579 = vst.msk [vmem:[#allocation2 + $0x44] sm:$0x1] %vm562_vm3, %v2728_v12  ;;  %581 = vst.msk [vmem:[#allocation2 + $0x4c] sm:$0x1] %vm562_vm3, %v2728_v12  ;;  %v876_v19 = vld [vmem:[#allocation2] sm:$0xf] }
  0x18   : > { %v896_v22 = vshrl.u32 %v876_v19, 16  ;;  %v899_v23 = vshll.u32 %v876_v19, 16  ;;  %v2369_v26 = vld [vmem:[%s3310_s4] ss:$0 sm:$0xff]  ;;  %v2846_v33 = vld [vmem:[#allocation2 + $0x4] sm:$0x1] }
  0x19   : > { %v2848_v34 = vld [vmem:[#allocation2] sm:$0xe]  ;;  %v905_v37 = vshll.u32 %v2846_v33, 16  ;;  %vm696_vm5 = vsmask.f32 7938  ;;  %v1138_v53 = vrot.slane %v2846_v33, 5 }
  0x1a   : > { %2580 = vmatmul.mubr.msk.bf16.vlgmr.msra.gmra.mxu1 %vm337_vm1, %v2705_v9  ;;  %v898_v28 = vrot.slane %v896_v22, 4  ;;  %v901_v29 = vrot.slane %v899_v23, 5  ;;  %vm702_vm6 = vsmask.f32 256  ;;  %v2412_v42 = vrot.slane %v2848_v34, 9  ;;  %vm2913_vm7 = vmand %vm560_vm2, %vm696_vm5  ;;  %s2503_s15 = sshll.u32 %s3331_s25, 6 }
  0x1b   : > { %2583 = vmatprep.mubr.msk.bf16.mxu1 %vm337_vm1, %v2706_v10  ;;  %2598 = vmatpush3.bf16.msra.mxu1 %v1034_v17  ;;  %v2855_v43 = vld [vmem:[%s3311_s5 + $0x10] sm:$0xf]  ;;  %v2860_v47 = vld [vmem:[%s3311_s5 + $0x14] sm:$0xf]  ;;  %v2865_v48 = vld [vmem:[%s3311_s5 + $0x18] sm:$0xf]  ;;  %s3275_s17 = scalar_lea.vmem %s3313_s7, %s2503_s15 }
  0x1c   : > { %2685 = vmatprep.subr.msk.bf16.mxu1 %vm799_vm4, %v2429_v18  ;;  %v902_v36 = vor.u32 %v901_v29, %v898_v28  ;;  %v2872_v52 = vrot.slane %v905_v37, 5  ;;  %v2878_v54 = vld [vmem:[%s3311_s5 + $0x1c] sm:$0xf]  ;;  %v2883_v59 = vld [vmem:[%s3311_s5 + $0x20] sm:$0xf]  ;;  %v2888_v62 = vsel %vm799_vm4, %v2429_v18, 0  ;;  %vm2919_vm8 = vmand %vm562_vm3, %vm702_vm6 }
  0x1d   : > { %v2885_v60 = vld [vmem:[#allocation2 + $0x48] sm:$0xf]  ;;  %v2892_v63 = vsel %vm799_vm4, %v2855_v43, 0  ;;  %v2896_v0 = vsel %vm799_vm4, %v2860_v47, 0  ;;  %v2900_v1 = vsel %vm799_vm4, %v2865_v48, 0  ;;  %v2904_v8 = vsel %vm799_vm4, %v2878_v54, 0 }
  0x1e   : > { %v2870_v51 = vrot.slane %v902_v36, 4  ;;  %v2908_v9 = vsel %vm799_vm4, %v2883_v59, 0  ;;  %v2010_v10 = vshrl.u32 %v2885_v60, 16  ;;  %v713_v23 = vld [vmem:[#allocation2 + $0x18] sm:$0xf]  ;;  %vm1134_vm13 = vcmask 1046532  }
  0x1f   : > { %vm892_vm10 = vsmask.f32 3328  ;;  %vm893_vm11 = vsmask.f32 7440  ;;  %vm2990_vm15 = vmor %vm1133_vm12, %vm1134_vm13 }
  0x20   : > { %vm2960_vm14 = vmor %vm892_vm10, %vm893_vm11 }
  0x22   : > { %2584 = vmatmul.mubr.msk.bf16.gmra.mxu1 %vm337_vm1, %v2707_v11 }
  0xd2   : > { %v2571_v20 = vpop.f32.mrf.mxu0  ;;  %v2575_v21 = vpop.f32.mrf.mxu1 }
  0xd3   : > { %v421_v30 = vadd.f32 %v2571_v20, %v2369_v26  ;;  %v425_v6 = vadd.f32 %v2575_v21, %v2369_v26 }
  0xd4   : > { %v388_v24 = vpop.f32.mrf.mxu0  ;;  %v404_v25 = vpop.f32.mrf.mxu1 }
  0xd5   : > { %v419_v38 = vadd.f32 %v2369_v26, %v388_v24  ;;  %v423_v11 = vadd.f32 %v2369_v26, %v404_v25 }
  0xd6   : > { %v2576_v27 = vpop.f32.mrf.mxu1  ;;  %v2572_v31 = vpop.f32.mrf.mxu0 }
  0xd7   : > { %v422_v44 = vadd.f32 %v2572_v31, %v2369_v26  ;;  %v426_v15 = vadd.f32 %v2576_v27, %v2369_v26 }
  0xd8   : > { %v407_v32 = vpop.f32.mrf.mxu1  ;;  %v391_v40 = vpop.f32.mrf.mxu0 }
  0xd9   : > { %v420_v55 = vadd.f32 %v2369_v26, %v391_v40  ;;  %v424_v16 = vadd.f32 %v2369_v26, %v407_v32  ;;  %v716_v26 = vld [vmem:[#allocation2 + $0x1c] sm:$0x1]  ;;  %v704_v40 = vld [vmem:[#allocation2 + $0xc] sm:$0x1] }
  0xda   : > { %v2581_v35 = vpop.f32.mrf.mxu1 }
  0xdb   : > { %v538_v39 = vadd.f32 %v2581_v35, %v421_v30 }
  0xdc   : > { %v505_v41 = vpop.f32.mrf.mxu1 }
  0xdd   : > { %v546_v45 = vmul.f32 0.2, %v538_v39  ;;  %v536_v46 = vadd.f32 %v505_v41, %v419_v38  ;;  %v698_v38 = vld [vmem:[#allocation2 + $0x8] sm:$0xf] }
  0xde   : > { %v2582_v49 = vpop.f32.mrf.mxu1 }
  0xdf   : > { %v554_v56 = vmax.f32 %v538_v39, %v546_v45  ;;  %v544_v57 = vmul.f32 0.2, %v536_v46  ;;  %v539_v58 = vadd.f32 %v2582_v49, %v422_v44 }
  0xe0   : > { %v508_v61 = vpop.f32.mrf.mxu1 }
  0xe1   : > { %v2506_v2 = vpack.c.bf16 %v554_v56, %v554_v56  ;;  %v552_v3 = vmax.f32 %v536_v46, %v544_v57  ;;  %v547_v4 = vmul.f32 0.2, %v539_v58  ;;  %v537_v5 = vadd.f32 %v508_v61, %v420_v55 }
  0xe2   : > { %v2585_v7 = vpop.f32.mrf.mxu1 }
  0xe3   : > { %v631_v12 = vshrl.u32 %v2506_v2, 16  ;;  %v2504_v13 = vpack.c.bf16 %v552_v3, %v552_v3  ;;  %v555_v14 = vmax.f32 %v539_v58, %v547_v4  ;;  %v545_v17 = vmul.f32 0.2, %v537_v5 }
  0xe4   : > { %v542_v18 = vadd.f32 %v2585_v7, %v425_v6  ;;  %v521_v19 = vpop.f32.mrf.mxu1  ;;  %v634_v21 = vshll.u32 %v2506_v2, 16  ;;  %v719_v7 = vld [vmem:[#allocation2 + $0x20] sm:$0xf] }
  0xe5   : > { %v633_v20 = vrot.slane %v631_v12, 7  ;;  %v615_v24 = vshrl.u32 %v2504_v13, 16  ;;  %v2507_v28 = vpack.c.bf16 %v555_v14, %v555_v14  ;;  %v618_v27 = vshll.u32 %v2504_v13, 16 }
  0xe6   : > { %v553_v29 = vmax.f32 %v537_v5, %v545_v17  ;;  %v550_v30 = vmul.f32 0.2, %v542_v18  ;;  %v540_v31 = vadd.f32 %v521_v19, %v423_v11  ;;  %v2586_v32 = vpop.f32.mrf.mxu1  ;;  %v722_v11 = vld [vmem:[#allocation2 + $0x24] sm:$0x1]  ;;  %v707_v19 = vld [vmem:[#allocation2 + $0x10] sm:$0xf] }
  0xe7   : > { %v636_v35 = vor.u32 %v634_v21, %v633_v20  ;;  %v637_v36 = vrot.slane %v633_v20, 4  ;;  %v617_v37 = vrot.slane %v615_v24, 7  ;;  %v639_v39 = vshrl.u32 %v2507_v28, 16  ;;  %v710_v21 = vld [vmem:[#allocation2 + $0x14] sm:$0x1] }
  0xe8   : > { %v642_v41 = vshll.u32 %v2507_v28, 16  ;;  %v2505_v44 = vpack.c.bf16 %v553_v29, %v553_v29  ;;  %v558_v45 = vmax.f32 %v542_v18, %v550_v30  ;;  %v548_v46 = vmul.f32 0.2, %v540_v31  ;;  %v524_v4 = vpop.f32.mrf.mxu1 }
  0xe9   : > { %v714_v49 = vsel %vm2913_vm7, %v636_v35, %v713_v23  ;;  %v717_v55 = vsel %vm2919_vm8, %v637_v36, %v716_v26  ;;  %v620_v56 = vor.u32 %v618_v27, %v617_v37  ;;  %v621_v57 = vrot.slane %v617_v37, 4  ;;  %v740_v36 = vld [vmem:[#allocation2 + $0x3c] sm:$0x1] }
  0xea   : > { %715 = vst [vmem:[#allocation2 + $0x18] sm:$0xf] %v714_v49  ;;  %718 = vst [vmem:[#allocation2 + $0x1c] sm:$0x1] %v717_v55  ;;  %v641_v58 = vrot.slane %v639_v39, 7  ;;  %v623_v61 = vshrl.u32 %v2505_v44, 16  ;;  %v2510_v3 = vpack.c.bf16 %v558_v45, %v558_v45  ;;  %v556_v12 = vmax.f32 %v540_v31, %v548_v46 }
  0xeb   : > { %v626_v2 = vshll.u32 %v2505_v44, 16  ;;  %v699_v5 = vsel %vm2913_vm7, %v620_v56, %v698_v38  ;;  %v705_v6 = vsel %vm2919_vm8, %v621_v57, %v704_v40  ;;  %v543_v13 = vadd.f32 %v2586_v32, %v426_v15  ;;  %v737_v31 = vld [vmem:[#allocation2 + $0x38] sm:$0xf]  ;;  %v728_v57 = vld [vmem:[#allocation2 + $0x2c] sm:$0x1] }
  0xec   : > { %700 = vst [vmem:[#allocation2 + $0x8] sm:$0xf] %v699_v5  ;;  %706 = vst [vmem:[#allocation2 + $0xc] sm:$0x1] %v705_v6  ;;  %v644_v14 = vor.u32 %v642_v41, %v641_v58  ;;  %v645_v17 = vrot.slane %v641_v58, 4  ;;  %v625_v18 = vrot.slane %v623_v61, 7  ;;  %v2508_v23 = vpack.c.bf16 %v556_v12, %v556_v12 }
  0xed   : > { %v663_v20 = vshrl.u32 %v2510_v3, 16  ;;  %v551_v24 = vmul.f32 0.2, %v543_v13  ;;  %v541_v28 = vadd.f32 %v524_v4, %v424_v16  ;;  %v2013_v26 = vshll.u32 %v2885_v60, 16  ;;  %v725_v41 = vld [vmem:[#allocation2 + $0x28] sm:$0xf] }
  0xee   : > { %v720_v27 = vsel %vm2913_vm7, %v644_v14, %v719_v7  ;;  %v723_v15 = vsel %vm2919_vm8, %v645_v17, %v722_v11  ;;  %v628_v29 = vor.u32 %v626_v2, %v625_v18  ;;  %v629_v30 = vrot.slane %v625_v18, 4 }
  0xef   : > { %721 = vst [vmem:[#allocation2 + $0x20] sm:$0xf] %v720_v27  ;;  %724 = vst [vmem:[#allocation2 + $0x24] sm:$0x1] %v723_v15  ;;  %v665_v32 = vrot.slane %v663_v20, 7  ;;  %v666_v35 = vshll.u32 %v2510_v3, 16  ;;  %v559_v38 = vmax.f32 %v543_v13, %v551_v24 }
  0xf0   : > { %v647_v37 = vshrl.u32 %v2508_v23, 16  ;;  %v708_v16 = vsel %vm2913_vm7, %v628_v29, %v707_v19  ;;  %v711_v39 = vsel %vm2919_vm8, %v629_v30, %v710_v21  ;;  %v650_v40 = vshll.u32 %v2508_v23, 16  ;;  %v743_v20 = vld [vmem:[#allocation2 + $0x40] sm:$0xf]  ;;  %v746_v21 = vld [vmem:[#allocation2 + $0x44] sm:$0x1] }
  0xf1   : > { %v549_v44 = vmul.f32 0.2, %v541_v28  ;;  %709 = vst [vmem:[#allocation2 + $0x10] sm:$0xf] %v708_v16  ;;  %712 = vst [vmem:[#allocation2 + $0x14] sm:$0x1] %v711_v39  ;;  %v668_v45 = vor.u32 %v666_v35, %v665_v32  ;;  %v2511_v55 = vpack.c.bf16 %v559_v38, %v559_v38 }
  0xf2   : > { %v669_v46 = vrot.slane %v665_v32, 4  ;;  %v649_v49 = vrot.slane %v647_v37, 7  ;;  %v882_v56 = vld [vmem:[#allocation2 + $0x18] sm:$0xf]  ;;  %v2942_v3 = vrot.slane %v2010_v10, 4 }
  0xf3   : > { %v557_v58 = vmax.f32 %v541_v28, %v549_v44  ;;  %v938_v61 = vshrl.u32 %v882_v56, 16  ;;  %v941_v2 = vshll.u32 %v882_v56, 16  ;;  %v738_v4 = vsel %vm2913_vm7, %v668_v45, %v737_v31  ;;  %v2708_v11 = vld [vmem:[#allocation2] ss:$8 sps:$4 sm:$0xff]   ;;  %v2948_v18 = vld [vmem:[#allocation2 + $0xc] sm:$0x1] }
  0xf4   : > { %v741_v5 = vsel %vm2919_vm8, %v669_v46, %v740_v36  ;;  %v652_v6 = vor.u32 %v650_v40, %v649_v49  ;;  %v653_v7 = vrot.slane %v649_v49, 4  ;;  %739 = vst [vmem:[#allocation2 + $0x38] sm:$0xf] %v738_v4  ;;  %v671_v12 = vshrl.u32 %v2511_v55, 16  ;;  %v878_v17 = vld [vmem:[#allocation2 + $0x8] sm:$0xf]  ;;  %2589 = vmatprep.mubr.msk.bf16.mxu0 %vm786_vm9, %v2708_v11 }
  0xf5   : > { %742 = vst [vmem:[#allocation2 + $0x3c] sm:$0x1] %v741_v5  ;;  %v674_v13 = vshll.u32 %v2511_v55, 16  ;;  %v2509_v14 = vpack.c.bf16 %v557_v58, %v557_v58  ;;  %v910_v23 = vshrl.u32 %v878_v17, 16  ;;  %v913_v24 = vshll.u32 %v878_v17, 16 }
  0xf6   : > { %v726_v10 = vsel %vm2913_vm7, %v652_v6, %v725_v41  ;;  %v729_v19 = vsel %vm2919_vm8, %v653_v7, %v728_v57  ;;  %v2955_v28 = vld [vmem:[#allocation2 + $0x1c] sm:$0x1]  ;;  %v673_v27 = vrot.slane %v671_v12, 7  ;;  %v919_v30 = vshll.u32 %v2948_v18, 16  ;;  %v731_v31 = vld [vmem:[#allocation2 + $0x30] sm:$0xf] }
  0xf7   : > { %727 = vst [vmem:[#allocation2 + $0x28] sm:$0xf] %v726_v10  ;;  %730 = vst [vmem:[#allocation2 + $0x2c] sm:$0x1] %v729_v19  ;;  %v655_v15 = vshrl.u32 %v2509_v14, 16  ;;  %v658_v29 = vshll.u32 %v2509_v14, 16  ;;  %v908_v45 = vsel %vm2960_vm14, %v2870_v51, %v2872_v52 }
  0xf8   : > { %v734_v32 = vld [vmem:[#allocation2 + $0x34] sm:$0x1]  ;;  %v912_v36 = vrot.slane %v910_v23, 4  ;;  %v915_v37 = vrot.slane %v913_v24, 5  ;;  %v940_v38 = vrot.slane %v938_v61, 4  ;;  %v943_v16 = vrot.slane %v941_v2, 5 }
  0xf9   : > { %v676_v39 = vor.u32 %v674_v13, %v673_v27  ;;  %v677_v40 = vrot.slane %v673_v27, 4  ;;  %v657_v41 = vrot.slane %v655_v15, 7  ;;  %v2709_v44 = vld [vmem:[#allocation2 + $0x10] ss:$8 sps:$4 sm:$0xff]   ;;  %v921_v49 = vrot.slane %v919_v30, 5 }
  0xfa   : > { %v916_v46 = vor.u32 %v915_v37, %v912_v36  ;;  %v880_v55 = vld [vmem:[#allocation2 + $0x10] sm:$0xf]  ;;  %v2968_v56 = vld [vmem:[#allocation2 + $0x14] sm:$0x1]  ;;  %v944_v57 = vor.u32 %v943_v16, %v940_v38  ;;  %v947_v58 = vshll.u32 %v2955_v28, 16  ;;  %2590 = vmatmul.mubr.msk.bf16.vlgmr.msra.gmra.mxu0 %vm786_vm9, %v2709_v44 }
  0xfb   : > { %v744_v61 = vsel %vm2913_vm7, %v676_v39, %v743_v20  ;;  %v747_v2 = vsel %vm2919_vm8, %v677_v40, %v746_v21  ;;  %v660_v4 = vor.u32 %v658_v29, %v657_v41  ;;  %v661_v5 = vrot.slane %v657_v41, 4  ;;  %v1110_v6 = vld [vmem:[#allocation2 + $0x8] sm:$0xe]  ;;  %2608 = vmatpush3.bf16.msra.mxu0 %v2868_v50  ;;  %v884_v10 = vld [vmem:[#allocation2 + $0x20] sm:$0xf] }
  0xfc   : > { %745 = vst [vmem:[#allocation2 + $0x40] sm:$0xf] %v744_v61  ;;  %748 = vst [vmem:[#allocation2 + $0x44] sm:$0x1] %v747_v2  ;;  %v917_v51 = vrot.slane %v916_v46, 4  ;;  %v924_v52 = vshrl.u32 %v880_v55, 16  ;;  %2686 = vmatprep.subr.msk.bf16.mxu0 %vm799_vm4, %v2855_v43  ;;  %v1139_v43 = vsel %vm2990_vm15, %v2412_v42, %v1138_v53 }
  0xfd   : > { %v927_v7 = vshll.u32 %v880_v55, 16  ;;  %v933_v11 = vshll.u32 %v2968_v56, 16  ;;  %v732_v12 = vsel %vm2913_vm7, %v660_v4, %v731_v31  ;;  %v735_v13 = vsel %vm2919_vm8, %v661_v5, %v734_v32  ;;  %v2982_v19 = vld [vmem:[#allocation2 + $0x24] sm:$0x1]  ;;  %v1112_v37 = vld [vmem:[#allocation2 + $0x18] sm:$0xe] }
  0xfe   : > { %v945_v14 = vrot.slane %v944_v57, 4  ;;  %v949_v17 = vrot.slane %v947_v58, 5  ;;  %733 = vst [vmem:[#allocation2 + $0x30] sm:$0xf] %v732_v12  ;;  %736 = vst [vmem:[#allocation2 + $0x34] sm:$0x1] %v735_v13  ;;  %v922_v20 = vsel %vm2960_vm14, %v917_v51, %v921_v49 }
  0xff   : > { %v2710_v50 = vld [vmem:[#allocation2 + $0x20] ss:$8 sps:$4 sm:$0xff]   ;;  %v926_v21 = vrot.slane %v924_v52, 4  ;;  %v929_v22 = vrot.slane %v927_v7, 5  ;;  %v2404_v23 = vcombine.low %v908_v45, %v922_v20  ;;  %v935_v24 = vrot.slane %v933_v11, 5 }
 0x100   : > { %v2413_v27 = vrot.slane %v1110_v6, 9  ;;  %v886_v15 = vld [vmem:[#allocation2 + $0x28] sm:$0xf]  ;;  %v3000_v29 = vld [vmem:[#allocation2 + $0x2c] sm:$0x1]  ;;  %2593 = vmatprep.mubr.msk.bf16.mxu0 %vm786_vm9, %v2710_v50  ;;  %v1142_v31 = vrot.slane %v2948_v18, 5  ;;  %v950_v39 = vsel %vm2960_vm14, %v945_v14, %v949_v17 }
 0x101   : > { %v930_v30 = vor.u32 %v929_v22, %v926_v21  ;;  %v952_v32 = vshrl.u32 %v884_v10, 16  ;;  %v955_v36 = vshll.u32 %v884_v10, 16  ;;  %2599 = vmatprep.mubr.msk.bf16.mxu1 %vm786_vm9, %v2404_v23  ;;  %v961_v33 = vshll.u32 %v2982_v19, 16  ;;  %v1111_v53 = vld [vmem:[#allocation2 + $0x10] sm:$0xe] }
 0x102   : > { %v966_v34 = vshrl.u32 %v886_v15, 16  ;;  %v969_v38 = vshll.u32 %v886_v15, 16  ;;  %v975_v42 = vshll.u32 %v3000_v29, 16  ;;  %v1143_v18 = vsel %vm2990_vm15, %v2413_v27, %v1142_v31  ;;  %v890_v61 = vld [vmem:[#allocation2 + $0x38] sm:$0xf] }
 0x103   : > { %v931_v16 = vrot.slane %v930_v30, 4  ;;  %v954_v40 = vrot.slane %v952_v32, 4  ;;  %v957_v41 = vrot.slane %v955_v36, 5  ;;  %v963_v44 = vrot.slane %v961_v33, 5  ;;  %v891_v14 = vld [vmem:[#allocation2 + $0x3c] sm:$0x1] }
 0x104   : > { %v968_v45 = vrot.slane %v966_v34, 4  ;;  %v971_v46 = vrot.slane %v969_v38, 5  ;;  %v977_v57 = vrot.slane %v975_v42, 5  ;;  %v2414_v58 = vrot.slane %v1111_v53, 9  ;;  %v1113_v21 = vld [vmem:[#allocation2 + $0x20] sm:$0xe] }
 0x105   : > { %v936_v49 = vsel %vm2960_vm14, %v931_v16, %v935_v24  ;;  %v958_v55 = vor.u32 %v957_v41, %v954_v40  ;;  %v2711_v2 = vld [vmem:[#allocation2 + $0x30] ss:$8 sps:$4 sm:$0xff]   ;;  %v1146_v6 = vrot.slane %v2968_v56, 5  ;;  %v2415_v51 = vrot.slane %v1112_v37, 9  ;;  %v889_v13 = vld [vmem:[#allocation2 + $0x34] sm:$0x1] }
 0x106   : > { %v2405_v4 = vcombine.low %v936_v49, %v950_v39  ;;  %v972_v5 = vor.u32 %v971_v46, %v968_v45  ;;  %v2421_v52 = vcombine.low %v1139_v43, %v1143_v18  ;;  %v1150_v11 = vrot.slane %v2955_v28, 5  ;;  %v888_v12 = vld [vmem:[#allocation2 + $0x30] sm:$0xf]  ;;  %2594 = vmatmul.mubr.msk.bf16.gmra.mxu0 %vm786_vm9, %v2711_v2  ;;  %v1114_v23 = vld [vmem:[#allocation2 + $0x28] sm:$0xe] }
 0x107   : > { %v959_v7 = vrot.slane %v958_v55, 4  ;;  %v1147_v10 = vsel %vm2990_vm15, %v2414_v58, %v1146_v6  ;;  %v980_v50 = vshrl.u32 %v888_v12, 16  ;;  %v983_v20 = vshll.u32 %v888_v12, 16  ;;  %v1115_v31 = vld [vmem:[#allocation2 + $0x30] sm:$0xe] }
 0x108   : > { %2600 = vmatmul.mubr.msk.bf16.vlgmr.msra.gmra.mxu1 %vm786_vm9, %v2405_v4  ;;  %v973_v17 = vrot.slane %v972_v5, 4  ;;  %2609 = vmatprep.mubr.msk.bf16.mxu0 %vm786_vm9, %v2421_v52  ;;  %v1151_v28 = vsel %vm2990_vm15, %v2415_v51, %v1150_v11  ;;  %v994_v22 = vshrl.u32 %v890_v61, 16  ;;  %v3027_v24 = vrot.slane %v2013_v26, 5  ;;  %v1116_v33 = vld [vmem:[#allocation2 + $0x38] sm:$0xe] }
 0x109   : > { %v964_v56 = vsel %vm2960_vm14, %v959_v7, %v963_v44  ;;  %2618 = vmatpush3.bf16.msra.mxu1 %v2888_v62  ;;  %v982_v27 = vrot.slane %v980_v50, 4  ;;  %v985_v15 = vrot.slane %v983_v20, 5  ;;  %v989_v30 = vshll.u32 %v889_v13, 16  ;;  %v1388_v34 = vld [vmem:[#allocation2 + $0x8] sm:$0xf] }
 0x10a   : > { %v978_v43 = vsel %vm2960_vm14, %v973_v17, %v977_v57  ;;  %2687 = vmatprep.subr.msk.bf16.mxu1 %vm799_vm4, %v2860_v47  ;;  %v2422_v32 = vcombine.low %v1147_v10, %v1151_v28  ;;  %v996_v36 = vrot.slane %v994_v22, 4  ;;  %v997_v37 = vshll.u32 %v890_v61, 16  ;;  %v3034_v53 = vld [vmem:[#allocation2 + $0xc] sm:$0x1]  ;;  %v1390_v57 = vld [vmem:[#allocation2 + $0x10] sm:$0xf] }
 0x10b   : > { %v2406_v62 = vcombine.low %v964_v56, %v978_v43  ;;  %v986_v38 = vor.u32 %v985_v15, %v982_v27  ;;  %v1003_v60 = vshll.u32 %v891_v14, 16  ;;  %v2416_v26 = vrot.slane %v1113_v21, 9  ;;  %v3045_v2 = vld [vmem:[#allocation2 + $0x14] sm:$0x1]  ;;  %v1392_v5 = vld [vmem:[#allocation2 + $0x18] sm:$0xf] }
 0x10c   : > { %v1154_v42 = vrot.slane %v2982_v19, 5  ;;  %v999_v16 = vrot.slane %v997_v37, 5  ;;  %v2417_v39 = vrot.slane %v1114_v23, 9  ;;  %v1158_v40 = vrot.slane %v3000_v29, 5  ;;  %v3051_v11 = vld [vmem:[#allocation2 + $0x1c] sm:$0x1] }
 0x10d   : > { %2603 = vmatprep.mubr.msk.bf16.mxu1 %vm786_vm9, %v2406_v62  ;;  %v2418_v47 = vrot.slane %v1115_v31, 9  ;;  %v987_v41 = vrot.slane %v986_v38, 4  ;;  %v991_v18 = vrot.slane %v989_v30, 5  ;;  %v1162_v45 = vrot.slane %v889_v13, 5  ;;  %v2712_v10 = vld [vmem:[#allocation2 + $0x8] ss:$8 sps:$4 sm:$0xff]  }
 0x10e   : > { %v1155_v44 = vsel %vm2990_vm15, %v2416_v26, %v1154_v42  ;;  %v1000_v46 = vor.u32 %v999_v16, %v996_v36  ;;  %v1159_v49 = vsel %vm2990_vm15, %v2417_v39, %v1158_v40  ;;  %v2419_v19 = vrot.slane %v1116_v33, 9  ;;  %2610 = vmatmul.mubr.msk.bf16.vlgmr.msra.gmra.mxu0 %vm786_vm9, %v2422_v32  ;;  %v1394_v56 = vld [vmem:[#allocation2 + $0x20] sm:$0xf]  ;;  %v3061_v43 = vld [vmem:[#allocation2 + $0x24] sm:$0x1] }
 0x10f   : > { %v1166_v55 = vrot.slane %v891_v14, 5  ;;  %v1005_v58 = vrot.slane %v1003_v60, 5  ;;  %v2423_v61 = vcombine.low %v1155_v44, %v1159_v49  ;;  %v1163_v29 = vsel %vm2990_vm15, %v2418_v47, %v1162_v45  ;;  %2628 = vmatpush3.bf16.msra.mxu0 %v2892_v63  ;;  %v1396_v62 = vld [vmem:[#allocation2 + $0x28] sm:$0xf]  ;;  %v3067_v42 = vld [vmem:[#allocation2 + $0x2c] sm:$0x1] }
 0x110   : > { %v1405_v4 = vshrl.u32 %v1388_v34, 16  ;;  %v992_v6 = vsel %vm2960_vm14, %v987_v41, %v991_v18  ;;  %v1001_v51 = vrot.slane %v1000_v46, 4  ;;  %v1408_v52 = vshll.u32 %v1388_v34, 16  ;;  %2688 = vmatprep.subr.msk.bf16.mxu0 %vm799_vm4, %v2865_v48  ;;  %v1398_v47 = vld [vmem:[#allocation2 + $0x30] sm:$0xf] }
 0x111   : > { %v1414_v7 = vshll.u32 %v3034_v53, 16  ;;  %2613 = vmatprep.mubr.msk.bf16.mxu0 %vm786_vm9, %v2423_v61  ;;  %v1167_v12 = vsel %vm2990_vm15, %v2419_v19, %v1166_v55  ;;  %v1419_v14 = vshrl.u32 %v1390_v57, 16  ;;  %v1422_v17 = vshll.u32 %v1390_v57, 16  ;;  %v2713_v49 = vld [vmem:[#allocation2 + $0x18] ss:$8 sps:$4 sm:$0xff]  }
 0x112   : > { %v1407_v13 = vrot.slane %v1405_v4, 4  ;;  %v1006_v63 = vsel %vm2960_vm14, %v1001_v51, %v1005_v58  ;;  %v2424_v50 = vcombine.low %v1163_v29, %v1167_v12  ;;  %v1410_v20 = vrot.slane %v1408_v52, 5  ;;  %v3074_v57 = vld [vmem:[#allocation2 + $0x34] sm:$0x1]  ;;  %v1618_v29 = vld [vmem:[#allocation2 + $0x8] sm:$0xe] }
 0x113   : > { %v1428_v21 = vshll.u32 %v3045_v2, 16  ;;  %v2407_v28 = vcombine.low %v992_v6, %v1006_v63  ;;  %v1421_v22 = vrot.slane %v1419_v14, 4  ;;  %v1424_v23 = vrot.slane %v1422_v17, 5  ;;  %v1400_v63 = vld [vmem:[#allocation2 + $0x38] sm:$0xf] }
 0x114   : > { %v1433_v27 = vshrl.u32 %v1392_v5, 16  ;;  %v1411_v15 = vor.u32 %v1410_v20, %v1407_v13  ;;  %v1416_v30 = vrot.slane %v1414_v7, 5  ;;  %v1436_v31 = vshll.u32 %v1392_v5, 16  ;;  %v2714_v5 = vld [vmem:[#allocation2 + $0x28] ss:$8 sps:$4 sm:$0xff]  }
 0x115   : > { %v1442_v48 = vshll.u32 %v3051_v11, 16  ;;  %2604 = vmatmul.mubr.msk.bf16.gmra.mxu1 %vm786_vm9, %v2407_v28  ;;  %v1425_v32 = vor.u32 %v1424_v23, %v1421_v22  ;;  %v1447_v37 = vshrl.u32 %v1394_v56, 16  ;;  %v1450_v33 = vshll.u32 %v1394_v56, 16  ;;  %v1619_v7 = vld [vmem:[#allocation2 + $0x10] sm:$0xe] }
 0x116   : > { %v1435_v36 = vrot.slane %v1433_v27, 4  ;;  %2619 = vmatprep.mubr.msk.bf16.mxu1 %vm786_vm9, %v2712_v10  ;;  %v1412_v34 = vrot.slane %v1411_v15, 4  ;;  %v1430_v38 = vrot.slane %v1428_v21, 5  ;;  %v1438_v60 = vrot.slane %v1436_v31, 5  ;;  %2614 = vmatmul.mubr.msk.bf16.gmra.mxu0 %vm786_vm9, %v2424_v50  ;;  %v3079_v56 = vld [vmem:[#allocation2 + $0x3c] sm:$0x1] }
 0x117   : > { %v1456_v26 = vshll.u32 %v3061_v43, 16  ;;  %v1426_v16 = vrot.slane %v1425_v32, 4  ;;  %v1449_v39 = vrot.slane %v1447_v37, 4  ;;  %v1452_v40 = vrot.slane %v1450_v33, 5  ;;  %v1402_v15 = vld [vmem:[#allocation2 + $0x40] sm:$0xf] }
 0x118   : > { %v1461_v41 = vshrl.u32 %v1396_v62, 16  ;;  %v1417_v18 = vsel %vm2960_vm14, %v1412_v34, %v1416_v30  ;;  %v1439_v44 = vor.u32 %v1438_v60, %v1435_v36  ;;  %v1444_v45 = vrot.slane %v1442_v48, 5  ;;  %v3090_v36 = vld [vmem:[#allocation2 + $0x44] sm:$0x1]  ;;  %v1620_v34 = vld [vmem:[#allocation2 + $0x18] sm:$0xe] }
 0x119   : > { %v1464_v46 = vshll.u32 %v1396_v62, 16  ;;  %v1431_v19 = vsel %vm2960_vm14, %v1426_v16, %v1430_v38  ;;  %v1453_v55 = vor.u32 %v1452_v40, %v1449_v39  ;;  %v1470_v61 = vshll.u32 %v3067_v42, 16 }
 0x11a   : > { %v1463_v58 = vrot.slane %v1461_v41, 4  ;;  %v2439_v4 = vcombine.low %v1417_v18, %v1431_v19  ;;  %v1440_v6 = vrot.slane %v1439_v44, 4  ;;  %v1475_v52 = vshrl.u32 %v1398_v47, 16  ;;  %v1622_v18 = vld [vmem:[#allocation2 + $0x28] sm:$0xe] }
 0x11b   : > { %v1466_v51 = vrot.slane %v1464_v46, 5  ;;  %v1454_v12 = vrot.slane %v1453_v55, 4  ;;  %v1458_v13 = vrot.slane %v1456_v26, 5  ;;  %v1472_v14 = vrot.slane %v1470_v61, 5  ;;  %v1621_v26 = vld [vmem:[#allocation2 + $0x20] sm:$0xe] }
 0x11c   : > { %v1478_v17 = vshll.u32 %v1398_v47, 16  ;;  %2629 = vmatprep.mubr.msk.bf16.mxu0 %vm786_vm9, %v2439_v4  ;;  %v1477_v50 = vrot.slane %v1475_v52, 4  ;;  %v1484_v20 = vshll.u32 %v3074_v57, 16  ;;  %v2447_v21 = vrot.slane %v1618_v29, 9  ;;  %v2715_v44 = vld [vmem:[#allocation2 + $0x38] ss:$8 sps:$4 sm:$0xff]  }
 0x11d   : > { %v1467_v10 = vor.u32 %v1466_v51, %v1463_v58  ;;  %2620 = vmatmul.mubr.msk.bf16.vlgmr.msra.gmra.mxu1 %vm786_vm9, %v2713_v49  ;;  %v1445_v28 = vsel %vm2960_vm14, %v1440_v6, %v1444_v45  ;;  %v1459_v22 = vsel %vm2960_vm14, %v1454_v12, %v1458_v13  ;;  %v1644_v27 = vrot.slane %v3034_v53, 5  ;;  %v1623_v19 = vld [vmem:[#allocation2 + $0x30] sm:$0xe]  ;;  %v3111_v4 = vld [vmem:[#allocation2 + $0x38] sm:$0xe] }
 0x11e   : > { %v1480_v23 = vrot.slane %v1478_v17, 5  ;;  %2623 = vmatprep.mubr.msk.bf16.mxu1 %vm786_vm9, %v2714_v5  ;;  %2638 = vmatpush3.bf16.msra.mxu1 %v2896_v0  ;;  %v2440_v30 = vcombine.low %v1445_v28, %v1459_v22  ;;  %v2448_v48 = vrot.slane %v1619_v7, 9  ;;  %v1648_v62 = vrot.slane %v3045_v2, 5  ;;  %v3113_v5 = vld [vmem:[#allocation2 + $0x4c] sm:$0x1] }
 0x11f   : > { %v1468_v31 = vrot.slane %v1467_v10, 4  ;;  %v1489_v37 = vshrl.u32 %v1400_v63, 16  ;;  %v1492_v33 = vshll.u32 %v1400_v63, 16  ;;  %2689 = vmatprep.subr.msk.bf16.mxu1 %vm799_vm4, %v2878_v54  ;;  %v2016_v53 = vor.u32 %v3027_v24, %v2942_v3  ;;  %v1895_v10 = vld [vmem:[#allocation2 + $0x10] sm:$0xf] }
 0x120   : > { %v1481_v32 = vor.u32 %v1480_v23, %v1477_v50  ;;  %2630 = vmatmul.mubr.msk.bf16.vlgmr.msra.gmra.mxu0 %vm786_vm9, %v2440_v30  ;;  %v1486_v0 = vrot.slane %v1484_v20, 5  ;;  %v1645_v38 = vsel %vm2990_vm15, %v2447_v21, %v1644_v27  ;;  %v1649_v2 = vsel %vm2990_vm15, %v2448_v48, %v1648_v62  ;;  %v1897_v22 = vld [vmem:[#allocation2 + $0x18] sm:$0xf]  ;;  %v3140_v62 = vld [vmem:[#allocation2 + $0x1c] sm:$0x1] }
 0x121   : > { %v1503_v60 = vshrl.u32 %v1402_v15, 16  ;;  %2648 = vmatpush3.bf16.msra.mxu0 %v2900_v1  ;;  %v1491_v39 = vrot.slane %v1489_v37, 4  ;;  %v1494_v40 = vrot.slane %v1492_v33, 5  ;;  %v1498_v54 = vshll.u32 %v3079_v56, 16  ;;  %v1899_v33 = vld [vmem:[#allocation2 + $0x20] sm:$0xf] }
 0x122   : > { %v1482_v16 = vrot.slane %v1481_v32, 4  ;;  %v1473_v3 = vsel %vm2960_vm14, %v1468_v31, %v1472_v14  ;;  %v1506_v47 = vshll.u32 %v1402_v15, 16  ;;  %v1512_v41 = vshll.u32 %v3090_v36, 16  ;;  %2690 = vmatprep.subr.msk.bf16.mxu0 %vm799_vm4, %v2883_v59  ;;  %v1625_v14 = vld [vmem:[#allocation2 + $0x40] sm:$0xe] }
 0x123   : > { %v1505_v24 = vrot.slane %v1503_v60, 4  ;;  %v1495_v45 = vor.u32 %v1494_v40, %v1491_v39  ;;  %v2449_v46 = vrot.slane %v1620_v34, 9  ;;  %v1652_v49 = vrot.slane %v3051_v11, 5  ;;  %v2716_v60 = vld [vmem:[#allocation2 + $0x10] ss:$8 sps:$4 sm:$0xff]  }
 0x124   : > { %v1487_v1 = vsel %vm2960_vm14, %v1482_v16, %v1486_v0  ;;  %v2456_v58 = vcombine.low %v1645_v38, %v1649_v2  ;;  %v1508_v61 = vrot.slane %v1506_v47, 5  ;;  %v2450_v29 = vrot.slane %v1621_v26, 9  ;;  %v1901_v2 = vld [vmem:[#allocation2 + $0x28] sm:$0xf] }
 0x125   : > { %v2441_v55 = vcombine.low %v1473_v3, %v1487_v1  ;;  %2624 = vmatmul.mubr.msk.bf16.gmra.mxu1 %vm786_vm9, %v2715_v44  ;;  %v1496_v59 = vrot.slane %v1495_v45, 4  ;;  %v1500_v6 = vrot.slane %v1498_v54, 5  ;;  %v1656_v51 = vrot.slane %v3061_v43, 5 }
 0x126   : > { %v2451_v52 = vrot.slane %v1622_v18, 9  ;;  %2639 = vmatprep.mubr.msk.bf16.mxu1 %vm786_vm9, %v2456_v58  ;;  %v1509_v11 = vor.u32 %v1508_v61, %v1505_v24  ;;  %v1660_v7 = vrot.slane %v3067_v42, 5  ;;  %v2452_v12 = vrot.slane %v1623_v19, 9  ;;  %v3148_v24 = vld [vmem:[#allocation2 + $0x24] sm:$0x1] }
 0x127   : > { %2633 = vmatprep.mubr.msk.bf16.mxu0 %vm786_vm9, %v2441_v55  ;;  %v1664_v13 = vrot.slane %v3074_v57, 5  ;;  %v1514_v17 = vrot.slane %v1512_v41, 5  ;;  %v1657_v63 = vsel %vm2990_vm15, %v2450_v29, %v1656_v51  ;;  %v3123_v50 = vrot.slane %v2016_v53, 4  ;;  %v3131_v57 = vld [vmem:[#allocation2 + $0x14] sm:$0x1] }
 0x128   : > { %v2019_v43 = vshll.u32 %v3113_v5, 16  ;;  %v1501_v20 = vsel %vm2960_vm14, %v1496_v59, %v1500_v6  ;;  %v1510_v21 = vrot.slane %v1509_v11, 4  ;;  %v1653_v42 = vsel %vm2990_vm15, %v2449_v46, %v1652_v49  ;;  %v3154_v46 = vld [vmem:[#allocation2 + $0x2c] sm:$0x1]  ;;  %v1903_v11 = vld [vmem:[#allocation2 + $0x30] sm:$0xf] }
 0x129   : > { %v2453_v28 = vrot.slane %v3111_v4, 9  ;;  %v2457_v23 = vcombine.low %v1653_v42, %v1657_v63  ;;  %v1665_v27 = vsel %vm2990_vm15, %v2452_v12, %v1664_v13  ;;  %v2454_v15 = vrot.slane %v1625_v14, 9  ;;  %v2125_v4 = vld [vmem:[#allocation2 + $0x10] sm:$0xe]  ;;  %v1905_v42 = vld [vmem:[#allocation2 + $0x38] sm:$0xf] }
 0x12a   : > { %v1672_v30 = vrot.slane %v3090_v36, 5  ;;  %v1515_v31 = vsel %vm2960_vm14, %v1510_v21, %v1514_v17  ;;  %v1661_v48 = vsel %vm2990_vm15, %v2451_v52, %v1660_v7  ;;  %v1912_v32 = vshrl.u32 %v1895_v10, 16  ;;  %v2126_v52 = vld [vmem:[#allocation2 + $0x18] sm:$0xe]  ;;  %v3163_v21 = vld [vmem:[#allocation2 + $0x34] sm:$0x1] }
 0x12b   : > { %v1915_v37 = vshll.u32 %v1895_v10, 16  ;;  %v2442_v34 = vcombine.low %v1501_v20, %v1515_v31  ;;  %v1921_v53 = vshll.u32 %v3131_v57, 16  ;;  %v1926_v0 = vshrl.u32 %v1897_v22, 16 }
 0x12c   : > { %v1929_v38 = vshll.u32 %v1897_v22, 16  ;;  %v2458_v26 = vcombine.low %v1661_v48, %v1665_v27  ;;  %v1668_v36 = vrot.slane %v3079_v56, 5  ;;  %v1914_v16 = vrot.slane %v1912_v32, 4 }
 0x12d   : > { %v1917_v39 = vrot.slane %v1915_v37, 5  ;;  %2634 = vmatmul.mubr.msk.bf16.gmra.mxu0 %vm786_vm9, %v2442_v34  ;;  %2640 = vmatmul.mubr.msk.bf16.vlgmr.msra.gmra.mxu1 %vm786_vm9, %v2457_v23  ;;  %v1673_v40 = vsel %vm2990_vm15, %v2454_v15, %v1672_v30  ;;  %v1928_v54 = vrot.slane %v1926_v0, 4  ;;  %v1940_v47 = vshrl.u32 %v1899_v33, 16  ;;  %v3172_v37 = vld [vmem:[#allocation2 + $0x3c] sm:$0x1] }
 0x12e   : > { %v1931_v3 = vrot.slane %v1929_v38, 5  ;;  %2649 = vmatprep.mubr.msk.bf16.mxu0 %vm786_vm9, %v2716_v60  ;;  %2643 = vmatprep.mubr.msk.bf16.mxu1 %vm786_vm9, %v2458_v26  ;;  %v1935_v56 = vshll.u32 %v3140_v62, 16  ;;  %v1943_v18 = vshll.u32 %v1899_v33, 16  ;;  %v1954_v44 = vshrl.u32 %v1901_v2, 16  ;;  %v1907_v60 = vld [vmem:[#allocation2 + $0x40] sm:$0xf] }
 0x12f   : > { %v1918_v41 = vor.u32 %v1917_v39, %v1914_v16  ;;  %2658 = vmatpush3.bf16.msra.mxu1 %v2904_v8  ;;  %v1923_v1 = vrot.slane %v1921_v53, 5  ;;  %v1942_v49 = vrot.slane %v1940_v47, 4  ;;  %v1957_v19 = vshll.u32 %v1901_v2, 16  ;;  %v2717_v8 = vld [vmem:[#allocation2 + $0x20] ss:$8 sps:$4 sm:$0xff]  }
 0x130   : > { %v1932_v45 = vor.u32 %v1931_v3, %v1928_v54  ;;  %v1945_v58 = vrot.slane %v1943_v18, 5  ;;  %v1949_v61 = vshll.u32 %v3148_v24, 16  ;;  %v1956_v29 = vrot.slane %v1954_v44, 4  ;;  %v2128_v16 = vld [vmem:[#allocation2 + $0x28] sm:$0xe] }
 0x131   : > { %v1919_v55 = vrot.slane %v1918_v41, 4  ;;  %v1669_v59 = vsel %vm2990_vm15, %v2453_v28, %v1668_v36  ;;  %v1959_v51 = vrot.slane %v1957_v19, 5  ;;  %v1937_v12 = vrot.slane %v1935_v56, 5  ;;  %v2718_v28 = vld [vmem:[#allocation2 + $0x30] ss:$8 sps:$4 sm:$0xff]  }
 0x132   : > { %v1933_v6 = vrot.slane %v1932_v45, 4  ;;  %v1946_v13 = vor.u32 %v1945_v58, %v1942_v49  ;;  %v1963_v14 = vshll.u32 %v3154_v46, 16  ;;  %v2459_v17 = vcombine.low %v1669_v59, %v1673_v40  ;;  %v1908_v41 = vld [vmem:[#allocation2 + $0x44] sm:$0x1]  ;;  %v2129_v45 = vld [vmem:[#allocation2 + $0x30] sm:$0xe] }
 0x133   : > { %v1924_v7 = vsel %vm2960_vm14, %v1919_v55, %v1923_v1  ;;  %v1960_v63 = vor.u32 %v1959_v51, %v1956_v29  ;;  %v2482_v10 = vrot.slane %v2125_v4, 9  ;;  %v2151_v20 = vrot.slane %v3131_v57, 5  ;;  %v2719_v49 = vld [vmem:[#allocation2 + $0x40] ss:$8 sps:$4 sm:$0xff]   ;;  %v2130_v51 = vld [vmem:[#allocation2 + $0x38] sm:$0xe] }
 0x134   : > { %v1938_v22 = vsel %vm2960_vm14, %v1933_v6, %v1937_v12  ;;  %v2483_v23 = vrot.slane %v2126_v52, 9  ;;  %v2155_v27 = vrot.slane %v3140_v62, 5  ;;  %v1968_v15 = vshrl.u32 %v1903_v11, 16 }
 0x135   : > { %2650 = vmatmul.mubr.msk.bf16.vlgmr.msra.gmra.mxu0 %vm786_vm9, %v2717_v8  ;;  %2644 = vmatmul.mubr.msk.bf16.gmra.mxu1 %vm786_vm9, %v2459_v17  ;;  %v2474_v30 = vcombine.low %v1924_v7, %v1938_v22  ;;  %v1947_v31 = vrot.slane %v1946_v13, 4  ;;  %v1961_v48 = vrot.slane %v1960_v63, 4  ;;  %v1971_v32 = vshll.u32 %v1903_v11, 16 }
 0x136   : > { %2668 = vmatpush3.bf16.msra.mxu0 %v2908_v9  ;;  %2653 = vmatprep.mubr.msk.bf16.mxu0 %vm786_vm9, %v2718_v28  ;;  %v1965_v57 = vrot.slane %v1963_v14, 5  ;;  %v1970_v33 = vrot.slane %v1968_v15, 4  ;;  %v1977_v34 = vshll.u32 %v3163_v21, 16  ;;  %v1982_v62 = vshrl.u32 %v1905_v42, 16 }
 0x137   : > { %2659 = vmatprep.mubr.msk.bf16.mxu1 %vm786_vm9, %v2474_v30  ;;  %v1951_v53 = vrot.slane %v1949_v61, 5  ;;  %v2152_v0 = vsel %vm2990_vm15, %v2482_v10, %v2151_v20  ;;  %v1973_v38 = vrot.slane %v1971_v32, 5  ;;  %v1985_v2 = vshll.u32 %v1905_v42, 16  ;;  %v2127_v61 = vld [vmem:[#allocation2 + $0x20] sm:$0xe] }
 0x138   : > { %v1966_v9 = vsel %vm2960_vm14, %v1961_v48, %v1965_v57  ;;  %v2156_v26 = vsel %vm2990_vm15, %v2483_v23, %v2155_v27  ;;  %v1984_v36 = vrot.slane %v1982_v62, 4  ;;  %v2021_v39 = vrot.slane %v2019_v43, 5  ;;  %v2131_v27 = vld [vmem:[#allocation2 + $0x40] sm:$0xe] }
 0x139   : > { %v1952_v40 = vsel %vm2960_vm14, %v1947_v31, %v1951_v53  ;;  %v1974_v54 = vor.u32 %v1973_v38, %v1970_v33  ;;  %v1987_v3 = vrot.slane %v1985_v2, 5  ;;  %v1991_v47 = vshll.u32 %v3172_v37, 16 }
 0x13a   : > { %v2491_v56 = vcombine.low %v2152_v0, %v2156_v26  ;;  %v1979_v18 = vrot.slane %v1977_v34, 5  ;;  %v1996_v44 = vshrl.u32 %v1907_v60, 16  ;;  %v1999_v1 = vshll.u32 %v1907_v60, 16 }
 0x13b   : > { %v2475_v19 = vcombine.low %v1952_v40, %v1966_v9  ;;  %v1975_v55 = vrot.slane %v1974_v54, 4  ;;  %v1988_v58 = vor.u32 %v1987_v3, %v1984_v36  ;;  %v2485_v29 = vrot.slane %v2128_v16, 9 }
 0x13c   : > { %v2163_v43 = vrot.slane %v3154_v46, 5  ;;  %v1998_v4 = vrot.slane %v1996_v44, 4  ;;  %v2001_v59 = vrot.slane %v1999_v1, 5  ;;  %v2005_v6 = vshll.u32 %v1908_v41, 16 }
 0x13d   : > { %2654 = vmatmul.mubr.msk.bf16.gmra.mxu0 %vm786_vm9, %v2719_v49  ;;  %2660 = vmatmul.mubr.msk.bf16.vlgmr.msra.gmra.mxu1 %vm786_vm9, %v2475_v19  ;;  %v1980_v52 = vsel %vm2960_vm14, %v1975_v55, %v1979_v18  ;;  %v1989_v11 = vrot.slane %v1988_v58, 4  ;;  %v1993_v8 = vrot.slane %v1991_v47, 5  ;;  %v2486_v7 = vrot.slane %v2129_v45, 9 }
 0x13e   : > { %2669 = vmatprep.mubr.msk.bf16.mxu0 %vm786_vm9, %v2491_v56  ;;  %v2484_v12 = vrot.slane %v2127_v61, 9  ;;  %v2159_v13 = vrot.slane %v3148_v24, 5  ;;  %v2002_v46 = vor.u32 %v2001_v59, %v1998_v4  ;;  %v2167_v14 = vrot.slane %v3163_v21, 5  ;;  %v2132_v24 = vld [vmem:[#allocation2 + $0x48] sm:$0xe] }
 0x13f   : > { %v1994_v17 = vsel %vm2960_vm14, %v1989_v11, %v1993_v8  ;;  %v2022_v63 = vsel %vm2960_vm14, %v3123_v50, %v2021_v39  ;;  %v2487_v10 = vrot.slane %v2130_v51, 9  ;;  %v2171_v20 = vrot.slane %v3172_v37, 5 }
 0x140   : > { %v2476_v42 = vcombine.low %v1980_v52, %v1994_v17  ;;  %v2164_v28 = vsel %vm2990_vm15, %v2485_v29, %v2163_v43  ;;  %v2003_v22 = vrot.slane %v2002_v46, 4  ;;  %v2007_v23 = vrot.slane %v2005_v6, 5 }
 0x141   : > { %v2168_v21 = vsel %vm2990_vm15, %v2486_v7, %v2167_v14  ;;  %v2160_v15 = vsel %vm2990_vm15, %v2484_v12, %v2159_v13  ;;  %v2172_v48 = vsel %vm2990_vm15, %v2487_v10, %v2171_v20  ;;  %v2489_v32 = vrot.slane %v2132_v24, 9  ;;  %v2394_v10 = vld [vmem:[%s3312_s6] ss:$0 sm:$0xff] }
 0x142   : > { %2663 = vmatprep.mubr.msk.bf16.mxu1 %vm786_vm9, %v2476_v42  ;;  %v2008_v50 = vsel %vm2960_vm14, %v2003_v22, %v2007_v23  ;;  %v2492_v30 = vcombine.low %v2160_v15, %v2164_v28  ;;  %v2493_v57 = vcombine.low %v2168_v21, %v2172_v48  ;;  %v2488_v37 = vrot.slane %v2131_v27, 9 }
 0x143   : > { %v2477_v31 = vcombine.low %v2008_v50, %v2022_v63  ;;  %v2175_v33 = vrot.slane %v1908_v41, 5  ;;  %v2179_v34 = vrot.slane %v3113_v5, 5 }
 0x145   : > { %2670 = vmatmul.mubr.msk.bf16.vlgmr.msra.gmra.mxu0 %vm786_vm9, %v2492_v30  ;;  %2664 = vmatmul.mubr.msk.bf16.gmra.mxu1 %vm786_vm9, %v2477_v31  ;;  %v2176_v35 = vsel %vm2990_vm15, %v2488_v37, %v2175_v33  ;;  %v2180_v62 = vsel %vm2990_vm15, %v2489_v32, %v2179_v34 }
 0x146   : > { %2673 = vmatprep.mubr.msk.bf16.mxu0 %vm786_vm9, %v2493_v57  ;;  %v2494_v53 = vcombine.low %v2176_v35, %v2180_v62 }
 0x14d   : > { %2674 = vmatmul.mubr.msk.bf16.gmra.mxu0 %vm786_vm9, %v2494_v53 }
 0x1ba   : > { %v2591_v0 = vpop.f32.mrf.mxu0 }
 0x1bb   : > { %v870_v23 = vadd.f32 %v2591_v0, %v2394_v10 }
 0x1bc   : > { %v837_v38 = vpop.f32.mrf.mxu0 }
 0x1bd   : > { %v868_v27 = vadd.f32 %v2394_v10, %v837_v38 }
 0x1be   : > { %v2592_v2 = vpop.f32.mrf.mxu0 }
 0x1bf   : > { %v871_v31 = vadd.f32 %v2592_v2, %v2394_v10 }
 0x1c0   : > { %v840_v60 = vpop.f32.mrf.mxu0 }
 0x1c1   : > { %v869_v33 = vadd.f32 %v2394_v10, %v840_v60 }
 0x1c6   : > { %v2595_v5 = vpop.f32.mrf.mxu0 }
 0x1c7   : > { %v874_v53 = vadd.f32 %v2595_v5, %v2394_v10 }
 0x1c8   : > { %v2601_v9 = vpop.f32.mrf.mxu1  ;;  %v3221_v26 = vpop.f32.mrf.mxu0 }
 0x1c9   : > { %v1103_v15 = vadd.f32 %v2601_v9, %v870_v23  ;;  %v872_v23 = vadd.f32 %v2394_v10, %v3221_v26 }
 0x1ca   : > { %v1070_v36 = vpop.f32.mrf.mxu1  ;;  %v3223_v16 = vpop.f32.mrf.mxu0 }
 0x1cb   : > { %v1101_v48 = vadd.f32 %v1070_v36, %v868_v27 }
 0x1cc   : > { %v2602_v39 = vpop.f32.mrf.mxu1  ;;  %v3225_v40 = vpop.f32.mrf.mxu0 }
 0x1cd   : > { %v1104_v34 = vadd.f32 %v2602_v39, %v871_v31  ;;  %v875_v39 = vadd.f32 %v3223_v16, %v2394_v10  ;;  %v873_v26 = vadd.f32 %v2394_v10, %v3225_v40 }
 0x1ce   : > { %v2611_v54 = vpop.f32.mrf.mxu0  ;;  %v1073_v25 = vpop.f32.mrf.mxu1 }
 0x1cf   : > { %v1264_v32 = vadd.f32 %v2611_v54, %v1103_v15 }
 0x1d0   : > { %v1231_v3 = vpop.f32.mrf.mxu0 }
 0x1d1   : > { %v1262_v35 = vadd.f32 %v1231_v3, %v1101_v48 }
 0x1d2   : > { %v2612_v47 = vpop.f32.mrf.mxu0 }
 0x1d4   : > { %v1234_v56 = vpop.f32.mrf.mxu0 }
 0x1d5   : > { %v2605_v41 = vpop.f32.mrf.mxu1 }
 0x1d6   : > { %v2615_v44 = vpop.f32.mrf.mxu0 }
 0x1d7   : > { %v1086_v18 = vpop.f32.mrf.mxu1 }
 0x1d8   : > { %v3229_v45 = vpop.f32.mrf.mxu0  ;;  %v1105_v3 = vadd.f32 %v1086_v18, %v872_v23 }
 0x1d9   : > { %v3227_v1 = vpop.f32.mrf.mxu1 }
 0x1da   : > { %v3233_v19 = vpop.f32.mrf.mxu0 }
 0x1db   : > { %v3231_v49 = vpop.f32.mrf.mxu1 }
 0x1dc   : > { %v3235_v58 = vpop.f32.mrf.mxu0 }
 0x1dd   : > { %v2621_v55 = vpop.f32.mrf.mxu1 }
 0x1de   : > { %v1382_v62 = vadd.f32 %v2621_v55, %v1264_v32 }
 0x1df   : > { %v1349_v61 = vpop.f32.mrf.mxu1 }
 0x1e0   : > { %v2631_v29 = vpop.f32.mrf.mxu0  ;;  %v1380_v38 = vadd.f32 %v1349_v61, %v1262_v35 }
 0x1e1   : > { %v2622_v43 = vpop.f32.mrf.mxu1  ;;  %v1612_v9 = vadd.f32 %v2631_v29, %v1382_v62 }
 0x1e2   : > { %v1579_v4 = vpop.f32.mrf.mxu0 }
 0x1e3   : > { %v1352_v59 = vpop.f32.mrf.mxu1  ;;  %v1610_v15 = vadd.f32 %v1579_v4, %v1380_v38 }
 0x1e4   : > { %v2632_v51 = vpop.f32.mrf.mxu0 }
 0x1e5   : > { %v2625_v6 = vpop.f32.mrf.mxu1 }
 0x1e6   : > { %v1582_v8 = vpop.f32.mrf.mxu0 }
 0x1e7   : > { %v3237_v52 = vpop.f32.mrf.mxu1 }
 0x1e9   : > { %v3239_v11 = vpop.f32.mrf.mxu1 }
 0x1eb   : > { %v3241_v7 = vpop.f32.mrf.mxu1 }
 0x1ed   : > { %v3243_v12 = vpop.f32.mrf.mxu0  ;;  %v2641_v13 = vpop.f32.mrf.mxu1 }
 0x1ee   : > { %v1770_v60 = vadd.f32 %v2641_v13, %v1612_v9 }
 0x1ef   : > { %v3245_v46 = vpop.f32.mrf.mxu0  ;;  %v1737_v14 = vpop.f32.mrf.mxu1 }
 0x1f0   : > { %v1768_v61 = vadd.f32 %v1737_v14, %v1610_v15 }
 0x1f1   : > { %v3247_v17 = vpop.f32.mrf.mxu0  ;;  %v2642_v63 = vpop.f32.mrf.mxu1 }
 0x1f2   : > { %3322 = vst [vmem:[#allocation3_spill] sm:$0xff] %v3247_v17  ;;  %v1102_v17 = vadd.f32 %v1073_v25, %v869_v33 }
 0x1f3   : > { %v3252_v20 = vpop.f32.mrf.mxu0  ;;  %v1740_v42 = vpop.f32.mrf.mxu1 }
 0x1f4   : > { %3323 = vst [vmem:[#allocation4_spill] sm:$0xff] %v3252_v20  ;;  %v1263_v54 = vadd.f32 %v1234_v56, %v1102_v17  ;;  %v1266_v56 = vadd.f32 %v3229_v45, %v1105_v3 }
 0x1f5   : > { %v2651_v28 = vpop.f32.mrf.mxu0  ;;  %v3254_v22 = vpop.f32.mrf.mxu1 }
 0x1f6   : > { %v1381_v25 = vadd.f32 %v1352_v59, %v1263_v54  ;;  %v1889_v29 = vadd.f32 %v2651_v28, %v1770_v60 }
 0x1f7   : > { %v1856_v24 = vpop.f32.mrf.mxu0  ;;  %v3256_v21 = vpop.f32.mrf.mxu1 }
 0x1f8   : > { %3324 = vst [vmem:[#allocation5_spill] sm:$0xff] %v3256_v21  ;;  %v1265_v21 = vadd.f32 %v2612_v47, %v1104_v34  ;;  %v1611_v17 = vadd.f32 %v1582_v8, %v1381_v25  ;;  %v1887_v18 = vadd.f32 %v1856_v24, %v1768_v61 }
 0x1f9   : > { %v2652_v50 = vpop.f32.mrf.mxu0  ;;  %v3258_v30 = vpop.f32.mrf.mxu1 }
 0x1fa   : > { %3325 = vst [vmem:[#allocation6_spill] sm:$0xff] %v3258_v30  ;;  %v1107_v30 = vadd.f32 %v2605_v41, %v874_v53  ;;  %v1383_v27 = vadd.f32 %v2622_v43, %v1265_v21  ;;  %v1108_v41 = vadd.f32 %v3227_v1, %v875_v39  ;;  %v1106_v21 = vadd.f32 %v3231_v49, %v873_v26 }
 0x1fb   : > { %v1859_v57 = vpop.f32.mrf.mxu0  ;;  %v3260_v37 = vpop.f32.mrf.mxu1  ;;  %v1769_v45 = vadd.f32 %v1740_v42, %v1611_v17 }
 0x1fc   : > { %v1268_v5 = vadd.f32 %v2615_v44, %v1107_v30  ;;  %v1613_v47 = vadd.f32 %v2632_v51, %v1383_v27  ;;  %v1269_v59 = vadd.f32 %v3233_v19, %v1108_v41  ;;  %v1384_v51 = vadd.f32 %v3237_v52, %v1266_v56  ;;  %v3326_v30 = vld [vmem:[#allocation3_spill] sm:$0xff] }
 0x1fd   : > { %v2655_v0 = vpop.f32.mrf.mxu0  ;;  %v2661_v20 = vpop.f32.mrf.mxu1  ;;  %v1267_v49 = vadd.f32 %v3235_v58, %v1106_v21  ;;  %v1888_v28 = vadd.f32 %v1859_v57, %v1769_v45 }
 0x1fe   : > { %v1386_v43 = vadd.f32 %v2625_v6, %v1268_v5  ;;  %v1771_v16 = vadd.f32 %v2642_v63, %v1613_v47  ;;  %v2119_v44 = vadd.f32 %v2661_v20, %v1889_v29  ;;  %v1387_v19 = vadd.f32 %v3239_v11, %v1269_v59 }
 0x1ff   : > { %v1872_v2 = vpop.f32.mrf.mxu0  ;;  %v2086_v36 = vpop.f32.mrf.mxu1  ;;  %v1614_v52 = vadd.f32 %v3245_v46, %v1384_v51  ;;  %v3327_v32 = vld [vmem:[#allocation5_spill] sm:$0xff] }
 0x200   : > { %v1616_v14 = vadd.f32 %v3243_v12, %v1386_v43  ;;  %v1890_v6 = vadd.f32 %v2652_v50, %v1771_v16  ;;  %v2117_v8 = vadd.f32 %v2086_v36, %v1887_v18  ;;  %v1385_v50 = vadd.f32 %v3241_v7, %v1267_v49 }
 0x201   : > { %v2656_v55 = vpop.f32.mrf.mxu0  ;;  %v2662_v31 = vpop.f32.mrf.mxu1  ;;  %v1617_v48 = vadd.f32 %v3326_v30, %v1387_v19  ;;  %v1772_v33 = vadd.f32 %v3327_v32, %v1614_v52  ;;  %v3329_v53 = vld [vmem:[#allocation6_spill] sm:$0xff] }
 0x202   : > { %v1774_v20 = vadd.f32 %v3254_v22, %v1616_v14  ;;  %v2120_v24 = vadd.f32 %v2662_v31, %v1890_v6  ;;  %v3328_v22 = vld [vmem:[#allocation4_spill] sm:$0xff] }
 0x203   : > { %v1875_v4 = vpop.f32.mrf.mxu0  ;;  %v2089_v13 = vpop.f32.mrf.mxu1  ;;  %v1615_v57 = vadd.f32 %v3328_v22, %v1385_v50  ;;  %v1775_v38 = vadd.f32 %v3329_v53, %v1617_v48  ;;  %v1891_v9 = vadd.f32 %v1872_v2, %v1772_v33 }
 0x204   : > { %v1893_v11 = vadd.f32 %v2655_v0, %v1774_v20  ;;  %v2118_v46 = vadd.f32 %v2089_v13, %v1888_v28 }
 0x205   : > { %v2671_v40 = vpop.f32.mrf.mxu0  ;;  %v2665_v1 = vpop.f32.mrf.mxu1  ;;  %v1773_v0 = vadd.f32 %v3260_v37, %v1615_v57  ;;  %v1894_v54 = vadd.f32 %v2656_v55, %v1775_v38 }
 0x206   : > { %v2277_v63 = vadd.f32 %v2671_v40, %v2119_v44  ;;  %v2123_v7 = vadd.f32 %v2665_v1, %v1893_v11 }
 0x207   : > { %v2244_v12 = vpop.f32.mrf.mxu0  ;;  %v2102_v10 = vpop.f32.mrf.mxu1  ;;  %v1892_v3 = vadd.f32 %v1875_v4, %v1773_v0 }
 0x208   : > { %2285 = vst.msk [vmem:[%s3275_s17 + $0x10] sm:$0xff] %vm337_vm1, %v2277_v63  ;;  %v2275_v42 = vadd.f32 %v2244_v12, %v2117_v8  ;;  %v2121_v27 = vadd.f32 %v2102_v10, %v1891_v9 }
 0x209   : > { %v2672_v58 = vpop.f32.mrf.mxu0  ;;  %v2666_v35 = vpop.f32.mrf.mxu1 }
 0x20a   : > { %2283 = vst.msk [vmem:[%s3275_s17] sm:$0xff] %vm337_vm1, %v2275_v42  ;;  %v2278_v34 = vadd.f32 %v2672_v58, %v2120_v24  ;;  %v2124_v5 = vadd.f32 %v2666_v35, %v1894_v54 }
 0x20b   : > { %v2247_v62 = vpop.f32.mrf.mxu0  ;;  %v2105_v60 = vpop.f32.mrf.mxu1 }
 0x20c   : > { %2286 = vst.msk [vmem:[%s3275_s17 + $0x18] sm:$0xff] %vm337_vm1, %v2278_v34  ;;  %v2276_v23 = vadd.f32 %v2247_v62, %v2118_v46  ;;  %v2122_v25 = vadd.f32 %v2105_v60, %v1892_v3 }
 0x20d   : > { %v2675_v36 = vpop.f32.mrf.mxu0 }
 0x20e   : > { %2284 = vst.msk [vmem:[%s3275_s17 + $0x8] sm:$0xff] %vm337_vm1, %v2276_v23  ;;  %v2281_v15 = vadd.f32 %v2675_v36, %v2123_v7 }
 0x20f   : > { %v2260_v39 = vpop.f32.mrf.mxu0 }
 0x210   : > { %2289 = vst.msk [vmem:[%s3275_s17 + $0x30] sm:$0xff] %vm337_vm1, %v2281_v15  ;;  %v2279_v2 = vadd.f32 %v2260_v39, %v2121_v27 }
 0x211   : > { %v2676_v31 = vpop.f32.mrf.mxu0 }
 0x212   : > { %2287 = vst.msk [vmem:[%s3275_s17 + $0x20] sm:$0xff] %vm337_vm1, %v2279_v2  ;;  %v2282_v47 = vadd.f32 %v2676_v31, %v2124_v5 }
 0x213   : > { %v2263_v37 = vpop.f32.mrf.mxu0 }
 0x214   : > { %2290 = vst.msk [vmem:[%s3275_s17 + $0x38] sm:$0xff] %vm337_vm1, %v2282_v47  ;;  %v2280_v55 = vadd.f32 %v2263_v37, %v2122_v25 }
 0x216   : > { %2288 = vst.msk [vmem:[%s3275_s17 + $0x28] sm:$0xff] %vm337_vm1, %v2280_v55 }
 0x217 PF: > { %s17_s24 = sadd.s32 1, %s2726_s24  }
 0x218   : > { %p14_p4 = scmp.ge.s32.totalorder %s17_s24, 10  }
 0x21a   :  { %16 = sbr.rel (!%p14_p4) target bundleno = 1 (0x1), region = 91 }

// kernel: sa_conv_forward.6
= control target key start
LH: loop header
LB: loop body
LE: loop exit
PB: predicated region body
PF: predicated region fallthrough
CT: control target
= control target key end

     0   :  { %s630_s12 = smov 0   ;;  %s685_s0 = inlined_call_operand.vmem [shape: bf16[128,32], index: 0, kind: input, shape index: {}]   ;;  %s686_s1 = inlined_call_operand.vmem [shape: bf16[32,2], index: 1, kind: input, shape index: {}]   ;;  %s687_s2 = inlined_call_operand.vmem [shape: bf16[2,8], index: 2, kind: input, shape index: {}]   ;;  %s688_s3 = inlined_call_operand.vmem [shape: bf16[128,8], index: 3, kind: output, shape index: {}]  }
   0x1 LB: > { %s513_s13 = sadd.s32 4294967295, %s608_s12   ;;  %p517_p0 = scmp.ge.s32.totalorder %s608_s12, 1  ;;  %s608_s12 = sphi %s630_s12, %s13_s12  }
   0x2   : > { %p138_p1 = scmp.lt.s32.totalorder %s608_s12, 3 }
   0x4   : > { %p139_p2 = pnand %p517_p0, %p138_p1 }
   0x5   : > { %s518_s16 = sshll.u32 (!%p139_p2), %s513_s13, 3 }
   0x6   : > { %142 = sbr.rel (%p139_p2) target bundleno = 440 (0x1b8), region = 32  ;;  %p163_p3 = scmp.lt.s32.totalorder (!%p139_p2), %s518_s16, 15 }
   0xb   : > { %v596_v0 = vld [vmem:[%s686_s1 + $0x8] sm:$0xff]   ;;  %v597_v1 = vld [vmem:[%s686_s1] sm:$0xff]   ;;  %s690_s16 = smov (!%p163_p3, %s518_s16), 15  ;;  %vm219_vm0 = vcmask 261120   ;;  %vm331_vm1 = vcmask 1040384   ;;  %vm318_vm2 = vcmask 15360  }
   0xc   : > { %565 = vmatprep.subr.bf16.mxu0 %v596_v0  ;;  %s519_s19 = sshll.u32 %s690_s16, 2  ;;  %v317_v6 = vld [vmem:[%s687_s2] sm:$0x1]  ;;  %vm448_vm3 = vcmask 60416  }
   0xd   : > { %566 = vmatpush3.bf16.msra.mxu0 %v596_v0  ;;  %s166_s22 = scalar_lea.vmem %s685_s0, %s519_s19  ;;  %587 = vmatprep.subr.msk.bf16.mxu1 %vm331_vm1, %v317_v6  ;;  %v333_v7 = vsel %vm331_vm1, %v317_v6, 0  ;;  %s664_s27 = scalar_lea.vmem %s688_s3, %s519_s19 }
   0xe   : > { %567 = vmatprep.subr.bf16.mxu0 %v597_v1  ;;  %v598_v2 = vld [vmem:[%s166_s22] sm:$0xff]   ;;  %v599_v3 = vld [vmem:[%s166_s22 + $0x8] sm:$0xff]   ;;  %v600_v4 = vld [vmem:[%s166_s22 + $0x10] sm:$0xff]   ;;  %578 = vmatpush3.bf16.msra.mxu1 %v333_v7 }
   0xf   : > { %569 = vmatprep.mubr.msk.bf16.mxu0 %vm219_vm0, %v598_v2  ;;  %v601_v5 = vld [vmem:[%s166_s22 + $0x18] sm:$0xff]  }
  0x11   : > { %568 = vmatpush3.bf16.msra.mxu0 %v597_v1 }
  0x14   : > { %570 = vmatmul.mubr.msk.bf16.vlgmr.msra.gmra.mxu0 %vm219_vm0, %v599_v3 }
  0x15   : > { %573 = vmatprep.mubr.msk.bf16.mxu0 %vm219_vm0, %v600_v4 }
  0x1c   : > { %574 = vmatmul.mubr.msk.bf16.gmra.mxu0 %vm219_vm0, %v601_v5 }
  0xd4   : > { %v571_v8 = vpop.f32.mrf.mxu0 }
  0xd5   : > { %v299_v13 = vmul.f32 0.2, %v571_v8 }
  0xd6   : > { %v266_v9 = vpop.f32.mrf.mxu0 }
  0xd7   : > { %v297_v11 = vmul.f32 0.2, %v266_v9  ;;  %v307_v20 = vmax.f32 %v571_v8, %v299_v13 }
  0xd8   : > { %v572_v10 = vpop.f32.mrf.mxu0 }
  0xd9   : > { %v300_v12 = vmul.f32 0.2, %v572_v10  ;;  %v305_v18 = vmax.f32 %v266_v9, %v297_v11 }
  0xda   : > { %v269_v14 = vpop.f32.mrf.mxu0 }
  0xdb   : > { %v298_v15 = vmul.f32 0.2, %v269_v14  ;;  %v308_v16 = vmax.f32 %v572_v10, %v300_v12 }
  0xdc   : > { %v575_v17 = vpop.f32.mrf.mxu0 }
  0xdd   : > { %v306_v19 = vmax.f32 %v269_v14, %v298_v15  ;;  %v314_v23 = vpack.c.bf16 %v308_v16, %v307_v20  ;;  %v303_v27 = vmul.f32 0.2, %v575_v17 }
  0xde   : > { %v282_v21 = vpop.f32.mrf.mxu0 }
  0xdf   : > { %v313_v22 = vpack.c.bf16 %v306_v19, %v305_v18  ;;  %v301_v25 = vmul.f32 0.2, %v282_v21  ;;  %v311_v33 = vmax.f32 %v575_v17, %v303_v27 }
  0xe0   : > { %v576_v24 = vpop.f32.mrf.mxu0 }
  0xe1   : > { %v304_v26 = vmul.f32 0.2, %v576_v24  ;;  %579 = vmatprep.mubr.msk.bf16.mxu1 %vm318_vm2, %v313_v22  ;;  %v309_v31 = vmax.f32 %v282_v21, %v301_v25 }
  0xe2   : > { %v285_v28 = vpop.f32.mrf.mxu0  ;;  %580 = vmatmul.mubr.msk.bf16.vlgmr.msra.gmra.mxu1 %vm318_vm2, %v314_v23 }
  0xe3   : > { %v302_v29 = vmul.f32 0.2, %v285_v28  ;;  %v312_v30 = vmax.f32 %v576_v24, %v304_v26 }
  0xe5   : > { %v310_v32 = vmax.f32 %v285_v28, %v302_v29  ;;  %v316_v35 = vpack.c.bf16 %v312_v30, %v311_v33 }
  0xe7   : > { %v315_v34 = vpack.c.bf16 %v310_v32, %v309_v31 }
  0xe9   : > { %583 = vmatprep.mubr.msk.bf16.mxu1 %vm318_vm2, %v315_v34 }
  0xea   : > { %584 = vmatmul.mubr.msk.bf16.gmra.mxu1 %vm318_vm2, %v316_v35 }
 0x1a2   : > { %v581_v36 = vpop.f32.mrf.mxu1 }
 0x1a3   : > { %v402_v37 = vmul.f32 0.2, %v581_v36 }
 0x1a4   : > { %v369_v38 = vpop.f32.mrf.mxu1 }
 0x1a5   : > { %v410_v39 = vmax.f32 %v581_v36, %v402_v37  ;;  %v400_v40 = vmul.f32 0.2, %v369_v38 }
 0x1a6   : > { %v582_v41 = vpop.f32.mrf.mxu1 }
 0x1a7   : > { %v548_v42 = vpack.c.bf16 %v410_v39, %v410_v39  ;;  %v408_v43 = vmax.f32 %v369_v38, %v400_v40  ;;  %v403_v44 = vmul.f32 0.2, %v582_v41 }
 0x1a8   : > { %v372_v45 = vpop.f32.mrf.mxu1 }
 0x1a9   : > { %451 = vst.msk [vmem:[%s664_s27 + $0x8] sm:$0xf] %vm448_vm3, %v548_v42  ;;  %v546_v46 = vpack.c.bf16 %v408_v43, %v408_v43  ;;  %v411_v47 = vmax.f32 %v582_v41, %v403_v44  ;;  %v401_v48 = vmul.f32 0.2, %v372_v45 }
 0x1aa   : > { %v585_v49 = vpop.f32.mrf.mxu1 }
 0x1ab   : > { %449 = vst.msk [vmem:[%s664_s27] sm:$0xf] %vm448_vm3, %v546_v46  ;;  %v549_v50 = vpack.c.bf16 %v411_v47, %v411_v47  ;;  %v409_v51 = vmax.f32 %v372_v45, %v401_v48  ;;  %v406_v52 = vmul.f32 0.2, %v585_v49 }
 0x1ac   : > { %v385_v53 = vpop.f32.mrf.mxu1 }
 0x1ad   : > { %452 = vst.msk [vmem:[%s664_s27 + $0xc] sm:$0xf] %vm448_vm3, %v549_v50  ;;  %v547_v54 = vpack.c.bf16 %v409_v51, %v409_v51  ;;  %v414_v55 = vmax.f32 %v585_v49, %v406_v52  ;;  %v404_v56 = vmul.f32 0.2, %v385_v53 }
 0x1ae   : > { %v586_v57 = vpop.f32.mrf.mxu1 }
 0x1af   : > { %450 = vst.msk [vmem:[%s664_s27 + $0x4] sm:$0xf] %vm448_vm3, %v547_v54  ;;  %v552_v58 = vpack.c.bf16 %v414_v55, %v414_v55  ;;  %v412_v59 = vmax.f32 %v385_v53, %v404_v56  ;;  %v407_v60 = vmul.f32 0.2, %v586_v57 }
 0x1b0   : > { %v388_v61 = vpop.f32.mrf.mxu1 }
 0x1b1   : > { %455 = vst.msk [vmem:[%s664_s27 + $0x18] sm:$0xf] %vm448_vm3, %v552_v58  ;;  %v550_v62 = vpack.c.bf16 %v412_v59, %v412_v59  ;;  %v415_v63 = vmax.f32 %v586_v57, %v407_v60  ;;  %v405_v0 = vmul.f32 0.2, %v388_v61 }
 0x1b3   : > { %453 = vst.msk [vmem:[%s664_s27 + $0x10] sm:$0xf] %vm448_vm3, %v550_v62  ;;  %v553_v1 = vpack.c.bf16 %v415_v63, %v415_v63  ;;  %v413_v2 = vmax.f32 %v388_v61, %v405_v0 }
 0x1b5   : > { %456 = vst.msk [vmem:[%s664_s27 + $0x1c] sm:$0xf] %vm448_vm3, %v553_v1  ;;  %v551_v3 = vpack.c.bf16 %v413_v2, %v413_v2 }
 0x1b7   : > { %454 = vst.msk [vmem:[%s664_s27 + $0x14] sm:$0xf] %vm448_vm3, %v551_v3 }
 0x1b8 PF: > { %s13_s12 = sadd.s32 1, %s608_s12  }
 0x1b9   : > { %p10_p4 = scmp.ge.s32.totalorder %s13_s12, 4  }
 0x1bb   :  { %12 = sbr.rel (!%p10_p4) target bundleno = 1 (0x1), region = 62 }

// kernel: sa_conv_forward.5
= control target key start
LH: loop header
LB: loop body
LE: loop exit
PB: predicated region body
PF: predicated region fallthrough
CT: control target
= control target key end

     0   :  { %s4241_s18 = smov 0   ;;  %s5273_s0 = inlined_call_operand.vmem [shape: bf16[8,10,10,8], index: 0, kind: input, shape index: {}]   ;;  %s5274_s1 = inlined_call_operand.vmem [shape: bf16[9,8,8], index: 1, kind: input, shape index: {}]   ;;  %s5275_s2 = inlined_call_operand.vmem [shape: f32[1,8], index: 2, kind: input, shape index: {}]   ;;  %s5276_s3 = inlined_call_operand.vmem [shape: bf16[9,8,8], index: 3, kind: input, shape index: {}]   ;;  %s5277_s4 = inlined_call_operand.vmem [shape: f32[1,8], index: 4, kind: input, shape index: {}]   ;;  %s5278_s5 = inlined_call_operand.vmem [shape: bf16[8,8,8,8], index: 5, kind: output, shape index: {}]  }
   0x1 LB: > { %s3579_s19 = sadd.s32 4294967295, %s4208_s18   ;;  %p3583_p0 = scmp.ge.s32.totalorder %s4208_s18, 1  ;;  %s4208_s18 = sphi %s4241_s18, %s15_s18  }
   0x2   : > { %p187_p1 = scmp.lt.s32.totalorder %s4208_s18, 9 }
   0x4   : > { %p188_p2 = pnand %p3583_p0, %p187_p1 }
   0x6   : > { %191 = sbr.rel (%p188_p2) target bundleno = 612 (0x264), region = 40 }
   0xb   : > { %v242_v0 = vld [vmem:[%s5274_s1] sm:$0xf]  ;;  %vm276_vm0 = vcmask 1043456   ;;  %p215_p3 = scmp.lt.s32.totalorder %s3579_s19, 7  ;;  %v3613_v2 = vld [vmem:[%s5274_s1 + $0x8] sm:$0xf] }
   0xc   : > { %4150 = vmatprep.subr.msk.bf16.mxu0 %vm276_vm0, %v242_v0  ;;  %v278_v1 = vsel %vm276_vm0, %v242_v0, 0  ;;  %v3596_v3 = vld [vmem:[%s5274_s1 + $0x4] sm:$0xf]  ;;  %v3630_v5 = vld [vmem:[%s5274_s1 + $0xc] sm:$0xf]  ;;  %vm263_vm1 = vcmask 64512  }
   0xd   : > { %3971 = vmatpush3.bf16.msra.mxu0 %v278_v1  ;;  %s5314_s19 = smov (!%p215_p3, %s3579_s19), 7  ;;  %4151 = vmatprep.subr.msk.bf16.mxu1 %vm276_vm0, %v3596_v3  ;;  %v511_v4 = vsel %vm276_vm0, %v3596_v3, 0  ;;  %v3655_v6 = vld [vmem:[%s5274_s1 + $0x10] sm:$0xf]  ;;  %v4276_v7 = vld [vmem:[%s5274_s1 + $0x14] sm:$0xf] }
   0xe   : > { %4152 = vmatprep.subr.msk.bf16.mxu0 %vm276_vm0, %v3613_v2  ;;  %3981 = vmatpush3.bf16.msra.mxu1 %v511_v4  ;;  %s4168_s30 = smul.u32 80, %s5314_s19  ;;  %v672_v8 = vsel %vm276_vm0, %v3613_v2, 0  ;;  %v4280_v9 = vsel %vm276_vm0, %v3630_v5, 0  ;;  %vm369_vm2 = vsmask.f32 3328  ;;  %v4288_v10 = vsel %vm276_vm0, %v3655_v6, 0 }
   0xf   : > { %4153 = vmatprep.subr.msk.bf16.mxu1 %vm276_vm0, %v3630_v5  ;;  %vm370_vm3 = vsmask.f32 7440  ;;  %v4292_v11 = vsel %vm276_vm0, %v4276_v7, 0  ;;  %v4297_v12 = vld [vmem:[%s5274_s1 + $0x18] sm:$0xf]  ;;  %vm610_vm4 = vcmask 1042432  }
  0x10   : > { %s4285_s10 = scalar_lea.vmem %s5273_s0, %s4168_s30  ;;  %v4302_v13 = vld [vmem:[%s5274_s1 + $0x1c] sm:$0xf]  ;;  %vm611_vm5 = vcmask 1046532   ;;  %v4311_v17 = vsel %vm276_vm0, %v4297_v12, 0  ;;  %vm4335_vm6 = vmor %vm369_vm2, %vm370_vm3  ;;  %v5283_v46 = vmov 0  ;;  %v5286_v2 = vmov 0 }
  0x11   : > { %v4178_v14 = vld [vmem:[%s4285_s10] ss:$8 sps:$4 sm:$0xff]   ;;  %v4179_v15 = vld [vmem:[%s4285_s10 + $0x10] ss:$8 sps:$4 sm:$0xff]   ;;  %v4315_v18 = vsel %vm276_vm0, %v4302_v13, 0  ;;  %v5284_v46 = vsel %vm4335_vm6, 4294967295, %v5283_v46  ;;  %vm4350_vm7 = vmor %vm610_vm4, %vm611_vm5 }
  0x12   : > { %3972 = vmatprep.mubr.msk.bf16.mxu0 %vm263_vm1, %v4178_v14  ;;  %v4180_v16 = vld [vmem:[%s4285_s10 + $0x20] ss:$8 sps:$4 sm:$0xff]   ;;  %v354_v20 = vld [vmem:[%s4285_s10 + $0x4] sm:$0x1]  ;;  %v4181_v22 = vld [vmem:[%s4285_s10 + $0x30] ss:$8 sps:$4 sm:$0xff]  }
  0x13   : > { %3973 = vmatmul.mubr.msk.bf16.vlgmr.msra.gmra.mxu0 %vm263_vm1, %v4179_v15  ;;  %v353_v19 = vld [vmem:[%s4285_s10] sm:$0xf]  ;;  %v355_v21 = vld [vmem:[%s4285_s10 + $0x8] sm:$0xf]  ;;  %v356_v23 = vld [vmem:[%s4285_s10 + $0xc] sm:$0x1] }
  0x14   : > { %3991 = vmatpush3.bf16.msra.mxu0 %v672_v8  ;;  %3976 = vmatprep.mubr.msk.bf16.mxu0 %vm263_vm1, %v4180_v16  ;;  %v373_v24 = vshrl.u32 %v353_v19, 16  ;;  %v376_v25 = vshll.u32 %v353_v19, 16  ;;  %v382_v26 = vshll.u32 %v354_v20, 16  ;;  %v387_v27 = vshrl.u32 %v355_v21, 16  ;;  %v357_v32 = vld [vmem:[%s4285_s10 + $0x10] sm:$0xf] }
  0x15   : > { %4154 = vmatprep.subr.msk.bf16.mxu0 %vm276_vm0, %v3655_v6  ;;  %v390_v28 = vshll.u32 %v355_v21, 16  ;;  %v396_v29 = vshll.u32 %v356_v23, 16  ;;  %v615_v30 = vrot.slane %v354_v20, 5  ;;  %v619_v31 = vrot.slane %v356_v23, 5  ;;  %v4326_v37 = vld [vmem:[%s4285_s10 + $0x14] sm:$0x1] }
  0x16   : > { %v375_v33 = vrot.slane %v373_v24, 4  ;;  %v378_v34 = vrot.slane %v376_v25, 5  ;;  %v384_v35 = vrot.slane %v382_v26, 5  ;;  %v389_v36 = vrot.slane %v387_v27, 4  ;;  %v359_v40 = vld [vmem:[%s4285_s10 + $0x18] sm:$0xf] }
  0x17   : > { %v392_v38 = vrot.slane %v390_v28, 5  ;;  %v398_v39 = vrot.slane %v396_v29, 5  ;;  %v4330_v41 = vld [vmem:[%s4285_s10 + $0x1c] sm:$0x1]  ;;  %v401_v43 = vshrl.u32 %v357_v32, 16  ;;  %v404_v44 = vshll.u32 %v357_v32, 16 }
  0x18   : > { %v379_v42 = vor.u32 %v378_v34, %v375_v33  ;;  %v410_v45 = vshll.u32 %v4326_v37, 16  ;;  %5285 = vst [vmem:[#allocation3_spill] sm:$0xff] %v5284_v46  ;;  %v415_v48 = vshrl.u32 %v359_v40, 16  ;;  %v418_v49 = vshll.u32 %v359_v40, 16  ;;  %v586_v51 = vld [vmem:[%s4285_s10] sm:$0xe] }
  0x19   : > { %v393_v47 = vor.u32 %v392_v38, %v389_v36  ;;  %v424_v50 = vshll.u32 %v4330_v41, 16  ;;  %v403_v53 = vrot.slane %v401_v43, 4  ;;  %v406_v54 = vrot.slane %v404_v44, 5  ;;  %v587_v56 = vld [vmem:[%s4285_s10 + $0x8] sm:$0xe]  ;;  %s3871_s16 = sshll.u32 %s5314_s19, 5 }
  0x1a   : > { %v380_v52 = vrot.slane %v379_v42, 4  ;;  %v412_v55 = vrot.slane %v410_v45, 5  ;;  %v417_v58 = vrot.slane %v415_v48, 4  ;;  %v420_v59 = vrot.slane %v418_v49, 5  ;;  %v361_v61 = vld [vmem:[%s4285_s10 + $0x20] sm:$0xf]  ;;  %s5251_s20 = scalar_lea.vmem %s5278_s5, %s3871_s16 }
  0x1b   : > { %3977 = vmatmul.mubr.msk.bf16.gmra.mxu0 %vm263_vm1, %v4181_v22  ;;  %v394_v57 = vrot.slane %v393_v47, 4  ;;  %v426_v60 = vrot.slane %v424_v50, 5  ;;  %v407_v63 = vor.u32 %v406_v54, %v403_v53  ;;  %v623_v0 = vrot.slane %v4326_v37, 5  ;;  %v4355_v3 = vld [vmem:[%s4285_s10 + $0x24] sm:$0x1] }
  0x1c   : > { %v385_v62 = vsel %vm4335_vm6, %v380_v52, %v384_v35  ;;  %v627_v1 = vrot.slane %v4330_v41, 5  ;;  %v5287_v2 = vsel %vm4350_vm7, 4294967295, %v5286_v2  ;;  %v421_v5 = vor.u32 %v420_v59, %v417_v58  ;;  %v363_v16 = vld [vmem:[%s4285_s10 + $0x28] sm:$0xf]  ;;  %v4365_v24 = vld [vmem:[%s4285_s10 + $0x2c] sm:$0x1] }
  0x1d   : > { %5288 = vst [vmem:[#allocation4_spill] sm:$0xff] %v5287_v2  ;;  %v399_v4 = vsel %vm4335_vm6, %v394_v57, %v398_v39  ;;  %v3605_v6 = vrot.slane %v586_v51, 9  ;;  %v3606_v8 = vrot.slane %v587_v56, 9  ;;  %v408_v15 = vrot.slane %v407_v63, 4  ;;  %v588_v26 = vld [vmem:[%s4285_s10 + $0x10] sm:$0xe] }
  0x1e   : > { %v3597_v14 = vcombine.low %v385_v62, %v399_v4  ;;  %v429_v19 = vshrl.u32 %v361_v61, 16  ;;  %v432_v20 = vshll.u32 %v361_v61, 16  ;;  %v422_v21 = vrot.slane %v421_v5, 4  ;;  %v365_v33 = vld [vmem:[%s4285_s10 + $0x30] sm:$0xf] }
  0x1f   : > { %v616_v22 = vsel %vm4350_vm7, %v3605_v6, %v615_v30  ;;  %v620_v23 = vsel %vm4350_vm7, %v3606_v8, %v619_v31  ;;  %v438_v25 = vshll.u32 %v4355_v3, 16  ;;  %v413_v27 = vsel %vm4335_vm6, %v408_v15, %v412_v55  ;;  %v589_v30 = vld [vmem:[%s4285_s10 + $0x18] sm:$0xe]  ;;  %v4377_v37 = vld [vmem:[%s4285_s10 + $0x34] sm:$0x1] }
  0x20   : > { %3982 = vmatprep.mubr.msk.bf16.mxu1 %vm263_vm1, %v3597_v14  ;;  %v3614_v28 = vcombine.low %v616_v22, %v620_v23  ;;  %v431_v29 = vrot.slane %v429_v19, 4  ;;  %v434_v32 = vrot.slane %v432_v20, 5  ;;  %v427_v31 = vsel %vm4335_vm6, %v422_v21, %v426_v60  ;;  %v367_v42 = vld [vmem:[%s4285_s10 + $0x38] sm:$0xf]  ;;  %v4383_v43 = vld [vmem:[%s4285_s10 + $0x3c] sm:$0x1] }
  0x21   : > { %v440_v34 = vrot.slane %v438_v25, 5  ;;  %v443_v35 = vshrl.u32 %v363_v16, 16  ;;  %v446_v36 = vshll.u32 %v363_v16, 16  ;;  %v3598_v38 = vcombine.low %v413_v27, %v427_v31  ;;  %v590_v49 = vld [vmem:[%s4285_s10 + $0x20] sm:$0xe] }
  0x22   : > { %3992 = vmatprep.mubr.msk.bf16.mxu0 %vm263_vm1, %v3614_v28  ;;  %v435_v39 = vor.u32 %v434_v32, %v431_v29  ;;  %v452_v40 = vshll.u32 %v4365_v24, 16  ;;  %v3607_v41 = vrot.slane %v588_v26, 9  ;;  %v3608_v47 = vrot.slane %v589_v30, 9  ;;  %v591_v58 = vld [vmem:[%s4285_s10 + $0x28] sm:$0xe] }
  0x23   : > { %v445_v44 = vrot.slane %v443_v35, 4  ;;  %v448_v45 = vrot.slane %v446_v36, 5  ;;  %v457_v48 = vshrl.u32 %v365_v33, 16  ;;  %3983 = vmatmul.mubr.msk.bf16.vlgmr.msra.gmra.mxu1 %vm263_vm1, %v3598_v38  ;;  %v460_v53 = vshll.u32 %v365_v33, 16  ;;  %v592_v63 = vld [vmem:[%s4285_s10 + $0x30] sm:$0xe] }
  0x24   : > { %v436_v50 = vrot.slane %v435_v39, 4  ;;  %v454_v51 = vrot.slane %v452_v40, 5  ;;  %v624_v52 = vsel %vm4350_vm7, %v3607_v41, %v623_v0  ;;  %4001 = vmatpush3.bf16.msra.mxu1 %v4280_v9  ;;  %v628_v55 = vsel %vm4350_vm7, %v3608_v47, %v627_v1  ;;  %v593_v5 = vld [vmem:[%s4285_s10 + $0x38] sm:$0xe]  ;;  %v3639_v16 = vld [vmem:[%s4285_s10 + $0x8] sm:$0xf] }
  0x25   : > { %v449_v54 = vor.u32 %v448_v45, %v445_v44  ;;  %v459_v56 = vrot.slane %v457_v48, 4  ;;  %v466_v57 = vshll.u32 %v4377_v37, 16  ;;  %v3615_v60 = vcombine.low %v624_v52, %v628_v55  ;;  %4155 = vmatprep.subr.msk.bf16.mxu1 %vm276_vm0, %v4276_v7  ;;  %v4408_v22 = vld [vmem:[%s4285_s10 + $0xc] sm:$0x1]  ;;  %v4424_v31 = vld [vmem:[%s4285_s10 + $0x14] sm:$0x1] }
  0x26   : > { %v441_v59 = vsel %vm4335_vm6, %v436_v50, %v440_v34  ;;  %v462_v61 = vrot.slane %v460_v53, 5  ;;  %v471_v62 = vshrl.u32 %v367_v42, 16  ;;  %v474_v4 = vshll.u32 %v367_v42, 16  ;;  %v3643_v39 = vld [vmem:[%s4285_s10 + $0x18] sm:$0xf] }
  0x27   : > { %v450_v9 = vrot.slane %v449_v54, 4  ;;  %v468_v0 = vrot.slane %v466_v57, 5  ;;  %v480_v1 = vshll.u32 %v4383_v43, 16  ;;  %3993 = vmatmul.mubr.msk.bf16.vlgmr.msra.gmra.mxu0 %vm263_vm1, %v3615_v60  ;;  %v3609_v14 = vrot.slane %v590_v49, 9  ;;  %v4431_v40 = vld [vmem:[%s4285_s10 + $0x1c] sm:$0x1] }
  0x28   : > { %v463_v6 = vor.u32 %v462_v61, %v459_v56  ;;  %v473_v8 = vrot.slane %v471_v62, 4  ;;  %v631_v15 = vrot.slane %v4355_v3, 5  ;;  %4011 = vmatpush3.bf16.msra.mxu0 %v4288_v10  ;;  %v476_v7 = vrot.slane %v474_v4, 5  ;;  %v3641_v3 = vld [vmem:[%s4285_s10 + $0x10] sm:$0xf] }
  0x29   : > { %v455_v19 = vsel %vm4335_vm6, %v450_v9, %v454_v51  ;;  %v482_v20 = vrot.slane %v480_v1, 5  ;;  %v3610_v21 = vrot.slane %v591_v58, 9  ;;  %v635_v27 = vrot.slane %v4365_v24, 5  ;;  %4156 = vmatprep.subr.msk.bf16.mxu0 %vm276_vm0, %v4297_v12  ;;  %v3645_v45 = vld [vmem:[%s4285_s10 + $0x20] sm:$0xf] }
  0x2a   : > { %v3599_v23 = vcombine.low %v441_v59, %v455_v19  ;;  %v464_v25 = vrot.slane %v463_v6, 4  ;;  %v632_v26 = vsel %vm4350_vm7, %v3609_v14, %v631_v15  ;;  %v477_v10 = vor.u32 %v476_v7, %v473_v8  ;;  %v4443_v57 = vld [vmem:[%s4285_s10 + $0x24] sm:$0x1]  ;;  %v3647_v9 = vld [vmem:[%s4285_s10 + $0x28] sm:$0xf] }
  0x2b   : > { %v3611_v28 = vrot.slane %v592_v63, 9  ;;  %v639_v29 = vrot.slane %v4377_v37, 5  ;;  %v3612_v32 = vrot.slane %v593_v5, 9  ;;  %v636_v24 = vsel %vm4350_vm7, %v3610_v21, %v635_v27  ;;  %v4182_v37 = vld [vmem:[%s4285_s10 + $0x8] ss:$8 sps:$4 sm:$0xff]  }
  0x2c   : > { %3986 = vmatprep.mubr.msk.bf16.mxu1 %vm263_vm1, %v3599_v23  ;;  %v469_v30 = vsel %vm4335_vm6, %v464_v25, %v468_v0  ;;  %v643_v33 = vrot.slane %v4383_v43, 5  ;;  %v883_v12 = vshrl.u32 %v3639_v16, 16  ;;  %v478_v34 = vrot.slane %v477_v10, 4  ;;  %v4450_v6 = vld [vmem:[%s4285_s10 + $0x2c] sm:$0x1] }
  0x2d   : > { %v3616_v35 = vcombine.low %v632_v26, %v636_v24  ;;  %v640_v36 = vsel %vm4350_vm7, %v3611_v28, %v639_v29  ;;  %v886_v38 = vshll.u32 %v3639_v16, 16  ;;  %v892_v43 = vshll.u32 %v4408_v22, 16  ;;  %v3649_v19 = vld [vmem:[%s4285_s10 + $0x30] sm:$0xf]  ;;  %v4183_v7 = vld [vmem:[%s4285_s10 + $0x18] ss:$8 sps:$4 sm:$0xff]  }
  0x2e   : > { %v644_v41 = vsel %vm4350_vm7, %v3612_v32, %v643_v33  ;;  %v885_v42 = vrot.slane %v883_v12, 4  ;;  %v897_v44 = vshrl.u32 %v3641_v3, 16  ;;  %v483_v47 = vsel %vm4335_vm6, %v478_v34, %v482_v20  ;;  %v4184_v23 = vld [vmem:[%s4285_s10 + $0x28] ss:$8 sps:$4 sm:$0xff]   ;;  %v4459_v10 = vld [vmem:[%s4285_s10 + $0x34] sm:$0x1] }
  0x2f   : > { %3996 = vmatprep.mubr.msk.bf16.mxu0 %vm263_vm1, %v3616_v35  ;;  %v3617_v48 = vcombine.low %v640_v36, %v644_v41  ;;  %v888_v49 = vrot.slane %v886_v38, 5  ;;  %v900_v50 = vshll.u32 %v3641_v3, 16  ;;  %v3600_v51 = vcombine.low %v469_v30, %v483_v47  ;;  %v3651_v12 = vld [vmem:[%s4285_s10 + $0x38] sm:$0xf]  ;;  %v4466_v38 = vld [vmem:[%s4285_s10 + $0x3c] sm:$0x1] }
  0x30   : > { %v894_v52 = vrot.slane %v892_v43, 5  ;;  %v899_v53 = vrot.slane %v897_v44, 4  ;;  %v906_v54 = vshll.u32 %v4424_v31, 16  ;;  %v911_v58 = vshrl.u32 %v3643_v39, 16  ;;  %v3653_v44 = vld [vmem:[%s4285_s10 + $0x40] sm:$0xf] }
  0x31   : > { %3997 = vmatmul.mubr.msk.bf16.gmra.mxu0 %vm263_vm1, %v3617_v48  ;;  %v889_v55 = vor.u32 %v888_v49, %v885_v42  ;;  %v902_v56 = vrot.slane %v900_v50, 5  ;;  %v914_v59 = vshll.u32 %v3643_v39, 16  ;;  %3987 = vmatmul.mubr.msk.bf16.gmra.mxu1 %vm263_vm1, %v3600_v51  ;;  %v920_v61 = vshll.u32 %v4431_v40, 16  ;;  %v4477_v48 = vld [vmem:[%s4285_s10 + $0x44] sm:$0x1] }
  0x32   : > { %v908_v60 = vrot.slane %v906_v54, 5  ;;  %v925_v62 = vshrl.u32 %v3645_v45, 16  ;;  %v928_v63 = vshll.u32 %v3645_v45, 16  ;;  %4002 = vmatprep.mubr.msk.bf16.mxu1 %vm263_vm1, %v4182_v37  ;;  %v913_v1 = vrot.slane %v911_v58, 4  ;;  %v3664_v51 = vld [vmem:[%s4285_s10 + $0x8] sm:$0xe] }
  0x33   : > { %v890_v0 = vrot.slane %v889_v55, 4  ;;  %v903_v4 = vor.u32 %v902_v56, %v899_v53  ;;  %v916_v5 = vrot.slane %v914_v59, 5  ;;  %v922_v8 = vrot.slane %v920_v61, 5  ;;  %v3665_v58 = vld [vmem:[%s4285_s10 + $0x10] sm:$0xe] }
  0x34   : > { %v927_v14 = vrot.slane %v925_v62, 4  ;;  %v930_v15 = vrot.slane %v928_v63, 5  ;;  %v934_v16 = vshll.u32 %v4443_v57, 16  ;;  %v939_v26 = vshrl.u32 %v3647_v9, 16 }
  0x35   : > { %v895_v20 = vsel %vm4335_vm6, %v890_v0, %v894_v52  ;;  %v904_v21 = vrot.slane %v903_v4, 4  ;;  %v917_v25 = vor.u32 %v916_v5, %v913_v1  ;;  %v942_v28 = vshll.u32 %v3647_v9, 16  ;;  %v3747_v52 = vld [vmem:[%s5274_s1 + $0x20] sm:$0xf]  ;;  %v3666_v4 = vld [vmem:[%s4285_s10 + $0x18] sm:$0xe] }
  0x36   : > { %v931_v27 = vor.u32 %v930_v15, %v927_v14  ;;  %v936_v3 = vrot.slane %v934_v16, 5  ;;  %v948_v29 = vshll.u32 %v4450_v6, 16  ;;  %v941_v24 = vrot.slane %v939_v26, 4  ;;  %v4185_v1 = vld [vmem:[%s4285_s10 + $0x38] ss:$8 sps:$4 sm:$0xff]  }
  0x37   : > { %v909_v32 = vsel %vm4335_vm6, %v904_v21, %v908_v60  ;;  %v918_v30 = vrot.slane %v917_v25, 4  ;;  %v953_v33 = vshrl.u32 %v3649_v19, 16  ;;  %v944_v36 = vrot.slane %v942_v28, 5 }
  0x38   : > { %v3656_v34 = vcombine.low %v895_v20, %v909_v32  ;;  %v932_v35 = vrot.slane %v931_v27, 4  ;;  %v950_v37 = vrot.slane %v948_v29, 5  ;;  %v956_v42 = vshll.u32 %v3649_v19, 16  ;;  %v3668_v29 = vld [vmem:[%s4285_s10 + $0x28] sm:$0xe] }
  0x39   : > { %v923_v39 = vsel %vm4335_vm6, %v918_v30, %v922_v8  ;;  %v955_v41 = vrot.slane %v953_v33, 4  ;;  %v962_v43 = vshll.u32 %v4459_v10, 16  ;;  %4003 = vmatmul.mubr.msk.bf16.vlgmr.msra.gmra.mxu1 %vm263_vm1, %v4183_v7  ;;  %v945_v47 = vor.u32 %v944_v36, %v941_v24  ;;  %v3670_v33 = vld [vmem:[%s4285_s10 + $0x38] sm:$0xe]  ;;  %v3671_v36 = vld [vmem:[%s4285_s10 + $0x40] sm:$0xe] }
  0x3a   : > { %4012 = vmatprep.mubr.msk.bf16.mxu0 %vm263_vm1, %v3656_v34  ;;  %v937_v45 = vsel %vm4335_vm6, %v932_v35, %v936_v3  ;;  %v967_v49 = vshrl.u32 %v3651_v12, 16  ;;  %v970_v50 = vshll.u32 %v3651_v12, 16  ;;  %4021 = vmatpush3.bf16.msra.mxu1 %v4292_v11  ;;  %v958_v54 = vrot.slane %v956_v42, 5 }
  0x3b   : > { %4006 = vmatprep.mubr.msk.bf16.mxu1 %vm263_vm1, %v4184_v23  ;;  %v3657_v53 = vcombine.low %v923_v39, %v937_v45  ;;  %v964_v55 = vrot.slane %v962_v43, 5  ;;  %v976_v56 = vshll.u32 %v4466_v38, 16  ;;  %v946_v59 = vrot.slane %v945_v47, 4  ;;  %4157 = vmatprep.subr.msk.bf16.mxu1 %vm276_vm0, %v4302_v13  ;;  %v3667_v13 = vld [vmem:[%s4285_s10 + $0x20] sm:$0xe] }
  0x3c   : > { %v969_v60 = vrot.slane %v967_v49, 4  ;;  %v972_v61 = vrot.slane %v970_v50, 5  ;;  %v981_v62 = vshrl.u32 %v3653_v44, 16  ;;  %v959_v11 = vor.u32 %v958_v54, %v955_v41  ;;  %v3708_v54 = vld [vmem:[%s4285_s10 + $0x18] sm:$0xf] }
  0x3d   : > { %4013 = vmatmul.mubr.msk.bf16.vlgmr.msra.gmra.mxu0 %vm263_vm1, %v3657_v53  ;;  %v978_v63 = vrot.slane %v976_v56, 5  ;;  %v984_v9 = vshll.u32 %v3653_v44, 16  ;;  %v990_v0 = vshll.u32 %v4477_v48, 16  ;;  %v951_v5 = vsel %vm4335_vm6, %v946_v59, %v950_v37  ;;  %v4186_v44 = vld [vmem:[%s4285_s10 + $0x10] ss:$8 sps:$4 sm:$0xff]  }
  0x3e   : > { %4031 = vmatpush3.bf16.msra.mxu0 %v4311_v17  ;;  %v973_v8 = vor.u32 %v972_v61, %v969_v60  ;;  %v983_v14 = vrot.slane %v981_v62, 4  ;;  %v3672_v15 = vrot.slane %v3664_v51, 9  ;;  %v960_v16 = vrot.slane %v959_v11, 4  ;;  %v3706_v51 = vld [vmem:[%s4285_s10 + $0x10] sm:$0xf] }
  0x3f   : > { %v986_v19 = vrot.slane %v984_v9, 5  ;;  %v992_v7 = vrot.slane %v990_v0, 5  ;;  %v1122_v20 = vrot.slane %v4408_v22, 5  ;;  %4158 = vmatprep.subr.msk.bf16.mxu0 %vm276_vm0, %v3747_v52  ;;  %v3673_v17 = vrot.slane %v3665_v58, 9  ;;  %v3669_v22 = vld [vmem:[%s4285_s10 + $0x30] sm:$0xe] }
  0x40   : > { %v974_v21 = vrot.slane %v973_v8, 4  ;;  %v1126_v23 = vrot.slane %v4424_v31, 5  ;;  %v3674_v25 = vrot.slane %v3666_v4, 9  ;;  %v965_v26 = vsel %vm4335_vm6, %v960_v16, %v964_v55  ;;  %v4535_v53 = vld [vmem:[%s4285_s10 + $0x14] sm:$0x1] }
  0x41   : > { %v987_v27 = vor.u32 %v986_v19, %v983_v14  ;;  %v1123_v3 = vsel %vm4350_vm7, %v3672_v15, %v1122_v20  ;;  %v1130_v28 = vrot.slane %v4431_v40, 5  ;;  %4007 = vmatmul.mubr.msk.bf16.gmra.mxu1 %vm263_vm1, %v4185_v1  ;;  %v3658_v32 = vcombine.low %v951_v5, %v965_v26  ;;  %v4541_v59 = vld [vmem:[%s4285_s10 + $0x1c] sm:$0x1]  ;;  %v4553_v4 = vld [vmem:[%s4285_s10 + $0x24] sm:$0x1] }
  0x42   : > { %v979_v30 = vsel %vm4335_vm6, %v974_v21, %v978_v63  ;;  %v1127_v31 = vsel %vm4350_vm7, %v3673_v17, %v1126_v23  ;;  %v3675_v24 = vrot.slane %v3667_v13, 9  ;;  %v1134_v40 = vrot.slane %v4443_v57, 5  ;;  %v3710_v63 = vld [vmem:[%s4285_s10 + $0x20] sm:$0xf]  ;;  %v3712_v1 = vld [vmem:[%s4285_s10 + $0x28] sm:$0xf] }
  0x43   : > { %v988_v12 = vrot.slane %v987_v27, 4  ;;  %v3681_v34 = vcombine.low %v1123_v3, %v1127_v31  ;;  %v1131_v35 = vsel %vm4350_vm7, %v3674_v25, %v1130_v28  ;;  %4016 = vmatprep.mubr.msk.bf16.mxu0 %vm263_vm1, %v3658_v32  ;;  %v3676_v37 = vrot.slane %v3668_v29, 9  ;;  %v4187_v5 = vld [vmem:[%s4285_s10 + $0x20] ss:$8 sps:$4 sm:$0xff]   ;;  %v4559_v16 = vld [vmem:[%s4285_s10 + $0x2c] sm:$0x1] }
  0x44   : > { %v1138_v39 = vrot.slane %v4450_v6, 5  ;;  %v3677_v41 = vrot.slane %v3669_v22, 9  ;;  %v1142_v42 = vrot.slane %v4459_v10, 5  ;;  %v1135_v57 = vsel %vm4350_vm7, %v3675_v24, %v1134_v40  ;;  %v4188_v19 = vld [vmem:[%s4285_s10 + $0x30] ss:$8 sps:$4 sm:$0xff]  }
  0x45   : > { %v993_v43 = vsel %vm4335_vm6, %v988_v12, %v992_v7  ;;  %4022 = vmatprep.mubr.msk.bf16.mxu1 %vm263_vm1, %v3681_v34  ;;  %v4527_v45 = vsel %vm276_vm0, %v3747_v52, 0  ;;  %v3678_v47 = vrot.slane %v3670_v33, 9  ;;  %v3682_v50 = vcombine.low %v1131_v35, %v1135_v57  ;;  %v3731_v3 = vld [vmem:[%s4285_s10 + $0x10] sm:$0xe]  ;;  %v3732_v32 = vld [vmem:[%s4285_s10 + $0x18] sm:$0xe] }
  0x46   : > { %v3659_v49 = vcombine.low %v979_v30, %v993_v43  ;;  %v1139_v6 = vsel %vm4350_vm7, %v3676_v37, %v1138_v39  ;;  %v1143_v10 = vsel %vm4350_vm7, %v3677_v41, %v1142_v42  ;;  %v1146_v56 = vrot.slane %v4466_v38, 5  ;;  %v3714_v12 = vld [vmem:[%s4285_s10 + $0x30] sm:$0xf]  ;;  %v4574_v43 = vld [vmem:[%s4285_s10 + $0x34] sm:$0x1] }
  0x47   : > { %v3683_v55 = vcombine.low %v1139_v6, %v1143_v10  ;;  %v3679_v52 = vrot.slane %v3671_v36, 9  ;;  %v1150_v58 = vrot.slane %v4477_v48, 5  ;;  %v1390_v60 = vshrl.u32 %v3706_v51, 16 }
  0x48   : > { %4017 = vmatmul.mubr.msk.bf16.gmra.mxu0 %vm263_vm1, %v3659_v49  ;;  %v1393_v61 = vshll.u32 %v3706_v51, 16  ;;  %v1399_v62 = vshll.u32 %v4535_v53, 16  ;;  %v1404_v11 = vshrl.u32 %v3708_v54, 16  ;;  %v1147_v38 = vsel %vm4350_vm7, %v3678_v47, %v1146_v56  ;;  %v3716_v49 = vld [vmem:[%s4285_s10 + $0x38] sm:$0xf] }
  0x49   : > { %4032 = vmatprep.mubr.msk.bf16.mxu0 %vm263_vm1, %v4186_v44  ;;  %v1151_v48 = vsel %vm4350_vm7, %v3679_v52, %v1150_v58  ;;  %v1407_v9 = vshll.u32 %v3708_v54, 16  ;;  %v1413_v0 = vshll.u32 %v4541_v59, 16  ;;  %4023 = vmatmul.mubr.msk.bf16.vlgmr.msra.gmra.mxu1 %vm263_vm1, %v3682_v50  ;;  %v1392_v14 = vrot.slane %v1390_v60, 4  ;;  %v4586_v51 = vld [vmem:[%s4285_s10 + $0x3c] sm:$0x1] }
  0x4a   : > { %v3684_v8 = vcombine.low %v1147_v38, %v1151_v48  ;;  %v1395_v15 = vrot.slane %v1393_v61, 5  ;;  %v1401_v13 = vrot.slane %v1399_v62, 5  ;;  %4041 = vmatpush3.bf16.msra.mxu1 %v4315_v18  ;;  %4026 = vmatprep.mubr.msk.bf16.mxu1 %vm263_vm1, %v3683_v55  ;;  %v1406_v7 = vrot.slane %v1404_v11, 4  ;;  %v3733_v58 = vld [vmem:[%s4285_s10 + $0x20] sm:$0xe] }
  0x4b   : > { %v1409_v20 = vrot.slane %v1407_v9, 5  ;;  %v1415_v21 = vrot.slane %v1413_v0, 5  ;;  %v1418_v17 = vshrl.u32 %v3710_v63, 16  ;;  %v1421_v25 = vshll.u32 %v3710_v63, 16  ;;  %v3734_v11 = vld [vmem:[%s4285_s10 + $0x28] sm:$0xe] }
  0x4c   : > { %v1396_v23 = vor.u32 %v1395_v15, %v1392_v14  ;;  %v1427_v26 = vshll.u32 %v4553_v4, 16  ;;  %v1432_v27 = vshrl.u32 %v3712_v1, 16  ;;  %v1435_v22 = vshll.u32 %v3712_v1, 16  ;;  %v3718_v0 = vld [vmem:[%s4285_s10 + $0x40] sm:$0xf] }
  0x4d   : > { %v1410_v28 = vor.u32 %v1409_v20, %v1406_v7  ;;  %v1420_v29 = vrot.slane %v1418_v17, 4  ;;  %v1441_v18 = vshll.u32 %v4559_v16, 16  ;;  %v1423_v31 = vrot.slane %v1421_v25, 5  ;;  %v3720_v15 = vld [vmem:[%s4285_s10 + $0x48] sm:$0xf] }
  0x4e   : > { %v1397_v30 = vrot.slane %v1396_v23, 4  ;;  %v1429_v24 = vrot.slane %v1427_v26, 5  ;;  %v1434_v33 = vrot.slane %v1432_v27, 4  ;;  %v1437_v35 = vrot.slane %v1435_v22, 5 }
  0x4f   : > { %v1411_v34 = vrot.slane %v1410_v28, 4  ;;  %v1443_v40 = vrot.slane %v1441_v18, 5  ;;  %v3739_v36 = vrot.slane %v3731_v3, 9  ;;  %v1424_v39 = vor.u32 %v1423_v31, %v1420_v29  ;;  %v3721_v29 = vld [vmem:[%s4285_s10 + $0x4c] sm:$0x1] }
  0x50   : > { %4033 = vmatmul.mubr.msk.bf16.vlgmr.msra.gmra.mxu0 %vm263_vm1, %v4187_v5  ;;  %v1402_v37 = vsel %vm4335_vm6, %v1397_v30, %v1401_v13  ;;  %v1629_v41 = vrot.slane %v4535_v53, 5  ;;  %v3740_v42 = vrot.slane %v3732_v32, 9  ;;  %v1438_v44 = vor.u32 %v1437_v35, %v1434_v33  ;;  %v3736_v31 = vld [vmem:[%s4285_s10 + $0x38] sm:$0xe] }
  0x51   : > { %4051 = vmatpush3.bf16.msra.mxu0 %v4527_v45  ;;  %4036 = vmatprep.mubr.msk.bf16.mxu0 %vm263_vm1, %v4188_v19  ;;  %v1416_v57 = vsel %vm4335_vm6, %v1411_v34, %v1415_v21  ;;  %v1633_v47 = vrot.slane %v4541_v59, 5  ;;  %v1446_v50 = vshrl.u32 %v3714_v12, 16  ;;  %v1425_v10 = vrot.slane %v1424_v39, 4  ;;  %v4189_v59 = vld [vmem:[%s4285_s10 + $0x40] ss:$8 sps:$4 sm:$0xff]  }
  0x52   : > { %4027 = vmatmul.mubr.msk.bf16.gmra.mxu1 %vm263_vm1, %v3684_v8  ;;  %v3723_v6 = vcombine.low %v1402_v37, %v1416_v57  ;;  %v1630_v45 = vsel %vm4350_vm7, %v3739_v36, %v1629_v41  ;;  %v1449_v53 = vshll.u32 %v3714_v12, 16  ;;  %v1439_v54 = vrot.slane %v1438_v44, 4  ;;  %v3719_v21 = vld [vmem:[%s4285_s10 + $0x44] sm:$0x1]  ;;  %v3737_v39 = vld [vmem:[%s4285_s10 + $0x40] sm:$0xe] }
  0x53   : > { %v1634_v55 = vsel %vm4350_vm7, %v3740_v42, %v1633_v47  ;;  %v1448_v56 = vrot.slane %v1446_v50, 4  ;;  %v1455_v52 = vshll.u32 %v4574_v43, 16  ;;  %v1430_v60 = vsel %vm4335_vm6, %v1425_v10, %v1429_v24  ;;  %v3738_v47 = vld [vmem:[%s4285_s10 + $0x48] sm:$0xe] }
  0x54   : > { %4042 = vmatprep.mubr.msk.bf16.mxu1 %vm263_vm1, %v3723_v6  ;;  %v1451_v61 = vrot.slane %v1449_v53, 5  ;;  %v1460_v62 = vshrl.u32 %v3716_v49, 16  ;;  %v1444_v63 = vsel %vm4335_vm6, %v1439_v54, %v1443_v40  ;;  %v3748_v38 = vcombine.low %v1630_v45, %v1634_v55 }
  0x55   : > { %v1463_v48 = vshll.u32 %v3716_v49, 16  ;;  %v1469_v9 = vshll.u32 %v4586_v51, 16  ;;  %v3724_v1 = vcombine.low %v1430_v60, %v1444_v63  ;;  %v3741_v14 = vrot.slane %v3733_v58, 9 }
  0x56   : > { %v1452_v5 = vor.u32 %v1451_v61, %v1448_v56  ;;  %v1462_v8 = vrot.slane %v1460_v62, 4  ;;  %v1457_v13 = vrot.slane %v1455_v52, 5  ;;  %v1637_v7 = vrot.slane %v4553_v4, 5  ;;  %v3735_v4 = vld [vmem:[%s4285_s10 + $0x30] sm:$0xe] }
  0x57   : > { %v1465_v19 = vrot.slane %v1463_v48, 5  ;;  %v3742_v20 = vrot.slane %v3734_v11, 9  ;;  %v1641_v23 = vrot.slane %v4559_v16, 5  ;;  %v1474_v25 = vshrl.u32 %v3718_v0, 16 }
  0x58   : > { %4037 = vmatmul.mubr.msk.bf16.gmra.mxu0 %vm263_vm1, %v4189_v59  ;;  %v1453_v17 = vrot.slane %v1452_v5, 4  ;;  %v1477_v26 = vshll.u32 %v3718_v0, 16  ;;  %v1471_v3 = vrot.slane %v1469_v9, 5  ;;  %v1638_v28 = vsel %vm4350_vm7, %v3741_v14, %v1637_v7  ;;  %v1982_v9 = vld [vmem:[%s5276_s3] sm:$0xf] }
  0x59   : > { %4052 = vmatprep.mubr.msk.bf16.mxu0 %vm263_vm1, %v3748_v38  ;;  %v1466_v27 = vor.u32 %v1465_v19, %v1462_v8  ;;  %v1488_v22 = vshrl.u32 %v3720_v15, 16  ;;  %v1642_v18 = vsel %vm4350_vm7, %v3742_v20, %v1641_v23  ;;  %v1476_v32 = vrot.slane %v1474_v25, 4  ;;  %4159 = vmatprep.subr.msk.bf16.mxu1 %vm276_vm0, %v1982_v9  ;;  %v4671_v5 = vld [vmem:[%s5276_s3 + $0x8] sm:$0xf] }
  0x5a   : > { %4043 = vmatmul.mubr.msk.bf16.vlgmr.msra.gmra.mxu1 %vm263_vm1, %v3724_v1  ;;  %v1479_v16 = vrot.slane %v1477_v26, 5  ;;  %v1483_v30 = vshll.u32 %v3719_v21, 16  ;;  %v1458_v24 = vsel %vm4335_vm6, %v1453_v17, %v1457_v13  ;;  %v3749_v12 = vcombine.low %v1638_v28, %v1642_v18  ;;  %v3773_v1 = vld [vmem:[%s5276_s3 + $0x4] sm:$0xf]  ;;  %v4680_v13 = vld [vmem:[%s5276_s3 + $0xc] sm:$0xf] }
  0x5b   : > { %v1467_v33 = vrot.slane %v1466_v27, 4  ;;  %v1490_v34 = vrot.slane %v1488_v22, 4  ;;  %v1491_v40 = vshll.u32 %v3720_v15, 16  ;;  %v1497_v36 = vshll.u32 %v3721_v29, 16  ;;  %4160 = vmatprep.subr.msk.bf16.mxu0 %vm276_vm0, %v3773_v1 }
  0x5c   : > { %v1480_v35 = vor.u32 %v1479_v16, %v1476_v32  ;;  %v3743_v37 = vrot.slane %v3735_v4, 9  ;;  %v1645_v42 = vrot.slane %v4574_v43, 5  ;;  %v3744_v57 = vrot.slane %v3736_v31, 9 }
  0x5d   : > { %v1472_v41 = vsel %vm4335_vm6, %v1467_v33, %v1471_v3  ;;  %v1649_v44 = vrot.slane %v4586_v51, 5  ;;  %v1485_v6 = vrot.slane %v1483_v30, 5  ;;  %v1493_v10 = vrot.slane %v1491_v40, 5 }
  0x5e   : > { %v3725_v49 = vcombine.low %v1458_v24, %v1472_v41  ;;  %v1481_v50 = vrot.slane %v1480_v35, 4  ;;  %v1646_v45 = vsel %vm4350_vm7, %v3743_v37, %v1645_v42  ;;  %v3745_v54 = vrot.slane %v3737_v39, 9 }
  0x5f   : > { %v1650_v53 = vsel %vm4350_vm7, %v3744_v57, %v1649_v44  ;;  %v1653_v55 = vrot.slane %v3719_v21, 5  ;;  %v1494_v43 = vor.u32 %v1493_v10, %v1490_v34  ;;  %v1499_v56 = vrot.slane %v1497_v36, 5 }
  0x60   : > { %4046 = vmatprep.mubr.msk.bf16.mxu1 %vm263_vm1, %v3725_v49  ;;  %4053 = vmatmul.mubr.msk.bf16.vlgmr.msra.gmra.mxu0 %vm263_vm1, %v3749_v12  ;;  %v3750_v51 = vcombine.low %v1646_v45, %v1650_v53  ;;  %v3746_v52 = vrot.slane %v3738_v47, 9  ;;  %v1657_v59 = vrot.slane %v3721_v29, 5  ;;  %v1486_v60 = vsel %vm4335_vm6, %v1481_v50, %v1485_v6 }
  0x61   : > { %v1654_v58 = vsel %vm4350_vm7, %v3745_v54, %v1653_v55  ;;  %v1495_v61 = vrot.slane %v1494_v43, 4  ;;  %vm1777_vm8 = vcmask 60416   ;;  %vm1779_vm9 = vcmask 57344  }
  0x62   : > { %4056 = vmatprep.mubr.msk.bf16.mxu0 %vm263_vm1, %v3750_v51  ;;  %v1658_v62 = vsel %vm4350_vm7, %v3746_v52, %v1657_v59  ;;  %v4210_v48 = vmov 0   ;;  %v2016_v0 = vsel %vm276_vm0, %v1982_v9, 0  ;;  %v2246_v8 = vsel %vm276_vm0, %v3773_v1, 0 }
  0x63   : > { %v1500_v11 = vsel %vm4335_vm6, %v1495_v61, %v1499_v56  ;;  %v3751_v63 = vcombine.low %v1654_v58, %v1658_v62  ;;  %1785 = vst.msk [vmem:[#allocation2 + $0x18] sm:$0xf] %vm1777_vm8, %v4210_v48  ;;  %1778 = vst.msk [vmem:[#allocation2] sm:$0xf] %vm1777_vm8, %v4210_v48  ;;  %4061 = vmatpush3.bf16.msra.mxu1 %v2016_v0  ;;  %4071 = vmatpush3.bf16.msra.mxu0 %v2246_v8  ;;  %v3587_v56 = vld [vmem:[%s5275_s2] ss:$0 sm:$0xff] }
  0x64   : > { %v3726_v38 = vcombine.low %v1486_v60, %v1500_v11  ;;  %1786 = vst.msk [vmem:[#allocation2 + $0x1c] sm:$0x1] %vm1779_vm9, %v4210_v48  ;;  %1780 = vst.msk [vmem:[#allocation2 + $0x4] sm:$0x1] %vm1779_vm9, %v4210_v48  ;;  %4161 = vmatprep.subr.msk.bf16.mxu1 %vm276_vm0, %v4671_v5  ;;  %4162 = vmatprep.subr.msk.bf16.mxu0 %vm276_vm0, %v4680_v13  ;;  %vm1913_vm10 = vsmask.f32 7938 }
  0x65   : > { %1781 = vst.msk [vmem:[#allocation2 + $0x8] sm:$0xf] %vm1777_vm8, %v4210_v48  ;;  %1783 = vst.msk [vmem:[#allocation2 + $0x10] sm:$0xf] %vm1777_vm8, %v4210_v48  ;;  %vm1919_vm11 = vsmask.f32 256 }
  0x66   : > { %4047 = vmatmul.mubr.msk.bf16.gmra.mxu1 %vm263_vm1, %v3726_v38  ;;  %1782 = vst.msk [vmem:[#allocation2 + $0xc] sm:$0x1] %vm1779_vm9, %v4210_v48  ;;  %1784 = vst.msk [vmem:[#allocation2 + $0x14] sm:$0x1] %vm1779_vm9, %v4210_v48 }
  0x67   : > { %1787 = vst.msk [vmem:[#allocation2 + $0x20] sm:$0xf] %vm1777_vm8, %v4210_v48  ;;  %1789 = vst.msk [vmem:[#allocation2 + $0x28] sm:$0xf] %vm1777_vm8, %v4210_v48 }
  0x68   : > { %4057 = vmatmul.mubr.msk.bf16.gmra.mxu0 %vm263_vm1, %v3751_v63  ;;  %1788 = vst.msk [vmem:[#allocation2 + $0x24] sm:$0x1] %vm1779_vm9, %v4210_v48  ;;  %1790 = vst.msk [vmem:[#allocation2 + $0x2c] sm:$0x1] %vm1779_vm9, %v4210_v48 }
  0x69   : > { %1791 = vst.msk [vmem:[#allocation2 + $0x30] sm:$0xf] %vm1777_vm8, %v4210_v48  ;;  %1793 = vst.msk [vmem:[#allocation2 + $0x38] sm:$0xf] %vm1777_vm8, %v4210_v48 }
  0x6a   : > { %1792 = vst.msk [vmem:[#allocation2 + $0x34] sm:$0x1] %vm1779_vm9, %v4210_v48  ;;  %1794 = vst.msk [vmem:[#allocation2 + $0x3c] sm:$0x1] %vm1779_vm9, %v4210_v48  ;;  %v2091_v49 = vld [vmem:[#allocation2] sm:$0xf] }
  0x6b   : > { %1795 = vst.msk [vmem:[#allocation2 + $0x40] sm:$0xf] %vm1777_vm8, %v4210_v48  ;;  %1797 = vst.msk [vmem:[#allocation2 + $0x48] sm:$0xf] %vm1777_vm8, %v4210_v48  ;;  %v2108_v53 = vshrl.u32 %v2091_v49, 16  ;;  %v2111_v54 = vshll.u32 %v2091_v49, 16 }
  0x6c   : > { %1796 = vst.msk [vmem:[#allocation2 + $0x44] sm:$0x1] %vm1779_vm9, %v4210_v48  ;;  %1798 = vst.msk [vmem:[#allocation2 + $0x4c] sm:$0x1] %vm1779_vm9, %v4210_v48  ;;  %v4751_v11 = vld [vmem:[#allocation2 + $0x4] sm:$0x1] }
  0x6d   : > { %v2110_v58 = vrot.slane %v2108_v53, 4  ;;  %v2113_v59 = vrot.slane %v2111_v54, 5  ;;  %v2117_v9 = vshll.u32 %v4751_v11, 16  ;;  %v4762_v46 = vld [vmem:[#allocation2] sm:$0xe]  ;;  %vm4871_vm12 = vmand %vm1777_vm8, %vm1913_vm10 }
  0x6e   : > { %vm4877_vm13 = vmand %vm1779_vm9, %vm1919_vm11 }
  0x6f   : > { %v2114_v48 = vor.u32 %v2113_v59, %v2110_v58 }
  0xd3   : > { %v3974_v14 = vpop.f32.mrf.mxu0 }
  0xd4   : > { %v347_v62 = vadd.f32 %v3974_v14, %v3587_v56  ;;  %v4767_v14 = vld [vmem:[%s5276_s3 + $0x10] sm:$0xf] }
  0xd5   : > { %v314_v15 = vpop.f32.mrf.mxu0 }
  0xd6   : > { %v345_v0 = vadd.f32 %v3587_v56, %v314_v15  ;;  %v4775_v15 = vsel %vm276_vm0, %v4671_v5, 0 }
  0xd7   : > { %v3975_v19 = vpop.f32.mrf.mxu0 }
  0xd8   : > { %v348_v53 = vadd.f32 %v3975_v19, %v3587_v56  ;;  %v4779_v19 = vrot.slane %v2117_v9, 5 }
  0xd9   : > { %v4684_v7 = vpop.f32.mrf.mxu0 }
  0xdb   : > { %v4686_v20 = vpop.f32.mrf.mxu0 }
  0xdd   : > { %v4688_v21 = vpop.f32.mrf.mxu0 }
  0xdf   : > { %v4690_v17 = vpop.f32.mrf.mxu0 }
  0xe1   : > { %v4692_v25 = vpop.f32.mrf.mxu0 }
  0xe3   : > { %v3984_v23 = vpop.f32.mrf.mxu1 }
  0xe4   : > { %v580_v1 = vadd.f32 %v3984_v23, %v347_v62  ;;  %v4777_v23 = vrot.slane %v2114_v48, 4 }
  0xe5   : > { %v547_v26 = vpop.f32.mrf.mxu1 }
  0xe6   : > { %v578_v54 = vadd.f32 %v547_v26, %v345_v0  ;;  %v4796_v26 = vsel %vm276_vm0, %v4680_v13, 0  ;;  %v4812_v13 = vld [vmem:[%s5276_s3 + $0x1c] sm:$0xf] }
  0xe7   : > { %v3994_v27 = vpop.f32.mrf.mxu0  ;;  %v3985_v3 = vpop.f32.mrf.mxu1 }
  0xe8   : > { %v741_v2 = vadd.f32 %v3994_v27, %v580_v1  ;;  %v346_v27 = vadd.f32 %v3587_v56, %v4684_v7  ;;  %v581_v59 = vadd.f32 %v3985_v3, %v348_v53  ;;  %v4786_v1 = vld [vmem:[%s5276_s3 + $0x14] sm:$0xf]  ;;  %v349_v53 = vadd.f32 %v3587_v56, %v4688_v21 }
  0xe9   : > { %v708_v28 = vpop.f32.mrf.mxu0  ;;  %v4696_v22 = vpop.f32.mrf.mxu1 }
  0xea   : > { %v739_v62 = vadd.f32 %v708_v28, %v578_v54  ;;  %v579_v7 = vadd.f32 %v4696_v22, %v346_v27  ;;  %v352_v54 = vadd.f32 %v4690_v17, %v3587_v56  ;;  %v350_v22 = vadd.f32 %v3587_v56, %v4692_v25 }
  0xeb   : > { %v4694_v29 = vpop.f32.mrf.mxu0 }
  0xec   : > { %v742_v3 = vadd.f32 %v4694_v29, %v581_v59 }
  0xed   : > { %v4698_v4 = vpop.f32.mrf.mxu0 }
  0xf1   : > { %v4700_v18 = vpop.f32.mrf.mxu0  ;;  %v4702_v32 = vpop.f32.mrf.mxu1 }
  0xf3   : > { %v4704_v16 = vpop.f32.mrf.mxu0  ;;  %v4706_v30 = vpop.f32.mrf.mxu1 }
  0xf4   : > { %v582_v17 = vadd.f32 %v4706_v30, %v349_v53 }
  0xf5   : > { %v4708_v31 = vpop.f32.mrf.mxu0  ;;  %v4710_v24 = vpop.f32.mrf.mxu1 }
  0xf7   : > { %v4712_v33 = vpop.f32.mrf.mxu1  ;;  %v4714_v12 = vpop.f32.mrf.mxu0 }
  0xf8   : > { %v583_v30 = vadd.f32 %v4712_v33, %v350_v22 }
  0xf9   : > { %v4004_v34 = vpop.f32.mrf.mxu1 }
  0xfa   : > { %v860_v0 = vadd.f32 %v4004_v34, %v741_v2  ;;  %v4800_v2 = vsel %vm276_vm0, %v4767_v14, 0  ;;  %v4807_v34 = vld [vmem:[%s5276_s3 + $0x18] sm:$0xf] }
  0xfb   : > { %v827_v35 = vpop.f32.mrf.mxu1 }
  0xfc   : > { %v858_v28 = vadd.f32 %v827_v35, %v739_v62  ;;  %v4821_v35 = vsel %vm276_vm0, %v4786_v1, 0 }
  0xfd   : > { %v4014_v40 = vpop.f32.mrf.mxu0  ;;  %v4716_v36 = vpop.f32.mrf.mxu1  ;;  %5291 = vst [vmem:[#allocation7_spill] sm:$0xff] %v4821_v35  ;;  %v4834_v35 = vsel %vm276_vm0, %v4812_v13, 0 }
  0xfe   : > { %v861_v59 = vadd.f32 %v4716_v36, %v742_v3 }
  0xff   : > { %v4718_v37 = vpop.f32.mrf.mxu0  ;;  %v4720_v39 = vpop.f32.mrf.mxu1 }
 0x100   : > { %v1088_v62 = vadd.f32 %v4718_v37, %v858_v28 }
 0x101   : > { %v4722_v41 = vpop.f32.mrf.mxu0  ;;  %v4724_v42 = vpop.f32.mrf.mxu1 }
 0x102   : > { %v1091_v36 = vadd.f32 %v4722_v41, %v861_v59 }
 0x103   : > { %v4726_v57 = vpop.f32.mrf.mxu1  ;;  %v4728_v44 = vpop.f32.mrf.mxu0 }
 0x105   : > { %v4730_v47 = vpop.f32.mrf.mxu1 }
 0x107   : > { %v4732_v50 = vpop.f32.mrf.mxu1 }
 0x108   : > { %v4734_v6 = vpop.f32.mrf.mxu0 }
 0x109   : > { %v4024_v10 = vpop.f32.mrf.mxu1 }
 0x10a   : > { %v4736_v45 = vpop.f32.mrf.mxu0 }
 0x10b   : > { %v4738_v55 = vpop.f32.mrf.mxu1 }
 0x10c   : > { %v4740_v43 = vpop.f32.mrf.mxu0  ;;  %v1246_v37 = vadd.f32 %v4738_v55, %v1088_v62 }
 0x10d   : > { %v4745_v51 = vpop.f32.mrf.mxu1 }
 0x10e   : > { %v4747_v52 = vpop.f32.mrf.mxu0  ;;  %v1249_v53 = vadd.f32 %v4745_v51, %v1091_v36 }
 0x10f   : > { %v4749_v60 = vpop.f32.mrf.mxu1 }
 0x110   : > { %v4034_v61 = vpop.f32.mrf.mxu0 }
 0x112   : > { %v4753_v63 = vpop.f32.mrf.mxu1  ;;  %v4755_v38 = vpop.f32.mrf.mxu0 }
 0x113   : > { %5289 = vst [vmem:[#allocation5_spill] sm:$0xff] %v4753_v63 }
 0x114   : > { %v4758_v8 = vpop.f32.mrf.mxu1  ;;  %v4760_v49 = vpop.f32.mrf.mxu0 }
 0x116   : > { %v4769_v63 = vpop.f32.mrf.mxu1  ;;  %v4771_v58 = vpop.f32.mrf.mxu0 }
 0x117   : > { %5290 = vst [vmem:[#allocation6_spill] sm:$0xff] %v4769_v63  ;;  %v351_v63 = vadd.f32 %v4686_v20, %v3587_v56  ;;  %v1090_v20 = vadd.f32 %v4014_v40, %v860_v0  ;;  %v740_v40 = vadd.f32 %v4698_v4, %v579_v7  ;;  %v4830_v56 = vsel %vm276_vm0, %v4807_v34, 0 }
 0x118   : > { %v4789_v5 = vpop.f32.mrf.mxu1  ;;  %v4791_v48 = vpop.f32.mrf.mxu0  ;;  %v743_v7 = vadd.f32 %v4704_v16, %v582_v17 }
 0x119   : > { %v1248_v0 = vadd.f32 %v4024_v10, %v1090_v20  ;;  %v584_v21 = vadd.f32 %v4702_v32, %v351_v63  ;;  %v859_v4 = vadd.f32 %v4720_v39, %v740_v40  ;;  %v585_v32 = vadd.f32 %v4710_v24, %v352_v54  ;;  %v4846_v40 = vld [vmem:[#allocation2 + $0x48] sm:$0xf] }
 0x11a   : > { %v4044_v27 = vpop.f32.mrf.mxu1  ;;  %v4817_v29 = vpop.f32.mrf.mxu0  ;;  %v1365_v39 = vadd.f32 %v4755_v38, %v1246_v37  ;;  %v744_v24 = vadd.f32 %v4714_v12, %v583_v30 }
 0x11b   : > { %v1367_v10 = vadd.f32 %v4034_v61, %v1248_v0  ;;  %v745_v63 = vadd.f32 %v4700_v18, %v584_v21  ;;  %v1089_v20 = vadd.f32 %v4728_v44, %v859_v4  ;;  %v746_v55 = vadd.f32 %v4708_v31, %v585_v32 }
 0x11c   : > { %v1564_v9 = vpop.f32.mrf.mxu1  ;;  %v4039_v25 = vpop.f32.mrf.mxu0  ;;  %v862_v18 = vadd.f32 %v4726_v57, %v743_v7  ;;  %v1368_v44 = vadd.f32 %v4760_v49, %v1249_v53  ;;  %v863_v22 = vadd.f32 %v4732_v50, %v744_v24 }
 0x11d   : > { %v1597_v41 = vadd.f32 %v4044_v27, %v1367_v10  ;;  %v864_v33 = vadd.f32 %v4724_v42, %v745_v63  ;;  %v1247_v61 = vadd.f32 %v4749_v60, %v1089_v20  ;;  %v1595_v51 = vadd.f32 %v1564_v9, %v1365_v39 }
 0x11e   : > { %v4045_v3 = vpop.f32.mrf.mxu1  ;;  %v1353_v28 = vpop.f32.mrf.mxu0  ;;  %v865_v38 = vadd.f32 %v4730_v47, %v746_v55  ;;  %v3219_v42 = vshrl.u32 %v4846_v40, 16  ;;  %v1092_v49 = vadd.f32 %v4736_v45, %v862_v18  ;;  %v1093_v0 = vadd.f32 %v4747_v52, %v863_v22  ;;  %v5292_v47 = vld [vmem:[#allocation5_spill] sm:$0xff]  ;;  %v5293_v10 = vld [vmem:[#allocation6_spill] sm:$0xff] }
 0x11f   : > { %v1094_v31 = vadd.f32 %v4734_v6, %v864_v33  ;;  %v1366_v57 = vadd.f32 %v4771_v58, %v1247_v61  ;;  %v1598_v59 = vadd.f32 %v4045_v3, %v1368_v44  ;;  %v3222_v55 = vshll.u32 %v4846_v40, 16 }
 0x120   : > { %v4054_v16 = vpop.f32.mrf.mxu0  ;;  %v1567_v12 = vpop.f32.mrf.mxu1  ;;  %v1095_v9 = vadd.f32 %v4740_v43, %v865_v38  ;;  %v1250_v37 = vadd.f32 %v4758_v8, %v1092_v49  ;;  %v1251_v32 = vadd.f32 %v4789_v5, %v1093_v0 }
 0x121   : > { %v1755_v54 = vadd.f32 %v4054_v16, %v1597_v41  ;;  %v1252_v21 = vadd.f32 %v5292_v47, %v1094_v31  ;;  %v1596_v17 = vadd.f32 %v1567_v12, %v1366_v57  ;;  %v1930_v12 = vld [vmem:[#allocation2 + $0x18] sm:$0xf] }
 0x122   : > { %v1722_v27 = vpop.f32.mrf.mxu0  ;;  %v1253_v58 = vadd.f32 %v5293_v10, %v1095_v9  ;;  %v1369_v20 = vadd.f32 %v4817_v29, %v1250_v37  ;;  %v1370_v8 = vadd.f32 %v1353_v28, %v1251_v32 }
 0x123   : > { %v1763_v62 = vmul.f32 0.2, %v1755_v54  ;;  %v1753_v60 = vadd.f32 %v1722_v27, %v1595_v51  ;;  %v1371_v30 = vadd.f32 %v4791_v48, %v1252_v21  ;;  %v1933_v27 = vld [vmem:[#allocation2 + $0x1c] sm:$0x1] }
 0x124   : > { %v4055_v50 = vpop.f32.mrf.mxu0  ;;  %v1372_v53 = vadd.f32 %v4039_v25, %v1253_v58 }
 0x125   : > { %v1771_v6 = vmax.f32 %v1755_v54, %v1763_v62  ;;  %v1761_v4 = vmul.f32 0.2, %v1753_v60  ;;  %v1756_v36 = vadd.f32 %v4055_v50, %v1598_v59 }
 0x126   : > { %v1725_v45 = vpop.f32.mrf.mxu0  ;;  %v4048_v43 = vpop.f32.mrf.mxu1 }
 0x127   : > { %v3874_v63 = vpack.c.bf16 %v1771_v6, %v1771_v6  ;;  %v1769_v7 = vmax.f32 %v1753_v60, %v1761_v4  ;;  %v1764_v52 = vmul.f32 0.2, %v1756_v36  ;;  %v1754_v3 = vadd.f32 %v1725_v45, %v1596_v17  ;;  %v1915_v17 = vld [vmem:[#allocation2 + $0x8] sm:$0xf]  ;;  %v1921_v6 = vld [vmem:[#allocation2 + $0xc] sm:$0x1] }
 0x128   : > { %v1601_v39 = vadd.f32 %v4048_v43, %v1371_v30  ;;  %v4058_v41 = vpop.f32.mrf.mxu0  ;;  %v1580_v18 = vpop.f32.mrf.mxu1  ;;  %v1936_v43 = vld [vmem:[#allocation2 + $0x20] sm:$0xf] }
 0x129   : > { %v1848_v24 = vshrl.u32 %v3874_v63, 16  ;;  %v3872_v33 = vpack.c.bf16 %v1769_v7, %v1769_v7  ;;  %v1772_v5 = vmax.f32 %v1756_v36, %v1764_v52  ;;  %v1851_v16 = vshll.u32 %v3874_v63, 16 }
 0x12a   : > { %v1599_v48 = vadd.f32 %v1580_v18, %v1369_v20  ;;  %v1762_v61 = vmul.f32 0.2, %v1754_v3  ;;  %v1759_v44 = vadd.f32 %v4058_v41, %v1601_v39  ;;  %v1738_v51 = vpop.f32.mrf.mxu0  ;;  %v4049_v28 = vpop.f32.mrf.mxu1  ;;  %v1939_v41 = vld [vmem:[#allocation2 + $0x24] sm:$0x1] }
 0x12b   : > { %v1850_v54 = vrot.slane %v1848_v24, 7  ;;  %v1832_v25 = vshrl.u32 %v3872_v33, 16  ;;  %v1835_v38 = vshll.u32 %v3872_v33, 16  ;;  %v3875_v22 = vpack.c.bf16 %v1772_v5, %v1772_v5 }
 0x12c   : > { %v1602_v57 = vadd.f32 %v4049_v28, %v1372_v53  ;;  %v1770_v59 = vmax.f32 %v1754_v3, %v1762_v61  ;;  %v1767_v62 = vmul.f32 0.2, %v1759_v44  ;;  %v1757_v60 = vadd.f32 %v1738_v51, %v1599_v48  ;;  %v4059_v49 = vpop.f32.mrf.mxu0  ;;  %v1583_v50 = vpop.f32.mrf.mxu1  ;;  %v1927_v48 = vld [vmem:[#allocation2 + $0x14] sm:$0x1] }
 0x12d   : > { %v1853_v9 = vor.u32 %v1851_v16, %v1850_v54  ;;  %v1854_v0 = vrot.slane %v1850_v54, 4  ;;  %v1834_v47 = vrot.slane %v1832_v25, 7  ;;  %v1856_v21 = vshrl.u32 %v3875_v22, 16 }
 0x12e   : > { %v1859_v4 = vshll.u32 %v3875_v22, 16  ;;  %v3873_v36 = vpack.c.bf16 %v1770_v59, %v1770_v59  ;;  %v1600_v37 = vadd.f32 %v1583_v50, %v1370_v8  ;;  %v1775_v10 = vmax.f32 %v1759_v44, %v1767_v62  ;;  %v1741_v20 = vpop.f32.mrf.mxu0  ;;  %v1924_v8 = vld [vmem:[#allocation2 + $0x10] sm:$0xf]  ;;  %v1954_v59 = vld [vmem:[#allocation2 + $0x38] sm:$0xf] }
 0x12f   : > { %v1931_v58 = vsel %vm4871_vm12, %v1853_v9, %v1930_v12  ;;  %v1934_v32 = vsel %vm4877_vm13, %v1854_v0, %v1933_v27  ;;  %v1837_v30 = vor.u32 %v1835_v38, %v1834_v47  ;;  %v1838_v45 = vrot.slane %v1834_v47, 4  ;;  %v4892_v38 = vld [vmem:[%s5276_s3 + $0x20] sm:$0xf]  ;;  %v1957_v47 = vld [vmem:[#allocation2 + $0x3c] sm:$0x1] }
 0x130   : > { %1932 = vst [vmem:[#allocation2 + $0x18] sm:$0xf] %v1931_v58  ;;  %1935 = vst [vmem:[#allocation2 + $0x1c] sm:$0x1] %v1934_v32  ;;  %v1858_v63 = vrot.slane %v1856_v21, 7  ;;  %v1840_v7 = vshrl.u32 %v3873_v36, 16  ;;  %v3878_v3 = vpack.c.bf16 %v1775_v10, %v1775_v10  ;;  %v1760_v33 = vadd.f32 %v4059_v49, %v1602_v57 }
 0x131   : > { %v1843_v52 = vshll.u32 %v3873_v36, 16  ;;  %v1916_v53 = vsel %vm4871_vm12, %v1837_v30, %v1915_v17  ;;  %v1922_v39 = vsel %vm4877_vm13, %v1838_v45, %v1921_v6  ;;  %v1765_v24 = vmul.f32 0.2, %v1757_v60  ;;  %v4906_v50 = vld [vmem:[#allocation2 + $0x4c] sm:$0x1] }
 0x132   : > { %1917 = vst [vmem:[#allocation2 + $0x8] sm:$0xf] %v1916_v53  ;;  %1923 = vst [vmem:[#allocation2 + $0xc] sm:$0x1] %v1922_v39  ;;  %v1861_v18 = vor.u32 %v1859_v4, %v1858_v63  ;;  %v1862_v5 = vrot.slane %v1858_v63, 4  ;;  %v1842_v16 = vrot.slane %v1840_v7, 7  ;;  %v1758_v25 = vadd.f32 %v1741_v20, %v1600_v37 }
 0x133   : > { %v1880_v61 = vshrl.u32 %v3878_v3, 16  ;;  %v1883_v44 = vshll.u32 %v3878_v3, 16  ;;  %v1773_v51 = vmax.f32 %v1757_v60, %v1765_v24  ;;  %v1768_v54 = vmul.f32 0.2, %v1760_v33  ;;  %v1942_v58 = vld [vmem:[#allocation2 + $0x28] sm:$0xf] }
 0x134   : > { %v1937_v22 = vsel %vm4871_vm12, %v1861_v18, %v1936_v43  ;;  %v1940_v28 = vsel %vm4877_vm13, %v1862_v5, %v1939_v41  ;;  %v1845_v12 = vor.u32 %v1843_v52, %v1842_v16  ;;  %v1846_v27 = vrot.slane %v1842_v16, 4  ;;  %v1945_v32 = vld [vmem:[#allocation2 + $0x2c] sm:$0x1]  ;;  %v1963_v18 = vld [vmem:[#allocation2 + $0x44] sm:$0x1] }
 0x135   : > { %1938 = vst [vmem:[#allocation2 + $0x20] sm:$0xf] %v1937_v22  ;;  %1941 = vst [vmem:[#allocation2 + $0x24] sm:$0x1] %v1940_v28  ;;  %v1882_v57 = vrot.slane %v1880_v61, 7  ;;  %v3876_v62 = vpack.c.bf16 %v1773_v51, %v1773_v51  ;;  %v1776_v60 = vmax.f32 %v1760_v33, %v1768_v54  ;;  %v4904_v21 = vsel %vm276_vm0, %v4892_v38, 0 }
 0x136   : > { %v1766_v49 = vmul.f32 0.2, %v1758_v25  ;;  %v1925_v9 = vsel %vm4871_vm12, %v1845_v12, %v1924_v8  ;;  %v1928_v0 = vsel %vm4877_vm13, %v1846_v27, %v1927_v48  ;;  %v4910_v17 = vrot.slane %v3219_v42, 4  ;;  %v1960_v33 = vld [vmem:[#allocation2 + $0x40] sm:$0xf] }
 0x137   : > { %1926 = vst [vmem:[#allocation2 + $0x10] sm:$0xf] %v1925_v9  ;;  %1929 = vst [vmem:[#allocation2 + $0x14] sm:$0x1] %v1928_v0  ;;  %v1885_v6 = vor.u32 %v1883_v44, %v1882_v57  ;;  %v1886_v4 = vrot.slane %v1882_v57, 4  ;;  %v1864_v36 = vshrl.u32 %v3876_v62, 16  ;;  %v3879_v30 = vpack.c.bf16 %v1776_v60, %v1776_v60 }
 0x138   : > { %v4914_v37 = vrot.slane %v3222_v55, 5  ;;  %v1867_v10 = vshll.u32 %v3876_v62, 16  ;;  %v1774_v45 = vmax.f32 %v1758_v25, %v1766_v49  ;;  %v4916_v63 = vld [vmem:[#allocation2 + $0x18] sm:$0xf]  ;;  %v3228_v43 = vshll.u32 %v4906_v50, 16 }
 0x139   : > { %v1955_v42 = vsel %vm4871_vm12, %v1885_v6, %v1954_v59  ;;  %v1958_v7 = vsel %vm4877_vm13, %v1886_v4, %v1957_v47  ;;  %v1866_v52 = vrot.slane %v1864_v36, 7  ;;  %v4190_v3 = vld [vmem:[#allocation2] ss:$8 sps:$4 sm:$0xff]   ;;  %v2150_v40 = vshrl.u32 %v4916_v63, 16  ;;  %v4924_v41 = vld [vmem:[#allocation2 + $0xc] sm:$0x1] }
 0x13a   : > { %1956 = vst [vmem:[#allocation2 + $0x38] sm:$0xf] %v1955_v42  ;;  %1959 = vst [vmem:[#allocation2 + $0x3c] sm:$0x1] %v1958_v7  ;;  %v1888_v55 = vshrl.u32 %v3879_v30, 16  ;;  %v1891_v20 = vshll.u32 %v3879_v30, 16  ;;  %v3877_v53 = vpack.c.bf16 %v1774_v45, %v1774_v45  ;;  %4062 = vmatprep.mubr.msk.bf16.mxu1 %vm263_vm1, %v4190_v3  ;;  %v2120_v0 = vsel %vm4335_vm6, %v4777_v23, %v4779_v19 }
 0x13b   : > { %v2093_v39 = vld [vmem:[#allocation2 + $0x8] sm:$0xf]  ;;  %v1869_v8 = vor.u32 %v1867_v10, %v1866_v52  ;;  %v1870_v24 = vrot.slane %v1866_v52, 4  ;;  %v2131_v51 = vshll.u32 %v4924_v41, 16  ;;  %v1948_v22 = vld [vmem:[#allocation2 + $0x30] sm:$0xf] }
 0x13c   : > { %v2122_v5 = vshrl.u32 %v2093_v39, 16  ;;  %v2125_v16 = vshll.u32 %v2093_v39, 16  ;;  %v1890_v48 = vrot.slane %v1888_v55, 7  ;;  %v1872_v61 = vshrl.u32 %v3877_v53, 16  ;;  %v1951_v28 = vld [vmem:[#allocation2 + $0x34] sm:$0x1] }
 0x13d   : > { %v1875_v44 = vshll.u32 %v3877_v53, 16  ;;  %v1943_v54 = vsel %vm4871_vm12, %v1869_v8, %v1942_v58  ;;  %v1946_v25 = vsel %vm4877_vm13, %v1870_v24, %v1945_v32  ;;  %v4932_v57 = vld [vmem:[#allocation2 + $0x1c] sm:$0x1]  ;;  %v2133_v6 = vrot.slane %v2131_v51, 5  ;;  %v2322_v42 = vld [vmem:[#allocation2 + $0x8] sm:$0xe] }
 0x13e   : > { %v2124_v12 = vrot.slane %v2122_v5, 4  ;;  %v2127_v27 = vrot.slane %v2125_v16, 5  ;;  %1944 = vst [vmem:[#allocation2 + $0x28] sm:$0xf] %v1943_v54  ;;  %1947 = vst [vmem:[#allocation2 + $0x2c] sm:$0x1] %v1946_v25  ;;  %v1893_v59 = vor.u32 %v1891_v20, %v1890_v48 }
 0x13f   : > { %v1894_v62 = vrot.slane %v1890_v48, 4  ;;  %v1874_v60 = vrot.slane %v1872_v61, 7  ;;  %v4191_v49 = vld [vmem:[#allocation2 + $0x10] ss:$8 sps:$4 sm:$0xff]   ;;  %v4938_v36 = vld [vmem:[#allocation2 + $0x14] sm:$0x1] }
 0x140   : > { %v2128_v47 = vor.u32 %v2127_v27, %v2124_v12  ;;  %v2095_v4 = vld [vmem:[#allocation2 + $0x10] sm:$0xf]  ;;  %v2152_v10 = vrot.slane %v2150_v40, 4  ;;  %v1961_v58 = vsel %vm4871_vm12, %v1893_v59, %v1960_v33  ;;  %4063 = vmatmul.mubr.msk.bf16.vlgmr.msra.gmra.mxu1 %vm263_vm1, %v4191_v49  ;;  %v2145_v52 = vshll.u32 %v4938_v36, 16  ;;  %v2099_v53 = vld [vmem:[#allocation2 + $0x20] sm:$0xf] }
 0x141   : > { %v1964_v32 = vsel %vm4877_vm13, %v1894_v62, %v1963_v18  ;;  %v1877_v30 = vor.u32 %v1875_v44, %v1874_v60  ;;  %v1878_v45 = vrot.slane %v1874_v60, 4  ;;  %1962 = vst [vmem:[#allocation2 + $0x40] sm:$0xf] %v1961_v58  ;;  %4081 = vmatpush3.bf16.msra.mxu1 %v4775_v15  ;;  %v2136_v19 = vshrl.u32 %v2095_v4, 16  ;;  %v4953_v39 = vld [vmem:[#allocation2 + $0x24] sm:$0x1] }
 0x142   : > { %1965 = vst [vmem:[#allocation2 + $0x44] sm:$0x1] %v1964_v32  ;;  %v2129_v23 = vrot.slane %v2128_v47, 4  ;;  %v2139_v7 = vshll.u32 %v2095_v4, 16  ;;  %v2153_v55 = vshll.u32 %v4916_v63, 16  ;;  %v2159_v20 = vshll.u32 %v4932_v57, 16  ;;  %4163 = vmatprep.subr.msk.bf16.mxu1 %vm276_vm0, %v4767_v14 }
 0x143   : > { %v1949_v3 = vsel %vm4871_vm12, %v1877_v30, %v1948_v22  ;;  %v1952_v40 = vsel %vm4877_vm13, %v1878_v45, %v1951_v28  ;;  %v2138_v29 = vrot.slane %v2136_v19, 4  ;;  %v2147_v24 = vrot.slane %v2145_v52, 5  ;;  %v2323_v60 = vld [vmem:[#allocation2 + $0x10] sm:$0xe]  ;;  %v2324_v4 = vld [vmem:[#allocation2 + $0x18] sm:$0xe] }
 0x144   : > { %1950 = vst [vmem:[#allocation2 + $0x30] sm:$0xf] %v1949_v3  ;;  %1953 = vst [vmem:[#allocation2 + $0x34] sm:$0x1] %v1952_v40  ;;  %v2134_v15 = vsel %vm4335_vm6, %v2129_v23, %v2133_v6  ;;  %v2141_v8 = vrot.slane %v2139_v7, 5  ;;  %v2155_v33 = vrot.slane %v2153_v55, 5 }
 0x145   : > { %v3774_v31 = vcombine.low %v2120_v0, %v2134_v15  ;;  %v2161_v18 = vrot.slane %v2159_v20, 5  ;;  %v3783_v63 = vrot.slane %v2322_v42, 9  ;;  %v4192_v5 = vld [vmem:[#allocation2 + $0x20] ss:$8 sps:$4 sm:$0xff]   ;;  %v5299_v48 = vrot.slane %v4751_v11, 5 }
 0x146   : > { %v2142_v16 = vor.u32 %v2141_v8, %v2138_v29  ;;  %v5300_v61 = vrot.slane %v4762_v46, 9  ;;  %v2351_v51 = vrot.slane %v4924_v41, 5  ;;  %v2164_v54 = vshrl.u32 %v2099_v53, 16  ;;  %v2101_v22 = vld [vmem:[#allocation2 + $0x28] sm:$0xf]  ;;  %4066 = vmatprep.mubr.msk.bf16.mxu1 %vm263_vm1, %v4192_v5 }
 0x147   : > { %4072 = vmatprep.mubr.msk.bf16.mxu0 %vm263_vm1, %v3774_v31  ;;  %v2156_v25 = vor.u32 %v2155_v33, %v2152_v10  ;;  %v4967_v28 = vld [vmem:[#allocation2 + $0x2c] sm:$0x1]  ;;  %v2167_v12 = vshll.u32 %v2099_v53, 16  ;;  %v2173_v27 = vshll.u32 %v4953_v39, 16  ;;  %v3225_v11 = vor.u32 %v4914_v37, %v4910_v17  ;;  %v2105_v45 = vld [vmem:[#allocation2 + $0x38] sm:$0xf] }
 0x148   : > { %v2348_v14 = vsel %vm4350_vm7, %v5300_v61, %v5299_v48  ;;  %v2143_v46 = vrot.slane %v2142_v16, 4  ;;  %v2352_v59 = vsel %vm4350_vm7, %v3783_v63, %v2351_v51  ;;  %v2166_v41 = vrot.slane %v2164_v54, 4  ;;  %v2106_v15 = vld [vmem:[#allocation2 + $0x3c] sm:$0x1]  ;;  %v2325_v29 = vld [vmem:[#allocation2 + $0x20] sm:$0xe] }
 0x149   : > { %v2178_v62 = vshrl.u32 %v2101_v22, 16  ;;  %v2157_v49 = vrot.slane %v2156_v25, 4  ;;  %v3791_v0 = vcombine.low %v2348_v14, %v2352_v59  ;;  %v2169_v47 = vrot.slane %v2167_v12, 5  ;;  %v2326_v48 = vld [vmem:[#allocation2 + $0x28] sm:$0xe] }
 0x14a   : > { %v2175_v6 = vrot.slane %v2173_v27, 5  ;;  %v2148_v10 = vsel %vm4335_vm6, %v2143_v46, %v2147_v24  ;;  %v2181_v32 = vshll.u32 %v2101_v22, 16  ;;  %v2187_v30 = vshll.u32 %v4967_v28, 16 }
 0x14b   : > { %v2180_v58 = vrot.slane %v2178_v62, 4  ;;  %v4193_v42 = vld [vmem:[#allocation2 + $0x30] ss:$8 sps:$4 sm:$0xff]   ;;  %v2162_v23 = vsel %vm4335_vm6, %v2157_v49, %v2161_v18  ;;  %v2170_v19 = vor.u32 %v2169_v47, %v2166_v41  ;;  %v3784_v7 = vrot.slane %v2323_v60, 9  ;;  %v2104_v33 = vld [vmem:[#allocation2 + $0x34] sm:$0x1] }
 0x14c   : > { %v2355_v52 = vrot.slane %v4938_v36, 5  ;;  %v3775_v3 = vcombine.low %v2148_v10, %v2162_v23  ;;  %v2183_v40 = vrot.slane %v2181_v32, 5  ;;  %v2189_v55 = vrot.slane %v2187_v30, 5  ;;  %v2103_v53 = vld [vmem:[#allocation2 + $0x30] sm:$0xf]  ;;  %4067 = vmatmul.mubr.msk.bf16.gmra.mxu1 %vm263_vm1, %v4193_v42 }
 0x14d   : > { %v3785_v20 = vrot.slane %v2324_v4, 9  ;;  %v2171_v8 = vrot.slane %v2170_v19, 4  ;;  %v2359_v31 = vrot.slane %v4932_v57, 5  ;;  %v2192_v18 = vshrl.u32 %v2103_v53, 16  ;;  %4082 = vmatprep.mubr.msk.bf16.mxu1 %vm263_vm1, %v3791_v0  ;;  %v2327_v62 = vld [vmem:[#allocation2 + $0x30] sm:$0xe] }
 0x14e   : > { %v2356_v24 = vsel %vm4350_vm7, %v3784_v7, %v2355_v52  ;;  %4073 = vmatmul.mubr.msk.bf16.vlgmr.msra.gmra.mxu0 %vm263_vm1, %v3775_v3  ;;  %v2184_v36 = vor.u32 %v2183_v40, %v2180_v58  ;;  %v2195_v63 = vshll.u32 %v2103_v53, 16  ;;  %v2201_v5 = vshll.u32 %v2104_v33, 16  ;;  %v2328_v47 = vld [vmem:[#allocation2 + $0x38] sm:$0xe]  ;;  %v2599_v3 = vld [vmem:[#allocation2 + $0x10] sm:$0xf] }
 0x14f   : > { %v2206_v16 = vshrl.u32 %v2105_v45, 16  ;;  %v2176_v61 = vsel %vm4335_vm6, %v2171_v8, %v2175_v6  ;;  %4091 = vmatpush3.bf16.msra.mxu0 %v4796_v26  ;;  %v2360_v14 = vsel %vm4350_vm7, %v3785_v20, %v2359_v31  ;;  %v2194_v57 = vrot.slane %v2192_v18, 4  ;;  %v2597_v6 = vld [vmem:[#allocation2 + $0x8] sm:$0xf]  ;;  %v5011_v20 = vld [vmem:[#allocation2 + $0x14] sm:$0x1] }
 0x150   : > { %v2209_v51 = vshll.u32 %v2105_v45, 16  ;;  %v2185_v54 = vrot.slane %v2184_v36, 4  ;;  %v3792_v25 = vcombine.low %v2356_v24, %v2360_v14  ;;  %v2197_v22 = vrot.slane %v2195_v63, 5  ;;  %4164 = vmatprep.subr.msk.bf16.mxu0 %vm276_vm0, %v4786_v1  ;;  %v4998_v1 = vld [vmem:[#allocation2 + $0xc] sm:$0x1] }
 0x151   : > { %v2203_v12 = vrot.slane %v2201_v5, 5  ;;  %v2208_v27 = vrot.slane %v2206_v16, 4  ;;  %v2215_v59 = vshll.u32 %v2106_v15, 16  ;;  %v3786_v41 = vrot.slane %v2325_v29, 9  ;;  %v2601_v29 = vld [vmem:[#allocation2 + $0x18] sm:$0xf] }
 0x152   : > { %v2211_v46 = vrot.slane %v2209_v51, 5  ;;  %v2190_v26 = vsel %vm4335_vm6, %v2185_v54, %v2189_v55  ;;  %v2198_v60 = vor.u32 %v2197_v22, %v2194_v57  ;;  %v2363_v49 = vrot.slane %v4953_v39, 5  ;;  %v5020_v31 = vld [vmem:[#allocation2 + $0x1c] sm:$0x1]  ;;  %v4194_v16 = vld [vmem:[#allocation2 + $0x8] ss:$8 sps:$4 sm:$0xff]  }
 0x153   : > { %v3787_v0 = vrot.slane %v2326_v48, 9  ;;  %v3776_v4 = vcombine.low %v2176_v61, %v2190_v26  ;;  %v2217_v58 = vrot.slane %v2215_v59, 5  ;;  %v2367_v32 = vrot.slane %v4967_v28, 5  ;;  %v5025_v54 = vld [vmem:[#allocation2 + $0x24] sm:$0x1] }
 0x154   : > { %v2212_v10 = vor.u32 %v2211_v46, %v2208_v27  ;;  %v2199_v30 = vrot.slane %v2198_v60, 4  ;;  %v2364_v45 = vsel %vm4350_vm7, %v3786_v41, %v2363_v49  ;;  %v3788_v42 = vrot.slane %v2327_v62, 9  ;;  %4083 = vmatmul.mubr.msk.bf16.vlgmr.msra.gmra.mxu1 %vm263_vm1, %v3792_v25  ;;  %v2605_v41 = vld [vmem:[#allocation2 + $0x28] sm:$0xf] }
 0x155   : > { %v2371_v23 = vrot.slane %v2104_v33, 5  ;;  %4076 = vmatprep.mubr.msk.bf16.mxu0 %vm263_vm1, %v3776_v4  ;;  %v2368_v19 = vsel %vm4350_vm7, %v3787_v0, %v2367_v32  ;;  %v3789_v7 = vrot.slane %v2328_v47, 9  ;;  %v2375_v52 = vrot.slane %v2106_v15, 5  ;;  %4101 = vmatpush3.bf16.msra.mxu1 %v4800_v2  ;;  %v2603_v33 = vld [vmem:[#allocation2 + $0x20] sm:$0xf] }
 0x156   : > { %v2213_v39 = vrot.slane %v2212_v10, 4  ;;  %v2204_v28 = vsel %vm4335_vm6, %v2199_v30, %v2203_v12  ;;  %v3793_v40 = vcombine.low %v2364_v45, %v2368_v19  ;;  %v2614_v53 = vshrl.u32 %v2597_v6, 16  ;;  %4165 = vmatprep.subr.msk.bf16.mxu1 %vm276_vm0, %v4807_v34  ;;  %v5029_v0 = vld [vmem:[#allocation2 + $0x2c] sm:$0x1]  ;;  %v2607_v45 = vld [vmem:[#allocation2 + $0x30] sm:$0xf] }
 0x157   : > { %v2372_v55 = vsel %vm4350_vm7, %v3788_v42, %v2371_v23  ;;  %v2376_v15 = vsel %vm4350_vm7, %v3789_v7, %v2375_v52  ;;  %v2617_v24 = vshll.u32 %v2597_v6, 16  ;;  %v2623_v2 = vshll.u32 %v4998_v1, 16  ;;  %v4196_v7 = vld [vmem:[#allocation2 + $0x28] ss:$8 sps:$4 sm:$0xff]  }
 0x158   : > { %v2218_v8 = vsel %vm4335_vm6, %v2213_v39, %v2217_v58  ;;  %4086 = vmatprep.mubr.msk.bf16.mxu1 %vm263_vm1, %v3793_v40  ;;  %v3794_v36 = vcombine.low %v2372_v55, %v2376_v15  ;;  %v2616_v63 = vrot.slane %v2614_v53, 4  ;;  %v2628_v5 = vshrl.u32 %v2599_v3, 16  ;;  %v4195_v58 = vld [vmem:[#allocation2 + $0x18] ss:$8 sps:$4 sm:$0xff]  }
 0x159   : > { %v3777_v18 = vcombine.low %v2204_v28, %v2218_v8  ;;  %v2619_v48 = vrot.slane %v2617_v24, 5  ;;  %v2625_v61 = vrot.slane %v2623_v2, 5  ;;  %v2631_v14 = vshll.u32 %v2599_v3, 16  ;;  %v5035_v3 = vld [vmem:[#allocation2 + $0x34] sm:$0x1] }
 0x15a   : > { %v2637_v57 = vshll.u32 %v5011_v20, 16  ;;  %v2630_v51 = vrot.slane %v2628_v5, 4  ;;  %v2642_v34 = vshrl.u32 %v2601_v29, 16  ;;  %v2645_v25 = vshll.u32 %v2601_v29, 16  ;;  %v2827_v8 = vld [vmem:[#allocation2 + $0x8] sm:$0xe] }
 0x15b   : > { %4077 = vmatmul.mubr.msk.bf16.gmra.mxu0 %vm263_vm1, %v3777_v18  ;;  %v2651_v22 = vshll.u32 %v5020_v31, 16  ;;  %v2620_v12 = vor.u32 %v2619_v48, %v2616_v63  ;;  %v2633_v27 = vrot.slane %v2631_v14, 5  ;;  %v2656_v59 = vshrl.u32 %v2603_v33, 16  ;;  %v2828_v18 = vld [vmem:[#allocation2 + $0x10] sm:$0xe] }
 0x15c   : > { %4092 = vmatprep.mubr.msk.bf16.mxu0 %vm263_vm1, %v4194_v16  ;;  %v2639_v46 = vrot.slane %v2637_v57, 5  ;;  %v2644_v62 = vrot.slane %v2642_v34, 4  ;;  %v2647_v26 = vrot.slane %v2645_v25, 5  ;;  %v2659_v49 = vshll.u32 %v2603_v33, 16  ;;  %4087 = vmatmul.mubr.msk.bf16.gmra.mxu1 %vm263_vm1, %v3794_v36  ;;  %v2609_v48 = vld [vmem:[#allocation2 + $0x38] sm:$0xf] }
 0x15d   : > { %v2653_v60 = vrot.slane %v2651_v22, 5  ;;  %v2621_v47 = vrot.slane %v2620_v12, 4  ;;  %v2634_v6 = vor.u32 %v2633_v27, %v2630_v51  ;;  %v2658_v4 = vrot.slane %v2656_v59, 4  ;;  %v5302_v14 = vld [vmem:[#allocation7_spill] sm:$0xff]  ;;  %v2611_v22 = vld [vmem:[#allocation2 + $0x40] sm:$0xf] }
 0x15e   : > { %v2665_v10 = vshll.u32 %v5025_v54, 16  ;;  %v2648_v32 = vor.u32 %v2647_v26, %v2644_v62  ;;  %v2661_v30 = vrot.slane %v2659_v49, 5  ;;  %v2670_v42 = vshrl.u32 %v2605_v41, 16 }
 0x15f   : > { %v2673_v23 = vshll.u32 %v2605_v41, 16  ;;  %v2626_v39 = vsel %vm4335_vm6, %v2621_v47, %v2625_v61  ;;  %v2635_v19 = vrot.slane %v2634_v6, 4  ;;  %v2679_v28 = vshll.u32 %v5029_v0, 16  ;;  %v5043_v61 = vld [vmem:[#allocation2 + $0x3c] sm:$0x1] }
 0x160   : > { %v2667_v52 = vrot.slane %v2665_v10, 5  ;;  %v2649_v40 = vrot.slane %v2648_v32, 4  ;;  %v2662_v55 = vor.u32 %v2661_v30, %v2658_v4  ;;  %v2672_v53 = vrot.slane %v2670_v42, 4  ;;  %v5052_v41 = vld [vmem:[#allocation2 + $0x44] sm:$0x1] }
 0x161   : > { %v2675_v29 = vrot.slane %v2673_v23, 5  ;;  %v2640_v15 = vsel %vm4335_vm6, %v2635_v19, %v2639_v46  ;;  %v2681_v24 = vrot.slane %v2679_v28, 5  ;;  %v2684_v2 = vshrl.u32 %v2607_v45, 16  ;;  %v4197_v47 = vld [vmem:[#allocation2 + $0x38] ss:$8 sps:$4 sm:$0xff]  }
 0x162   : > { %v2687_v33 = vshll.u32 %v2607_v45, 16  ;;  %v3809_v36 = vcombine.low %v2626_v39, %v2640_v15  ;;  %v2654_v63 = vsel %vm4335_vm6, %v2649_v40, %v2653_v60  ;;  %v2663_v5 = vrot.slane %v2662_v55, 4  ;;  %v2830_v45 = vld [vmem:[#allocation2 + $0x20] sm:$0xe]  ;;  %v2831_v40 = vld [vmem:[#allocation2 + $0x28] sm:$0xe] }
 0x163   : > { %4093 = vmatmul.mubr.msk.bf16.vlgmr.msra.gmra.mxu0 %vm263_vm1, %v4195_v58  ;;  %v2676_v16 = vor.u32 %v2675_v29, %v2672_v53  ;;  %v2686_v57 = vrot.slane %v2684_v2, 4  ;;  %v2693_v34 = vshll.u32 %v5035_v3, 16  ;;  %v3817_v25 = vrot.slane %v2827_v8, 9  ;;  %v2829_v58 = vld [vmem:[#allocation2 + $0x18] sm:$0xe] }
 0x164   : > { %4096 = vmatprep.mubr.msk.bf16.mxu0 %vm263_vm1, %v4196_v7  ;;  %4111 = vmatpush3.bf16.msra.mxu0 %v5302_v14  ;;  %v2689_v51 = vrot.slane %v2687_v33, 5  ;;  %v2668_v12 = vsel %vm4335_vm6, %v2663_v5, %v2667_v52  ;;  %v2853_v46 = vrot.slane %v4998_v1, 5  ;;  %v3818_v59 = vrot.slane %v2828_v18, 9  ;;  %v2832_v8 = vld [vmem:[#allocation2 + $0x30] sm:$0xe] }
 0x165   : > { %4102 = vmatprep.mubr.msk.bf16.mxu1 %vm263_vm1, %v3809_v36  ;;  %v2677_v27 = vrot.slane %v2676_v16, 4  ;;  %4166 = vmatprep.subr.msk.bf16.mxu0 %vm276_vm0, %v4812_v13  ;;  %v3810_v62 = vcombine.low %v2654_v63, %v2668_v12  ;;  %v2857_v60 = vrot.slane %v5011_v20, 5  ;;  %v5059_v49 = vrot.slane %v3228_v43, 5  ;;  %v2833_v15 = vld [vmem:[#allocation2 + $0x38] sm:$0xe] }
 0x166   : > { %v2690_v26 = vor.u32 %v2689_v51, %v2686_v57  ;;  %v2695_v4 = vrot.slane %v2693_v34, 5  ;;  %v2698_v1 = vshrl.u32 %v2609_v48, 16  ;;  %v2701_v10 = vshll.u32 %v2609_v48, 16  ;;  %v2834_v36 = vld [vmem:[#allocation2 + $0x40] sm:$0xe] }
 0x167   : > { %v2682_v6 = vsel %vm4335_vm6, %v2677_v27, %v2681_v24  ;;  %4103 = vmatmul.mubr.msk.bf16.vlgmr.msra.gmra.mxu1 %vm263_vm1, %v3810_v62  ;;  %v2858_v13 = vsel %vm4350_vm7, %v3818_v59, %v2857_v60  ;;  %v2707_v20 = vshll.u32 %v5043_v61, 16  ;;  %v2712_v30 = vshrl.u32 %v2611_v22, 16  ;;  %v5088_v12 = vld [vmem:[#allocation2 + $0x14] sm:$0x1]  ;;  %v3106_v62 = vld [vmem:[#allocation2 + $0x18] sm:$0xf] }
 0x168   : > { %v2691_v32 = vrot.slane %v2690_v26, 4  ;;  %4121 = vmatpush3.bf16.msra.mxu1 %v4830_v56  ;;  %v2854_v43 = vsel %vm4350_vm7, %v3817_v25, %v2853_v46  ;;  %v2700_v42 = vrot.slane %v2698_v1, 4  ;;  %v2703_v23 = vrot.slane %v2701_v10, 5 }
 0x169   : > { %v2715_v39 = vshll.u32 %v2611_v22, 16  ;;  %v3826_v7 = vcombine.low %v2854_v43, %v2858_v13  ;;  %v2714_v52 = vrot.slane %v2712_v30, 4  ;;  %v2721_v28 = vshll.u32 %v5052_v41, 16  ;;  %4167 = vmatprep.subr.msk.bf16.mxu1 %vm276_vm0, %v4892_v38  ;;  %v3104_v22 = vld [vmem:[#allocation2 + $0x10] sm:$0xf] }
 0x16a   : > { %v2696_v19 = vsel %vm4335_vm6, %v2691_v32, %v2695_v4  ;;  %v2704_v55 = vor.u32 %v2703_v23, %v2700_v42  ;;  %v3819_v29 = vrot.slane %v2829_v58, 9  ;;  %v2709_v24 = vrot.slane %v2707_v20, 5  ;;  %v3108_v32 = vld [vmem:[#allocation2 + $0x20] sm:$0xf]  ;;  %v3110_v23 = vld [vmem:[#allocation2 + $0x28] sm:$0xf] }
 0x16b   : > { %4097 = vmatmul.mubr.msk.bf16.gmra.mxu0 %vm263_vm1, %v4197_v47  ;;  %v3811_v56 = vcombine.low %v2682_v6, %v2696_v19  ;;  %v2717_v53 = vrot.slane %v2715_v39, 5  ;;  %v2861_v2 = vrot.slane %v5020_v31, 5  ;;  %v3820_v33 = vrot.slane %v2830_v45, 9  ;;  %v5098_v47 = vld [vmem:[#allocation2 + $0x1c] sm:$0x1] }
 0x16c   : > { %4112 = vmatprep.mubr.msk.bf16.mxu0 %vm263_vm1, %v3826_v7  ;;  %v2865_v18 = vrot.slane %v5025_v54, 5  ;;  %v2705_v38 = vrot.slane %v2704_v55, 4  ;;  %v3821_v5 = vrot.slane %v2831_v40, 9  ;;  %v2869_v16 = vrot.slane %v5029_v0, 5 }
 0x16d   : > { %4106 = vmatprep.mubr.msk.bf16.mxu1 %vm263_vm1, %v3811_v56  ;;  %v2718_v63 = vor.u32 %v2717_v53, %v2714_v52  ;;  %v2862_v48 = vsel %vm4350_vm7, %v3819_v29, %v2861_v2  ;;  %v3822_v57 = vrot.slane %v2832_v8, 9  ;;  %v2873_v31 = vrot.slane %v5035_v3, 5  ;;  %v5116_v52 = vld [vmem:[#allocation2 + $0x24] sm:$0x1]  ;;  %v5118_v29 = vld [vmem:[#allocation2 + $0x2c] sm:$0x1] }
 0x16e   : > { %v2866_v14 = vsel %vm4350_vm7, %v3820_v33, %v2865_v18  ;;  %v2710_v54 = vsel %vm4335_vm6, %v2705_v38, %v2709_v24  ;;  %v2723_v34 = vrot.slane %v2721_v28, 5  ;;  %v3823_v27 = vrot.slane %v2833_v15, 9  ;;  %v3334_v24 = vld [vmem:[#allocation2 + $0x10] sm:$0xe] }
 0x16f   : > { %v2719_v51 = vrot.slane %v2718_v63, 4  ;;  %v3827_v25 = vcombine.low %v2862_v48, %v2866_v14  ;;  %v2874_v0 = vsel %vm4350_vm7, %v3822_v57, %v2873_v31  ;;  %v2877_v46 = vrot.slane %v5043_v61, 5  ;;  %v4198_v61 = vld [vmem:[#allocation2 + $0x10] ss:$8 sps:$4 sm:$0xff]   ;;  %v4199_v14 = vld [vmem:[#allocation2 + $0x20] ss:$8 sps:$4 sm:$0xff]  }
 0x170   : > { %v3824_v59 = vrot.slane %v2834_v36, 9  ;;  %v2870_v26 = vsel %vm4350_vm7, %v3821_v5, %v2869_v16  ;;  %v2881_v60 = vrot.slane %v5052_v41, 5  ;;  %v3121_v6 = vshrl.u32 %v3104_v22, 16  ;;  %v3335_v36 = vld [vmem:[#allocation2 + $0x18] sm:$0xe] }
 0x171   : > { %v2724_v3 = vsel %vm4335_vm6, %v2719_v51, %v2723_v34  ;;  %v3828_v1 = vcombine.low %v2870_v26, %v2874_v0  ;;  %v3124_v10 = vshll.u32 %v3104_v22, 16  ;;  %v3130_v58 = vshll.u32 %v5088_v12, 16  ;;  %v3112_v48 = vld [vmem:[#allocation2 + $0x30] sm:$0xf]  ;;  %v5125_v51 = vld [vmem:[#allocation2 + $0x34] sm:$0x1] }
 0x172   : > { %v3812_v4 = vcombine.low %v2710_v54, %v2724_v3  ;;  %v2882_v13 = vsel %vm4350_vm7, %v3824_v59, %v2881_v60  ;;  %v3123_v20 = vrot.slane %v3121_v6, 4  ;;  %v3135_v30 = vshrl.u32 %v3106_v62, 16  ;;  %v4200_v34 = vld [vmem:[#allocation2 + $0x30] ss:$8 sps:$4 sm:$0xff]   ;;  %v5132_v3 = vld [vmem:[#allocation2 + $0x3c] sm:$0x1] }
 0x173   : > { %4113 = vmatmul.mubr.msk.bf16.vlgmr.msra.gmra.mxu0 %vm263_vm1, %v3827_v25  ;;  %v3138_v45 = vshll.u32 %v3106_v62, 16  ;;  %v2878_v41 = vsel %vm4350_vm7, %v3823_v27, %v2877_v46  ;;  %v3126_v43 = vrot.slane %v3124_v10, 5  ;;  %v3144_v42 = vshll.u32 %v5098_v47, 16  ;;  %v3114_v46 = vld [vmem:[#allocation2 + $0x38] sm:$0xf] }
 0x174   : > { %4107 = vmatmul.mubr.msk.bf16.gmra.mxu1 %vm263_vm1, %v3812_v4  ;;  %4116 = vmatprep.mubr.msk.bf16.mxu0 %vm263_vm1, %v3828_v1  ;;  %v5112_v39 = vrot.slane %v3225_v11, 4  ;;  %v3137_v19 = vrot.slane %v3135_v30, 4  ;;  %v3149_v28 = vshrl.u32 %v3108_v32, 16  ;;  %v3152_v40 = vshll.u32 %v3108_v32, 16  ;;  %v3116_v30 = vld [vmem:[#allocation2 + $0x40] sm:$0xf] }
 0x175   : > { %4122 = vmatprep.mubr.msk.bf16.mxu1 %vm263_vm1, %v4198_v61  ;;  %4131 = vmatpush3.bf16.msra.mxu0 %v4834_v35  ;;  %v3140_v7 = vrot.slane %v3138_v45, 5  ;;  %v3829_v56 = vcombine.low %v2878_v41, %v2882_v13  ;;  %v3127_v55 = vor.u32 %v3126_v43, %v3123_v20  ;;  %v3132_v53 = vrot.slane %v3130_v58, 5  ;;  %v3336_v20 = vld [vmem:[#allocation2 + $0x20] sm:$0xe] }
 0x176   : > { %v3163_v8 = vshrl.u32 %v3110_v23, 16  ;;  %v3151_v17 = vrot.slane %v3149_v28, 4  ;;  %v3154_v37 = vrot.slane %v3152_v40, 5  ;;  %v3166_v11 = vshll.u32 %v3110_v23, 16  ;;  %v3337_v23 = vld [vmem:[#allocation2 + $0x28] sm:$0xe] }
 0x177   : > { %v3141_v15 = vor.u32 %v3140_v7, %v3137_v19  ;;  %v3128_v2 = vrot.slane %v3127_v55, 4  ;;  %v3146_v33 = vrot.slane %v3144_v42, 5  ;;  %v3158_v35 = vshll.u32 %v5116_v52, 16  ;;  %v3338_v55 = vld [vmem:[#allocation2 + $0x30] sm:$0xe] }
 0x178   : > { %v3165_v18 = vrot.slane %v3163_v8, 4  ;;  %v3155_v63 = vor.u32 %v3154_v37, %v3151_v17  ;;  %v3168_v5 = vrot.slane %v3166_v11, 5  ;;  %v3172_v16 = vshll.u32 %v5118_v29, 16 }
 0x179   : > { %v3142_v38 = vrot.slane %v3141_v15, 4  ;;  %v3133_v57 = vsel %vm4335_vm6, %v3128_v2, %v3132_v53  ;;  %v3852_v31 = vrot.slane %v3334_v24, 9  ;;  %v3360_v54 = vrot.slane %v5088_v12, 5  ;;  %v4201_v53 = vld [vmem:[#allocation2 + $0x40] ss:$8 sps:$4 sm:$0xff]  }
 0x17a   : > { %v3156_v22 = vrot.slane %v3155_v63, 4  ;;  %v3169_v0 = vor.u32 %v3168_v5, %v3165_v18  ;;  %v3853_v27 = vrot.slane %v3335_v36, 9  ;;  %v3364_v62 = vrot.slane %v5098_v47, 5 }
 0x17b   : > { %4117 = vmatmul.mubr.msk.bf16.gmra.mxu0 %vm263_vm1, %v3829_v56  ;;  %v3147_v25 = vsel %vm4335_vm6, %v3142_v38, %v3146_v33  ;;  %v3177_v12 = vshrl.u32 %v3112_v48, 16  ;;  %v3180_v26 = vshll.u32 %v3112_v48, 16  ;;  %v3160_v60 = vrot.slane %v3158_v35, 5  ;;  %v3117_v56 = vld [vmem:[#allocation2 + $0x44] sm:$0x1] }
 0x17c   : > { %4123 = vmatmul.mubr.msk.bf16.vlgmr.msra.gmra.mxu1 %vm263_vm1, %v4199_v14  ;;  %v3844_v59 = vcombine.low %v3133_v57, %v3147_v25  ;;  %v3170_v6 = vrot.slane %v3169_v0, 4  ;;  %v3174_v4 = vrot.slane %v3172_v16, 5  ;;  %v3186_v1 = vshll.u32 %v5125_v51, 16  ;;  %v3339_v35 = vld [vmem:[#allocation2 + $0x38] sm:$0xe] }
 0x17d   : > { %4141 = vmatpush3.bf16.msra.mxu1 %v4904_v21  ;;  %4126 = vmatprep.mubr.msk.bf16.mxu1 %vm263_vm1, %v4200_v34  ;;  %v3361_v10 = vsel %vm4350_vm7, %v3852_v31, %v3360_v54  ;;  %v3179_v58 = vrot.slane %v3177_v12, 4  ;;  %v3182_v47 = vrot.slane %v3180_v26, 5  ;;  %v3191_v32 = vshrl.u32 %v3114_v46, 16  ;;  %v3341_v54 = vld [vmem:[#allocation2 + $0x48] sm:$0xe] }
 0x17e   : > { %4132 = vmatprep.mubr.msk.bf16.mxu0 %vm263_vm1, %v3844_v59  ;;  %v3175_v61 = vsel %vm4335_vm6, %v3170_v6, %v3174_v4  ;;  %v3194_v13 = vshll.u32 %v3114_v46, 16  ;;  %v3200_v21 = vshll.u32 %v5132_v3, 16  ;;  %v3161_v45 = vsel %vm4335_vm6, %v3156_v22, %v3160_v60  ;;  %v3340_v46 = vld [vmem:[#allocation2 + $0x40] sm:$0xe] }
 0x17f   : > { %v3365_v41 = vsel %vm4350_vm7, %v3853_v27, %v3364_v62  ;;  %v3183_v43 = vor.u32 %v3182_v47, %v3179_v58  ;;  %v3193_v42 = vrot.slane %v3191_v32, 4  ;;  %v3845_v19 = vcombine.low %v3161_v45, %v3175_v61 }
 0x180   : > { %v3861_v7 = vcombine.low %v3361_v10, %v3365_v41  ;;  %v3188_v28 = vrot.slane %v3186_v1, 5  ;;  %v3196_v40 = vrot.slane %v3194_v13, 5  ;;  %v3854_v15 = vrot.slane %v3336_v20, 9 }
 0x181   : > { %v3184_v8 = vrot.slane %v3183_v43, 4  ;;  %v3205_v17 = vshrl.u32 %v3116_v30, 16  ;;  %v3208_v37 = vshll.u32 %v3116_v30, 16  ;;  %v3202_v24 = vrot.slane %v3200_v21, 5 }
 0x182   : > { %v3197_v11 = vor.u32 %v3196_v40, %v3193_v42  ;;  %v3855_v2 = vrot.slane %v3337_v23, 9  ;;  %v3372_v33 = vrot.slane %v5118_v29, 5  ;;  %v3214_v38 = vshll.u32 %v3117_v56, 16 }
 0x183   : > { %4133 = vmatmul.mubr.msk.bf16.vlgmr.msra.gmra.mxu0 %vm263_vm1, %v3845_v19  ;;  %v3207_v18 = vrot.slane %v3205_v17, 4  ;;  %v3210_v36 = vrot.slane %v3208_v37, 5  ;;  %v3856_v63 = vrot.slane %v3338_v55, 9  ;;  %v3189_v5 = vsel %vm4335_vm6, %v3184_v8, %v3188_v28 }
 0x184   : > { %4127 = vmatmul.mubr.msk.bf16.gmra.mxu1 %vm263_vm1, %v4201_v53  ;;  %v3198_v16 = vrot.slane %v3197_v11, 4  ;;  %v3368_v48 = vrot.slane %v5116_v52, 5  ;;  %v3376_v14 = vrot.slane %v5125_v51, 5  ;;  %v3857_v31 = vrot.slane %v3339_v35, 9 }
 0x185   : > { %4142 = vmatprep.mubr.msk.bf16.mxu1 %vm263_vm1, %v3861_v7  ;;  %v3211_v57 = vor.u32 %v3210_v36, %v3207_v18  ;;  %v3380_v29 = vrot.slane %v5132_v3, 5  ;;  %v3373_v25 = vsel %vm4350_vm7, %v3855_v2, %v3372_v33  ;;  %v3231_v22 = vsel %vm4335_vm6, %v5112_v39, %v5059_v49 }
 0x186   : > { %v3203_v34 = vsel %vm4335_vm6, %v3198_v16, %v3202_v24  ;;  %v3216_v27 = vrot.slane %v3214_v38, 5  ;;  %v3377_v51 = vsel %vm4350_vm7, %v3856_v63, %v3376_v14  ;;  %v3369_v59 = vsel %vm4350_vm7, %v3854_v15, %v3368_v48 }
 0x187   : > { %v3846_v0 = vcombine.low %v3189_v5, %v3203_v34  ;;  %v3212_v52 = vrot.slane %v3211_v57, 4  ;;  %v3859_v62 = vrot.slane %v3341_v54, 9  ;;  %v3862_v3 = vcombine.low %v3369_v59, %v3373_v25  ;;  %v3764_v34 = vld [vmem:[%s5277_s4] ss:$0 sm:$0xff] }
 0x188   : > { %v3381_v49 = vsel %vm4350_vm7, %v3857_v31, %v3380_v29  ;;  %v3388_v39 = vrot.slane %v4906_v50, 5  ;;  %v3858_v6 = vrot.slane %v3340_v46, 9  ;;  %v3384_v4 = vrot.slane %v3117_v56, 5 }
 0x189   : > { %4136 = vmatprep.mubr.msk.bf16.mxu0 %vm263_vm1, %v3846_v0  ;;  %v3217_v12 = vsel %vm4335_vm6, %v3212_v52, %v3216_v27  ;;  %v3863_v60 = vcombine.low %v3377_v51, %v3381_v49 }
 0x18a   : > { %v3847_v26 = vcombine.low %v3217_v12, %v3231_v22  ;;  %v3385_v1 = vsel %vm4350_vm7, %v3858_v6, %v3384_v4  ;;  %v3389_v9 = vsel %vm4350_vm7, %v3859_v62, %v3388_v39 }
 0x18b   : > { %v3864_v10 = vcombine.low %v3385_v1, %v3389_v9 }
 0x18c   : > { %4143 = vmatmul.mubr.msk.bf16.vlgmr.msra.gmra.mxu1 %vm263_vm1, %v3862_v3  ;;  %4137 = vmatmul.mubr.msk.bf16.gmra.mxu0 %vm263_vm1, %v3847_v26 }
 0x18d   : > { %4146 = vmatprep.mubr.msk.bf16.mxu1 %vm263_vm1, %v3863_v60 }
 0x194   : > { %4147 = vmatmul.mubr.msk.bf16.gmra.mxu1 %vm263_vm1, %v3864_v10 }
 0x200   : > { %v4064_v50 = vpop.f32.mrf.mxu1 }
 0x201   : > { %v2085_v52 = vadd.f32 %v4064_v50, %v3764_v34 }
 0x202   : > { %v2052_v58 = vpop.f32.mrf.mxu1 }
 0x203   : > { %v2083_v46 = vadd.f32 %v3764_v34, %v2052_v58 }
 0x204   : > { %v4065_v47 = vpop.f32.mrf.mxu1 }
 0x205   : > { %v2086_v12 = vadd.f32 %v4065_v47, %v3764_v34 }
 0x206   : > { %v2055_v32 = vpop.f32.mrf.mxu1 }
 0x207   : > { %v2084_v6 = vadd.f32 %v3764_v34, %v2055_v32 }
 0x20c   : > { %v4068_v61 = vpop.f32.mrf.mxu1 }
 0x20d   : > { %v2089_v50 = vadd.f32 %v4068_v61, %v3764_v34 }
 0x20e   : > { %v4074_v13 = vpop.f32.mrf.mxu0  ;;  %v5182_v21 = vpop.f32.mrf.mxu1 }
 0x20f   : > { %v2315_v59 = vadd.f32 %v4074_v13, %v2085_v52 }
 0x210   : > { %v2282_v20 = vpop.f32.mrf.mxu0  ;;  %v5184_v30 = vpop.f32.mrf.mxu1 }
 0x211   : > { %v2313_v49 = vadd.f32 %v2282_v20, %v2083_v46 }
 0x212   : > { %v4075_v45 = vpop.f32.mrf.mxu0  ;;  %v5186_v41 = vpop.f32.mrf.mxu1 }
 0x213   : > { %v2316_v4 = vadd.f32 %v4075_v45, %v2086_v12  ;;  %v2090_v45 = vadd.f32 %v5184_v30, %v3764_v34 }
 0x214   : > { %v4084_v43 = vpop.f32.mrf.mxu1  ;;  %v2285_v44 = vpop.f32.mrf.mxu0 }
 0x215   : > { %v2473_v39 = vadd.f32 %v4084_v43, %v2315_v59 }
 0x216   : > { %v2440_v42 = vpop.f32.mrf.mxu1 }
 0x217   : > { %v2471_v1 = vadd.f32 %v2440_v42, %v2313_v49 }
 0x218   : > { %v4085_v23 = vpop.f32.mrf.mxu1 }
 0x21a   : > { %v2443_v7 = vpop.f32.mrf.mxu1 }
 0x21b   : > { %v4078_v19 = vpop.f32.mrf.mxu0 }
 0x21c   : > { %v5190_v40 = vpop.f32.mrf.mxu1  ;;  %v2319_v47 = vadd.f32 %v4078_v19, %v2089_v50 }
 0x21d   : > { %v5188_v28 = vpop.f32.mrf.mxu0 }
 0x21e   : > { %v5194_v55 = vpop.f32.mrf.mxu1  ;;  %v2477_v61 = vadd.f32 %v5190_v40, %v2319_v47 }
 0x21f   : > { %v5192_v56 = vpop.f32.mrf.mxu0 }
 0x220   : > { %v5198_v8 = vpop.f32.mrf.mxu1  ;;  %v2320_v19 = vadd.f32 %v5192_v56, %v2090_v45 }
 0x221   : > { %v5196_v53 = vpop.f32.mrf.mxu0 }
 0x222   : > { %v5200_v17 = vpop.f32.mrf.mxu1 }
 0x223   : > { %v4094_v15 = vpop.f32.mrf.mxu0 }
 0x224   : > { %v2591_v9 = vadd.f32 %v4094_v15, %v2473_v39 }
 0x225   : > { %v2558_v37 = vpop.f32.mrf.mxu0 }
 0x226   : > { %v2589_v58 = vadd.f32 %v2558_v37, %v2471_v1 }
 0x227   : > { %v4095_v11 = vpop.f32.mrf.mxu0  ;;  %v4104_v24 = vpop.f32.mrf.mxu1 }
 0x228   : > { %v2821_v13 = vadd.f32 %v4104_v24, %v2591_v9 }
 0x229   : > { %v2561_v2 = vpop.f32.mrf.mxu0  ;;  %v2788_v33 = vpop.f32.mrf.mxu1 }
 0x22a   : > { %v2819_v59 = vadd.f32 %v2788_v33, %v2589_v58 }
 0x22b   : > { %v4098_v35 = vpop.f32.mrf.mxu0  ;;  %v4105_v18 = vpop.f32.mrf.mxu1 }
 0x22d   : > { %v5202_v36 = vpop.f32.mrf.mxu0  ;;  %v2791_v63 = vpop.f32.mrf.mxu1 }
 0x22f   : > { %v5204_v38 = vpop.f32.mrf.mxu0 }
 0x231   : > { %v5206_v5 = vpop.f32.mrf.mxu0 }
 0x233   : > { %v4114_v16 = vpop.f32.mrf.mxu0 }
 0x234   : > { %v5208_v48 = vpop.f32.mrf.mxu1 }
 0x235   : > { %v2946_v14 = vpop.f32.mrf.mxu0 }
 0x236   : > { %v5210_v57 = vpop.f32.mrf.mxu1  ;;  %v2977_v37 = vadd.f32 %v2946_v14, %v2819_v59 }
 0x237   : > { %v4115_v31 = vpop.f32.mrf.mxu0 }
 0x238   : > { %v5212_v29 = vpop.f32.mrf.mxu1 }
 0x239   : > { %5303 = vst [vmem:[#allocation5_spill] sm:$0xff] %v5212_v29  ;;  %v2949_v54 = vpop.f32.mrf.mxu0  ;;  %v2474_v29 = vadd.f32 %v4085_v23, %v2316_v4 }
 0x23a   : > { %v5217_v25 = vpop.f32.mrf.mxu1 }
 0x23b   : > { %5304 = vst [vmem:[#allocation6_spill] sm:$0xff] %v5217_v25  ;;  %v5219_v22 = vpop.f32.mrf.mxu0  ;;  %v2592_v46 = vadd.f32 %v4095_v11, %v2474_v29  ;;  %v2595_v11 = vadd.f32 %v4098_v35, %v2477_v61 }
 0x23c   : > { %v4124_v0 = vpop.f32.mrf.mxu1 }
 0x23d   : > { %v5221_v27 = vpop.f32.mrf.mxu0  ;;  %v2822_v15 = vadd.f32 %v4105_v18, %v2592_v46  ;;  %v2825_v14 = vadd.f32 %v5208_v48, %v2595_v11 }
 0x23e   : > { %5305 = vst [vmem:[#allocation3_spill] sm:$0xff] %v5221_v27  ;;  %v3065_v51 = vpop.f32.mrf.mxu1  ;;  %v2314_v27 = vadd.f32 %v2285_v44, %v2084_v6 }
 0x23f   : > { %v5223_v62 = vpop.f32.mrf.mxu0  ;;  %v2980_v30 = vadd.f32 %v4115_v31, %v2822_v15  ;;  %v3096_v29 = vadd.f32 %v3065_v51, %v2977_v37 }
 0x240   : > { %5306 = vst [vmem:[#allocation4_spill] sm:$0xff] %v5223_v62  ;;  %v4125_v3 = vpop.f32.mrf.mxu1  ;;  %v2087_v62 = vadd.f32 %v3764_v34, %v5182_v21  ;;  %v2472_v43 = vadd.f32 %v2443_v7, %v2314_v27  ;;  %v2088_v21 = vadd.f32 %v3764_v34, %v5186_v41 }
 0x241   : > { %v5225_v26 = vpop.f32.mrf.mxu0  ;;  %v3099_v56 = vadd.f32 %v4125_v3, %v2980_v30  ;;  %v5308_v3 = vld [vmem:[#allocation5_spill] sm:$0xff] }
 0x242   : > { %5307 = vst [vmem:[#allocation7_spill] sm:$0xff] %v5225_v26  ;;  %v3068_v60 = vpop.f32.mrf.mxu1  ;;  %v2979_v26 = vadd.f32 %v4114_v16, %v2821_v13  ;;  %v2317_v42 = vadd.f32 %v5188_v28, %v2087_v62  ;;  %v2590_v23 = vadd.f32 %v2561_v2, %v2472_v43  ;;  %v2318_v40 = vadd.f32 %v5196_v53, %v2088_v21 }
 0x243   : > { %v4134_v10 = vpop.f32.mrf.mxu0  ;;  %v2478_v2 = vadd.f32 %v5198_v8, %v2320_v19  ;;  %v2983_v53 = vadd.f32 %v5219_v22, %v2825_v14 }
 0x244   : > { %v4128_v25 = vpop.f32.mrf.mxu1  ;;  %v3098_v24 = vadd.f32 %v4124_v0, %v2979_v26  ;;  %v2475_v7 = vadd.f32 %v5194_v55, %v2317_v42  ;;  %v2820_v16 = vadd.f32 %v2791_v63, %v2590_v23  ;;  %v2476_v63 = vadd.f32 %v5200_v17, %v2318_v40 }
 0x245   : > { %v3295_v52 = vpop.f32.mrf.mxu0  ;;  %v2596_v31 = vadd.f32 %v5204_v38, %v2478_v2  ;;  %v5309_v26 = vld [vmem:[#allocation3_spill] sm:$0xff]  ;;  %v3102_v17 = vadd.f32 %v4128_v25, %v2983_v53 }
 0x246   : > { %v3081_v20 = vpop.f32.mrf.mxu1  ;;  %v3328_v28 = vadd.f32 %v4134_v10, %v3098_v24  ;;  %v2593_v18 = vadd.f32 %v5202_v36, %v2475_v7  ;;  %v2978_v34 = vadd.f32 %v2949_v54, %v2820_v16  ;;  %v3326_v0 = vadd.f32 %v3295_v52, %v3096_v29  ;;  %v5310_v10 = vld [vmem:[#allocation6_spill] sm:$0xff] }
 0x247   : > { %v4135_v32 = vpop.f32.mrf.mxu0  ;;  %v2594_v54 = vadd.f32 %v5206_v5, %v2476_v63  ;;  %v2826_v39 = vadd.f32 %v5308_v3, %v2596_v31  ;;  %v5311_v50 = vld [vmem:[#allocation4_spill] sm:$0xff] }
 0x248   : > { %v4129_v44 = vpop.f32.mrf.mxu1  ;;  %v2823_v27 = vadd.f32 %v5210_v57, %v2593_v18  ;;  %v3097_v51 = vadd.f32 %v3068_v60, %v2978_v34  ;;  %v3329_v62 = vadd.f32 %v4135_v32, %v3099_v56 }
 0x249   : > { %v3298_v12 = vpop.f32.mrf.mxu0  ;;  %v2824_v60 = vadd.f32 %v5310_v10, %v2594_v54  ;;  %v2984_v58 = vadd.f32 %v5311_v50, %v2826_v39  ;;  %v5312_v59 = vld [vmem:[#allocation7_spill] sm:$0xff] }
 0x24a   : > { %v3084_v33 = vpop.f32.mrf.mxu1  ;;  %v2981_v6 = vadd.f32 %v5309_v26, %v2823_v27  ;;  %v3327_v38 = vadd.f32 %v3298_v12, %v3097_v51 }
 0x24b   : > { %v2982_v32 = vadd.f32 %v5312_v59, %v2824_v60  ;;  %v3103_v45 = vadd.f32 %v4129_v44, %v2984_v58 }
 0x24c   : > { %v4144_v41 = vpop.f32.mrf.mxu1  ;;  %v4138_v35 = vpop.f32.mrf.mxu0  ;;  %v3100_v13 = vadd.f32 %v3081_v20, %v2981_v6 }
 0x24d   : > { %v3486_v55 = vadd.f32 %v4144_v41, %v3328_v28  ;;  %v3332_v5 = vadd.f32 %v4138_v35, %v3102_v17  ;;  %v3101_v12 = vadd.f32 %v3084_v33, %v2982_v32 }
 0x24e   : > { %v3453_v8 = vpop.f32.mrf.mxu1  ;;  %v3311_v49 = vpop.f32.mrf.mxu0 }
 0x24f   : > { %v3494_v36 = vmul.f32 0.2, %v3486_v55  ;;  %v3484_v48 = vadd.f32 %v3453_v8, %v3326_v0  ;;  %v3330_v42 = vadd.f32 %v3311_v49, %v3100_v13 }
 0x250   : > { %v4145_v4 = vpop.f32.mrf.mxu1  ;;  %v4139_v22 = vpop.f32.mrf.mxu0 }
 0x251   : > { %v3502_v1 = vmax.f32 %v3486_v55, %v3494_v36  ;;  %v3492_v57 = vmul.f32 0.2, %v3484_v48  ;;  %v3487_v9 = vadd.f32 %v4145_v4, %v3329_v62  ;;  %v3333_v21 = vadd.f32 %v4139_v22, %v3103_v45 }
 0x252   : > { %v3456_v52 = vpop.f32.mrf.mxu1  ;;  %v3314_v37 = vpop.f32.mrf.mxu0 }
 0x253   : > { %v3510_v25 = vpack.c.bf16 %v3502_v1, %v3502_v1  ;;  %v3500_v47 = vmax.f32 %v3484_v48, %v3492_v57  ;;  %v3495_v43 = vmul.f32 0.2, %v3487_v9  ;;  %v3485_v46 = vadd.f32 %v3456_v52, %v3327_v38 }
 0x254   : > { %v4148_v61 = vpop.f32.mrf.mxu1  ;;  %v3331_v30 = vadd.f32 %v3314_v37, %v3101_v12 }
 0x255   : > { %3518 = vst.msk [vmem:[%s5251_s20 + $0x8] sm:$0xf] %vm1777_vm8, %v3510_v25  ;;  %v3508_v20 = vpack.c.bf16 %v3500_v47, %v3500_v47  ;;  %v3503_v23 = vmax.f32 %v3487_v9, %v3495_v43  ;;  %v3493_v15 = vmul.f32 0.2, %v3485_v46  ;;  %v3490_v24 = vadd.f32 %v4148_v61, %v3332_v5 }
 0x256   : > { %v3469_v19 = vpop.f32.mrf.mxu1 }
 0x257   : > { %3516 = vst.msk [vmem:[%s5251_s20] sm:$0xf] %vm1777_vm8, %v3508_v20  ;;  %v3511_v7 = vpack.c.bf16 %v3503_v23, %v3503_v23  ;;  %v3501_v11 = vmax.f32 %v3485_v46, %v3493_v15  ;;  %v3498_v44 = vmul.f32 0.2, %v3490_v24  ;;  %v3488_v16 = vadd.f32 %v3469_v19, %v3330_v42 }
 0x258   : > { %v4149_v29 = vpop.f32.mrf.mxu1 }
 0x259   : > { %3519 = vst.msk [vmem:[%s5251_s20 + $0xc] sm:$0xf] %vm1777_vm8, %v3511_v7  ;;  %v3509_v28 = vpack.c.bf16 %v3501_v11, %v3501_v11  ;;  %v3506_v40 = vmax.f32 %v3490_v24, %v3498_v44  ;;  %v3496_v2 = vmul.f32 0.2, %v3488_v16  ;;  %v3491_v33 = vadd.f32 %v4149_v29, %v3333_v21 }
 0x25a   : > { %v3472_v18 = vpop.f32.mrf.mxu1 }
 0x25b   : > { %3517 = vst.msk [vmem:[%s5251_s20 + $0x4] sm:$0xf] %vm1777_vm8, %v3509_v28  ;;  %v3514_v14 = vpack.c.bf16 %v3506_v40, %v3506_v40  ;;  %v3504_v41 = vmax.f32 %v3488_v16, %v3496_v2  ;;  %v3499_v34 = vmul.f32 0.2, %v3491_v33  ;;  %v3489_v56 = vadd.f32 %v3472_v18, %v3331_v30 }
 0x25d   : > { %3522 = vst.msk [vmem:[%s5251_s20 + $0x18] sm:$0xf] %vm1777_vm8, %v3514_v14  ;;  %v3512_v0 = vpack.c.bf16 %v3504_v41, %v3504_v41  ;;  %v3507_v55 = vmax.f32 %v3491_v33, %v3499_v34  ;;  %v3497_v35 = vmul.f32 0.2, %v3489_v56 }
 0x25f   : > { %3520 = vst.msk [vmem:[%s5251_s20 + $0x10] sm:$0xf] %vm1777_vm8, %v3512_v0  ;;  %v3515_v63 = vpack.c.bf16 %v3507_v55, %v3507_v55  ;;  %v3505_v31 = vmax.f32 %v3489_v56, %v3497_v35 }
 0x261   : > { %3523 = vst.msk [vmem:[%s5251_s20 + $0x1c] sm:$0xf] %vm1777_vm8, %v3515_v63  ;;  %v3513_v27 = vpack.c.bf16 %v3505_v31, %v3505_v31 }
 0x263   : > { %3521 = vst.msk [vmem:[%s5251_s20 + $0x14] sm:$0xf] %vm1777_vm8, %v3513_v27 }
 0x264 PF: > { %s15_s18 = sadd.s32 1, %s4208_s18  }
 0x265   : > { %p12_p4 = scmp.ge.s32.totalorder %s15_s18, 10  }
 0x267   :  { %14 = sbr.rel (!%p12_p4) target bundleno = 1 (0x1), region = 90 }

// kernel: sa_conv_forward.8
= control target key start
LH: loop header
LB: loop body
LE: loop exit
PB: predicated region body
PF: predicated region fallthrough
CT: control target
= control target key end

     0   :  { %s2770_s24 = smov 0   ;;  %s3303_s0 = inlined_call_operand.vmem [shape: bf16[8,8,8,8], index: 0, kind: input, shape index: {}]   ;;  %s3304_s1 = inlined_call_operand.vmem [shape: bf16[8,8,8,2], index: 1, kind: input, shape index: {}]   ;;  %s3305_s2 = inlined_call_operand.vmem [shape: bf16[8,8], index: 2, kind: input, shape index: {}]   ;;  %s3306_s3 = inlined_call_operand.vmem [shape: bf16[2,8], index: 3, kind: input, shape index: {}]   ;;  %s3307_s4 = inlined_call_operand.vmem [shape: f32[1,8], index: 4, kind: input, shape index: {}]   ;;  %s3308_s5 = inlined_call_operand.vmem [shape: bf16[9,8,4], index: 5, kind: input, shape index: {}]   ;;  %s3309_s6 = inlined_call_operand.vmem [shape: f32[1,4], index: 6, kind: input, shape index: {}]   ;;  %s3310_s7 = inlined_call_operand.vmem [shape: f32[8,8,8,4], index: 7, kind: output, shape index: {}]  }
   0x1 LB: > { %s2359_s25 = sadd.s32 4294967295, %s2727_s24   ;;  %p2363_p0 = scmp.ge.s32.totalorder %s2727_s24, 1  ;;  %s2727_s24 = sphi %s2770_s24, %s17_s24  }
   0x2   : > { %p247_p1 = scmp.lt.s32.totalorder %s2727_s24, 9 }
   0x4   : > { %p248_p2 = pnand %p2363_p0, %p247_p1 }
   0x6   : > { %251 = sbr.rel (%p248_p2) target bundleno = 535 (0x217), region = 48 }
   0xb   : > { %v316_v0 = vld [vmem:[%s3305_s2] sm:$0xf]  ;;  %vm350_vm0 = vcmask 1043456   ;;  %p284_p3 = scmp.lt.s32.totalorder %s2359_s25, 7  ;;  %vm469_vm1 = vcmask 1040384   ;;  %vm337_vm2 = vcmask 64512  }
   0xc   : > { %2681 = vmatprep.subr.msk.bf16.mxu1 %vm350_vm0, %v316_v0  ;;  %2680 = vmatprep.subr.msk.bf16.mxu0 %vm350_vm0, %v316_v0  ;;  %v352_v1 = vsel %vm350_vm0, %v316_v0, 0  ;;  %v435_v2 = vld [vmem:[%s3306_s3] sm:$0x1]  ;;  %vm456_vm3 = vcmask 15360   ;;  %vm562_vm4 = vcmask 60416   ;;  %vm564_vm5 = vcmask 57344  }
   0xd   : > { %2679 = vmatpush3.bf16.msra.mxu1 %v352_v1  ;;  %2569 = vmatpush3.bf16.msra.mxu0 %v352_v1  ;;  %s3328_s25 = smov (!%p284_p3, %s2359_s25), 7  ;;  %v471_v7 = vsel %vm469_vm1, %v435_v2, 0  ;;  %v2729_v12 = vmov 0   ;;  %v767_v13 = vld [vmem:[%s3308_s5] sm:$0xf]  ;;  %vm1133_vm12 = vcmask 1042432  }
   0xe   : > { %2682 = vmatprep.subr.msk.bf16.mxu1 %vm469_vm1, %v435_v2  ;;  %s2502_s30 = sshll.u32 %s3328_s25, 5  ;;  %570 = vst.msk [vmem:[#allocation2 + $0x18] sm:$0xf] %vm562_vm4, %v2729_v12  ;;  %563 = vst.msk [vmem:[#allocation2] sm:$0xf] %vm562_vm4, %v2729_v12  ;;  %2683 = vmatprep.subr.msk.bf16.mxu0 %vm350_vm0, %v767_v13  ;;  %v801_v14 = vsel %vm350_vm0, %v767_v13, 0 }
   0xf   : > { %s288_s10 = scalar_lea.vmem %s3303_s0, %s2502_s30  ;;  %s293_s13 = scalar_lea.vmem %s3304_s1, %s2502_s30  ;;  %571 = vst.msk [vmem:[#allocation2 + $0x1c] sm:$0x1] %vm564_vm5, %v2729_v12  ;;  %565 = vst.msk [vmem:[#allocation2 + $0x4] sm:$0x1] %vm564_vm5, %v2729_v12  ;;  %v2404_v15 = vld [vmem:[%s3308_s5 + $0x4] sm:$0xf] }
  0x10   : > { %v2701_v3 = vld [vmem:[%s288_s10] sm:$0xff]   ;;  %v2702_v4 = vld [vmem:[%s288_s10 + $0x10] sm:$0xff]   ;;  %v2703_v5 = vld [vmem:[%s288_s10 + $0x8] sm:$0xff]   ;;  %566 = vst.msk [vmem:[#allocation2 + $0x8] sm:$0xf] %vm562_vm4, %v2729_v12  ;;  %v1034_v17 = vsel %vm350_vm0, %v2404_v15, 0 }
  0x11   : > { %2570 = vmatprep.mubr.msk.bf16.mxu0 %vm337_vm2, %v2701_v3  ;;  %2574 = vmatprep.mubr.msk.bf16.mxu1 %vm337_vm2, %v2702_v4  ;;  %v2704_v6 = vld [vmem:[%s288_s10 + $0x18] sm:$0xff]   ;;  %v2705_v8 = vld [vmem:[%s293_s13] sm:$0xff]   ;;  %v2706_v9 = vld [vmem:[%s293_s13 + $0x8] sm:$0xff]   ;;  %567 = vst.msk [vmem:[#allocation2 + $0xc] sm:$0x1] %vm564_vm5, %v2729_v12  ;;  %vm1134_vm13 = vcmask 1046532  }
  0x12   : > { %2571 = vmatmul.mubr.msk.bf16.vlgmr.msra.gmra.mxu0 %vm337_vm2, %v2703_v5  ;;  %2575 = vmatmul.mubr.msk.bf16.vlgmr.msra.gmra.mxu1 %vm337_vm2, %v2704_v6  ;;  %v2707_v10 = vld [vmem:[%s293_s13 + $0x10] sm:$0xff]   ;;  %v2708_v11 = vld [vmem:[%s293_s13 + $0x18] sm:$0xff]   ;;  %568 = vst.msk [vmem:[#allocation2 + $0x10] sm:$0xf] %vm562_vm4, %v2729_v12  ;;  %572 = vst.msk [vmem:[#allocation2 + $0x20] sm:$0xf] %vm562_vm4, %v2729_v12 }
  0x13   : > { %2579 = vmatpush3.bf16.msra.mxu1 %v471_v7  ;;  %2580 = vmatprep.mubr.msk.bf16.mxu1 %vm456_vm3, %v2705_v8  ;;  %569 = vst.msk [vmem:[#allocation2 + $0x14] sm:$0x1] %vm564_vm5, %v2729_v12  ;;  %573 = vst.msk [vmem:[#allocation2 + $0x24] sm:$0x1] %vm564_vm5, %v2729_v12  ;;  %v2421_v16 = vld [vmem:[%s3308_s5 + $0x8] sm:$0xf] }
  0x14   : > { %574 = vst.msk [vmem:[#allocation2 + $0x28] sm:$0xf] %vm562_vm4, %v2729_v12  ;;  %576 = vst.msk [vmem:[#allocation2 + $0x30] sm:$0xf] %vm562_vm4, %v2729_v12  ;;  %2589 = vmatpush3.bf16.msra.mxu0 %v801_v14  ;;  %2684 = vmatprep.subr.msk.bf16.mxu1 %vm350_vm0, %v2404_v15  ;;  %v2430_v18 = vld [vmem:[%s3308_s5 + $0xc] sm:$0xf] }
  0x15   : > { %575 = vst.msk [vmem:[#allocation2 + $0x2c] sm:$0x1] %vm564_vm5, %v2729_v12  ;;  %577 = vst.msk [vmem:[#allocation2 + $0x34] sm:$0x1] %vm564_vm5, %v2729_v12  ;;  %2685 = vmatprep.subr.msk.bf16.mxu0 %vm350_vm0, %v2421_v16  ;;  %v876_v19 = vld [vmem:[#allocation2] sm:$0xf] }
  0x16   : > { %578 = vst.msk [vmem:[#allocation2 + $0x38] sm:$0xf] %vm562_vm4, %v2729_v12  ;;  %580 = vst.msk [vmem:[#allocation2 + $0x40] sm:$0xf] %vm562_vm4, %v2729_v12  ;;  %v896_v22 = vshrl.u32 %v876_v19, 16  ;;  %v899_v23 = vshll.u32 %v876_v19, 16 }
  0x17   : > { %579 = vst.msk [vmem:[#allocation2 + $0x3c] sm:$0x1] %vm564_vm5, %v2729_v12  ;;  %581 = vst.msk [vmem:[#allocation2 + $0x44] sm:$0x1] %vm564_vm5, %v2729_v12  ;;  %v2370_v26 = vld [vmem:[%s3307_s4] ss:$0 sm:$0xff] }
  0x18   : > { %582 = vst.msk [vmem:[#allocation2 + $0x48] sm:$0xf] %vm562_vm4, %v2729_v12  ;;  %v898_v28 = vrot.slane %v896_v22, 4  ;;  %v901_v29 = vrot.slane %v899_v23, 5  ;;  %v2843_v33 = vld [vmem:[#allocation2 + $0x4] sm:$0x1]  ;;  %vm2987_vm15 = vmor %vm1133_vm12, %vm1134_vm13 }
  0x19   : > { %583 = vst.msk [vmem:[#allocation2 + $0x4c] sm:$0x1] %vm564_vm5, %v2729_v12  ;;  %v905_v36 = vshll.u32 %v2843_v33, 16  ;;  %vm698_vm6 = vsmask.f32 7938  ;;  %v1138_v42 = vrot.slane %v2843_v33, 5 }
  0x1a   : > { %2581 = vmatmul.mubr.msk.bf16.vlgmr.msra.gmra.mxu1 %vm456_vm3, %v2706_v9  ;;  %v902_v35 = vor.u32 %v901_v29, %v898_v28  ;;  %v2846_v39 = vld [vmem:[#allocation2] sm:$0xe]  ;;  %vm704_vm7 = vsmask.f32 256  ;;  %v2852_v43 = vld [vmem:[%s3308_s5 + $0x10] sm:$0xf]  ;;  %vm2910_vm8 = vmand %vm562_vm4, %vm698_vm6 }
  0x1b   : > { %2584 = vmatprep.mubr.msk.bf16.mxu1 %vm456_vm3, %v2707_v10  ;;  %2599 = vmatpush3.bf16.msra.mxu1 %v1034_v17  ;;  %v2857_v47 = vld [vmem:[%s3308_s5 + $0x14] sm:$0xf]  ;;  %v2862_v48 = vld [vmem:[%s3308_s5 + $0x18] sm:$0xf]  ;;  %v2865_v50 = vsel %vm350_vm0, %v2421_v16, 0  ;;  %v2869_v52 = vrot.slane %v905_v36, 5  ;;  %vm2916_vm9 = vmand %vm564_vm5, %vm704_vm7 }
  0x1c   : > { %2686 = vmatprep.subr.msk.bf16.mxu1 %vm350_vm0, %v2430_v18  ;;  %v2867_v51 = vrot.slane %v902_v35, 4  ;;  %v2413_v53 = vrot.slane %v2846_v39, 9  ;;  %v2875_v54 = vld [vmem:[%s3308_s5 + $0x1c] sm:$0xf]  ;;  %v2880_v59 = vld [vmem:[%s3308_s5 + $0x20] sm:$0xf] }
  0x1d   : > { %v2885_v62 = vsel %vm350_vm0, %v2430_v18, 0  ;;  %v2889_v63 = vsel %vm350_vm0, %v2852_v43, 0  ;;  %v2893_v0 = vsel %vm350_vm0, %v2857_v47, 0  ;;  %v2897_v1 = vsel %vm350_vm0, %v2862_v48, 0  ;;  %v715_v23 = vld [vmem:[#allocation2 + $0x18] sm:$0xf] }
  0x1e   : > { %v2901_v8 = vsel %vm350_vm0, %v2875_v54, 0  ;;  %v2905_v9 = vsel %vm350_vm0, %v2880_v59, 0  ;;  %vm892_vm10 = vsmask.f32 3328  ;;  %vm893_vm11 = vsmask.f32 7440 }
  0x1f   : > { %v2882_v60 = vld [vmem:[#allocation2 + $0x48] sm:$0xf]  ;;  %vm2957_vm14 = vmor %vm892_vm10, %vm893_vm11  ;;  %s2504_s15 = sshll.u32 %s3328_s25, 6 }
  0x20   : > { %v2010_v10 = vshrl.u32 %v2882_v60, 16  ;;  %s3272_s17 = scalar_lea.vmem %s3310_s7, %s2504_s15 }
  0x22   : > { %2585 = vmatmul.mubr.msk.bf16.gmra.mxu1 %vm456_vm3, %v2708_v11 }
  0xd2   : > { %v2572_v20 = vpop.f32.mrf.mxu0  ;;  %v2576_v21 = vpop.f32.mrf.mxu1 }
  0xd3   : > { %v421_v30 = vadd.f32 %v2572_v20, %v2370_v26  ;;  %v425_v6 = vadd.f32 %v2576_v21, %v2370_v26 }
  0xd4   : > { %v388_v24 = vpop.f32.mrf.mxu0  ;;  %v404_v25 = vpop.f32.mrf.mxu1 }
  0xd5   : > { %v419_v37 = vadd.f32 %v2370_v26, %v388_v24  ;;  %v423_v11 = vadd.f32 %v2370_v26, %v404_v25 }
  0xd6   : > { %v2577_v27 = vpop.f32.mrf.mxu1  ;;  %v2573_v31 = vpop.f32.mrf.mxu0 }
  0xd7   : > { %v422_v44 = vadd.f32 %v2573_v31, %v2370_v26  ;;  %v426_v15 = vadd.f32 %v2577_v27, %v2370_v26 }
  0xd8   : > { %v407_v32 = vpop.f32.mrf.mxu1  ;;  %v391_v40 = vpop.f32.mrf.mxu0 }
  0xd9   : > { %v420_v55 = vadd.f32 %v2370_v26, %v391_v40  ;;  %v424_v16 = vadd.f32 %v2370_v26, %v407_v32  ;;  %v718_v26 = vld [vmem:[#allocation2 + $0x1c] sm:$0x1]  ;;  %v706_v40 = vld [vmem:[#allocation2 + $0xc] sm:$0x1] }
  0xda   : > { %v2582_v34 = vpop.f32.mrf.mxu1 }
  0xdb   : > { %v540_v38 = vadd.f32 %v2582_v34, %v421_v30 }
  0xdc   : > { %v507_v41 = vpop.f32.mrf.mxu1 }
  0xdd   : > { %v548_v45 = vmul.f32 0.2, %v540_v38  ;;  %v538_v46 = vadd.f32 %v507_v41, %v419_v37  ;;  %v700_v37 = vld [vmem:[#allocation2 + $0x8] sm:$0xf] }
  0xde   : > { %v2583_v49 = vpop.f32.mrf.mxu1 }
  0xdf   : > { %v556_v56 = vmax.f32 %v540_v38, %v548_v45  ;;  %v546_v57 = vmul.f32 0.2, %v538_v46  ;;  %v541_v58 = vadd.f32 %v2583_v49, %v422_v44 }
  0xe0   : > { %v510_v61 = vpop.f32.mrf.mxu1 }
  0xe1   : > { %v2507_v2 = vpack.c.bf16 %v556_v56, %v556_v56  ;;  %v554_v3 = vmax.f32 %v538_v46, %v546_v57  ;;  %v549_v4 = vmul.f32 0.2, %v541_v58  ;;  %v539_v5 = vadd.f32 %v510_v61, %v420_v55 }
  0xe2   : > { %v2586_v7 = vpop.f32.mrf.mxu1 }
  0xe3   : > { %v633_v12 = vshrl.u32 %v2507_v2, 16  ;;  %v2505_v13 = vpack.c.bf16 %v554_v3, %v554_v3  ;;  %v557_v14 = vmax.f32 %v541_v58, %v549_v4  ;;  %v547_v17 = vmul.f32 0.2, %v539_v5 }
  0xe4   : > { %v544_v18 = vadd.f32 %v2586_v7, %v425_v6  ;;  %v523_v19 = vpop.f32.mrf.mxu1  ;;  %v636_v21 = vshll.u32 %v2507_v2, 16  ;;  %v721_v7 = vld [vmem:[#allocation2 + $0x20] sm:$0xf] }
  0xe5   : > { %v635_v20 = vrot.slane %v633_v12, 7  ;;  %v617_v24 = vshrl.u32 %v2505_v13, 16  ;;  %v2508_v28 = vpack.c.bf16 %v557_v14, %v557_v14  ;;  %v620_v27 = vshll.u32 %v2505_v13, 16 }
  0xe6   : > { %v555_v29 = vmax.f32 %v539_v5, %v547_v17  ;;  %v552_v30 = vmul.f32 0.2, %v544_v18  ;;  %v542_v31 = vadd.f32 %v523_v19, %v423_v11  ;;  %v2587_v32 = vpop.f32.mrf.mxu1  ;;  %v724_v11 = vld [vmem:[#allocation2 + $0x24] sm:$0x1]  ;;  %v709_v19 = vld [vmem:[#allocation2 + $0x10] sm:$0xf] }
  0xe7   : > { %v638_v34 = vor.u32 %v636_v21, %v635_v20  ;;  %v639_v35 = vrot.slane %v635_v20, 4  ;;  %v619_v36 = vrot.slane %v617_v24, 7  ;;  %v641_v38 = vshrl.u32 %v2508_v28, 16  ;;  %v712_v21 = vld [vmem:[#allocation2 + $0x14] sm:$0x1] }
  0xe8   : > { %v644_v41 = vshll.u32 %v2508_v28, 16  ;;  %v2506_v44 = vpack.c.bf16 %v555_v29, %v555_v29  ;;  %v560_v45 = vmax.f32 %v544_v18, %v552_v30  ;;  %v550_v46 = vmul.f32 0.2, %v542_v31  ;;  %v526_v4 = vpop.f32.mrf.mxu1 }
  0xe9   : > { %v716_v49 = vsel %vm2910_vm8, %v638_v34, %v715_v23  ;;  %v719_v55 = vsel %vm2916_vm9, %v639_v35, %v718_v26  ;;  %v622_v56 = vor.u32 %v620_v27, %v619_v36  ;;  %v623_v57 = vrot.slane %v619_v36, 4  ;;  %v742_v35 = vld [vmem:[#allocation2 + $0x3c] sm:$0x1] }
  0xea   : > { %717 = vst [vmem:[#allocation2 + $0x18] sm:$0xf] %v716_v49  ;;  %720 = vst [vmem:[#allocation2 + $0x1c] sm:$0x1] %v719_v55  ;;  %v643_v58 = vrot.slane %v641_v38, 7  ;;  %v625_v61 = vshrl.u32 %v2506_v44, 16  ;;  %v2511_v3 = vpack.c.bf16 %v560_v45, %v560_v45  ;;  %v558_v12 = vmax.f32 %v542_v31, %v550_v46 }
  0xeb   : > { %v628_v2 = vshll.u32 %v2506_v44, 16  ;;  %v701_v5 = vsel %vm2910_vm8, %v622_v56, %v700_v37  ;;  %v707_v6 = vsel %vm2916_vm9, %v623_v57, %v706_v40  ;;  %v545_v13 = vadd.f32 %v2587_v32, %v426_v15  ;;  %v739_v31 = vld [vmem:[#allocation2 + $0x38] sm:$0xf]  ;;  %v730_v57 = vld [vmem:[#allocation2 + $0x2c] sm:$0x1] }
  0xec   : > { %702 = vst [vmem:[#allocation2 + $0x8] sm:$0xf] %v701_v5  ;;  %708 = vst [vmem:[#allocation2 + $0xc] sm:$0x1] %v707_v6  ;;  %v646_v14 = vor.u32 %v644_v41, %v643_v58  ;;  %v647_v17 = vrot.slane %v643_v58, 4  ;;  %v627_v18 = vrot.slane %v625_v61, 7  ;;  %v2509_v23 = vpack.c.bf16 %v558_v12, %v558_v12 }
  0xed   : > { %v665_v20 = vshrl.u32 %v2511_v3, 16  ;;  %v553_v24 = vmul.f32 0.2, %v545_v13  ;;  %v543_v28 = vadd.f32 %v526_v4, %v424_v16  ;;  %v2013_v26 = vshll.u32 %v2882_v60, 16  ;;  %v727_v41 = vld [vmem:[#allocation2 + $0x28] sm:$0xf] }
  0xee   : > { %v722_v27 = vsel %vm2910_vm8, %v646_v14, %v721_v7  ;;  %v725_v15 = vsel %vm2916_vm9, %v647_v17, %v724_v11  ;;  %v630_v29 = vor.u32 %v628_v2, %v627_v18  ;;  %v631_v30 = vrot.slane %v627_v18, 4 }
  0xef   : > { %723 = vst [vmem:[#allocation2 + $0x20] sm:$0xf] %v722_v27  ;;  %726 = vst [vmem:[#allocation2 + $0x24] sm:$0x1] %v725_v15  ;;  %v667_v32 = vrot.slane %v665_v20, 7  ;;  %v668_v34 = vshll.u32 %v2511_v3, 16  ;;  %v561_v37 = vmax.f32 %v545_v13, %v553_v24 }
  0xf0   : > { %v649_v36 = vshrl.u32 %v2509_v23, 16  ;;  %v710_v16 = vsel %vm2910_vm8, %v630_v29, %v709_v19  ;;  %v713_v38 = vsel %vm2916_vm9, %v631_v30, %v712_v21  ;;  %v652_v40 = vshll.u32 %v2509_v23, 16  ;;  %v745_v20 = vld [vmem:[#allocation2 + $0x40] sm:$0xf]  ;;  %v748_v21 = vld [vmem:[#allocation2 + $0x44] sm:$0x1] }
  0xf1   : > { %v551_v44 = vmul.f32 0.2, %v543_v28  ;;  %711 = vst [vmem:[#allocation2 + $0x10] sm:$0xf] %v710_v16  ;;  %714 = vst [vmem:[#allocation2 + $0x14] sm:$0x1] %v713_v38  ;;  %v670_v45 = vor.u32 %v668_v34, %v667_v32  ;;  %v2512_v55 = vpack.c.bf16 %v561_v37, %v561_v37 }
  0xf2   : > { %v671_v46 = vrot.slane %v667_v32, 4  ;;  %v651_v49 = vrot.slane %v649_v36, 7  ;;  %v882_v56 = vld [vmem:[#allocation2 + $0x18] sm:$0xf]  ;;  %v2939_v3 = vrot.slane %v2010_v10, 4 }
  0xf3   : > { %v559_v58 = vmax.f32 %v543_v28, %v551_v44  ;;  %v938_v61 = vshrl.u32 %v882_v56, 16  ;;  %v941_v2 = vshll.u32 %v882_v56, 16  ;;  %v740_v4 = vsel %vm2910_vm8, %v670_v45, %v739_v31  ;;  %v2709_v11 = vld [vmem:[#allocation2] ss:$8 sps:$4 sm:$0xff]   ;;  %v2945_v18 = vld [vmem:[#allocation2 + $0xc] sm:$0x1] }
  0xf4   : > { %v743_v5 = vsel %vm2916_vm9, %v671_v46, %v742_v35  ;;  %v654_v6 = vor.u32 %v652_v40, %v651_v49  ;;  %v655_v7 = vrot.slane %v651_v49, 4  ;;  %741 = vst [vmem:[#allocation2 + $0x38] sm:$0xf] %v740_v4  ;;  %v673_v12 = vshrl.u32 %v2512_v55, 16  ;;  %v878_v17 = vld [vmem:[#allocation2 + $0x8] sm:$0xf]  ;;  %2590 = vmatprep.mubr.msk.bf16.mxu0 %vm337_vm2, %v2709_v11 }
  0xf5   : > { %744 = vst [vmem:[#allocation2 + $0x3c] sm:$0x1] %v743_v5  ;;  %v676_v13 = vshll.u32 %v2512_v55, 16  ;;  %v2510_v14 = vpack.c.bf16 %v559_v58, %v559_v58  ;;  %v910_v23 = vshrl.u32 %v878_v17, 16  ;;  %v913_v24 = vshll.u32 %v878_v17, 16 }
  0xf6   : > { %v728_v10 = vsel %vm2910_vm8, %v654_v6, %v727_v41  ;;  %v731_v19 = vsel %vm2916_vm9, %v655_v7, %v730_v57  ;;  %v2952_v28 = vld [vmem:[#allocation2 + $0x1c] sm:$0x1]  ;;  %v675_v27 = vrot.slane %v673_v12, 7  ;;  %v919_v30 = vshll.u32 %v2945_v18, 16  ;;  %v733_v31 = vld [vmem:[#allocation2 + $0x30] sm:$0xf] }
  0xf7   : > { %729 = vst [vmem:[#allocation2 + $0x28] sm:$0xf] %v728_v10  ;;  %732 = vst [vmem:[#allocation2 + $0x2c] sm:$0x1] %v731_v19  ;;  %v657_v15 = vshrl.u32 %v2510_v14, 16  ;;  %v660_v29 = vshll.u32 %v2510_v14, 16  ;;  %v908_v45 = vsel %vm2957_vm14, %v2867_v51, %v2869_v52 }
  0xf8   : > { %v736_v32 = vld [vmem:[#allocation2 + $0x34] sm:$0x1]  ;;  %v912_v35 = vrot.slane %v910_v23, 4  ;;  %v915_v36 = vrot.slane %v913_v24, 5  ;;  %v940_v37 = vrot.slane %v938_v61, 4  ;;  %v943_v16 = vrot.slane %v941_v2, 5 }
  0xf9   : > { %v678_v38 = vor.u32 %v676_v13, %v675_v27  ;;  %v679_v40 = vrot.slane %v675_v27, 4  ;;  %v659_v41 = vrot.slane %v657_v15, 7  ;;  %v2710_v44 = vld [vmem:[#allocation2 + $0x10] ss:$8 sps:$4 sm:$0xff]   ;;  %v921_v49 = vrot.slane %v919_v30, 5 }
  0xfa   : > { %v916_v46 = vor.u32 %v915_v36, %v912_v35  ;;  %v880_v55 = vld [vmem:[#allocation2 + $0x10] sm:$0xf]  ;;  %v2965_v56 = vld [vmem:[#allocation2 + $0x14] sm:$0x1]  ;;  %v944_v57 = vor.u32 %v943_v16, %v940_v37  ;;  %v947_v58 = vshll.u32 %v2952_v28, 16  ;;  %2591 = vmatmul.mubr.msk.bf16.vlgmr.msra.gmra.mxu0 %vm337_vm2, %v2710_v44 }
  0xfb   : > { %v746_v61 = vsel %vm2910_vm8, %v678_v38, %v745_v20  ;;  %v749_v2 = vsel %vm2916_vm9, %v679_v40, %v748_v21  ;;  %v662_v4 = vor.u32 %v660_v29, %v659_v41  ;;  %v663_v5 = vrot.slane %v659_v41, 4  ;;  %v1110_v6 = vld [vmem:[#allocation2 + $0x8] sm:$0xe]  ;;  %2609 = vmatpush3.bf16.msra.mxu0 %v2865_v50  ;;  %v884_v10 = vld [vmem:[#allocation2 + $0x20] sm:$0xf] }
  0xfc   : > { %747 = vst [vmem:[#allocation2 + $0x40] sm:$0xf] %v746_v61  ;;  %750 = vst [vmem:[#allocation2 + $0x44] sm:$0x1] %v749_v2  ;;  %v917_v51 = vrot.slane %v916_v46, 4  ;;  %v924_v52 = vshrl.u32 %v880_v55, 16  ;;  %2687 = vmatprep.subr.msk.bf16.mxu0 %vm350_vm0, %v2852_v43  ;;  %v1139_v43 = vsel %vm2987_vm15, %v2413_v53, %v1138_v42 }
  0xfd   : > { %v927_v7 = vshll.u32 %v880_v55, 16  ;;  %v933_v11 = vshll.u32 %v2965_v56, 16  ;;  %v734_v12 = vsel %vm2910_vm8, %v662_v4, %v733_v31  ;;  %v737_v13 = vsel %vm2916_vm9, %v663_v5, %v736_v32  ;;  %v2979_v19 = vld [vmem:[#allocation2 + $0x24] sm:$0x1]  ;;  %v1112_v36 = vld [vmem:[#allocation2 + $0x18] sm:$0xe] }
  0xfe   : > { %v945_v14 = vrot.slane %v944_v57, 4  ;;  %v949_v17 = vrot.slane %v947_v58, 5  ;;  %735 = vst [vmem:[#allocation2 + $0x30] sm:$0xf] %v734_v12  ;;  %738 = vst [vmem:[#allocation2 + $0x34] sm:$0x1] %v737_v13  ;;  %v922_v20 = vsel %vm2957_vm14, %v917_v51, %v921_v49 }
  0xff   : > { %v2711_v50 = vld [vmem:[#allocation2 + $0x20] ss:$8 sps:$4 sm:$0xff]   ;;  %v926_v21 = vrot.slane %v924_v52, 4  ;;  %v929_v22 = vrot.slane %v927_v7, 5  ;;  %v2405_v23 = vcombine.low %v908_v45, %v922_v20  ;;  %v935_v24 = vrot.slane %v933_v11, 5 }
 0x100   : > { %v2414_v27 = vrot.slane %v1110_v6, 9  ;;  %v886_v15 = vld [vmem:[#allocation2 + $0x28] sm:$0xf]  ;;  %v2997_v29 = vld [vmem:[#allocation2 + $0x2c] sm:$0x1]  ;;  %2594 = vmatprep.mubr.msk.bf16.mxu0 %vm337_vm2, %v2711_v50  ;;  %v1142_v31 = vrot.slane %v2945_v18, 5  ;;  %v950_v38 = vsel %vm2957_vm14, %v945_v14, %v949_v17 }
 0x101   : > { %v930_v30 = vor.u32 %v929_v22, %v926_v21  ;;  %v952_v32 = vshrl.u32 %v884_v10, 16  ;;  %v955_v35 = vshll.u32 %v884_v10, 16  ;;  %2600 = vmatprep.mubr.msk.bf16.mxu1 %vm337_vm2, %v2405_v23  ;;  %v961_v33 = vshll.u32 %v2979_v19, 16  ;;  %v1111_v53 = vld [vmem:[#allocation2 + $0x10] sm:$0xe] }
 0x102   : > { %v966_v39 = vshrl.u32 %v886_v15, 16  ;;  %v969_v37 = vshll.u32 %v886_v15, 16  ;;  %v975_v42 = vshll.u32 %v2997_v29, 16  ;;  %v1143_v18 = vsel %vm2987_vm15, %v2414_v27, %v1142_v31  ;;  %v890_v61 = vld [vmem:[#allocation2 + $0x38] sm:$0xf] }
 0x103   : > { %v931_v16 = vrot.slane %v930_v30, 4  ;;  %v954_v40 = vrot.slane %v952_v32, 4  ;;  %v957_v41 = vrot.slane %v955_v35, 5  ;;  %v963_v44 = vrot.slane %v961_v33, 5  ;;  %v891_v14 = vld [vmem:[#allocation2 + $0x3c] sm:$0x1] }
 0x104   : > { %v968_v45 = vrot.slane %v966_v39, 4  ;;  %v971_v46 = vrot.slane %v969_v37, 5  ;;  %v977_v57 = vrot.slane %v975_v42, 5  ;;  %v2415_v58 = vrot.slane %v1111_v53, 9  ;;  %v1113_v21 = vld [vmem:[#allocation2 + $0x20] sm:$0xe] }
 0x105   : > { %v936_v49 = vsel %vm2957_vm14, %v931_v16, %v935_v24  ;;  %v958_v55 = vor.u32 %v957_v41, %v954_v40  ;;  %v2712_v2 = vld [vmem:[#allocation2 + $0x30] ss:$8 sps:$4 sm:$0xff]   ;;  %v1146_v6 = vrot.slane %v2965_v56, 5  ;;  %v2416_v51 = vrot.slane %v1112_v36, 9  ;;  %v889_v13 = vld [vmem:[#allocation2 + $0x34] sm:$0x1] }
 0x106   : > { %v2406_v4 = vcombine.low %v936_v49, %v950_v38  ;;  %v972_v5 = vor.u32 %v971_v46, %v968_v45  ;;  %v2422_v52 = vcombine.low %v1139_v43, %v1143_v18  ;;  %v1150_v11 = vrot.slane %v2952_v28, 5  ;;  %v888_v12 = vld [vmem:[#allocation2 + $0x30] sm:$0xf]  ;;  %2595 = vmatmul.mubr.msk.bf16.gmra.mxu0 %vm337_vm2, %v2712_v2  ;;  %v1114_v23 = vld [vmem:[#allocation2 + $0x28] sm:$0xe] }
 0x107   : > { %v959_v7 = vrot.slane %v958_v55, 4  ;;  %v1147_v10 = vsel %vm2987_vm15, %v2415_v58, %v1146_v6  ;;  %v980_v50 = vshrl.u32 %v888_v12, 16  ;;  %v983_v20 = vshll.u32 %v888_v12, 16  ;;  %v1115_v31 = vld [vmem:[#allocation2 + $0x30] sm:$0xe] }
 0x108   : > { %2601 = vmatmul.mubr.msk.bf16.vlgmr.msra.gmra.mxu1 %vm337_vm2, %v2406_v4  ;;  %v973_v17 = vrot.slane %v972_v5, 4  ;;  %2610 = vmatprep.mubr.msk.bf16.mxu0 %vm337_vm2, %v2422_v52  ;;  %v1151_v28 = vsel %vm2987_vm15, %v2416_v51, %v1150_v11  ;;  %v994_v22 = vshrl.u32 %v890_v61, 16  ;;  %v3024_v24 = vrot.slane %v2013_v26, 5  ;;  %v1116_v33 = vld [vmem:[#allocation2 + $0x38] sm:$0xe] }
 0x109   : > { %v964_v56 = vsel %vm2957_vm14, %v959_v7, %v963_v44  ;;  %2619 = vmatpush3.bf16.msra.mxu1 %v2885_v62  ;;  %v982_v27 = vrot.slane %v980_v50, 4  ;;  %v985_v15 = vrot.slane %v983_v20, 5  ;;  %v989_v30 = vshll.u32 %v889_v13, 16  ;;  %v1388_v39 = vld [vmem:[#allocation2 + $0x8] sm:$0xf] }
 0x10a   : > { %v978_v43 = vsel %vm2957_vm14, %v973_v17, %v977_v57  ;;  %2688 = vmatprep.subr.msk.bf16.mxu1 %vm350_vm0, %v2857_v47  ;;  %v2423_v32 = vcombine.low %v1147_v10, %v1151_v28  ;;  %v996_v35 = vrot.slane %v994_v22, 4  ;;  %v997_v36 = vshll.u32 %v890_v61, 16  ;;  %v3031_v53 = vld [vmem:[#allocation2 + $0xc] sm:$0x1]  ;;  %v1390_v57 = vld [vmem:[#allocation2 + $0x10] sm:$0xf] }
 0x10b   : > { %v2407_v62 = vcombine.low %v964_v56, %v978_v43  ;;  %v986_v37 = vor.u32 %v985_v15, %v982_v27  ;;  %v1003_v60 = vshll.u32 %v891_v14, 16  ;;  %v2417_v26 = vrot.slane %v1113_v21, 9  ;;  %v3042_v2 = vld [vmem:[#allocation2 + $0x14] sm:$0x1]  ;;  %v1392_v5 = vld [vmem:[#allocation2 + $0x18] sm:$0xf] }
 0x10c   : > { %v1154_v42 = vrot.slane %v2979_v19, 5  ;;  %v999_v16 = vrot.slane %v997_v36, 5  ;;  %v2418_v38 = vrot.slane %v1114_v23, 9  ;;  %v1158_v40 = vrot.slane %v2997_v29, 5  ;;  %v3048_v11 = vld [vmem:[#allocation2 + $0x1c] sm:$0x1] }
 0x10d   : > { %2604 = vmatprep.mubr.msk.bf16.mxu1 %vm337_vm2, %v2407_v62  ;;  %v2419_v47 = vrot.slane %v1115_v31, 9  ;;  %v987_v41 = vrot.slane %v986_v37, 4  ;;  %v991_v18 = vrot.slane %v989_v30, 5  ;;  %v1162_v45 = vrot.slane %v889_v13, 5  ;;  %v2713_v10 = vld [vmem:[#allocation2 + $0x8] ss:$8 sps:$4 sm:$0xff]  }
 0x10e   : > { %v1155_v44 = vsel %vm2987_vm15, %v2417_v26, %v1154_v42  ;;  %v1000_v46 = vor.u32 %v999_v16, %v996_v35  ;;  %v1159_v49 = vsel %vm2987_vm15, %v2418_v38, %v1158_v40  ;;  %v2420_v19 = vrot.slane %v1116_v33, 9  ;;  %2611 = vmatmul.mubr.msk.bf16.vlgmr.msra.gmra.mxu0 %vm337_vm2, %v2423_v32  ;;  %v1394_v56 = vld [vmem:[#allocation2 + $0x20] sm:$0xf]  ;;  %v3058_v43 = vld [vmem:[#allocation2 + $0x24] sm:$0x1] }
 0x10f   : > { %v1166_v55 = vrot.slane %v891_v14, 5  ;;  %v1005_v58 = vrot.slane %v1003_v60, 5  ;;  %v2424_v61 = vcombine.low %v1155_v44, %v1159_v49  ;;  %v1163_v29 = vsel %vm2987_vm15, %v2419_v47, %v1162_v45  ;;  %2629 = vmatpush3.bf16.msra.mxu0 %v2889_v63  ;;  %v1396_v62 = vld [vmem:[#allocation2 + $0x28] sm:$0xf]  ;;  %v3064_v42 = vld [vmem:[#allocation2 + $0x2c] sm:$0x1] }
 0x110   : > { %v1405_v4 = vshrl.u32 %v1388_v39, 16  ;;  %v992_v6 = vsel %vm2957_vm14, %v987_v41, %v991_v18  ;;  %v1001_v51 = vrot.slane %v1000_v46, 4  ;;  %v1408_v52 = vshll.u32 %v1388_v39, 16  ;;  %2689 = vmatprep.subr.msk.bf16.mxu0 %vm350_vm0, %v2862_v48  ;;  %v1398_v47 = vld [vmem:[#allocation2 + $0x30] sm:$0xf] }
 0x111   : > { %v1414_v7 = vshll.u32 %v3031_v53, 16  ;;  %2614 = vmatprep.mubr.msk.bf16.mxu0 %vm337_vm2, %v2424_v61  ;;  %v1167_v12 = vsel %vm2987_vm15, %v2420_v19, %v1166_v55  ;;  %v1419_v14 = vshrl.u32 %v1390_v57, 16  ;;  %v1422_v17 = vshll.u32 %v1390_v57, 16  ;;  %v2714_v49 = vld [vmem:[#allocation2 + $0x18] ss:$8 sps:$4 sm:$0xff]  }
 0x112   : > { %v1407_v13 = vrot.slane %v1405_v4, 4  ;;  %v1006_v63 = vsel %vm2957_vm14, %v1001_v51, %v1005_v58  ;;  %v2425_v50 = vcombine.low %v1163_v29, %v1167_v12  ;;  %v1410_v20 = vrot.slane %v1408_v52, 5  ;;  %v3071_v57 = vld [vmem:[#allocation2 + $0x34] sm:$0x1]  ;;  %v1618_v29 = vld [vmem:[#allocation2 + $0x8] sm:$0xe] }
 0x113   : > { %v1428_v21 = vshll.u32 %v3042_v2, 16  ;;  %v2408_v28 = vcombine.low %v992_v6, %v1006_v63  ;;  %v1421_v22 = vrot.slane %v1419_v14, 4  ;;  %v1424_v23 = vrot.slane %v1422_v17, 5  ;;  %v1400_v63 = vld [vmem:[#allocation2 + $0x38] sm:$0xf] }
 0x114   : > { %v1433_v27 = vshrl.u32 %v1392_v5, 16  ;;  %v1411_v15 = vor.u32 %v1410_v20, %v1407_v13  ;;  %v1416_v30 = vrot.slane %v1414_v7, 5  ;;  %v1436_v31 = vshll.u32 %v1392_v5, 16  ;;  %v2715_v5 = vld [vmem:[#allocation2 + $0x28] ss:$8 sps:$4 sm:$0xff]  }
 0x115   : > { %v1442_v48 = vshll.u32 %v3048_v11, 16  ;;  %2605 = vmatmul.mubr.msk.bf16.gmra.mxu1 %vm337_vm2, %v2408_v28  ;;  %v1425_v32 = vor.u32 %v1424_v23, %v1421_v22  ;;  %v1447_v36 = vshrl.u32 %v1394_v56, 16  ;;  %v1450_v33 = vshll.u32 %v1394_v56, 16  ;;  %v1619_v7 = vld [vmem:[#allocation2 + $0x10] sm:$0xe] }
 0x116   : > { %v1435_v35 = vrot.slane %v1433_v27, 4  ;;  %2620 = vmatprep.mubr.msk.bf16.mxu1 %vm337_vm2, %v2713_v10  ;;  %v1412_v39 = vrot.slane %v1411_v15, 4  ;;  %v1430_v37 = vrot.slane %v1428_v21, 5  ;;  %v1438_v60 = vrot.slane %v1436_v31, 5  ;;  %2615 = vmatmul.mubr.msk.bf16.gmra.mxu0 %vm337_vm2, %v2425_v50  ;;  %v3076_v56 = vld [vmem:[#allocation2 + $0x3c] sm:$0x1] }
 0x117   : > { %v1456_v26 = vshll.u32 %v3058_v43, 16  ;;  %v1426_v16 = vrot.slane %v1425_v32, 4  ;;  %v1449_v38 = vrot.slane %v1447_v36, 4  ;;  %v1452_v40 = vrot.slane %v1450_v33, 5  ;;  %v1402_v15 = vld [vmem:[#allocation2 + $0x40] sm:$0xf] }
 0x118   : > { %v1461_v41 = vshrl.u32 %v1396_v62, 16  ;;  %v1417_v18 = vsel %vm2957_vm14, %v1412_v39, %v1416_v30  ;;  %v1439_v44 = vor.u32 %v1438_v60, %v1435_v35  ;;  %v1444_v45 = vrot.slane %v1442_v48, 5  ;;  %v3087_v35 = vld [vmem:[#allocation2 + $0x44] sm:$0x1]  ;;  %v1620_v39 = vld [vmem:[#allocation2 + $0x18] sm:$0xe] }
 0x119   : > { %v1464_v46 = vshll.u32 %v1396_v62, 16  ;;  %v1431_v19 = vsel %vm2957_vm14, %v1426_v16, %v1430_v37  ;;  %v1453_v55 = vor.u32 %v1452_v40, %v1449_v38  ;;  %v1470_v61 = vshll.u32 %v3064_v42, 16 }
 0x11a   : > { %v1463_v58 = vrot.slane %v1461_v41, 4  ;;  %v2440_v4 = vcombine.low %v1417_v18, %v1431_v19  ;;  %v1440_v6 = vrot.slane %v1439_v44, 4  ;;  %v1475_v52 = vshrl.u32 %v1398_v47, 16  ;;  %v1622_v18 = vld [vmem:[#allocation2 + $0x28] sm:$0xe] }
 0x11b   : > { %v1466_v51 = vrot.slane %v1464_v46, 5  ;;  %v1454_v12 = vrot.slane %v1453_v55, 4  ;;  %v1458_v13 = vrot.slane %v1456_v26, 5  ;;  %v1472_v14 = vrot.slane %v1470_v61, 5  ;;  %v1621_v26 = vld [vmem:[#allocation2 + $0x20] sm:$0xe] }
 0x11c   : > { %v1478_v17 = vshll.u32 %v1398_v47, 16  ;;  %2630 = vmatprep.mubr.msk.bf16.mxu0 %vm337_vm2, %v2440_v4  ;;  %v1477_v50 = vrot.slane %v1475_v52, 4  ;;  %v1484_v20 = vshll.u32 %v3071_v57, 16  ;;  %v2448_v21 = vrot.slane %v1618_v29, 9  ;;  %v2716_v44 = vld [vmem:[#allocation2 + $0x38] ss:$8 sps:$4 sm:$0xff]  }
 0x11d   : > { %v1467_v10 = vor.u32 %v1466_v51, %v1463_v58  ;;  %2621 = vmatmul.mubr.msk.bf16.vlgmr.msra.gmra.mxu1 %vm337_vm2, %v2714_v49  ;;  %v1445_v28 = vsel %vm2957_vm14, %v1440_v6, %v1444_v45  ;;  %v1459_v22 = vsel %vm2957_vm14, %v1454_v12, %v1458_v13  ;;  %v1644_v27 = vrot.slane %v3031_v53, 5  ;;  %v1623_v19 = vld [vmem:[#allocation2 + $0x30] sm:$0xe]  ;;  %v3108_v4 = vld [vmem:[#allocation2 + $0x38] sm:$0xe] }
 0x11e   : > { %v1480_v23 = vrot.slane %v1478_v17, 5  ;;  %2624 = vmatprep.mubr.msk.bf16.mxu1 %vm337_vm2, %v2715_v5  ;;  %2639 = vmatpush3.bf16.msra.mxu1 %v2893_v0  ;;  %v2441_v30 = vcombine.low %v1445_v28, %v1459_v22  ;;  %v2449_v48 = vrot.slane %v1619_v7, 9  ;;  %v1648_v62 = vrot.slane %v3042_v2, 5  ;;  %v3110_v5 = vld [vmem:[#allocation2 + $0x4c] sm:$0x1] }
 0x11f   : > { %v1468_v31 = vrot.slane %v1467_v10, 4  ;;  %v1489_v36 = vshrl.u32 %v1400_v63, 16  ;;  %v1492_v33 = vshll.u32 %v1400_v63, 16  ;;  %2690 = vmatprep.subr.msk.bf16.mxu1 %vm350_vm0, %v2875_v54  ;;  %v2016_v53 = vor.u32 %v3024_v24, %v2939_v3  ;;  %v1895_v10 = vld [vmem:[#allocation2 + $0x10] sm:$0xf] }
 0x120   : > { %v1481_v32 = vor.u32 %v1480_v23, %v1477_v50  ;;  %2631 = vmatmul.mubr.msk.bf16.vlgmr.msra.gmra.mxu0 %vm337_vm2, %v2441_v30  ;;  %v1486_v0 = vrot.slane %v1484_v20, 5  ;;  %v1645_v37 = vsel %vm2987_vm15, %v2448_v21, %v1644_v27  ;;  %v1649_v2 = vsel %vm2987_vm15, %v2449_v48, %v1648_v62  ;;  %v1897_v22 = vld [vmem:[#allocation2 + $0x18] sm:$0xf]  ;;  %v3137_v62 = vld [vmem:[#allocation2 + $0x1c] sm:$0x1] }
 0x121   : > { %v1503_v60 = vshrl.u32 %v1402_v15, 16  ;;  %2649 = vmatpush3.bf16.msra.mxu0 %v2897_v1  ;;  %v1491_v38 = vrot.slane %v1489_v36, 4  ;;  %v1494_v40 = vrot.slane %v1492_v33, 5  ;;  %v1498_v54 = vshll.u32 %v3076_v56, 16  ;;  %v1899_v33 = vld [vmem:[#allocation2 + $0x20] sm:$0xf] }
 0x122   : > { %v1482_v16 = vrot.slane %v1481_v32, 4  ;;  %v1473_v3 = vsel %vm2957_vm14, %v1468_v31, %v1472_v14  ;;  %v1506_v47 = vshll.u32 %v1402_v15, 16  ;;  %v1512_v41 = vshll.u32 %v3087_v35, 16  ;;  %2691 = vmatprep.subr.msk.bf16.mxu0 %vm350_vm0, %v2880_v59  ;;  %v1625_v14 = vld [vmem:[#allocation2 + $0x40] sm:$0xe] }
 0x123   : > { %v1505_v24 = vrot.slane %v1503_v60, 4  ;;  %v1495_v45 = vor.u32 %v1494_v40, %v1491_v38  ;;  %v2450_v46 = vrot.slane %v1620_v39, 9  ;;  %v1652_v49 = vrot.slane %v3048_v11, 5  ;;  %v2717_v60 = vld [vmem:[#allocation2 + $0x10] ss:$8 sps:$4 sm:$0xff]  }
 0x124   : > { %v1487_v1 = vsel %vm2957_vm14, %v1482_v16, %v1486_v0  ;;  %v2457_v58 = vcombine.low %v1645_v37, %v1649_v2  ;;  %v1508_v61 = vrot.slane %v1506_v47, 5  ;;  %v2451_v29 = vrot.slane %v1621_v26, 9  ;;  %v1901_v2 = vld [vmem:[#allocation2 + $0x28] sm:$0xf] }
 0x125   : > { %v2442_v55 = vcombine.low %v1473_v3, %v1487_v1  ;;  %2625 = vmatmul.mubr.msk.bf16.gmra.mxu1 %vm337_vm2, %v2716_v44  ;;  %v1496_v59 = vrot.slane %v1495_v45, 4  ;;  %v1500_v6 = vrot.slane %v1498_v54, 5  ;;  %v1656_v51 = vrot.slane %v3058_v43, 5 }
 0x126   : > { %v2452_v52 = vrot.slane %v1622_v18, 9  ;;  %2640 = vmatprep.mubr.msk.bf16.mxu1 %vm337_vm2, %v2457_v58  ;;  %v1509_v11 = vor.u32 %v1508_v61, %v1505_v24  ;;  %v1660_v7 = vrot.slane %v3064_v42, 5  ;;  %v2453_v12 = vrot.slane %v1623_v19, 9  ;;  %v3145_v24 = vld [vmem:[#allocation2 + $0x24] sm:$0x1] }
 0x127   : > { %2634 = vmatprep.mubr.msk.bf16.mxu0 %vm337_vm2, %v2442_v55  ;;  %v1664_v13 = vrot.slane %v3071_v57, 5  ;;  %v1514_v17 = vrot.slane %v1512_v41, 5  ;;  %v1657_v63 = vsel %vm2987_vm15, %v2451_v29, %v1656_v51  ;;  %v3120_v50 = vrot.slane %v2016_v53, 4  ;;  %v3128_v57 = vld [vmem:[#allocation2 + $0x14] sm:$0x1] }
 0x128   : > { %v2019_v43 = vshll.u32 %v3110_v5, 16  ;;  %v1501_v20 = vsel %vm2957_vm14, %v1496_v59, %v1500_v6  ;;  %v1510_v21 = vrot.slane %v1509_v11, 4  ;;  %v1653_v42 = vsel %vm2987_vm15, %v2450_v46, %v1652_v49  ;;  %v3151_v46 = vld [vmem:[#allocation2 + $0x2c] sm:$0x1]  ;;  %v1903_v11 = vld [vmem:[#allocation2 + $0x30] sm:$0xf] }
 0x129   : > { %v2454_v28 = vrot.slane %v3108_v4, 9  ;;  %v2458_v23 = vcombine.low %v1653_v42, %v1657_v63  ;;  %v1665_v27 = vsel %vm2987_vm15, %v2453_v12, %v1664_v13  ;;  %v2455_v15 = vrot.slane %v1625_v14, 9  ;;  %v2125_v4 = vld [vmem:[#allocation2 + $0x10] sm:$0xe]  ;;  %v1905_v42 = vld [vmem:[#allocation2 + $0x38] sm:$0xf] }
 0x12a   : > { %v1672_v30 = vrot.slane %v3087_v35, 5  ;;  %v1515_v31 = vsel %vm2957_vm14, %v1510_v21, %v1514_v17  ;;  %v1661_v48 = vsel %vm2987_vm15, %v2452_v52, %v1660_v7  ;;  %v1912_v32 = vshrl.u32 %v1895_v10, 16  ;;  %v2126_v52 = vld [vmem:[#allocation2 + $0x18] sm:$0xe]  ;;  %v3160_v21 = vld [vmem:[#allocation2 + $0x34] sm:$0x1] }
 0x12b   : > { %v1915_v36 = vshll.u32 %v1895_v10, 16  ;;  %v2443_v39 = vcombine.low %v1501_v20, %v1515_v31  ;;  %v1921_v53 = vshll.u32 %v3128_v57, 16  ;;  %v1926_v0 = vshrl.u32 %v1897_v22, 16 }
 0x12c   : > { %v1929_v37 = vshll.u32 %v1897_v22, 16  ;;  %v2459_v26 = vcombine.low %v1661_v48, %v1665_v27  ;;  %v1668_v35 = vrot.slane %v3076_v56, 5  ;;  %v1914_v16 = vrot.slane %v1912_v32, 4 }
 0x12d   : > { %v1917_v38 = vrot.slane %v1915_v36, 5  ;;  %2635 = vmatmul.mubr.msk.bf16.gmra.mxu0 %vm337_vm2, %v2443_v39  ;;  %2641 = vmatmul.mubr.msk.bf16.vlgmr.msra.gmra.mxu1 %vm337_vm2, %v2458_v23  ;;  %v1673_v40 = vsel %vm2987_vm15, %v2455_v15, %v1672_v30  ;;  %v1928_v54 = vrot.slane %v1926_v0, 4  ;;  %v1940_v47 = vshrl.u32 %v1899_v33, 16  ;;  %v3169_v36 = vld [vmem:[#allocation2 + $0x3c] sm:$0x1] }
 0x12e   : > { %v1931_v3 = vrot.slane %v1929_v37, 5  ;;  %2650 = vmatprep.mubr.msk.bf16.mxu0 %vm337_vm2, %v2717_v60  ;;  %2644 = vmatprep.mubr.msk.bf16.mxu1 %vm337_vm2, %v2459_v26  ;;  %v1935_v56 = vshll.u32 %v3137_v62, 16  ;;  %v1943_v18 = vshll.u32 %v1899_v33, 16  ;;  %v1954_v44 = vshrl.u32 %v1901_v2, 16  ;;  %v1907_v60 = vld [vmem:[#allocation2 + $0x40] sm:$0xf] }
 0x12f   : > { %v1918_v41 = vor.u32 %v1917_v38, %v1914_v16  ;;  %2659 = vmatpush3.bf16.msra.mxu1 %v2901_v8  ;;  %v1923_v1 = vrot.slane %v1921_v53, 5  ;;  %v1942_v49 = vrot.slane %v1940_v47, 4  ;;  %v1957_v19 = vshll.u32 %v1901_v2, 16  ;;  %v2718_v8 = vld [vmem:[#allocation2 + $0x20] ss:$8 sps:$4 sm:$0xff]  }
 0x130   : > { %v1932_v45 = vor.u32 %v1931_v3, %v1928_v54  ;;  %v1945_v58 = vrot.slane %v1943_v18, 5  ;;  %v1949_v61 = vshll.u32 %v3145_v24, 16  ;;  %v1956_v29 = vrot.slane %v1954_v44, 4  ;;  %v2128_v16 = vld [vmem:[#allocation2 + $0x28] sm:$0xe] }
 0x131   : > { %v1919_v55 = vrot.slane %v1918_v41, 4  ;;  %v1669_v59 = vsel %vm2987_vm15, %v2454_v28, %v1668_v35  ;;  %v1959_v51 = vrot.slane %v1957_v19, 5  ;;  %v1937_v12 = vrot.slane %v1935_v56, 5  ;;  %v2719_v28 = vld [vmem:[#allocation2 + $0x30] ss:$8 sps:$4 sm:$0xff]  }
 0x132   : > { %v1933_v6 = vrot.slane %v1932_v45, 4  ;;  %v1946_v13 = vor.u32 %v1945_v58, %v1942_v49  ;;  %v1963_v14 = vshll.u32 %v3151_v46, 16  ;;  %v2460_v17 = vcombine.low %v1669_v59, %v1673_v40  ;;  %v1908_v41 = vld [vmem:[#allocation2 + $0x44] sm:$0x1]  ;;  %v2129_v45 = vld [vmem:[#allocation2 + $0x30] sm:$0xe] }
 0x133   : > { %v1924_v7 = vsel %vm2957_vm14, %v1919_v55, %v1923_v1  ;;  %v1960_v63 = vor.u32 %v1959_v51, %v1956_v29  ;;  %v2483_v10 = vrot.slane %v2125_v4, 9  ;;  %v2151_v20 = vrot.slane %v3128_v57, 5  ;;  %v2720_v49 = vld [vmem:[#allocation2 + $0x40] ss:$8 sps:$4 sm:$0xff]   ;;  %v2130_v51 = vld [vmem:[#allocation2 + $0x38] sm:$0xe] }
 0x134   : > { %v1938_v22 = vsel %vm2957_vm14, %v1933_v6, %v1937_v12  ;;  %v2484_v23 = vrot.slane %v2126_v52, 9  ;;  %v2155_v27 = vrot.slane %v3137_v62, 5  ;;  %v1968_v15 = vshrl.u32 %v1903_v11, 16 }
 0x135   : > { %2651 = vmatmul.mubr.msk.bf16.vlgmr.msra.gmra.mxu0 %vm337_vm2, %v2718_v8  ;;  %2645 = vmatmul.mubr.msk.bf16.gmra.mxu1 %vm337_vm2, %v2460_v17  ;;  %v2475_v30 = vcombine.low %v1924_v7, %v1938_v22  ;;  %v1947_v31 = vrot.slane %v1946_v13, 4  ;;  %v1961_v48 = vrot.slane %v1960_v63, 4  ;;  %v1971_v32 = vshll.u32 %v1903_v11, 16 }
 0x136   : > { %2669 = vmatpush3.bf16.msra.mxu0 %v2905_v9  ;;  %2654 = vmatprep.mubr.msk.bf16.mxu0 %vm337_vm2, %v2719_v28  ;;  %v1965_v57 = vrot.slane %v1963_v14, 5  ;;  %v1970_v33 = vrot.slane %v1968_v15, 4  ;;  %v1977_v39 = vshll.u32 %v3160_v21, 16  ;;  %v1982_v62 = vshrl.u32 %v1905_v42, 16 }
 0x137   : > { %2660 = vmatprep.mubr.msk.bf16.mxu1 %vm337_vm2, %v2475_v30  ;;  %v1951_v53 = vrot.slane %v1949_v61, 5  ;;  %v2152_v0 = vsel %vm2987_vm15, %v2483_v10, %v2151_v20  ;;  %v1973_v37 = vrot.slane %v1971_v32, 5  ;;  %v1985_v2 = vshll.u32 %v1905_v42, 16  ;;  %v2127_v61 = vld [vmem:[#allocation2 + $0x20] sm:$0xe] }
 0x138   : > { %v1966_v9 = vsel %vm2957_vm14, %v1961_v48, %v1965_v57  ;;  %v2156_v26 = vsel %vm2987_vm15, %v2484_v23, %v2155_v27  ;;  %v1984_v35 = vrot.slane %v1982_v62, 4  ;;  %v2021_v38 = vrot.slane %v2019_v43, 5  ;;  %v2131_v27 = vld [vmem:[#allocation2 + $0x40] sm:$0xe] }
 0x139   : > { %v1952_v40 = vsel %vm2957_vm14, %v1947_v31, %v1951_v53  ;;  %v1974_v54 = vor.u32 %v1973_v37, %v1970_v33  ;;  %v1987_v3 = vrot.slane %v1985_v2, 5  ;;  %v1991_v47 = vshll.u32 %v3169_v36, 16 }
 0x13a   : > { %v2492_v56 = vcombine.low %v2152_v0, %v2156_v26  ;;  %v1979_v18 = vrot.slane %v1977_v39, 5  ;;  %v1996_v44 = vshrl.u32 %v1907_v60, 16  ;;  %v1999_v1 = vshll.u32 %v1907_v60, 16 }
 0x13b   : > { %v2476_v19 = vcombine.low %v1952_v40, %v1966_v9  ;;  %v1975_v55 = vrot.slane %v1974_v54, 4  ;;  %v1988_v58 = vor.u32 %v1987_v3, %v1984_v35  ;;  %v2486_v29 = vrot.slane %v2128_v16, 9 }
 0x13c   : > { %v2163_v43 = vrot.slane %v3151_v46, 5  ;;  %v1998_v4 = vrot.slane %v1996_v44, 4  ;;  %v2001_v59 = vrot.slane %v1999_v1, 5  ;;  %v2005_v6 = vshll.u32 %v1908_v41, 16 }
 0x13d   : > { %2655 = vmatmul.mubr.msk.bf16.gmra.mxu0 %vm337_vm2, %v2720_v49  ;;  %2661 = vmatmul.mubr.msk.bf16.vlgmr.msra.gmra.mxu1 %vm337_vm2, %v2476_v19  ;;  %v1980_v52 = vsel %vm2957_vm14, %v1975_v55, %v1979_v18  ;;  %v1989_v11 = vrot.slane %v1988_v58, 4  ;;  %v1993_v8 = vrot.slane %v1991_v47, 5  ;;  %v2487_v7 = vrot.slane %v2129_v45, 9 }
 0x13e   : > { %2670 = vmatprep.mubr.msk.bf16.mxu0 %vm337_vm2, %v2492_v56  ;;  %v2485_v12 = vrot.slane %v2127_v61, 9  ;;  %v2159_v13 = vrot.slane %v3145_v24, 5  ;;  %v2002_v46 = vor.u32 %v2001_v59, %v1998_v4  ;;  %v2167_v14 = vrot.slane %v3160_v21, 5  ;;  %v2132_v24 = vld [vmem:[#allocation2 + $0x48] sm:$0xe] }
 0x13f   : > { %v1994_v17 = vsel %vm2957_vm14, %v1989_v11, %v1993_v8  ;;  %v2022_v63 = vsel %vm2957_vm14, %v3120_v50, %v2021_v38  ;;  %v2488_v10 = vrot.slane %v2130_v51, 9  ;;  %v2171_v20 = vrot.slane %v3169_v36, 5 }
 0x140   : > { %v2477_v42 = vcombine.low %v1980_v52, %v1994_v17  ;;  %v2164_v28 = vsel %vm2987_vm15, %v2486_v29, %v2163_v43  ;;  %v2003_v22 = vrot.slane %v2002_v46, 4  ;;  %v2007_v23 = vrot.slane %v2005_v6, 5 }
 0x141   : > { %v2168_v21 = vsel %vm2987_vm15, %v2487_v7, %v2167_v14  ;;  %v2160_v15 = vsel %vm2987_vm15, %v2485_v12, %v2159_v13  ;;  %v2172_v48 = vsel %vm2987_vm15, %v2488_v10, %v2171_v20  ;;  %v2490_v32 = vrot.slane %v2132_v24, 9  ;;  %v2395_v10 = vld [vmem:[%s3309_s6] ss:$0 sm:$0xff] }
 0x142   : > { %2664 = vmatprep.mubr.msk.bf16.mxu1 %vm337_vm2, %v2477_v42  ;;  %v2008_v50 = vsel %vm2957_vm14, %v2003_v22, %v2007_v23  ;;  %v2493_v30 = vcombine.low %v2160_v15, %v2164_v28  ;;  %v2494_v57 = vcombine.low %v2168_v21, %v2172_v48  ;;  %v2489_v36 = vrot.slane %v2131_v27, 9 }
 0x143   : > { %v2478_v31 = vcombine.low %v2008_v50, %v2022_v63  ;;  %v2175_v33 = vrot.slane %v1908_v41, 5  ;;  %v2179_v39 = vrot.slane %v3110_v5, 5  ;;  %vm2283_vm0 = vcmask 31744  }
 0x145   : > { %2671 = vmatmul.mubr.msk.bf16.vlgmr.msra.gmra.mxu0 %vm337_vm2, %v2493_v30  ;;  %2665 = vmatmul.mubr.msk.bf16.gmra.mxu1 %vm337_vm2, %v2478_v31  ;;  %v2176_v34 = vsel %vm2987_vm15, %v2489_v36, %v2175_v33  ;;  %v2180_v62 = vsel %vm2987_vm15, %v2490_v32, %v2179_v39 }
 0x146   : > { %2674 = vmatprep.mubr.msk.bf16.mxu0 %vm337_vm2, %v2494_v57  ;;  %v2495_v53 = vcombine.low %v2176_v34, %v2180_v62 }
 0x14d   : > { %2675 = vmatmul.mubr.msk.bf16.gmra.mxu0 %vm337_vm2, %v2495_v53 }
 0x1ba   : > { %v2592_v0 = vpop.f32.mrf.mxu0 }
 0x1bb   : > { %v870_v23 = vadd.f32 %v2592_v0, %v2395_v10 }
 0x1bc   : > { %v837_v37 = vpop.f32.mrf.mxu0 }
 0x1bd   : > { %v868_v27 = vadd.f32 %v2395_v10, %v837_v37 }
 0x1be   : > { %v2593_v2 = vpop.f32.mrf.mxu0 }
 0x1bf   : > { %v871_v31 = vadd.f32 %v2593_v2, %v2395_v10 }
 0x1c0   : > { %v840_v60 = vpop.f32.mrf.mxu0 }
 0x1c1   : > { %v869_v33 = vadd.f32 %v2395_v10, %v840_v60 }
 0x1c6   : > { %v2596_v5 = vpop.f32.mrf.mxu0 }
 0x1c7   : > { %v874_v53 = vadd.f32 %v2596_v5, %v2395_v10 }
 0x1c8   : > { %v2602_v9 = vpop.f32.mrf.mxu1  ;;  %v3218_v26 = vpop.f32.mrf.mxu0 }
 0x1c9   : > { %v1103_v15 = vadd.f32 %v2602_v9, %v870_v23  ;;  %v872_v23 = vadd.f32 %v2395_v10, %v3218_v26 }
 0x1ca   : > { %v1070_v35 = vpop.f32.mrf.mxu1  ;;  %v3220_v16 = vpop.f32.mrf.mxu0 }
 0x1cb   : > { %v1101_v48 = vadd.f32 %v1070_v35, %v868_v27 }
 0x1cc   : > { %v2603_v38 = vpop.f32.mrf.mxu1  ;;  %v3222_v40 = vpop.f32.mrf.mxu0 }
 0x1cd   : > { %v1104_v39 = vadd.f32 %v2603_v38, %v871_v31  ;;  %v875_v38 = vadd.f32 %v3220_v16, %v2395_v10  ;;  %v873_v26 = vadd.f32 %v2395_v10, %v3222_v40 }
 0x1ce   : > { %v2612_v54 = vpop.f32.mrf.mxu0  ;;  %v1073_v25 = vpop.f32.mrf.mxu1 }
 0x1cf   : > { %v1264_v32 = vadd.f32 %v2612_v54, %v1103_v15 }
 0x1d0   : > { %v1231_v3 = vpop.f32.mrf.mxu0 }
 0x1d1   : > { %v1262_v34 = vadd.f32 %v1231_v3, %v1101_v48 }
 0x1d2   : > { %v2613_v47 = vpop.f32.mrf.mxu0 }
 0x1d4   : > { %v1234_v56 = vpop.f32.mrf.mxu0 }
 0x1d5   : > { %v2606_v41 = vpop.f32.mrf.mxu1 }
 0x1d6   : > { %v2616_v44 = vpop.f32.mrf.mxu0 }
 0x1d7   : > { %v1086_v18 = vpop.f32.mrf.mxu1 }
 0x1d8   : > { %v3226_v45 = vpop.f32.mrf.mxu0  ;;  %v1105_v3 = vadd.f32 %v1086_v18, %v872_v23 }
 0x1d9   : > { %v3224_v1 = vpop.f32.mrf.mxu1 }
 0x1da   : > { %v3230_v19 = vpop.f32.mrf.mxu0 }
 0x1db   : > { %v3228_v49 = vpop.f32.mrf.mxu1 }
 0x1dc   : > { %v3232_v58 = vpop.f32.mrf.mxu0 }
 0x1dd   : > { %v2622_v55 = vpop.f32.mrf.mxu1 }
 0x1de   : > { %v1382_v62 = vadd.f32 %v2622_v55, %v1264_v32 }
 0x1df   : > { %v1349_v61 = vpop.f32.mrf.mxu1 }
 0x1e0   : > { %v2632_v29 = vpop.f32.mrf.mxu0  ;;  %v1380_v37 = vadd.f32 %v1349_v61, %v1262_v34 }
 0x1e1   : > { %v2623_v43 = vpop.f32.mrf.mxu1  ;;  %v1612_v9 = vadd.f32 %v2632_v29, %v1382_v62 }
 0x1e2   : > { %v1579_v4 = vpop.f32.mrf.mxu0 }
 0x1e3   : > { %v1352_v59 = vpop.f32.mrf.mxu1  ;;  %v1610_v15 = vadd.f32 %v1579_v4, %v1380_v37 }
 0x1e4   : > { %v2633_v51 = vpop.f32.mrf.mxu0 }
 0x1e5   : > { %v2626_v6 = vpop.f32.mrf.mxu1 }
 0x1e6   : > { %v1582_v8 = vpop.f32.mrf.mxu0 }
 0x1e7   : > { %v3234_v52 = vpop.f32.mrf.mxu1 }
 0x1e9   : > { %v3236_v11 = vpop.f32.mrf.mxu1 }
 0x1eb   : > { %v3238_v7 = vpop.f32.mrf.mxu1 }
 0x1ed   : > { %v3240_v12 = vpop.f32.mrf.mxu0  ;;  %v2642_v13 = vpop.f32.mrf.mxu1 }
 0x1ee   : > { %v1770_v60 = vadd.f32 %v2642_v13, %v1612_v9 }
 0x1ef   : > { %v3242_v46 = vpop.f32.mrf.mxu0  ;;  %v1737_v14 = vpop.f32.mrf.mxu1 }
 0x1f0   : > { %v1768_v61 = vadd.f32 %v1737_v14, %v1610_v15 }
 0x1f1   : > { %v3244_v17 = vpop.f32.mrf.mxu0  ;;  %v2643_v63 = vpop.f32.mrf.mxu1 }
 0x1f2   : > { %3319 = vst [vmem:[#allocation3_spill] sm:$0xff] %v3244_v17  ;;  %v1102_v17 = vadd.f32 %v1073_v25, %v869_v33 }
 0x1f3   : > { %v3249_v20 = vpop.f32.mrf.mxu0  ;;  %v1740_v42 = vpop.f32.mrf.mxu1 }
 0x1f4   : > { %3320 = vst [vmem:[#allocation4_spill] sm:$0xff] %v3249_v20  ;;  %v1263_v54 = vadd.f32 %v1234_v56, %v1102_v17  ;;  %v1266_v56 = vadd.f32 %v3226_v45, %v1105_v3 }
 0x1f5   : > { %v2652_v28 = vpop.f32.mrf.mxu0  ;;  %v3251_v22 = vpop.f32.mrf.mxu1 }
 0x1f6   : > { %v1381_v25 = vadd.f32 %v1352_v59, %v1263_v54  ;;  %v1889_v29 = vadd.f32 %v2652_v28, %v1770_v60 }
 0x1f7   : > { %v1856_v24 = vpop.f32.mrf.mxu0  ;;  %v3253_v21 = vpop.f32.mrf.mxu1 }
 0x1f8   : > { %3321 = vst [vmem:[#allocation5_spill] sm:$0xff] %v3253_v21  ;;  %v1265_v21 = vadd.f32 %v2613_v47, %v1104_v39  ;;  %v1611_v16 = vadd.f32 %v1582_v8, %v1381_v25 }
 0x1f9   : > { %v2653_v50 = vpop.f32.mrf.mxu0  ;;  %v3255_v30 = vpop.f32.mrf.mxu1 }
 0x1fa   : > { %3322 = vst [vmem:[#allocation6_spill] sm:$0xff] %v3255_v30  ;;  %v1107_v30 = vadd.f32 %v2606_v41, %v874_v53  ;;  %v1383_v27 = vadd.f32 %v2623_v43, %v1265_v21  ;;  %v1108_v41 = vadd.f32 %v3224_v1, %v875_v38  ;;  %v1106_v21 = vadd.f32 %v3228_v49, %v873_v26 }
 0x1fb   : > { %v1859_v57 = vpop.f32.mrf.mxu0  ;;  %v3257_v36 = vpop.f32.mrf.mxu1  ;;  %v1769_v45 = vadd.f32 %v1740_v42, %v1611_v16 }
 0x1fc   : > { %v1268_v5 = vadd.f32 %v2616_v44, %v1107_v30  ;;  %v1613_v47 = vadd.f32 %v2633_v51, %v1383_v27  ;;  %v1887_v44 = vadd.f32 %v1856_v24, %v1768_v61  ;;  %v1269_v59 = vadd.f32 %v3230_v19, %v1108_v41  ;;  %v3323_v30 = vld [vmem:[#allocation3_spill] sm:$0xff] }
 0x1fd   : > { %v2656_v0 = vpop.f32.mrf.mxu0  ;;  %v2662_v20 = vpop.f32.mrf.mxu1  ;;  %v1384_v51 = vadd.f32 %v3234_v52, %v1266_v56  ;;  %v1267_v49 = vadd.f32 %v3232_v58, %v1106_v21  ;;  %v1888_v28 = vadd.f32 %v1859_v57, %v1769_v45 }
 0x1fe   : > { %v1386_v43 = vadd.f32 %v2626_v6, %v1268_v5  ;;  %v1771_v18 = vadd.f32 %v2643_v63, %v1613_v47  ;;  %v2119_v17 = vadd.f32 %v2662_v20, %v1889_v29  ;;  %v1387_v19 = vadd.f32 %v3236_v11, %v1269_v59 }
 0x1ff   : > { %v1872_v2 = vpop.f32.mrf.mxu0  ;;  %v2086_v35 = vpop.f32.mrf.mxu1  ;;  %v1614_v52 = vadd.f32 %v3242_v46, %v1384_v51  ;;  %v3324_v32 = vld [vmem:[#allocation5_spill] sm:$0xff] }
 0x200   : > { %v1616_v14 = vadd.f32 %v3240_v12, %v1386_v43  ;;  %v1890_v6 = vadd.f32 %v2653_v50, %v1771_v18  ;;  %v2117_v8 = vadd.f32 %v2086_v35, %v1887_v44  ;;  %v1385_v50 = vadd.f32 %v3238_v7, %v1267_v49 }
 0x201   : > { %v2657_v55 = vpop.f32.mrf.mxu0  ;;  %v2663_v31 = vpop.f32.mrf.mxu1  ;;  %v1617_v48 = vadd.f32 %v3323_v30, %v1387_v19  ;;  %v1772_v33 = vadd.f32 %v3324_v32, %v1614_v52  ;;  %v3326_v53 = vld [vmem:[#allocation6_spill] sm:$0xff] }
 0x202   : > { %v1774_v20 = vadd.f32 %v3251_v22, %v1616_v14  ;;  %v2120_v24 = vadd.f32 %v2663_v31, %v1890_v6  ;;  %v3325_v22 = vld [vmem:[#allocation4_spill] sm:$0xff] }
 0x203   : > { %v1875_v4 = vpop.f32.mrf.mxu0  ;;  %v2089_v13 = vpop.f32.mrf.mxu1  ;;  %v1615_v57 = vadd.f32 %v3325_v22, %v1385_v50  ;;  %v1775_v37 = vadd.f32 %v3326_v53, %v1617_v48  ;;  %v1891_v9 = vadd.f32 %v1872_v2, %v1772_v33 }
 0x204   : > { %v1893_v11 = vadd.f32 %v2656_v0, %v1774_v20  ;;  %v2118_v46 = vadd.f32 %v2089_v13, %v1888_v28 }
 0x205   : > { %v2672_v40 = vpop.f32.mrf.mxu0  ;;  %v2666_v1 = vpop.f32.mrf.mxu1  ;;  %v1773_v0 = vadd.f32 %v3257_v36, %v1615_v57  ;;  %v1894_v54 = vadd.f32 %v2657_v55, %v1775_v37 }
 0x206   : > { %v2277_v63 = vadd.f32 %v2672_v40, %v2119_v17  ;;  %v2123_v7 = vadd.f32 %v2666_v1, %v1893_v11 }
 0x207   : > { %v2244_v12 = vpop.f32.mrf.mxu0  ;;  %v2102_v10 = vpop.f32.mrf.mxu1  ;;  %v1892_v3 = vadd.f32 %v1875_v4, %v1773_v0 }
 0x208   : > { %2286 = vst.msk [vmem:[%s3272_s17 + $0x10] sm:$0xff] %vm2283_vm0, %v2277_v63  ;;  %v2275_v42 = vadd.f32 %v2244_v12, %v2117_v8  ;;  %v2121_v27 = vadd.f32 %v2102_v10, %v1891_v9 }
 0x209   : > { %v2673_v58 = vpop.f32.mrf.mxu0  ;;  %v2667_v34 = vpop.f32.mrf.mxu1 }
 0x20a   : > { %2284 = vst.msk [vmem:[%s3272_s17] sm:$0xff] %vm2283_vm0, %v2275_v42  ;;  %v2278_v39 = vadd.f32 %v2673_v58, %v2120_v24  ;;  %v2124_v5 = vadd.f32 %v2667_v34, %v1894_v54 }
 0x20b   : > { %v2247_v62 = vpop.f32.mrf.mxu0  ;;  %v2105_v60 = vpop.f32.mrf.mxu1 }
 0x20c   : > { %2287 = vst.msk [vmem:[%s3272_s17 + $0x18] sm:$0xff] %vm2283_vm0, %v2278_v39  ;;  %v2276_v23 = vadd.f32 %v2247_v62, %v2118_v46  ;;  %v2122_v25 = vadd.f32 %v2105_v60, %v1892_v3 }
 0x20d   : > { %v2676_v35 = vpop.f32.mrf.mxu0 }
 0x20e   : > { %2285 = vst.msk [vmem:[%s3272_s17 + $0x8] sm:$0xff] %vm2283_vm0, %v2276_v23  ;;  %v2281_v15 = vadd.f32 %v2676_v35, %v2123_v7 }
 0x20f   : > { %v2260_v38 = vpop.f32.mrf.mxu0 }
 0x210   : > { %2290 = vst.msk [vmem:[%s3272_s17 + $0x30] sm:$0xff] %vm2283_vm0, %v2281_v15  ;;  %v2279_v2 = vadd.f32 %v2260_v38, %v2121_v27 }
 0x211   : > { %v2677_v31 = vpop.f32.mrf.mxu0 }
 0x212   : > { %2288 = vst.msk [vmem:[%s3272_s17 + $0x20] sm:$0xff] %vm2283_vm0, %v2279_v2  ;;  %v2282_v47 = vadd.f32 %v2677_v31, %v2124_v5 }
 0x213   : > { %v2263_v36 = vpop.f32.mrf.mxu0 }
 0x214   : > { %2291 = vst.msk [vmem:[%s3272_s17 + $0x38] sm:$0xff] %vm2283_vm0, %v2282_v47  ;;  %v2280_v55 = vadd.f32 %v2263_v36, %v2122_v25 }
 0x216   : > { %2289 = vst.msk [vmem:[%s3272_s17 + $0x28] sm:$0xff] %vm2283_vm0, %v2280_v55 }
 0x217 PF: > { %s17_s24 = sadd.s32 1, %s2727_s24  }
 0x218   : > { %p14_p4 = scmp.ge.s32.totalorder %s17_s24, 10  }
 0x21a   :  { %16 = sbr.rel (!%p14_p4) target bundleno = 1 (0x1), region = 91 }

</bundles_post_ra>
